<compile_context>
chip_gen: v5e
topology: v5e:2x2
jax: 0.10.0
libtpu: 0.0.40
codegen_flags: <defaults>
</compile_context>

<pallas_src>
import functools
import math

import jax
import jax.numpy as jnp
from jax.experimental import pallas as pl
from jax.experimental.pallas import tpu as pltpu

EXPAND = 6                      # expand_ratio in the PyTorch module
_INV_SQRT2 = 0.7071067811865476


def _gelu(x):
    # exact GELU (erf-based), matching PyTorch nn.GELU default; f32 math
    return 0.5 * x * (1.0 + jax.lax.erf(x * _INV_SQRT2))


def _dot(w, x):
    # bf16 MXU operands (weights pre-cast on host), f32 accumulation
    return jnp.dot(w, x, preferred_element_type=jnp.float32)


# ----------------------------------------------------------------------------
# Block plan: mirrors TemporalDilatedConv._create_block
# ----------------------------------------------------------------------------
def make_block_plan(time_steps, kernel_size, target):
    plan = []
    cur, dil = time_steps, 1
    while cur > target:
        req = cur - target
        k = req + 1 if req + 1 < kernel_size else kernel_size
        plan.append((k, dil))
        cur -= dil * (k - 1)
        dil *= 2
    assert cur == target, "chosen steps must reduce exactly to target_time_steps"
    return tuple(plan)


# ----------------------------------------------------------------------------
# The single fused kernel
# ----------------------------------------------------------------------------
def _fused_kernel(*refs, plans, chans):
    hc, dc, hdc, sc = chans
    out_c = hc + dc + hdc

    refs = list(refs)
    pos = 0

    def take(n):
        nonlocal pos
        out = refs[pos:pos + n]
        pos += n
        return out

    hour_ref, day_ref, half_ref, static_ref = take(4)
    stream_w = {name: [tuple(take(4)) for _ in plans[name]]
                for name in ("hour", "day", "half")}
    sw, sb, fw, fb, w1, b1, w2, b2, w3, b3 = take(10)
    (o_ref,) = take(1)

    def run_stream(x_ref, layer_refs, plan, c):
        # whole [T, C, tile] slab is resident; taps are static in-kernel slices
        xs = [x_ref[t] for t in range(x_ref.shape[0])]            # bf16 [c, tile]
        for (k, dil), (wt_r, bt_r, w1_r, w2_r) in zip(plan, layer_refs):
            bt = bt_r[...]
            t_out = len(xs) - dil * (k - 1)
            new_xs = []
            for t in range(t_out):
                # conv_time: k dilated taps, weight sliced tap-major
                acc = _dot(wt_r[:, 0:c], xs[t])
                for j in range(1, k):
                    acc = acc + _dot(wt_r[:, j * c:(j + 1) * c], xs[t + j * dil])
                h = _gelu(acc + bt)                                # conv_time + GELU
                h = _gelu(_dot(w1_r[...], h.astype(jnp.bfloat16)))  # conv1 + GELU
                # dropout_rate == 0.0 -> nn.Identity (inference): nothing to do
                y = _gelu(_dot(w2_r[...], h.astype(jnp.bfloat16)))  # conv2 + GELU
                new_xs.append(y.astype(jnp.bfloat16))
            xs = new_xs
        return xs                                                   # 2 x [c, tile]

    h_out = run_stream(hour_ref, stream_w["hour"], plans["hour"], hc)
    d_out = run_stream(day_ref, stream_w["day"], plans["day"], dc)
    hd_out = run_stream(half_ref, stream_w["half"], plans["half"], hdc)

    # final_conv (2,1,1) on cat(hour, day, half): the channel concat and the
    # 2-tap time kernel are folded into column slices of fw (time-major).
    acc = _dot(fw[:, 0:hc], h_out[0])
    acc = acc + _dot(fw[:, hc:hc + dc], d_out[0])
    acc = acc + _dot(fw[:, hc + dc:out_c], hd_out[0])
    acc = acc + _dot(fw[:, out_c:out_c + hc], h_out[1])
    acc = acc + _dot(fw[:, out_c + hc:out_c + hc + dc], d_out[1])
    acc = acc + _dot(fw[:, out_c + hc + dc:2 * out_c], hd_out[1])
    f_out = _gelu(acc + fb[...])                                    # [out_c, tile]

    # static_block: 1x1 conv + ReLU
    s_out = jnp.maximum(_dot(sw[...], static_ref[...]) + sb[...], 0.0)

    # conv_2d MLP on cat([f_out, s_out]); the concat is folded into w1 columns
    y = _gelu(_dot(w1[:, :out_c], f_out.astype(jnp.bfloat16))
              + _dot(w1[:, out_c:], s_out.astype(jnp.bfloat16)) + b1[...])
    y = _gelu(_dot(w2[...], y.astype(jnp.bfloat16)) + b2[...])
    y = _dot(w3[...], y.astype(jnp.bfloat16)) + b3[...]
    o_ref[...] = y.astype(o_ref.dtype)


# ----------------------------------------------------------------------------
# Parameters (weights pre-cast to bf16 on host; biases kept f32 [C, 1])
# ----------------------------------------------------------------------------
def _w(key, cout, cin):
    return (jax.random.normal(key, (cout, cin), jnp.float32)
            / math.sqrt(cin)).astype(jnp.bfloat16)


def _b(key, c):
    return 0.05 * jax.random.normal(key, (c, 1), jnp.float32)


def init_temporal_block_params(key, c, plan):
    ps = []
    for (k, _dil) in plan:
        key, k1, k2, k3, k4 = jax.random.split(key, 5)
        ps.append(dict(
            wt=_w(k1, c, k * c),          # conv_time weight   [Cout, k*Cin] (tap-major)
            bt=_b(k2, c),                 # conv_time bias     [Cout, 1]
            w1=_w(k3, EXPAND * c, c),     # conv1 (no bias)
            w2=_w(k4, c, EXPAND * c),     # conv2 (no bias)
        ))
    return ps


def init_params(key, cfg, plans):
    hc = cfg["hour_in_channels"] - 1
    dc = cfg["day_in_channels"] - 1
    hdc = cfg["half_day_in_channels"] - 1
    sc = cfg["static_in_channels"] - 2
    out_c = hc + dc + hdc
    cat_c = out_c + sc
    ks = jax.random.split(key, 14)
    return dict(
        hour=init_temporal_block_params(ks[0], hc, plans["hour"]),
        day=init_temporal_block_params(ks[1], dc, plans["day"]),
        half=init_temporal_block_params(ks[2], hdc, plans["half"]),
        static_w=_w(ks[3], sc, sc), static_b=_b(ks[4], sc),
        final_w=_w(ks[5], out_c, 2 * out_c), final_b=_b(ks[6], out_c),
        c2d_w1=_w(ks[7], EXPAND * cat_c, cat_c),
        c2d_b1=_b(ks[8], EXPAND * cat_c),
        c2d_w2=_w(ks[9], EXPAND * cat_c // 2, EXPAND * cat_c),
        c2d_b2=_b(ks[10], EXPAND * cat_c // 2),
        c2d_w3=_w(ks[11], cat_c // 2, EXPAND * cat_c // 2),
        c2d_b3=_b(ks[12], cat_c // 2),
    )


# ----------------------------------------------------------------------------
# Forward pass: layout glue in plain JAX, all compute in ONE pallas_call
# ----------------------------------------------------------------------------
def _choose_tile(n_pad):
    # Largest lane tile that still leaves >=2 grid steps (feeds v7x's second
    # TensorCore via the "parallel" grid axis; costs nothing on v5e/v6e).
    # If N can't be split (n_pad == 128), use a single full-width tile.
    for t in (4096, 2048, 1024, 512, 256, 128):
        if n_pad % t == 0 and n_pad // t >= 2:
            return t
    return n_pad


def forward(params, plans, hour, day, half_day, static):
    # inputs use PyTorch layouts: hour/day/half [B,C,T,H,W], static [B,C,H,W]
    # ---- process_temporal_data: add last channel (position emb) to the rest
    proc = lambda x: x[:, :-1] + x[:, -1:]
    hour, day, half_day = proc(hour), proc(day), proc(half_day)

    # ---- process_static_data: split lon/lat, add them to the temporal inputs
    lon, lat = static[:, -2:-1], static[:, -1:]
    static_p = static[:, :-2]                       # [B, Cs, H, W]
    pos = (lon + lat)[:, :, None]                   # broadcast over C, T
    hour, day, half_day = hour + pos, day + pos, half_day + pos

    b, hc, th, h, w = hour.shape
    dc, td = day.shape[1], day.shape[2]
    hdc, thd = half_day.shape[1], half_day.shape[2]
    sc = static_p.shape[1]
    out_c = hc + dc + hdc
    cat_c = out_c + sc
    oc_final = cat_c // 2

    n = b * h * w
    n_pad = ((n + 127) // 128) * 128                # pad lanes ONCE, amortized
    tile = _choose_tile(n_pad)
    grid_n = n_pad // tile

    def to_cn(x):
        """[B, C, T, H, W] -> bf16 [T, C, n_pad] (channels on sublanes, N on lanes)."""
        _, c, t = x.shape[:3]
        y = jnp.transpose(x, (2, 1, 0, 3, 4)).reshape(t, c, n)
        if n_pad != n:
            y = jnp.pad(y, ((0, 0), (0, 0), (0, n_pad - n)))
        return y.astype(jnp.bfloat16)

    hour_t, day_t, half_t = to_cn(hour), to_cn(day), to_cn(half_day)
    static_t = jnp.transpose(static_p, (1, 0, 2, 3)).reshape(sc, n)
    if n_pad != n:
        static_t = jnp.pad(static_t, ((0, 0), (0, n_pad - n)))
    static_t = static_t.astype(jnp.bfloat16)

    def full_spec(arr):
        nd = arr.ndim
        return pl.BlockSpec(arr.shape, lambda nn, nd=nd: (0,) * nd)

    args = [hour_t, day_t, half_t, static_t]
    specs = [
        pl.BlockSpec((th, hc, tile), lambda nn: (0, 0, nn)),
        pl.BlockSpec((td, dc, tile), lambda nn: (0, 0, nn)),
        pl.BlockSpec((thd, hdc, tile), lambda nn: (0, 0, nn)),
        pl.BlockSpec((sc, tile), lambda nn: (0, nn)),
    ]
    for name in ("hour", "day", "half"):
        for p in params[name]:
            for key in ("wt", "bt", "w1", "w2"):
                args.append(p[key])
                specs.append(full_spec(p[key]))
    for key in ("static_w", "static_b", "final_w", "final_b",
                "c2d_w1", "c2d_b1", "c2d_w2", "c2d_b2", "c2d_w3", "c2d_b3"):
        args.append(params[key])
        specs.append(full_spec(params[key]))

    out = pl.pallas_call(
        functools.partial(_fused_kernel, plans=plans, chans=(hc, dc, hdc, sc)),
        out_shape=jax.ShapeDtypeStruct((oc_final, n_pad), jnp.float32),
        grid=(grid_n,),
        in_specs=specs,
        out_specs=pl.BlockSpec((oc_final, tile), lambda nn: (0, nn)),
        compiler_params=pltpu.CompilerParams(
            dimension_semantics=("parallel",)),
    )(*args)

    # zero-padded lanes are garbage (GELU(bias) != 0) but are sliced off here
    out = out[:, :n].reshape(oc_final, b, h, w)
    return jnp.transpose(out, (1, 0, 2, 3))         # back to NCHW


# ----------------------------------------------------------------------------
if __name__ == "__main__":
    cfg = dict(
        hour_in_channels=4, hour_step=8,
        day_in_channels=4, day_step=4,
        half_day_in_channels=4, half_day_step=3,
        static_in_channels=5,
        kernel_size=3, target_time_steps=2,
    )
    B, H, W = 2, 8, 8

    plans = dict(
        hour=make_block_plan(cfg["hour_step"], cfg["kernel_size"], cfg["target_time_steps"]),
        day=make_block_plan(cfg["day_step"], cfg["kernel_size"], cfg["target_time_steps"]),
        half=make_block_plan(cfg["half_day_step"], cfg["kernel_size"], cfg["target_time_steps"]),
    )
    assert cfg["target_time_steps"] == 2, "final_conv time kernel is (2,1,1)"

    key = jax.random.PRNGKey(0)
    k_in, k_p = jax.random.split(key)
    k1, k2, k3, k4 = jax.random.split(k_in, 4)
    hour = jax.random.normal(k1, (B, cfg["hour_in_channels"], cfg["hour_step"], H, W), jnp.float32)
    day = jax.random.normal(k2, (B, cfg["day_in_channels"], cfg["day_step"], H, W), jnp.float32)
    half_day = jax.random.normal(k3, (B, cfg["half_day_in_channels"], cfg["half_day_step"], H, W), jnp.float32)
    static = jax.random.normal(k4, (B, cfg["static_in_channels"], H, W), jnp.float32)

    params = init_params(k_p, cfg, plans)

    fwd = jax.jit(lambda p, a, b_, c, d: forward(p, plans, a, b_, c, d))
    out = jax.block_until_ready(fwd(params, hour, day, half_day, static))

    expected_out_c = ((cfg["hour_in_channels"] - 1) + (cfg["day_in_channels"] - 1)
                      + (cfg["half_day_in_channels"] - 1)
                      + (cfg["static_in_channels"] - 2)) // 2
    assert out.shape == (B, expected_out_c, H, W), out.shape
    assert bool(jnp.all(jnp.isfinite(out)))
    print("KERNEL_OK")
</pallas_src>

<mosaic_0001>
module attributes {stable_mosaic.version = 11 : i64} {
  func.func @_fused_kernel(%arg0: i32, %arg1: memref<8x3x128xbf16, #tpu.memory_space<vmem>>, %arg2: memref<4x3x128xbf16, #tpu.memory_space<vmem>>, %arg3: memref<3x3x128xbf16, #tpu.memory_space<vmem>>, %arg4: memref<3x128xbf16, #tpu.memory_space<vmem>>, %arg5: memref<3x9xbf16, #tpu.memory_space<vmem>>, %arg6: memref<3x1xf32, #tpu.memory_space<vmem>>, %arg7: memref<18x3xbf16, #tpu.memory_space<vmem>>, %arg8: memref<3x18xbf16, #tpu.memory_space<vmem>>, %arg9: memref<3x9xbf16, #tpu.memory_space<vmem>>, %arg10: memref<3x1xf32, #tpu.memory_space<vmem>>, %arg11: memref<18x3xbf16, #tpu.memory_space<vmem>>, %arg12: memref<3x18xbf16, #tpu.memory_space<vmem>>, %arg13: memref<3x9xbf16, #tpu.memory_space<vmem>>, %arg14: memref<3x1xf32, #tpu.memory_space<vmem>>, %arg15: memref<18x3xbf16, #tpu.memory_space<vmem>>, %arg16: memref<3x18xbf16, #tpu.memory_space<vmem>>, %arg17: memref<3x6xbf16, #tpu.memory_space<vmem>>, %arg18: memref<3x1xf32, #tpu.memory_space<vmem>>, %arg19: memref<18x3xbf16, #tpu.memory_space<vmem>>, %arg20: memref<3x18xbf16, #tpu.memory_space<vmem>>, %arg21: memref<3x3xbf16, #tpu.memory_space<vmem>>, %arg22: memref<3x1xf32, #tpu.memory_space<vmem>>, %arg23: memref<9x18xbf16, #tpu.memory_space<vmem>>, %arg24: memref<9x1xf32, #tpu.memory_space<vmem>>, %arg25: memref<72x12xbf16, #tpu.memory_space<vmem>>, %arg26: memref<72x1xf32, #tpu.memory_space<vmem>>, %arg27: memref<36x72xbf16, #tpu.memory_space<vmem>>, %arg28: memref<36x1xf32, #tpu.memory_space<vmem>>, %arg29: memref<6x36xbf16, #tpu.memory_space<vmem>>, %arg30: memref<6x1xf32, #tpu.memory_space<vmem>>, %arg31: memref<6x128xf32, #tpu.memory_space<vmem>>) attributes {dimension_semantics = [#tpu.dimension_semantics<parallel>], iteration_bounds = array<i64: 1>, scalar_prefetch = 0 : i64, scratch_operands = 0 : i64, tpu.core_type = #tpu.core_type<tc>, window_params = [{transform_indices = @transform_0, window_bounds = array<i64: 8, 3, 128>}, {transform_indices = @transform_1, window_bounds = array<i64: 4, 3, 128>}, {transform_indices = @transform_2, window_bounds = array<i64: 3, 3, 128>}, {transform_indices = @transform_3, window_bounds = array<i64: 3, 128>}, {pipeline_mode = #tpu.pipeline_mode<synchronous>, transform_indices = @transform_4, window_bounds = array<i64: 3, 9>}, {pipeline_mode = #tpu.pipeline_mode<synchronous>, transform_indices = @transform_5, window_bounds = array<i64: 3, 1>}, {pipeline_mode = #tpu.pipeline_mode<synchronous>, transform_indices = @transform_6, window_bounds = array<i64: 18, 3>}, {pipeline_mode = #tpu.pipeline_mode<synchronous>, transform_indices = @transform_7, window_bounds = array<i64: 3, 18>}, {pipeline_mode = #tpu.pipeline_mode<synchronous>, transform_indices = @transform_8, window_bounds = array<i64: 3, 9>}, {pipeline_mode = #tpu.pipeline_mode<synchronous>, transform_indices = @transform_9, window_bounds = array<i64: 3, 1>}, {pipeline_mode = #tpu.pipeline_mode<synchronous>, transform_indices = @transform_10, window_bounds = array<i64: 18, 3>}, {pipeline_mode = #tpu.pipeline_mode<synchronous>, transform_indices = @transform_11, window_bounds = array<i64: 3, 18>}, {pipeline_mode = #tpu.pipeline_mode<synchronous>, transform_indices = @transform_12, window_bounds = array<i64: 3, 9>}, {pipeline_mode = #tpu.pipeline_mode<synchronous>, transform_indices = @transform_13, window_bounds = array<i64: 3, 1>}, {pipeline_mode = #tpu.pipeline_mode<synchronous>, transform_indices = @transform_14, window_bounds = array<i64: 18, 3>}, {pipeline_mode = #tpu.pipeline_mode<synchronous>, transform_indices = @transform_15, window_bounds = array<i64: 3, 18>}, {pipeline_mode = #tpu.pipeline_mode<synchronous>, transform_indices = @transform_16, window_bounds = array<i64: 3, 6>}, {pipeline_mode = #tpu.pipeline_mode<synchronous>, transform_indices = @transform_17, window_bounds = array<i64: 3, 1>}, {pipeline_mode = #tpu.pipeline_mode<synchronous>, transform_indices = @transform_18, window_bounds = array<i64: 18, 3>}, {pipeline_mode = #tpu.pipeline_mode<synchronous>, transform_indices = @transform_19, window_bounds = array<i64: 3, 18>}, {pipeline_mode = #tpu.pipeline_mode<synchronous>, transform_indices = @transform_20, window_bounds = array<i64: 3, 3>}, {pipeline_mode = #tpu.pipeline_mode<synchronous>, transform_indices = @transform_21, window_bounds = array<i64: 3, 1>}, {pipeline_mode = #tpu.pipeline_mode<synchronous>, transform_indices = @transform_22, window_bounds = array<i64: 9, 18>}, {pipeline_mode = #tpu.pipeline_mode<synchronous>, transform_indices = @transform_23, window_bounds = array<i64: 9, 1>}, {pipeline_mode = #tpu.pipeline_mode<synchronous>, transform_indices = @transform_24, window_bounds = array<i64: 72, 12>}, {pipeline_mode = #tpu.pipeline_mode<synchronous>, transform_indices = @transform_25, window_bounds = array<i64: 72, 1>}, {pipeline_mode = #tpu.pipeline_mode<synchronous>, transform_indices = @transform_26, window_bounds = array<i64: 36, 72>}, {pipeline_mode = #tpu.pipeline_mode<synchronous>, transform_indices = @transform_27, window_bounds = array<i64: 36, 1>}, {pipeline_mode = #tpu.pipeline_mode<synchronous>, transform_indices = @transform_28, window_bounds = array<i64: 6, 36>}, {pipeline_mode = #tpu.pipeline_mode<synchronous>, transform_indices = @transform_29, window_bounds = array<i64: 6, 1>}, {transform_indices = @transform_30, window_bounds = array<i64: 6, 128>}]} {
    %c0 = arith.constant 0 : index
    %c0_0 = arith.constant 0 : index
    %c0_1 = arith.constant 0 : index
    %0 = vector.load %arg1[%c0, %c0_0, %c0_1] : memref<8x3x128xbf16, #tpu.memory_space<vmem>>, vector<1x3x128xbf16>
    %1 = vector.shape_cast %0 : vector<1x3x128xbf16> to vector<3x128xbf16>
    %c1 = arith.constant 1 : index
    %c0_2 = arith.constant 0 : index
    %c0_3 = arith.constant 0 : index
    %2 = vector.load %arg1[%c1, %c0_2, %c0_3] : memref<8x3x128xbf16, #tpu.memory_space<vmem>>, vector<1x3x128xbf16>
    %3 = vector.shape_cast %2 : vector<1x3x128xbf16> to vector<3x128xbf16>
    %c2 = arith.constant 2 : index
    %c0_4 = arith.constant 0 : index
    %c0_5 = arith.constant 0 : index
    %4 = vector.load %arg1[%c2, %c0_4, %c0_5] : memref<8x3x128xbf16, #tpu.memory_space<vmem>>, vector<1x3x128xbf16>
    %5 = vector.shape_cast %4 : vector<1x3x128xbf16> to vector<3x128xbf16>
    %c3 = arith.constant 3 : index
    %c0_6 = arith.constant 0 : index
    %c0_7 = arith.constant 0 : index
    %6 = vector.load %arg1[%c3, %c0_6, %c0_7] : memref<8x3x128xbf16, #tpu.memory_space<vmem>>, vector<1x3x128xbf16>
    %7 = vector.shape_cast %6 : vector<1x3x128xbf16> to vector<3x128xbf16>
    %c4 = arith.constant 4 : index
    %c0_8 = arith.constant 0 : index
    %c0_9 = arith.constant 0 : index
    %8 = vector.load %arg1[%c4, %c0_8, %c0_9] : memref<8x3x128xbf16, #tpu.memory_space<vmem>>, vector<1x3x128xbf16>
    %9 = vector.shape_cast %8 : vector<1x3x128xbf16> to vector<3x128xbf16>
    %c5 = arith.constant 5 : index
    %c0_10 = arith.constant 0 : index
    %c0_11 = arith.constant 0 : index
    %10 = vector.load %arg1[%c5, %c0_10, %c0_11] : memref<8x3x128xbf16, #tpu.memory_space<vmem>>, vector<1x3x128xbf16>
    %11 = vector.shape_cast %10 : vector<1x3x128xbf16> to vector<3x128xbf16>
    %c6 = arith.constant 6 : index
    %c0_12 = arith.constant 0 : index
    %c0_13 = arith.constant 0 : index
    %12 = vector.load %arg1[%c6, %c0_12, %c0_13] : memref<8x3x128xbf16, #tpu.memory_space<vmem>>, vector<1x3x128xbf16>
    %13 = vector.shape_cast %12 : vector<1x3x128xbf16> to vector<3x128xbf16>
    %c7 = arith.constant 7 : index
    %c0_14 = arith.constant 0 : index
    %c0_15 = arith.constant 0 : index
    %14 = vector.load %arg1[%c7, %c0_14, %c0_15] : memref<8x3x128xbf16, #tpu.memory_space<vmem>>, vector<1x3x128xbf16>
    %15 = vector.shape_cast %14 : vector<1x3x128xbf16> to vector<3x128xbf16>
    %c0_16 = arith.constant 0 : index
    %c0_17 = arith.constant 0 : index
    %16 = vector.load %arg6[%c0_16, %c0_17] : memref<3x1xf32, #tpu.memory_space<vmem>>, vector<3x1xf32>
    %c0_18 = arith.constant 0 : index
    %c0_19 = arith.constant 0 : index
    %17 = vector.load %arg5[%c0_18, %c0_19] : memref<3x9xbf16, #tpu.memory_space<vmem>>, vector<3x3xbf16>
    %cst = arith.constant dense<0.000000e+00> : vector<3x128xf32>
    %18 = tpu.matmul %17, %1, %cst {dimension_numbers = #tpu.dot_dimension_numbers<[1], [0], [0], [1], [0, 0, 1, 1], [], []>} : vector<3x3xbf16>, vector<3x128xbf16>, vector<3x128xf32> -> vector<3x128xf32>
    %c0_20 = arith.constant 0 : index
    %c3_21 = arith.constant 3 : index
    %19 = vector.load %arg5[%c0_20, %c3_21] : memref<3x9xbf16, #tpu.memory_space<vmem>>, vector<3x3xbf16>
    %cst_22 = arith.constant dense<0.000000e+00> : vector<3x128xf32>
    %20 = tpu.matmul %19, %3, %cst_22 {dimension_numbers = #tpu.dot_dimension_numbers<[1], [0], [0], [1], [0, 0, 1, 1], [], []>} : vector<3x3xbf16>, vector<3x128xbf16>, vector<3x128xf32> -> vector<3x128xf32>
    %21 = arith.addf %18, %20 : vector<3x128xf32>
    %c0_23 = arith.constant 0 : index
    %c6_24 = arith.constant 6 : index
    %22 = vector.load %arg5[%c0_23, %c6_24] : memref<3x9xbf16, #tpu.memory_space<vmem>>, vector<3x3xbf16>
    %cst_25 = arith.constant dense<0.000000e+00> : vector<3x128xf32>
    %23 = tpu.matmul %22, %5, %cst_25 {dimension_numbers = #tpu.dot_dimension_numbers<[1], [0], [0], [1], [0, 0, 1, 1], [], []>} : vector<3x3xbf16>, vector<3x128xbf16>, vector<3x128xf32> -> vector<3x128xf32>
    %24 = arith.addf %21, %23 : vector<3x128xf32>
    %25 = vector.broadcast %16 : vector<3x1xf32> to vector<3x128xf32>
    %26 = arith.addf %24, %25 : vector<3x128xf32>
    %cst_26 = arith.constant 5.000000e-01 : f32
    %27 = vector.broadcast %cst_26 : f32 to vector<3x128xf32>
    %28 = arith.mulf %27, %26 : vector<3x128xf32>
    %cst_27 = arith.constant 0.707106769 : f32
    %29 = vector.broadcast %cst_27 : f32 to vector<3x128xf32>
    %30 = arith.mulf %26, %29 : vector<3x128xf32>
    %31 = math.erf %30 : vector<3x128xf32>
    %cst_28 = arith.constant 1.000000e+00 : f32
    %32 = vector.broadcast %cst_28 : f32 to vector<3x128xf32>
    %33 = arith.addf %32, %31 : vector<3x128xf32>
    %34 = arith.mulf %28, %33 : vector<3x128xf32>
    %c0_29 = arith.constant 0 : index
    %c0_30 = arith.constant 0 : index
    %35 = vector.load %arg7[%c0_29, %c0_30] : memref<18x3xbf16, #tpu.memory_space<vmem>>, vector<18x3xbf16>
    %36 = arith.truncf %34 : vector<3x128xf32> to vector<3x128xbf16>
    %cst_31 = arith.constant dense<0.000000e+00> : vector<18x128xf32>
    %37 = tpu.matmul %35, %36, %cst_31 {dimension_numbers = #tpu.dot_dimension_numbers<[1], [0], [0], [1], [0, 0, 1, 1], [], []>} : vector<18x3xbf16>, vector<3x128xbf16>, vector<18x128xf32> -> vector<18x128xf32>
    %cst_32 = arith.constant 5.000000e-01 : f32
    %38 = vector.broadcast %cst_32 : f32 to vector<18x128xf32>
    %39 = arith.mulf %38, %37 : vector<18x128xf32>
    %cst_33 = arith.constant 0.707106769 : f32
    %40 = vector.broadcast %cst_33 : f32 to vector<18x128xf32>
    %41 = arith.mulf %37, %40 : vector<18x128xf32>
    %42 = math.erf %41 : vector<18x128xf32>
    %cst_34 = arith.constant 1.000000e+00 : f32
    %43 = vector.broadcast %cst_34 : f32 to vector<18x128xf32>
    %44 = arith.addf %43, %42 : vector<18x128xf32>
    %45 = arith.mulf %39, %44 : vector<18x128xf32>
    %c0_35 = arith.constant 0 : index
    %c0_36 = arith.constant 0 : index
    %46 = vector.load %arg8[%c0_35, %c0_36] : memref<3x18xbf16, #tpu.memory_space<vmem>>, vector<3x18xbf16>
    %47 = arith.truncf %45 : vector<18x128xf32> to vector<18x128xbf16>
    %cst_37 = arith.constant dense<0.000000e+00> : vector<3x128xf32>
    %48 = tpu.matmul %46, %47, %cst_37 {dimension_numbers = #tpu.dot_dimension_numbers<[1], [0], [0], [1], [0, 0, 1, 1], [], []>} : vector<3x18xbf16>, vector<18x128xbf16>, vector<3x128xf32> -> vector<3x128xf32>
    %cst_38 = arith.constant 5.000000e-01 : f32
    %49 = vector.broadcast %cst_38 : f32 to vector<3x128xf32>
    %50 = arith.mulf %49, %48 : vector<3x128xf32>
    %cst_39 = arith.constant 0.707106769 : f32
    %51 = vector.broadcast %cst_39 : f32 to vector<3x128xf32>
    %52 = arith.mulf %48, %51 : vector<3x128xf32>
    %53 = math.erf %52 : vector<3x128xf32>
    %cst_40 = arith.constant 1.000000e+00 : f32
    %54 = vector.broadcast %cst_40 : f32 to vector<3x128xf32>
    %55 = arith.addf %54, %53 : vector<3x128xf32>
    %56 = arith.mulf %50, %55 : vector<3x128xf32>
    %57 = arith.truncf %56 : vector<3x128xf32> to vector<3x128xbf16>
    %c0_41 = arith.constant 0 : index
    %c0_42 = arith.constant 0 : index
    %58 = vector.load %arg5[%c0_41, %c0_42] : memref<3x9xbf16, #tpu.memory_space<vmem>>, vector<3x3xbf16>
    %cst_43 = arith.constant dense<0.000000e+00> : vector<3x128xf32>
    %59 = tpu.matmul %58, %3, %cst_43 {dimension_numbers = #tpu.dot_dimension_numbers<[1], [0], [0], [1], [0, 0, 1, 1], [], []>} : vector<3x3xbf16>, vector<3x128xbf16>, vector<3x128xf32> -> vector<3x128xf32>
    %c0_44 = arith.constant 0 : index
    %c3_45 = arith.constant 3 : index
    %60 = vector.load %arg5[%c0_44, %c3_45] : memref<3x9xbf16, #tpu.memory_space<vmem>>, vector<3x3xbf16>
    %cst_46 = arith.constant dense<0.000000e+00> : vector<3x128xf32>
    %61 = tpu.matmul %60, %5, %cst_46 {dimension_numbers = #tpu.dot_dimension_numbers<[1], [0], [0], [1], [0, 0, 1, 1], [], []>} : vector<3x3xbf16>, vector<3x128xbf16>, vector<3x128xf32> -> vector<3x128xf32>
    %62 = arith.addf %59, %61 : vector<3x128xf32>
    %c0_47 = arith.constant 0 : index
    %c6_48 = arith.constant 6 : index
    %63 = vector.load %arg5[%c0_47, %c6_48] : memref<3x9xbf16, #tpu.memory_space<vmem>>, vector<3x3xbf16>
    %cst_49 = arith.constant dense<0.000000e+00> : vector<3x128xf32>
    %64 = tpu.matmul %63, %7, %cst_49 {dimension_numbers = #tpu.dot_dimension_numbers<[1], [0], [0], [1], [0, 0, 1, 1], [], []>} : vector<3x3xbf16>, vector<3x128xbf16>, vector<3x128xf32> -> vector<3x128xf32>
    %65 = arith.addf %62, %64 : vector<3x128xf32>
    %66 = vector.broadcast %16 : vector<3x1xf32> to vector<3x128xf32>
    %67 = arith.addf %65, %66 : vector<3x128xf32>
    %cst_50 = arith.constant 5.000000e-01 : f32
    %68 = vector.broadcast %cst_50 : f32 to vector<3x128xf32>
    %69 = arith.mulf %68, %67 : vector<3x128xf32>
    %cst_51 = arith.constant 0.707106769 : f32
    %70 = vector.broadcast %cst_51 : f32 to vector<3x128xf32>
    %71 = arith.mulf %67, %70 : vector<3x128xf32>
    %72 = math.erf %71 : vector<3x128xf32>
    %cst_52 = arith.constant 1.000000e+00 : f32
    %73 = vector.broadcast %cst_52 : f32 to vector<3x128xf32>
    %74 = arith.addf %73, %72 : vector<3x128xf32>
    %75 = arith.mulf %69, %74 : vector<3x128xf32>
    %c0_53 = arith.constant 0 : index
    %c0_54 = arith.constant 0 : index
    %76 = vector.load %arg7[%c0_53, %c0_54] : memref<18x3xbf16, #tpu.memory_space<vmem>>, vector<18x3xbf16>
    %77 = arith.truncf %75 : vector<3x128xf32> to vector<3x128xbf16>
    %cst_55 = arith.constant dense<0.000000e+00> : vector<18x128xf32>
    %78 = tpu.matmul %76, %77, %cst_55 {dimension_numbers = #tpu.dot_dimension_numbers<[1], [0], [0], [1], [0, 0, 1, 1], [], []>} : vector<18x3xbf16>, vector<3x128xbf16>, vector<18x128xf32> -> vector<18x128xf32>
    %cst_56 = arith.constant 5.000000e-01 : f32
    %79 = vector.broadcast %cst_56 : f32 to vector<18x128xf32>
    %80 = arith.mulf %79, %78 : vector<18x128xf32>
    %cst_57 = arith.constant 0.707106769 : f32
    %81 = vector.broadcast %cst_57 : f32 to vector<18x128xf32>
    %82 = arith.mulf %78, %81 : vector<18x128xf32>
    %83 = math.erf %82 : vector<18x128xf32>
    %cst_58 = arith.constant 1.000000e+00 : f32
    %84 = vector.broadcast %cst_58 : f32 to vector<18x128xf32>
    %85 = arith.addf %84, %83 : vector<18x128xf32>
    %86 = arith.mulf %80, %85 : vector<18x128xf32>
    %c0_59 = arith.constant 0 : index
    %c0_60 = arith.constant 0 : index
    %87 = vector.load %arg8[%c0_59, %c0_60] : memref<3x18xbf16, #tpu.memory_space<vmem>>, vector<3x18xbf16>
    %88 = arith.truncf %86 : vector<18x128xf32> to vector<18x128xbf16>
    %cst_61 = arith.constant dense<0.000000e+00> : vector<3x128xf32>
    %89 = tpu.matmul %87, %88, %cst_61 {dimension_numbers = #tpu.dot_dimension_numbers<[1], [0], [0], [1], [0, 0, 1, 1], [], []>} : vector<3x18xbf16>, vector<18x128xbf16>, vector<3x128xf32> -> vector<3x128xf32>
    %cst_62 = arith.constant 5.000000e-01 : f32
    %90 = vector.broadcast %cst_62 : f32 to vector<3x128xf32>
    %91 = arith.mulf %90, %89 : vector<3x128xf32>
    %cst_63 = arith.constant 0.707106769 : f32
    %92 = vector.broadcast %cst_63 : f32 to vector<3x128xf32>
    %93 = arith.mulf %89, %92 : vector<3x128xf32>
    %94 = math.erf %93 : vector<3x128xf32>
    %cst_64 = arith.constant 1.000000e+00 : f32
    %95 = vector.broadcast %cst_64 : f32 to vector<3x128xf32>
    %96 = arith.addf %95, %94 : vector<3x128xf32>
    %97 = arith.mulf %91, %96 : vector<3x128xf32>
    %98 = arith.truncf %97 : vector<3x128xf32> to vector<3x128xbf16>
    %c0_65 = arith.constant 0 : index
    %c0_66 = arith.constant 0 : index
    %99 = vector.load %arg5[%c0_65, %c0_66] : memref<3x9xbf16, #tpu.memory_space<vmem>>, vector<3x3xbf16>
    %cst_67 = arith.constant dense<0.000000e+00> : vector<3x128xf32>
    %100 = tpu.matmul %99, %5, %cst_67 {dimension_numbers = #tpu.dot_dimension_numbers<[1], [0], [0], [1], [0, 0, 1, 1], [], []>} : vector<3x3xbf16>, vector<3x128xbf16>, vector<3x128xf32> -> vector<3x128xf32>
    %c0_68 = arith.constant 0 : index
    %c3_69 = arith.constant 3 : index
    %101 = vector.load %arg5[%c0_68, %c3_69] : memref<3x9xbf16, #tpu.memory_space<vmem>>, vector<3x3xbf16>
    %cst_70 = arith.constant dense<0.000000e+00> : vector<3x128xf32>
    %102 = tpu.matmul %101, %7, %cst_70 {dimension_numbers = #tpu.dot_dimension_numbers<[1], [0], [0], [1], [0, 0, 1, 1], [], []>} : vector<3x3xbf16>, vector<3x128xbf16>, vector<3x128xf32> -> vector<3x128xf32>
    %103 = arith.addf %100, %102 : vector<3x128xf32>
    %c0_71 = arith.constant 0 : index
    %c6_72 = arith.constant 6 : index
    %104 = vector.load %arg5[%c0_71, %c6_72] : memref<3x9xbf16, #tpu.memory_space<vmem>>, vector<3x3xbf16>
    %cst_73 = arith.constant dense<0.000000e+00> : vector<3x128xf32>
    %105 = tpu.matmul %104, %9, %cst_73 {dimension_numbers = #tpu.dot_dimension_numbers<[1], [0], [0], [1], [0, 0, 1, 1], [], []>} : vector<3x3xbf16>, vector<3x128xbf16>, vector<3x128xf32> -> vector<3x128xf32>
    %106 = arith.addf %103, %105 : vector<3x128xf32>
    %107 = vector.broadcast %16 : vector<3x1xf32> to vector<3x128xf32>
    %108 = arith.addf %106, %107 : vector<3x128xf32>
    %cst_74 = arith.constant 5.000000e-01 : f32
    %109 = vector.broadcast %cst_74 : f32 to vector<3x128xf32>
    %110 = arith.mulf %109, %108 : vector<3x128xf32>
    %cst_75 = arith.constant 0.707106769 : f32
    %111 = vector.broadcast %cst_75 : f32 to vector<3x128xf32>
    %112 = arith.mulf %108, %111 : vector<3x128xf32>
    %113 = math.erf %112 : vector<3x128xf32>
    %cst_76 = arith.constant 1.000000e+00 : f32
    %114 = vector.broadcast %cst_76 : f32 to vector<3x128xf32>
    %115 = arith.addf %114, %113 : vector<3x128xf32>
    %116 = arith.mulf %110, %115 : vector<3x128xf32>
    %c0_77 = arith.constant 0 : index
    %c0_78 = arith.constant 0 : index
    %117 = vector.load %arg7[%c0_77, %c0_78] : memref<18x3xbf16, #tpu.memory_space<vmem>>, vector<18x3xbf16>
    %118 = arith.truncf %116 : vector<3x128xf32> to vector<3x128xbf16>
    %cst_79 = arith.constant dense<0.000000e+00> : vector<18x128xf32>
    %119 = tpu.matmul %117, %118, %cst_79 {dimension_numbers = #tpu.dot_dimension_numbers<[1], [0], [0], [1], [0, 0, 1, 1], [], []>} : vector<18x3xbf16>, vector<3x128xbf16>, vector<18x128xf32> -> vector<18x128xf32>
    %cst_80 = arith.constant 5.000000e-01 : f32
    %120 = vector.broadcast %cst_80 : f32 to vector<18x128xf32>
    %121 = arith.mulf %120, %119 : vector<18x128xf32>
    %cst_81 = arith.constant 0.707106769 : f32
    %122 = vector.broadcast %cst_81 : f32 to vector<18x128xf32>
    %123 = arith.mulf %119, %122 : vector<18x128xf32>
    %124 = math.erf %123 : vector<18x128xf32>
    %cst_82 = arith.constant 1.000000e+00 : f32
    %125 = vector.broadcast %cst_82 : f32 to vector<18x128xf32>
    %126 = arith.addf %125, %124 : vector<18x128xf32>
    %127 = arith.mulf %121, %126 : vector<18x128xf32>
    %c0_83 = arith.constant 0 : index
    %c0_84 = arith.constant 0 : index
    %128 = vector.load %arg8[%c0_83, %c0_84] : memref<3x18xbf16, #tpu.memory_space<vmem>>, vector<3x18xbf16>
    %129 = arith.truncf %127 : vector<18x128xf32> to vector<18x128xbf16>
    %cst_85 = arith.constant dense<0.000000e+00> : vector<3x128xf32>
    %130 = tpu.matmul %128, %129, %cst_85 {dimension_numbers = #tpu.dot_dimension_numbers<[1], [0], [0], [1], [0, 0, 1, 1], [], []>} : vector<3x18xbf16>, vector<18x128xbf16>, vector<3x128xf32> -> vector<3x128xf32>
    %cst_86 = arith.constant 5.000000e-01 : f32
    %131 = vector.broadcast %cst_86 : f32 to vector<3x128xf32>
    %132 = arith.mulf %131, %130 : vector<3x128xf32>
    %cst_87 = arith.constant 0.707106769 : f32
    %133 = vector.broadcast %cst_87 : f32 to vector<3x128xf32>
    %134 = arith.mulf %130, %133 : vector<3x128xf32>
    %135 = math.erf %134 : vector<3x128xf32>
    %cst_88 = arith.constant 1.000000e+00 : f32
    %136 = vector.broadcast %cst_88 : f32 to vector<3x128xf32>
    %137 = arith.addf %136, %135 : vector<3x128xf32>
    %138 = arith.mulf %132, %137 : vector<3x128xf32>
    %139 = arith.truncf %138 : vector<3x128xf32> to vector<3x128xbf16>
    %c0_89 = arith.constant 0 : index
    %c0_90 = arith.constant 0 : index
    %140 = vector.load %arg5[%c0_89, %c0_90] : memref<3x9xbf16, #tpu.memory_space<vmem>>, vector<3x3xbf16>
    %cst_91 = arith.constant dense<0.000000e+00> : vector<3x128xf32>
    %141 = tpu.matmul %140, %7, %cst_91 {dimension_numbers = #tpu.dot_dimension_numbers<[1], [0], [0], [1], [0, 0, 1, 1], [], []>} : vector<3x3xbf16>, vector<3x128xbf16>, vector<3x128xf32> -> vector<3x128xf32>
    %c0_92 = arith.constant 0 : index
    %c3_93 = arith.constant 3 : index
    %142 = vector.load %arg5[%c0_92, %c3_93] : memref<3x9xbf16, #tpu.memory_space<vmem>>, vector<3x3xbf16>
    %cst_94 = arith.constant dense<0.000000e+00> : vector<3x128xf32>
    %143 = tpu.matmul %142, %9, %cst_94 {dimension_numbers = #tpu.dot_dimension_numbers<[1], [0], [0], [1], [0, 0, 1, 1], [], []>} : vector<3x3xbf16>, vector<3x128xbf16>, vector<3x128xf32> -> vector<3x128xf32>
    %144 = arith.addf %141, %143 : vector<3x128xf32>
    %c0_95 = arith.constant 0 : index
    %c6_96 = arith.constant 6 : index
    %145 = vector.load %arg5[%c0_95, %c6_96] : memref<3x9xbf16, #tpu.memory_space<vmem>>, vector<3x3xbf16>
    %cst_97 = arith.constant dense<0.000000e+00> : vector<3x128xf32>
    %146 = tpu.matmul %145, %11, %cst_97 {dimension_numbers = #tpu.dot_dimension_numbers<[1], [0], [0], [1], [0, 0, 1, 1], [], []>} : vector<3x3xbf16>, vector<3x128xbf16>, vector<3x128xf32> -> vector<3x128xf32>
    %147 = arith.addf %144, %146 : vector<3x128xf32>
    %148 = vector.broadcast %16 : vector<3x1xf32> to vector<3x128xf32>
    %149 = arith.addf %147, %148 : vector<3x128xf32>
    %cst_98 = arith.constant 5.000000e-01 : f32
    %150 = vector.broadcast %cst_98 : f32 to vector<3x128xf32>
    %151 = arith.mulf %150, %149 : vector<3x128xf32>
    %cst_99 = arith.constant 0.707106769 : f32
    %152 = vector.broadcast %cst_99 : f32 to vector<3x128xf32>
    %153 = arith.mulf %149, %152 : vector<3x128xf32>
    %154 = math.erf %153 : vector<3x128xf32>
    %cst_100 = arith.constant 1.000000e+00 : f32
    %155 = vector.broadcast %cst_100 : f32 to vector<3x128xf32>
    %156 = arith.addf %155, %154 : vector<3x128xf32>
    %157 = arith.mulf %151, %156 : vector<3x128xf32>
    %c0_101 = arith.constant 0 : index
    %c0_102 = arith.constant 0 : index
    %158 = vector.load %arg7[%c0_101, %c0_102] : memref<18x3xbf16, #tpu.memory_space<vmem>>, vector<18x3xbf16>
    %159 = arith.truncf %157 : vector<3x128xf32> to vector<3x128xbf16>
    %cst_103 = arith.constant dense<0.000000e+00> : vector<18x128xf32>
    %160 = tpu.matmul %158, %159, %cst_103 {dimension_numbers = #tpu.dot_dimension_numbers<[1], [0], [0], [1], [0, 0, 1, 1], [], []>} : vector<18x3xbf16>, vector<3x128xbf16>, vector<18x128xf32> -> vector<18x128xf32>
    %cst_104 = arith.constant 5.000000e-01 : f32
    %161 = vector.broadcast %cst_104 : f32 to vector<18x128xf32>
    %162 = arith.mulf %161, %160 : vector<18x128xf32>
    %cst_105 = arith.constant 0.707106769 : f32
    %163 = vector.broadcast %cst_105 : f32 to vector<18x128xf32>
    %164 = arith.mulf %160, %163 : vector<18x128xf32>
    %165 = math.erf %164 : vector<18x128xf32>
    %cst_106 = arith.constant 1.000000e+00 : f32
    %166 = vector.broadcast %cst_106 : f32 to vector<18x128xf32>
    %167 = arith.addf %166, %165 : vector<18x128xf32>
    %168 = arith.mulf %162, %167 : vector<18x128xf32>
    %c0_107 = arith.constant 0 : index
    %c0_108 = arith.constant 0 : index
    %169 = vector.load %arg8[%c0_107, %c0_108] : memref<3x18xbf16, #tpu.memory_space<vmem>>, vector<3x18xbf16>
    %170 = arith.truncf %168 : vector<18x128xf32> to vector<18x128xbf16>
    %cst_109 = arith.constant dense<0.000000e+00> : vector<3x128xf32>
    %171 = tpu.matmul %169, %170, %cst_109 {dimension_numbers = #tpu.dot_dimension_numbers<[1], [0], [0], [1], [0, 0, 1, 1], [], []>} : vector<3x18xbf16>, vector<18x128xbf16>, vector<3x128xf32> -> vector<3x128xf32>
    %cst_110 = arith.constant 5.000000e-01 : f32
    %172 = vector.broadcast %cst_110 : f32 to vector<3x128xf32>
    %173 = arith.mulf %172, %171 : vector<3x128xf32>
    %cst_111 = arith.constant 0.707106769 : f32
    %174 = vector.broadcast %cst_111 : f32 to vector<3x128xf32>
    %175 = arith.mulf %171, %174 : vector<3x128xf32>
    %176 = math.erf %175 : vector<3x128xf32>
    %cst_112 = arith.constant 1.000000e+00 : f32
    %177 = vector.broadcast %cst_112 : f32 to vector<3x128xf32>
    %178 = arith.addf %177, %176 : vector<3x128xf32>
    %179 = arith.mulf %173, %178 : vector<3x128xf32>
    %180 = arith.truncf %179 : vector<3x128xf32> to vector<3x128xbf16>
    %c0_113 = arith.constant 0 : index
    %c0_114 = arith.constant 0 : index
    %181 = vector.load %arg5[%c0_113, %c0_114] : memref<3x9xbf16, #tpu.memory_space<vmem>>, vector<3x3xbf16>
    %cst_115 = arith.constant dense<0.000000e+00> : vector<3x128xf32>
    %182 = tpu.matmul %181, %9, %cst_115 {dimension_numbers = #tpu.dot_dimension_numbers<[1], [0], [0], [1], [0, 0, 1, 1], [], []>} : vector<3x3xbf16>, vector<3x128xbf16>, vector<3x128xf32> -> vector<3x128xf32>
    %c0_116 = arith.constant 0 : index
    %c3_117 = arith.constant 3 : index
    %183 = vector.load %arg5[%c0_116, %c3_117] : memref<3x9xbf16, #tpu.memory_space<vmem>>, vector<3x3xbf16>
    %cst_118 = arith.constant dense<0.000000e+00> : vector<3x128xf32>
    %184 = tpu.matmul %183, %11, %cst_118 {dimension_numbers = #tpu.dot_dimension_numbers<[1], [0], [0], [1], [0, 0, 1, 1], [], []>} : vector<3x3xbf16>, vector<3x128xbf16>, vector<3x128xf32> -> vector<3x128xf32>
    %185 = arith.addf %182, %184 : vector<3x128xf32>
    %c0_119 = arith.constant 0 : index
    %c6_120 = arith.constant 6 : index
    %186 = vector.load %arg5[%c0_119, %c6_120] : memref<3x9xbf16, #tpu.memory_space<vmem>>, vector<3x3xbf16>
    %cst_121 = arith.constant dense<0.000000e+00> : vector<3x128xf32>
    %187 = tpu.matmul %186, %13, %cst_121 {dimension_numbers = #tpu.dot_dimension_numbers<[1], [0], [0], [1], [0, 0, 1, 1], [], []>} : vector<3x3xbf16>, vector<3x128xbf16>, vector<3x128xf32> -> vector<3x128xf32>
    %188 = arith.addf %185, %187 : vector<3x128xf32>
    %189 = vector.broadcast %16 : vector<3x1xf32> to vector<3x128xf32>
    %190 = arith.addf %188, %189 : vector<3x128xf32>
    %cst_122 = arith.constant 5.000000e-01 : f32
    %191 = vector.broadcast %cst_122 : f32 to vector<3x128xf32>
    %192 = arith.mulf %191, %190 : vector<3x128xf32>
    %cst_123 = arith.constant 0.707106769 : f32
    %193 = vector.broadcast %cst_123 : f32 to vector<3x128xf32>
    %194 = arith.mulf %190, %193 : vector<3x128xf32>
    %195 = math.erf %194 : vector<3x128xf32>
    %cst_124 = arith.constant 1.000000e+00 : f32
    %196 = vector.broadcast %cst_124 : f32 to vector<3x128xf32>
    %197 = arith.addf %196, %195 : vector<3x128xf32>
    %198 = arith.mulf %192, %197 : vector<3x128xf32>
    %c0_125 = arith.constant 0 : index
    %c0_126 = arith.constant 0 : index
    %199 = vector.load %arg7[%c0_125, %c0_126] : memref<18x3xbf16, #tpu.memory_space<vmem>>, vector<18x3xbf16>
    %200 = arith.truncf %198 : vector<3x128xf32> to vector<3x128xbf16>
    %cst_127 = arith.constant dense<0.000000e+00> : vector<18x128xf32>
    %201 = tpu.matmul %199, %200, %cst_127 {dimension_numbers = #tpu.dot_dimension_numbers<[1], [0], [0], [1], [0, 0, 1, 1], [], []>} : vector<18x3xbf16>, vector<3x128xbf16>, vector<18x128xf32> -> vector<18x128xf32>
    %cst_128 = arith.constant 5.000000e-01 : f32
    %202 = vector.broadcast %cst_128 : f32 to vector<18x128xf32>
    %203 = arith.mulf %202, %201 : vector<18x128xf32>
    %cst_129 = arith.constant 0.707106769 : f32
    %204 = vector.broadcast %cst_129 : f32 to vector<18x128xf32>
    %205 = arith.mulf %201, %204 : vector<18x128xf32>
    %206 = math.erf %205 : vector<18x128xf32>
    %cst_130 = arith.constant 1.000000e+00 : f32
    %207 = vector.broadcast %cst_130 : f32 to vector<18x128xf32>
    %208 = arith.addf %207, %206 : vector<18x128xf32>
    %209 = arith.mulf %203, %208 : vector<18x128xf32>
    %c0_131 = arith.constant 0 : index
    %c0_132 = arith.constant 0 : index
    %210 = vector.load %arg8[%c0_131, %c0_132] : memref<3x18xbf16, #tpu.memory_space<vmem>>, vector<3x18xbf16>
    %211 = arith.truncf %209 : vector<18x128xf32> to vector<18x128xbf16>
    %cst_133 = arith.constant dense<0.000000e+00> : vector<3x128xf32>
    %212 = tpu.matmul %210, %211, %cst_133 {dimension_numbers = #tpu.dot_dimension_numbers<[1], [0], [0], [1], [0, 0, 1, 1], [], []>} : vector<3x18xbf16>, vector<18x128xbf16>, vector<3x128xf32> -> vector<3x128xf32>
    %cst_134 = arith.constant 5.000000e-01 : f32
    %213 = vector.broadcast %cst_134 : f32 to vector<3x128xf32>
    %214 = arith.mulf %213, %212 : vector<3x128xf32>
    %cst_135 = arith.constant 0.707106769 : f32
    %215 = vector.broadcast %cst_135 : f32 to vector<3x128xf32>
    %216 = arith.mulf %212, %215 : vector<3x128xf32>
    %217 = math.erf %216 : vector<3x128xf32>
    %cst_136 = arith.constant 1.000000e+00 : f32
    %218 = vector.broadcast %cst_136 : f32 to vector<3x128xf32>
    %219 = arith.addf %218, %217 : vector<3x128xf32>
    %220 = arith.mulf %214, %219 : vector<3x128xf32>
    %221 = arith.truncf %220 : vector<3x128xf32> to vector<3x128xbf16>
    %c0_137 = arith.constant 0 : index
    %c0_138 = arith.constant 0 : index
    %222 = vector.load %arg5[%c0_137, %c0_138] : memref<3x9xbf16, #tpu.memory_space<vmem>>, vector<3x3xbf16>
    %cst_139 = arith.constant dense<0.000000e+00> : vector<3x128xf32>
    %223 = tpu.matmul %222, %11, %cst_139 {dimension_numbers = #tpu.dot_dimension_numbers<[1], [0], [0], [1], [0, 0, 1, 1], [], []>} : vector<3x3xbf16>, vector<3x128xbf16>, vector<3x128xf32> -> vector<3x128xf32>
    %c0_140 = arith.constant 0 : index
    %c3_141 = arith.constant 3 : index
    %224 = vector.load %arg5[%c0_140, %c3_141] : memref<3x9xbf16, #tpu.memory_space<vmem>>, vector<3x3xbf16>
    %cst_142 = arith.constant dense<0.000000e+00> : vector<3x128xf32>
    %225 = tpu.matmul %224, %13, %cst_142 {dimension_numbers = #tpu.dot_dimension_numbers<[1], [0], [0], [1], [0, 0, 1, 1], [], []>} : vector<3x3xbf16>, vector<3x128xbf16>, vector<3x128xf32> -> vector<3x128xf32>
    %226 = arith.addf %223, %225 : vector<3x128xf32>
    %c0_143 = arith.constant 0 : index
    %c6_144 = arith.constant 6 : index
    %227 = vector.load %arg5[%c0_143, %c6_144] : memref<3x9xbf16, #tpu.memory_space<vmem>>, vector<3x3xbf16>
    %cst_145 = arith.constant dense<0.000000e+00> : vector<3x128xf32>
    %228 = tpu.matmul %227, %15, %cst_145 {dimension_numbers = #tpu.dot_dimension_numbers<[1], [0], [0], [1], [0, 0, 1, 1], [], []>} : vector<3x3xbf16>, vector<3x128xbf16>, vector<3x128xf32> -> vector<3x128xf32>
    %229 = arith.addf %226, %228 : vector<3x128xf32>
    %230 = vector.broadcast %16 : vector<3x1xf32> to vector<3x128xf32>
    %231 = arith.addf %229, %230 : vector<3x128xf32>
    %cst_146 = arith.constant 5.000000e-01 : f32
    %232 = vector.broadcast %cst_146 : f32 to vector<3x128xf32>
    %233 = arith.mulf %232, %231 : vector<3x128xf32>
    %cst_147 = arith.constant 0.707106769 : f32
    %234 = vector.broadcast %cst_147 : f32 to vector<3x128xf32>
    %235 = arith.mulf %231, %234 : vector<3x128xf32>
    %236 = math.erf %235 : vector<3x128xf32>
    %cst_148 = arith.constant 1.000000e+00 : f32
    %237 = vector.broadcast %cst_148 : f32 to vector<3x128xf32>
    %238 = arith.addf %237, %236 : vector<3x128xf32>
    %239 = arith.mulf %233, %238 : vector<3x128xf32>
    %c0_149 = arith.constant 0 : index
    %c0_150 = arith.constant 0 : index
    %240 = vector.load %arg7[%c0_149, %c0_150] : memref<18x3xbf16, #tpu.memory_space<vmem>>, vector<18x3xbf16>
    %241 = arith.truncf %239 : vector<3x128xf32> to vector<3x128xbf16>
    %cst_151 = arith.constant dense<0.000000e+00> : vector<18x128xf32>
    %242 = tpu.matmul %240, %241, %cst_151 {dimension_numbers = #tpu.dot_dimension_numbers<[1], [0], [0], [1], [0, 0, 1, 1], [], []>} : vector<18x3xbf16>, vector<3x128xbf16>, vector<18x128xf32> -> vector<18x128xf32>
    %cst_152 = arith.constant 5.000000e-01 : f32
    %243 = vector.broadcast %cst_152 : f32 to vector<18x128xf32>
    %244 = arith.mulf %243, %242 : vector<18x128xf32>
    %cst_153 = arith.constant 0.707106769 : f32
    %245 = vector.broadcast %cst_153 : f32 to vector<18x128xf32>
    %246 = arith.mulf %242, %245 : vector<18x128xf32>
    %247 = math.erf %246 : vector<18x128xf32>
    %cst_154 = arith.constant 1.000000e+00 : f32
    %248 = vector.broadcast %cst_154 : f32 to vector<18x128xf32>
    %249 = arith.addf %248, %247 : vector<18x128xf32>
    %250 = arith.mulf %244, %249 : vector<18x128xf32>
    %c0_155 = arith.constant 0 : index
    %c0_156 = arith.constant 0 : index
    %251 = vector.load %arg8[%c0_155, %c0_156] : memref<3x18xbf16, #tpu.memory_space<vmem>>, vector<3x18xbf16>
    %252 = arith.truncf %250 : vector<18x128xf32> to vector<18x128xbf16>
    %cst_157 = arith.constant dense<0.000000e+00> : vector<3x128xf32>
    %253 = tpu.matmul %251, %252, %cst_157 {dimension_numbers = #tpu.dot_dimension_numbers<[1], [0], [0], [1], [0, 0, 1, 1], [], []>} : vector<3x18xbf16>, vector<18x128xbf16>, vector<3x128xf32> -> vector<3x128xf32>
    %cst_158 = arith.constant 5.000000e-01 : f32
    %254 = vector.broadcast %cst_158 : f32 to vector<3x128xf32>
    %255 = arith.mulf %254, %253 : vector<3x128xf32>
    %cst_159 = arith.constant 0.707106769 : f32
    %256 = vector.broadcast %cst_159 : f32 to vector<3x128xf32>
    %257 = arith.mulf %253, %256 : vector<3x128xf32>
    %258 = math.erf %257 : vector<3x128xf32>
    %cst_160 = arith.constant 1.000000e+00 : f32
    %259 = vector.broadcast %cst_160 : f32 to vector<3x128xf32>
    %260 = arith.addf %259, %258 : vector<3x128xf32>
    %261 = arith.mulf %255, %260 : vector<3x128xf32>
    %262 = arith.truncf %261 : vector<3x128xf32> to vector<3x128xbf16>
    %c0_161 = arith.constant 0 : index
    %c0_162 = arith.constant 0 : index
    %263 = vector.load %arg10[%c0_161, %c0_162] : memref<3x1xf32, #tpu.memory_space<vmem>>, vector<3x1xf32>
    %c0_163 = arith.constant 0 : index
    %c0_164 = arith.constant 0 : index
    %264 = vector.load %arg9[%c0_163, %c0_164] : memref<3x9xbf16, #tpu.memory_space<vmem>>, vector<3x3xbf16>
    %cst_165 = arith.constant dense<0.000000e+00> : vector<3x128xf32>
    %265 = tpu.matmul %264, %57, %cst_165 {dimension_numbers = #tpu.dot_dimension_numbers<[1], [0], [0], [1], [0, 0, 1, 1], [], []>} : vector<3x3xbf16>, vector<3x128xbf16>, vector<3x128xf32> -> vector<3x128xf32>
    %c0_166 = arith.constant 0 : index
    %c3_167 = arith.constant 3 : index
    %266 = vector.load %arg9[%c0_166, %c3_167] : memref<3x9xbf16, #tpu.memory_space<vmem>>, vector<3x3xbf16>
    %cst_168 = arith.constant dense<0.000000e+00> : vector<3x128xf32>
    %267 = tpu.matmul %266, %139, %cst_168 {dimension_numbers = #tpu.dot_dimension_numbers<[1], [0], [0], [1], [0, 0, 1, 1], [], []>} : vector<3x3xbf16>, vector<3x128xbf16>, vector<3x128xf32> -> vector<3x128xf32>
    %268 = arith.addf %265, %267 : vector<3x128xf32>
    %c0_169 = arith.constant 0 : index
    %c6_170 = arith.constant 6 : index
    %269 = vector.load %arg9[%c0_169, %c6_170] : memref<3x9xbf16, #tpu.memory_space<vmem>>, vector<3x3xbf16>
    %cst_171 = arith.constant dense<0.000000e+00> : vector<3x128xf32>
    %270 = tpu.matmul %269, %221, %cst_171 {dimension_numbers = #tpu.dot_dimension_numbers<[1], [0], [0], [1], [0, 0, 1, 1], [], []>} : vector<3x3xbf16>, vector<3x128xbf16>, vector<3x128xf32> -> vector<3x128xf32>
    %271 = arith.addf %268, %270 : vector<3x128xf32>
    %272 = vector.broadcast %263 : vector<3x1xf32> to vector<3x128xf32>
    %273 = arith.addf %271, %272 : vector<3x128xf32>
    %cst_172 = arith.constant 5.000000e-01 : f32
    %274 = vector.broadcast %cst_172 : f32 to vector<3x128xf32>
    %275 = arith.mulf %274, %273 : vector<3x128xf32>
    %cst_173 = arith.constant 0.707106769 : f32
    %276 = vector.broadcast %cst_173 : f32 to vector<3x128xf32>
    %277 = arith.mulf %273, %276 : vector<3x128xf32>
    %278 = math.erf %277 : vector<3x128xf32>
    %cst_174 = arith.constant 1.000000e+00 : f32
    %279 = vector.broadcast %cst_174 : f32 to vector<3x128xf32>
    %280 = arith.addf %279, %278 : vector<3x128xf32>
    %281 = arith.mulf %275, %280 : vector<3x128xf32>
    %c0_175 = arith.constant 0 : index
    %c0_176 = arith.constant 0 : index
    %282 = vector.load %arg11[%c0_175, %c0_176] : memref<18x3xbf16, #tpu.memory_space<vmem>>, vector<18x3xbf16>
    %283 = arith.truncf %281 : vector<3x128xf32> to vector<3x128xbf16>
    %cst_177 = arith.constant dense<0.000000e+00> : vector<18x128xf32>
    %284 = tpu.matmul %282, %283, %cst_177 {dimension_numbers = #tpu.dot_dimension_numbers<[1], [0], [0], [1], [0, 0, 1, 1], [], []>} : vector<18x3xbf16>, vector<3x128xbf16>, vector<18x128xf32> -> vector<18x128xf32>
    %cst_178 = arith.constant 5.000000e-01 : f32
    %285 = vector.broadcast %cst_178 : f32 to vector<18x128xf32>
    %286 = arith.mulf %285, %284 : vector<18x128xf32>
    %cst_179 = arith.constant 0.707106769 : f32
    %287 = vector.broadcast %cst_179 : f32 to vector<18x128xf32>
    %288 = arith.mulf %284, %287 : vector<18x128xf32>
    %289 = math.erf %288 : vector<18x128xf32>
    %cst_180 = arith.constant 1.000000e+00 : f32
    %290 = vector.broadcast %cst_180 : f32 to vector<18x128xf32>
    %291 = arith.addf %290, %289 : vector<18x128xf32>
    %292 = arith.mulf %286, %291 : vector<18x128xf32>
    %c0_181 = arith.constant 0 : index
    %c0_182 = arith.constant 0 : index
    %293 = vector.load %arg12[%c0_181, %c0_182] : memref<3x18xbf16, #tpu.memory_space<vmem>>, vector<3x18xbf16>
    %294 = arith.truncf %292 : vector<18x128xf32> to vector<18x128xbf16>
    %cst_183 = arith.constant dense<0.000000e+00> : vector<3x128xf32>
    %295 = tpu.matmul %293, %294, %cst_183 {dimension_numbers = #tpu.dot_dimension_numbers<[1], [0], [0], [1], [0, 0, 1, 1], [], []>} : vector<3x18xbf16>, vector<18x128xbf16>, vector<3x128xf32> -> vector<3x128xf32>
    %cst_184 = arith.constant 5.000000e-01 : f32
    %296 = vector.broadcast %cst_184 : f32 to vector<3x128xf32>
    %297 = arith.mulf %296, %295 : vector<3x128xf32>
    %cst_185 = arith.constant 0.707106769 : f32
    %298 = vector.broadcast %cst_185 : f32 to vector<3x128xf32>
    %299 = arith.mulf %295, %298 : vector<3x128xf32>
    %300 = math.erf %299 : vector<3x128xf32>
    %cst_186 = arith.constant 1.000000e+00 : f32
    %301 = vector.broadcast %cst_186 : f32 to vector<3x128xf32>
    %302 = arith.addf %301, %300 : vector<3x128xf32>
    %303 = arith.mulf %297, %302 : vector<3x128xf32>
    %304 = arith.truncf %303 : vector<3x128xf32> to vector<3x128xbf16>
    %c0_187 = arith.constant 0 : index
    %c0_188 = arith.constant 0 : index
    %305 = vector.load %arg9[%c0_187, %c0_188] : memref<3x9xbf16, #tpu.memory_space<vmem>>, vector<3x3xbf16>
    %cst_189 = arith.constant dense<0.000000e+00> : vector<3x128xf32>
    %306 = tpu.matmul %305, %98, %cst_189 {dimension_numbers = #tpu.dot_dimension_numbers<[1], [0], [0], [1], [0, 0, 1, 1], [], []>} : vector<3x3xbf16>, vector<3x128xbf16>, vector<3x128xf32> -> vector<3x128xf32>
    %c0_190 = arith.constant 0 : index
    %c3_191 = arith.constant 3 : index
    %307 = vector.load %arg9[%c0_190, %c3_191] : memref<3x9xbf16, #tpu.memory_space<vmem>>, vector<3x3xbf16>
    %cst_192 = arith.constant dense<0.000000e+00> : vector<3x128xf32>
    %308 = tpu.matmul %307, %180, %cst_192 {dimension_numbers = #tpu.dot_dimension_numbers<[1], [0], [0], [1], [0, 0, 1, 1], [], []>} : vector<3x3xbf16>, vector<3x128xbf16>, vector<3x128xf32> -> vector<3x128xf32>
    %309 = arith.addf %306, %308 : vector<3x128xf32>
    %c0_193 = arith.constant 0 : index
    %c6_194 = arith.constant 6 : index
    %310 = vector.load %arg9[%c0_193, %c6_194] : memref<3x9xbf16, #tpu.memory_space<vmem>>, vector<3x3xbf16>
    %cst_195 = arith.constant dense<0.000000e+00> : vector<3x128xf32>
    %311 = tpu.matmul %310, %262, %cst_195 {dimension_numbers = #tpu.dot_dimension_numbers<[1], [0], [0], [1], [0, 0, 1, 1], [], []>} : vector<3x3xbf16>, vector<3x128xbf16>, vector<3x128xf32> -> vector<3x128xf32>
    %312 = arith.addf %309, %311 : vector<3x128xf32>
    %313 = vector.broadcast %263 : vector<3x1xf32> to vector<3x128xf32>
    %314 = arith.addf %312, %313 : vector<3x128xf32>
    %cst_196 = arith.constant 5.000000e-01 : f32
    %315 = vector.broadcast %cst_196 : f32 to vector<3x128xf32>
    %316 = arith.mulf %315, %314 : vector<3x128xf32>
    %cst_197 = arith.constant 0.707106769 : f32
    %317 = vector.broadcast %cst_197 : f32 to vector<3x128xf32>
    %318 = arith.mulf %314, %317 : vector<3x128xf32>
    %319 = math.erf %318 : vector<3x128xf32>
    %cst_198 = arith.constant 1.000000e+00 : f32
    %320 = vector.broadcast %cst_198 : f32 to vector<3x128xf32>
    %321 = arith.addf %320, %319 : vector<3x128xf32>
    %322 = arith.mulf %316, %321 : vector<3x128xf32>
    %c0_199 = arith.constant 0 : index
    %c0_200 = arith.constant 0 : index
    %323 = vector.load %arg11[%c0_199, %c0_200] : memref<18x3xbf16, #tpu.memory_space<vmem>>, vector<18x3xbf16>
    %324 = arith.truncf %322 : vector<3x128xf32> to vector<3x128xbf16>
    %cst_201 = arith.constant dense<0.000000e+00> : vector<18x128xf32>
    %325 = tpu.matmul %323, %324, %cst_201 {dimension_numbers = #tpu.dot_dimension_numbers<[1], [0], [0], [1], [0, 0, 1, 1], [], []>} : vector<18x3xbf16>, vector<3x128xbf16>, vector<18x128xf32> -> vector<18x128xf32>
    %cst_202 = arith.constant 5.000000e-01 : f32
    %326 = vector.broadcast %cst_202 : f32 to vector<18x128xf32>
    %327 = arith.mulf %326, %325 : vector<18x128xf32>
    %cst_203 = arith.constant 0.707106769 : f32
    %328 = vector.broadcast %cst_203 : f32 to vector<18x128xf32>
    %329 = arith.mulf %325, %328 : vector<18x128xf32>
    %330 = math.erf %329 : vector<18x128xf32>
    %cst_204 = arith.constant 1.000000e+00 : f32
    %331 = vector.broadcast %cst_204 : f32 to vector<18x128xf32>
    %332 = arith.addf %331, %330 : vector<18x128xf32>
    %333 = arith.mulf %327, %332 : vector<18x128xf32>
    %c0_205 = arith.constant 0 : index
    %c0_206 = arith.constant 0 : index
    %334 = vector.load %arg12[%c0_205, %c0_206] : memref<3x18xbf16, #tpu.memory_space<vmem>>, vector<3x18xbf16>
    %335 = arith.truncf %333 : vector<18x128xf32> to vector<18x128xbf16>
    %cst_207 = arith.constant dense<0.000000e+00> : vector<3x128xf32>
    %336 = tpu.matmul %334, %335, %cst_207 {dimension_numbers = #tpu.dot_dimension_numbers<[1], [0], [0], [1], [0, 0, 1, 1], [], []>} : vector<3x18xbf16>, vector<18x128xbf16>, vector<3x128xf32> -> vector<3x128xf32>
    %cst_208 = arith.constant 5.000000e-01 : f32
    %337 = vector.broadcast %cst_208 : f32 to vector<3x128xf32>
    %338 = arith.mulf %337, %336 : vector<3x128xf32>
    %cst_209 = arith.constant 0.707106769 : f32
    %339 = vector.broadcast %cst_209 : f32 to vector<3x128xf32>
    %340 = arith.mulf %336, %339 : vector<3x128xf32>
    %341 = math.erf %340 : vector<3x128xf32>
    %cst_210 = arith.constant 1.000000e+00 : f32
    %342 = vector.broadcast %cst_210 : f32 to vector<3x128xf32>
    %343 = arith.addf %342, %341 : vector<3x128xf32>
    %344 = arith.mulf %338, %343 : vector<3x128xf32>
    %345 = arith.truncf %344 : vector<3x128xf32> to vector<3x128xbf16>
    %c0_211 = arith.constant 0 : index
    %c0_212 = arith.constant 0 : index
    %c0_213 = arith.constant 0 : index
    %346 = vector.load %arg2[%c0_211, %c0_212, %c0_213] : memref<4x3x128xbf16, #tpu.memory_space<vmem>>, vector<1x3x128xbf16>
    %347 = vector.shape_cast %346 : vector<1x3x128xbf16> to vector<3x128xbf16>
    %c1_214 = arith.constant 1 : index
    %c0_215 = arith.constant 0 : index
    %c0_216 = arith.constant 0 : index
    %348 = vector.load %arg2[%c1_214, %c0_215, %c0_216] : memref<4x3x128xbf16, #tpu.memory_space<vmem>>, vector<1x3x128xbf16>
    %349 = vector.shape_cast %348 : vector<1x3x128xbf16> to vector<3x128xbf16>
    %c2_217 = arith.constant 2 : index
    %c0_218 = arith.constant 0 : index
    %c0_219 = arith.constant 0 : index
    %350 = vector.load %arg2[%c2_217, %c0_218, %c0_219] : memref<4x3x128xbf16, #tpu.memory_space<vmem>>, vector<1x3x128xbf16>
    %351 = vector.shape_cast %350 : vector<1x3x128xbf16> to vector<3x128xbf16>
    %c3_220 = arith.constant 3 : index
    %c0_221 = arith.constant 0 : index
    %c0_222 = arith.constant 0 : index
    %352 = vector.load %arg2[%c3_220, %c0_221, %c0_222] : memref<4x3x128xbf16, #tpu.memory_space<vmem>>, vector<1x3x128xbf16>
    %353 = vector.shape_cast %352 : vector<1x3x128xbf16> to vector<3x128xbf16>
    %c0_223 = arith.constant 0 : index
    %c0_224 = arith.constant 0 : index
    %354 = vector.load %arg14[%c0_223, %c0_224] : memref<3x1xf32, #tpu.memory_space<vmem>>, vector<3x1xf32>
    %c0_225 = arith.constant 0 : index
    %c0_226 = arith.constant 0 : index
    %355 = vector.load %arg13[%c0_225, %c0_226] : memref<3x9xbf16, #tpu.memory_space<vmem>>, vector<3x3xbf16>
    %cst_227 = arith.constant dense<0.000000e+00> : vector<3x128xf32>
    %356 = tpu.matmul %355, %347, %cst_227 {dimension_numbers = #tpu.dot_dimension_numbers<[1], [0], [0], [1], [0, 0, 1, 1], [], []>} : vector<3x3xbf16>, vector<3x128xbf16>, vector<3x128xf32> -> vector<3x128xf32>
    %c0_228 = arith.constant 0 : index
    %c3_229 = arith.constant 3 : index
    %357 = vector.load %arg13[%c0_228, %c3_229] : memref<3x9xbf16, #tpu.memory_space<vmem>>, vector<3x3xbf16>
    %cst_230 = arith.constant dense<0.000000e+00> : vector<3x128xf32>
    %358 = tpu.matmul %357, %349, %cst_230 {dimension_numbers = #tpu.dot_dimension_numbers<[1], [0], [0], [1], [0, 0, 1, 1], [], []>} : vector<3x3xbf16>, vector<3x128xbf16>, vector<3x128xf32> -> vector<3x128xf32>
    %359 = arith.addf %356, %358 : vector<3x128xf32>
    %c0_231 = arith.constant 0 : index
    %c6_232 = arith.constant 6 : index
    %360 = vector.load %arg13[%c0_231, %c6_232] : memref<3x9xbf16, #tpu.memory_space<vmem>>, vector<3x3xbf16>
    %cst_233 = arith.constant dense<0.000000e+00> : vector<3x128xf32>
    %361 = tpu.matmul %360, %351, %cst_233 {dimension_numbers = #tpu.dot_dimension_numbers<[1], [0], [0], [1], [0, 0, 1, 1], [], []>} : vector<3x3xbf16>, vector<3x128xbf16>, vector<3x128xf32> -> vector<3x128xf32>
    %362 = arith.addf %359, %361 : vector<3x128xf32>
    %363 = vector.broadcast %354 : vector<3x1xf32> to vector<3x128xf32>
    %364 = arith.addf %362, %363 : vector<3x128xf32>
    %cst_234 = arith.constant 5.000000e-01 : f32
    %365 = vector.broadcast %cst_234 : f32 to vector<3x128xf32>
    %366 = arith.mulf %365, %364 : vector<3x128xf32>
    %cst_235 = arith.constant 0.707106769 : f32
    %367 = vector.broadcast %cst_235 : f32 to vector<3x128xf32>
    %368 = arith.mulf %364, %367 : vector<3x128xf32>
    %369 = math.erf %368 : vector<3x128xf32>
    %cst_236 = arith.constant 1.000000e+00 : f32
    %370 = vector.broadcast %cst_236 : f32 to vector<3x128xf32>
    %371 = arith.addf %370, %369 : vector<3x128xf32>
    %372 = arith.mulf %366, %371 : vector<3x128xf32>
    %c0_237 = arith.constant 0 : index
    %c0_238 = arith.constant 0 : index
    %373 = vector.load %arg15[%c0_237, %c0_238] : memref<18x3xbf16, #tpu.memory_space<vmem>>, vector<18x3xbf16>
    %374 = arith.truncf %372 : vector<3x128xf32> to vector<3x128xbf16>
    %cst_239 = arith.constant dense<0.000000e+00> : vector<18x128xf32>
    %375 = tpu.matmul %373, %374, %cst_239 {dimension_numbers = #tpu.dot_dimension_numbers<[1], [0], [0], [1], [0, 0, 1, 1], [], []>} : vector<18x3xbf16>, vector<3x128xbf16>, vector<18x128xf32> -> vector<18x128xf32>
    %cst_240 = arith.constant 5.000000e-01 : f32
    %376 = vector.broadcast %cst_240 : f32 to vector<18x128xf32>
    %377 = arith.mulf %376, %375 : vector<18x128xf32>
    %cst_241 = arith.constant 0.707106769 : f32
    %378 = vector.broadcast %cst_241 : f32 to vector<18x128xf32>
    %379 = arith.mulf %375, %378 : vector<18x128xf32>
    %380 = math.erf %379 : vector<18x128xf32>
    %cst_242 = arith.constant 1.000000e+00 : f32
    %381 = vector.broadcast %cst_242 : f32 to vector<18x128xf32>
    %382 = arith.addf %381, %380 : vector<18x128xf32>
    %383 = arith.mulf %377, %382 : vector<18x128xf32>
    %c0_243 = arith.constant 0 : index
    %c0_244 = arith.constant 0 : index
    %384 = vector.load %arg16[%c0_243, %c0_244] : memref<3x18xbf16, #tpu.memory_space<vmem>>, vector<3x18xbf16>
    %385 = arith.truncf %383 : vector<18x128xf32> to vector<18x128xbf16>
    %cst_245 = arith.constant dense<0.000000e+00> : vector<3x128xf32>
    %386 = tpu.matmul %384, %385, %cst_245 {dimension_numbers = #tpu.dot_dimension_numbers<[1], [0], [0], [1], [0, 0, 1, 1], [], []>} : vector<3x18xbf16>, vector<18x128xbf16>, vector<3x128xf32> -> vector<3x128xf32>
    %cst_246 = arith.constant 5.000000e-01 : f32
    %387 = vector.broadcast %cst_246 : f32 to vector<3x128xf32>
    %388 = arith.mulf %387, %386 : vector<3x128xf32>
    %cst_247 = arith.constant 0.707106769 : f32
    %389 = vector.broadcast %cst_247 : f32 to vector<3x128xf32>
    %390 = arith.mulf %386, %389 : vector<3x128xf32>
    %391 = math.erf %390 : vector<3x128xf32>
    %cst_248 = arith.constant 1.000000e+00 : f32
    %392 = vector.broadcast %cst_248 : f32 to vector<3x128xf32>
    %393 = arith.addf %392, %391 : vector<3x128xf32>
    %394 = arith.mulf %388, %393 : vector<3x128xf32>
    %395 = arith.truncf %394 : vector<3x128xf32> to vector<3x128xbf16>
    %c0_249 = arith.constant 0 : index
    %c0_250 = arith.constant 0 : index
    %396 = vector.load %arg13[%c0_249, %c0_250] : memref<3x9xbf16, #tpu.memory_space<vmem>>, vector<3x3xbf16>
    %cst_251 = arith.constant dense<0.000000e+00> : vector<3x128xf32>
    %397 = tpu.matmul %396, %349, %cst_251 {dimension_numbers = #tpu.dot_dimension_numbers<[1], [0], [0], [1], [0, 0, 1, 1], [], []>} : vector<3x3xbf16>, vector<3x128xbf16>, vector<3x128xf32> -> vector<3x128xf32>
    %c0_252 = arith.constant 0 : index
    %c3_253 = arith.constant 3 : index
    %398 = vector.load %arg13[%c0_252, %c3_253] : memref<3x9xbf16, #tpu.memory_space<vmem>>, vector<3x3xbf16>
    %cst_254 = arith.constant dense<0.000000e+00> : vector<3x128xf32>
    %399 = tpu.matmul %398, %351, %cst_254 {dimension_numbers = #tpu.dot_dimension_numbers<[1], [0], [0], [1], [0, 0, 1, 1], [], []>} : vector<3x3xbf16>, vector<3x128xbf16>, vector<3x128xf32> -> vector<3x128xf32>
    %400 = arith.addf %397, %399 : vector<3x128xf32>
    %c0_255 = arith.constant 0 : index
    %c6_256 = arith.constant 6 : index
    %401 = vector.load %arg13[%c0_255, %c6_256] : memref<3x9xbf16, #tpu.memory_space<vmem>>, vector<3x3xbf16>
    %cst_257 = arith.constant dense<0.000000e+00> : vector<3x128xf32>
    %402 = tpu.matmul %401, %353, %cst_257 {dimension_numbers = #tpu.dot_dimension_numbers<[1], [0], [0], [1], [0, 0, 1, 1], [], []>} : vector<3x3xbf16>, vector<3x128xbf16>, vector<3x128xf32> -> vector<3x128xf32>
    %403 = arith.addf %400, %402 : vector<3x128xf32>
    %404 = vector.broadcast %354 : vector<3x1xf32> to vector<3x128xf32>
    %405 = arith.addf %403, %404 : vector<3x128xf32>
    %cst_258 = arith.constant 5.000000e-01 : f32
    %406 = vector.broadcast %cst_258 : f32 to vector<3x128xf32>
    %407 = arith.mulf %406, %405 : vector<3x128xf32>
    %cst_259 = arith.constant 0.707106769 : f32
    %408 = vector.broadcast %cst_259 : f32 to vector<3x128xf32>
    %409 = arith.mulf %405, %408 : vector<3x128xf32>
    %410 = math.erf %409 : vector<3x128xf32>
    %cst_260 = arith.constant 1.000000e+00 : f32
    %411 = vector.broadcast %cst_260 : f32 to vector<3x128xf32>
    %412 = arith.addf %411, %410 : vector<3x128xf32>
    %413 = arith.mulf %407, %412 : vector<3x128xf32>
    %c0_261 = arith.constant 0 : index
    %c0_262 = arith.constant 0 : index
    %414 = vector.load %arg15[%c0_261, %c0_262] : memref<18x3xbf16, #tpu.memory_space<vmem>>, vector<18x3xbf16>
    %415 = arith.truncf %413 : vector<3x128xf32> to vector<3x128xbf16>
    %cst_263 = arith.constant dense<0.000000e+00> : vector<18x128xf32>
    %416 = tpu.matmul %414, %415, %cst_263 {dimension_numbers = #tpu.dot_dimension_numbers<[1], [0], [0], [1], [0, 0, 1, 1], [], []>} : vector<18x3xbf16>, vector<3x128xbf16>, vector<18x128xf32> -> vector<18x128xf32>
    %cst_264 = arith.constant 5.000000e-01 : f32
    %417 = vector.broadcast %cst_264 : f32 to vector<18x128xf32>
    %418 = arith.mulf %417, %416 : vector<18x128xf32>
    %cst_265 = arith.constant 0.707106769 : f32
    %419 = vector.broadcast %cst_265 : f32 to vector<18x128xf32>
    %420 = arith.mulf %416, %419 : vector<18x128xf32>
    %421 = math.erf %420 : vector<18x128xf32>
    %cst_266 = arith.constant 1.000000e+00 : f32
    %422 = vector.broadcast %cst_266 : f32 to vector<18x128xf32>
    %423 = arith.addf %422, %421 : vector<18x128xf32>
    %424 = arith.mulf %418, %423 : vector<18x128xf32>
    %c0_267 = arith.constant 0 : index
    %c0_268 = arith.constant 0 : index
    %425 = vector.load %arg16[%c0_267, %c0_268] : memref<3x18xbf16, #tpu.memory_space<vmem>>, vector<3x18xbf16>
    %426 = arith.truncf %424 : vector<18x128xf32> to vector<18x128xbf16>
    %cst_269 = arith.constant dense<0.000000e+00> : vector<3x128xf32>
    %427 = tpu.matmul %425, %426, %cst_269 {dimension_numbers = #tpu.dot_dimension_numbers<[1], [0], [0], [1], [0, 0, 1, 1], [], []>} : vector<3x18xbf16>, vector<18x128xbf16>, vector<3x128xf32> -> vector<3x128xf32>
    %cst_270 = arith.constant 5.000000e-01 : f32
    %428 = vector.broadcast %cst_270 : f32 to vector<3x128xf32>
    %429 = arith.mulf %428, %427 : vector<3x128xf32>
    %cst_271 = arith.constant 0.707106769 : f32
    %430 = vector.broadcast %cst_271 : f32 to vector<3x128xf32>
    %431 = arith.mulf %427, %430 : vector<3x128xf32>
    %432 = math.erf %431 : vector<3x128xf32>
    %cst_272 = arith.constant 1.000000e+00 : f32
    %433 = vector.broadcast %cst_272 : f32 to vector<3x128xf32>
    %434 = arith.addf %433, %432 : vector<3x128xf32>
    %435 = arith.mulf %429, %434 : vector<3x128xf32>
    %436 = arith.truncf %435 : vector<3x128xf32> to vector<3x128xbf16>
    %c0_273 = arith.constant 0 : index
    %c0_274 = arith.constant 0 : index
    %c0_275 = arith.constant 0 : index
    %437 = vector.load %arg3[%c0_273, %c0_274, %c0_275] : memref<3x3x128xbf16, #tpu.memory_space<vmem>>, vector<1x3x128xbf16>
    %438 = vector.shape_cast %437 : vector<1x3x128xbf16> to vector<3x128xbf16>
    %c1_276 = arith.constant 1 : index
    %c0_277 = arith.constant 0 : index
    %c0_278 = arith.constant 0 : index
    %439 = vector.load %arg3[%c1_276, %c0_277, %c0_278] : memref<3x3x128xbf16, #tpu.memory_space<vmem>>, vector<1x3x128xbf16>
    %440 = vector.shape_cast %439 : vector<1x3x128xbf16> to vector<3x128xbf16>
    %c2_279 = arith.constant 2 : index
    %c0_280 = arith.constant 0 : index
    %c0_281 = arith.constant 0 : index
    %441 = vector.load %arg3[%c2_279, %c0_280, %c0_281] : memref<3x3x128xbf16, #tpu.memory_space<vmem>>, vector<1x3x128xbf16>
    %442 = vector.shape_cast %441 : vector<1x3x128xbf16> to vector<3x128xbf16>
    %c0_282 = arith.constant 0 : index
    %c0_283 = arith.constant 0 : index
    %443 = vector.load %arg18[%c0_282, %c0_283] : memref<3x1xf32, #tpu.memory_space<vmem>>, vector<3x1xf32>
    %c0_284 = arith.constant 0 : index
    %c0_285 = arith.constant 0 : index
    %444 = vector.load %arg17[%c0_284, %c0_285] : memref<3x6xbf16, #tpu.memory_space<vmem>>, vector<3x3xbf16>
    %cst_286 = arith.constant dense<0.000000e+00> : vector<3x128xf32>
    %445 = tpu.matmul %444, %438, %cst_286 {dimension_numbers = #tpu.dot_dimension_numbers<[1], [0], [0], [1], [0, 0, 1, 1], [], []>} : vector<3x3xbf16>, vector<3x128xbf16>, vector<3x128xf32> -> vector<3x128xf32>
    %c0_287 = arith.constant 0 : index
    %c3_288 = arith.constant 3 : index
    %446 = vector.load %arg17[%c0_287, %c3_288] : memref<3x6xbf16, #tpu.memory_space<vmem>>, vector<3x3xbf16>
    %cst_289 = arith.constant dense<0.000000e+00> : vector<3x128xf32>
    %447 = tpu.matmul %446, %440, %cst_289 {dimension_numbers = #tpu.dot_dimension_numbers<[1], [0], [0], [1], [0, 0, 1, 1], [], []>} : vector<3x3xbf16>, vector<3x128xbf16>, vector<3x128xf32> -> vector<3x128xf32>
    %448 = arith.addf %445, %447 : vector<3x128xf32>
    %449 = vector.broadcast %443 : vector<3x1xf32> to vector<3x128xf32>
    %450 = arith.addf %448, %449 : vector<3x128xf32>
    %cst_290 = arith.constant 5.000000e-01 : f32
    %451 = vector.broadcast %cst_290 : f32 to vector<3x128xf32>
    %452 = arith.mulf %451, %450 : vector<3x128xf32>
    %cst_291 = arith.constant 0.707106769 : f32
    %453 = vector.broadcast %cst_291 : f32 to vector<3x128xf32>
    %454 = arith.mulf %450, %453 : vector<3x128xf32>
    %455 = math.erf %454 : vector<3x128xf32>
    %cst_292 = arith.constant 1.000000e+00 : f32
    %456 = vector.broadcast %cst_292 : f32 to vector<3x128xf32>
    %457 = arith.addf %456, %455 : vector<3x128xf32>
    %458 = arith.mulf %452, %457 : vector<3x128xf32>
    %c0_293 = arith.constant 0 : index
    %c0_294 = arith.constant 0 : index
    %459 = vector.load %arg19[%c0_293, %c0_294] : memref<18x3xbf16, #tpu.memory_space<vmem>>, vector<18x3xbf16>
    %460 = arith.truncf %458 : vector<3x128xf32> to vector<3x128xbf16>
    %cst_295 = arith.constant dense<0.000000e+00> : vector<18x128xf32>
    %461 = tpu.matmul %459, %460, %cst_295 {dimension_numbers = #tpu.dot_dimension_numbers<[1], [0], [0], [1], [0, 0, 1, 1], [], []>} : vector<18x3xbf16>, vector<3x128xbf16>, vector<18x128xf32> -> vector<18x128xf32>
    %cst_296 = arith.constant 5.000000e-01 : f32
    %462 = vector.broadcast %cst_296 : f32 to vector<18x128xf32>
    %463 = arith.mulf %462, %461 : vector<18x128xf32>
    %cst_297 = arith.constant 0.707106769 : f32
    %464 = vector.broadcast %cst_297 : f32 to vector<18x128xf32>
    %465 = arith.mulf %461, %464 : vector<18x128xf32>
    %466 = math.erf %465 : vector<18x128xf32>
    %cst_298 = arith.constant 1.000000e+00 : f32
    %467 = vector.broadcast %cst_298 : f32 to vector<18x128xf32>
    %468 = arith.addf %467, %466 : vector<18x128xf32>
    %469 = arith.mulf %463, %468 : vector<18x128xf32>
    %c0_299 = arith.constant 0 : index
    %c0_300 = arith.constant 0 : index
    %470 = vector.load %arg20[%c0_299, %c0_300] : memref<3x18xbf16, #tpu.memory_space<vmem>>, vector<3x18xbf16>
    %471 = arith.truncf %469 : vector<18x128xf32> to vector<18x128xbf16>
    %cst_301 = arith.constant dense<0.000000e+00> : vector<3x128xf32>
    %472 = tpu.matmul %470, %471, %cst_301 {dimension_numbers = #tpu.dot_dimension_numbers<[1], [0], [0], [1], [0, 0, 1, 1], [], []>} : vector<3x18xbf16>, vector<18x128xbf16>, vector<3x128xf32> -> vector<3x128xf32>
    %cst_302 = arith.constant 5.000000e-01 : f32
    %473 = vector.broadcast %cst_302 : f32 to vector<3x128xf32>
    %474 = arith.mulf %473, %472 : vector<3x128xf32>
    %cst_303 = arith.constant 0.707106769 : f32
    %475 = vector.broadcast %cst_303 : f32 to vector<3x128xf32>
    %476 = arith.mulf %472, %475 : vector<3x128xf32>
    %477 = math.erf %476 : vector<3x128xf32>
    %cst_304 = arith.constant 1.000000e+00 : f32
    %478 = vector.broadcast %cst_304 : f32 to vector<3x128xf32>
    %479 = arith.addf %478, %477 : vector<3x128xf32>
    %480 = arith.mulf %474, %479 : vector<3x128xf32>
    %481 = arith.truncf %480 : vector<3x128xf32> to vector<3x128xbf16>
    %c0_305 = arith.constant 0 : index
    %c0_306 = arith.constant 0 : index
    %482 = vector.load %arg17[%c0_305, %c0_306] : memref<3x6xbf16, #tpu.memory_space<vmem>>, vector<3x3xbf16>
    %cst_307 = arith.constant dense<0.000000e+00> : vector<3x128xf32>
    %483 = tpu.matmul %482, %440, %cst_307 {dimension_numbers = #tpu.dot_dimension_numbers<[1], [0], [0], [1], [0, 0, 1, 1], [], []>} : vector<3x3xbf16>, vector<3x128xbf16>, vector<3x128xf32> -> vector<3x128xf32>
    %c0_308 = arith.constant 0 : index
    %c3_309 = arith.constant 3 : index
    %484 = vector.load %arg17[%c0_308, %c3_309] : memref<3x6xbf16, #tpu.memory_space<vmem>>, vector<3x3xbf16>
    %cst_310 = arith.constant dense<0.000000e+00> : vector<3x128xf32>
    %485 = tpu.matmul %484, %442, %cst_310 {dimension_numbers = #tpu.dot_dimension_numbers<[1], [0], [0], [1], [0, 0, 1, 1], [], []>} : vector<3x3xbf16>, vector<3x128xbf16>, vector<3x128xf32> -> vector<3x128xf32>
    %486 = arith.addf %483, %485 : vector<3x128xf32>
    %487 = vector.broadcast %443 : vector<3x1xf32> to vector<3x128xf32>
    %488 = arith.addf %486, %487 : vector<3x128xf32>
    %cst_311 = arith.constant 5.000000e-01 : f32
    %489 = vector.broadcast %cst_311 : f32 to vector<3x128xf32>
    %490 = arith.mulf %489, %488 : vector<3x128xf32>
    %cst_312 = arith.constant 0.707106769 : f32
    %491 = vector.broadcast %cst_312 : f32 to vector<3x128xf32>
    %492 = arith.mulf %488, %491 : vector<3x128xf32>
    %493 = math.erf %492 : vector<3x128xf32>
    %cst_313 = arith.constant 1.000000e+00 : f32
    %494 = vector.broadcast %cst_313 : f32 to vector<3x128xf32>
    %495 = arith.addf %494, %493 : vector<3x128xf32>
    %496 = arith.mulf %490, %495 : vector<3x128xf32>
    %c0_314 = arith.constant 0 : index
    %c0_315 = arith.constant 0 : index
    %497 = vector.load %arg19[%c0_314, %c0_315] : memref<18x3xbf16, #tpu.memory_space<vmem>>, vector<18x3xbf16>
    %498 = arith.truncf %496 : vector<3x128xf32> to vector<3x128xbf16>
    %cst_316 = arith.constant dense<0.000000e+00> : vector<18x128xf32>
    %499 = tpu.matmul %497, %498, %cst_316 {dimension_numbers = #tpu.dot_dimension_numbers<[1], [0], [0], [1], [0, 0, 1, 1], [], []>} : vector<18x3xbf16>, vector<3x128xbf16>, vector<18x128xf32> -> vector<18x128xf32>
    %cst_317 = arith.constant 5.000000e-01 : f32
    %500 = vector.broadcast %cst_317 : f32 to vector<18x128xf32>
    %501 = arith.mulf %500, %499 : vector<18x128xf32>
    %cst_318 = arith.constant 0.707106769 : f32
    %502 = vector.broadcast %cst_318 : f32 to vector<18x128xf32>
    %503 = arith.mulf %499, %502 : vector<18x128xf32>
    %504 = math.erf %503 : vector<18x128xf32>
    %cst_319 = arith.constant 1.000000e+00 : f32
    %505 = vector.broadcast %cst_319 : f32 to vector<18x128xf32>
    %506 = arith.addf %505, %504 : vector<18x128xf32>
    %507 = arith.mulf %501, %506 : vector<18x128xf32>
    %c0_320 = arith.constant 0 : index
    %c0_321 = arith.constant 0 : index
    %508 = vector.load %arg20[%c0_320, %c0_321] : memref<3x18xbf16, #tpu.memory_space<vmem>>, vector<3x18xbf16>
    %509 = arith.truncf %507 : vector<18x128xf32> to vector<18x128xbf16>
    %cst_322 = arith.constant dense<0.000000e+00> : vector<3x128xf32>
    %510 = tpu.matmul %508, %509, %cst_322 {dimension_numbers = #tpu.dot_dimension_numbers<[1], [0], [0], [1], [0, 0, 1, 1], [], []>} : vector<3x18xbf16>, vector<18x128xbf16>, vector<3x128xf32> -> vector<3x128xf32>
    %cst_323 = arith.constant 5.000000e-01 : f32
    %511 = vector.broadcast %cst_323 : f32 to vector<3x128xf32>
    %512 = arith.mulf %511, %510 : vector<3x128xf32>
    %cst_324 = arith.constant 0.707106769 : f32
    %513 = vector.broadcast %cst_324 : f32 to vector<3x128xf32>
    %514 = arith.mulf %510, %513 : vector<3x128xf32>
    %515 = math.erf %514 : vector<3x128xf32>
    %cst_325 = arith.constant 1.000000e+00 : f32
    %516 = vector.broadcast %cst_325 : f32 to vector<3x128xf32>
    %517 = arith.addf %516, %515 : vector<3x128xf32>
    %518 = arith.mulf %512, %517 : vector<3x128xf32>
    %519 = arith.truncf %518 : vector<3x128xf32> to vector<3x128xbf16>
    %c0_326 = arith.constant 0 : index
    %c0_327 = arith.constant 0 : index
    %520 = vector.load %arg23[%c0_326, %c0_327] : memref<9x18xbf16, #tpu.memory_space<vmem>>, vector<9x3xbf16>
    %cst_328 = arith.constant dense<0.000000e+00> : vector<9x128xf32>
    %521 = tpu.matmul %520, %304, %cst_328 {dimension_numbers = #tpu.dot_dimension_numbers<[1], [0], [0], [1], [0, 0, 1, 1], [], []>} : vector<9x3xbf16>, vector<3x128xbf16>, vector<9x128xf32> -> vector<9x128xf32>
    %c0_329 = arith.constant 0 : index
    %c3_330 = arith.constant 3 : index
    %522 = vector.load %arg23[%c0_329, %c3_330] : memref<9x18xbf16, #tpu.memory_space<vmem>>, vector<9x3xbf16>
    %cst_331 = arith.constant dense<0.000000e+00> : vector<9x128xf32>
    %523 = tpu.matmul %522, %395, %cst_331 {dimension_numbers = #tpu.dot_dimension_numbers<[1], [0], [0], [1], [0, 0, 1, 1], [], []>} : vector<9x3xbf16>, vector<3x128xbf16>, vector<9x128xf32> -> vector<9x128xf32>
    %524 = arith.addf %521, %523 : vector<9x128xf32>
    %c0_332 = arith.constant 0 : index
    %c6_333 = arith.constant 6 : index
    %525 = vector.load %arg23[%c0_332, %c6_333] : memref<9x18xbf16, #tpu.memory_space<vmem>>, vector<9x3xbf16>
    %cst_334 = arith.constant dense<0.000000e+00> : vector<9x128xf32>
    %526 = tpu.matmul %525, %481, %cst_334 {dimension_numbers = #tpu.dot_dimension_numbers<[1], [0], [0], [1], [0, 0, 1, 1], [], []>} : vector<9x3xbf16>, vector<3x128xbf16>, vector<9x128xf32> -> vector<9x128xf32>
    %527 = arith.addf %524, %526 : vector<9x128xf32>
    %c0_335 = arith.constant 0 : index
    %c9 = arith.constant 9 : index
    %528 = vector.load %arg23[%c0_335, %c9] : memref<9x18xbf16, #tpu.memory_space<vmem>>, vector<9x3xbf16>
    %cst_336 = arith.constant dense<0.000000e+00> : vector<9x128xf32>
    %529 = tpu.matmul %528, %345, %cst_336 {dimension_numbers = #tpu.dot_dimension_numbers<[1], [0], [0], [1], [0, 0, 1, 1], [], []>} : vector<9x3xbf16>, vector<3x128xbf16>, vector<9x128xf32> -> vector<9x128xf32>
    %530 = arith.addf %527, %529 : vector<9x128xf32>
    %c0_337 = arith.constant 0 : index
    %c12 = arith.constant 12 : index
    %531 = vector.load %arg23[%c0_337, %c12] : memref<9x18xbf16, #tpu.memory_space<vmem>>, vector<9x3xbf16>
    %cst_338 = arith.constant dense<0.000000e+00> : vector<9x128xf32>
    %532 = tpu.matmul %531, %436, %cst_338 {dimension_numbers = #tpu.dot_dimension_numbers<[1], [0], [0], [1], [0, 0, 1, 1], [], []>} : vector<9x3xbf16>, vector<3x128xbf16>, vector<9x128xf32> -> vector<9x128xf32>
    %533 = arith.addf %530, %532 : vector<9x128xf32>
    %c0_339 = arith.constant 0 : index
    %c15 = arith.constant 15 : index
    %534 = vector.load %arg23[%c0_339, %c15] : memref<9x18xbf16, #tpu.memory_space<vmem>>, vector<9x3xbf16>
    %cst_340 = arith.constant dense<0.000000e+00> : vector<9x128xf32>
    %535 = tpu.matmul %534, %519, %cst_340 {dimension_numbers = #tpu.dot_dimension_numbers<[1], [0], [0], [1], [0, 0, 1, 1], [], []>} : vector<9x3xbf16>, vector<3x128xbf16>, vector<9x128xf32> -> vector<9x128xf32>
    %536 = arith.addf %533, %535 : vector<9x128xf32>
    %c0_341 = arith.constant 0 : index
    %c0_342 = arith.constant 0 : index
    %537 = vector.load %arg24[%c0_341, %c0_342] : memref<9x1xf32, #tpu.memory_space<vmem>>, vector<9x1xf32>
    %538 = vector.broadcast %537 : vector<9x1xf32> to vector<9x128xf32>
    %539 = arith.addf %536, %538 : vector<9x128xf32>
    %cst_343 = arith.constant 5.000000e-01 : f32
    %540 = vector.broadcast %cst_343 : f32 to vector<9x128xf32>
    %541 = arith.mulf %540, %539 : vector<9x128xf32>
    %cst_344 = arith.constant 0.707106769 : f32
    %542 = vector.broadcast %cst_344 : f32 to vector<9x128xf32>
    %543 = arith.mulf %539, %542 : vector<9x128xf32>
    %544 = math.erf %543 : vector<9x128xf32>
    %cst_345 = arith.constant 1.000000e+00 : f32
    %545 = vector.broadcast %cst_345 : f32 to vector<9x128xf32>
    %546 = arith.addf %545, %544 : vector<9x128xf32>
    %547 = arith.mulf %541, %546 : vector<9x128xf32>
    %c0_346 = arith.constant 0 : index
    %c0_347 = arith.constant 0 : index
    %548 = vector.load %arg21[%c0_346, %c0_347] : memref<3x3xbf16, #tpu.memory_space<vmem>>, vector<3x3xbf16>
    %c0_348 = arith.constant 0 : index
    %c0_349 = arith.constant 0 : index
    %549 = vector.load %arg4[%c0_348, %c0_349] : memref<3x128xbf16, #tpu.memory_space<vmem>>, vector<3x128xbf16>
    %cst_350 = arith.constant dense<0.000000e+00> : vector<3x128xf32>
    %550 = tpu.matmul %548, %549, %cst_350 {dimension_numbers = #tpu.dot_dimension_numbers<[1], [0], [0], [1], [0, 0, 1, 1], [], []>} : vector<3x3xbf16>, vector<3x128xbf16>, vector<3x128xf32> -> vector<3x128xf32>
    %c0_351 = arith.constant 0 : index
    %c0_352 = arith.constant 0 : index
    %551 = vector.load %arg22[%c0_351, %c0_352] : memref<3x1xf32, #tpu.memory_space<vmem>>, vector<3x1xf32>
    %552 = vector.broadcast %551 : vector<3x1xf32> to vector<3x128xf32>
    %553 = arith.addf %550, %552 : vector<3x128xf32>
    %cst_353 = arith.constant 0.000000e+00 : f32
    %554 = vector.broadcast %cst_353 : f32 to vector<3x128xf32>
    %555 = arith.maximumf %553, %554 : vector<3x128xf32>
    %c0_354 = arith.constant 0 : index
    %c0_355 = arith.constant 0 : index
    %556 = vector.load %arg25[%c0_354, %c0_355] : memref<72x12xbf16, #tpu.memory_space<vmem>>, vector<72x9xbf16>
    %557 = arith.truncf %547 : vector<9x128xf32> to vector<9x128xbf16>
    %cst_356 = arith.constant dense<0.000000e+00> : vector<72x128xf32>
    %558 = tpu.matmul %556, %557, %cst_356 {dimension_numbers = #tpu.dot_dimension_numbers<[1], [0], [0], [1], [0, 0, 1, 1], [], []>} : vector<72x9xbf16>, vector<9x128xbf16>, vector<72x128xf32> -> vector<72x128xf32>
    %c0_357 = arith.constant 0 : index
    %c9_358 = arith.constant 9 : index
    %559 = vector.load %arg25[%c0_357, %c9_358] : memref<72x12xbf16, #tpu.memory_space<vmem>>, vector<72x3xbf16>
    %560 = arith.truncf %555 : vector<3x128xf32> to vector<3x128xbf16>
    %cst_359 = arith.constant dense<0.000000e+00> : vector<72x128xf32>
    %561 = tpu.matmul %559, %560, %cst_359 {dimension_numbers = #tpu.dot_dimension_numbers<[1], [0], [0], [1], [0, 0, 1, 1], [], []>} : vector<72x3xbf16>, vector<3x128xbf16>, vector<72x128xf32> -> vector<72x128xf32>
    %562 = arith.addf %558, %561 : vector<72x128xf32>
    %c0_360 = arith.constant 0 : index
    %c0_361 = arith.constant 0 : index
    %563 = vector.load %arg26[%c0_360, %c0_361] : memref<72x1xf32, #tpu.memory_space<vmem>>, vector<72x1xf32>
    %564 = vector.broadcast %563 : vector<72x1xf32> to vector<72x128xf32>
    %565 = arith.addf %562, %564 : vector<72x128xf32>
    %cst_362 = arith.constant 5.000000e-01 : f32
    %566 = vector.broadcast %cst_362 : f32 to vector<72x128xf32>
    %567 = arith.mulf %566, %565 : vector<72x128xf32>
    %cst_363 = arith.constant 0.707106769 : f32
    %568 = vector.broadcast %cst_363 : f32 to vector<72x128xf32>
    %569 = arith.mulf %565, %568 : vector<72x128xf32>
    %570 = math.erf %569 : vector<72x128xf32>
    %cst_364 = arith.constant 1.000000e+00 : f32
    %571 = vector.broadcast %cst_364 : f32 to vector<72x128xf32>
    %572 = arith.addf %571, %570 : vector<72x128xf32>
    %573 = arith.mulf %567, %572 : vector<72x128xf32>
    %c0_365 = arith.constant 0 : index
    %c0_366 = arith.constant 0 : index
    %574 = vector.load %arg27[%c0_365, %c0_366] : memref<36x72xbf16, #tpu.memory_space<vmem>>, vector<36x72xbf16>
    %575 = arith.truncf %573 : vector<72x128xf32> to vector<72x128xbf16>
    %cst_367 = arith.constant dense<0.000000e+00> : vector<36x128xf32>
    %576 = tpu.matmul %574, %575, %cst_367 {dimension_numbers = #tpu.dot_dimension_numbers<[1], [0], [0], [1], [0, 0, 1, 1], [], []>} : vector<36x72xbf16>, vector<72x128xbf16>, vector<36x128xf32> -> vector<36x128xf32>
    %c0_368 = arith.constant 0 : index
    %c0_369 = arith.constant 0 : index
    %577 = vector.load %arg28[%c0_368, %c0_369] : memref<36x1xf32, #tpu.memory_space<vmem>>, vector<36x1xf32>
    %578 = vector.broadcast %577 : vector<36x1xf32> to vector<36x128xf32>
    %579 = arith.addf %576, %578 : vector<36x128xf32>
    %cst_370 = arith.constant 5.000000e-01 : f32
    %580 = vector.broadcast %cst_370 : f32 to vector<36x128xf32>
    %581 = arith.mulf %580, %579 : vector<36x128xf32>
    %cst_371 = arith.constant 0.707106769 : f32
    %582 = vector.broadcast %cst_371 : f32 to vector<36x128xf32>
    %583 = arith.mulf %579, %582 : vector<36x128xf32>
    %584 = math.erf %583 : vector<36x128xf32>
    %cst_372 = arith.constant 1.000000e+00 : f32
    %585 = vector.broadcast %cst_372 : f32 to vector<36x128xf32>
    %586 = arith.addf %585, %584 : vector<36x128xf32>
    %587 = arith.mulf %581, %586 : vector<36x128xf32>
    %c0_373 = arith.constant 0 : index
    %c0_374 = arith.constant 0 : index
    %588 = vector.load %arg29[%c0_373, %c0_374] : memref<6x36xbf16, #tpu.memory_space<vmem>>, vector<6x36xbf16>
    %589 = arith.truncf %587 : vector<36x128xf32> to vector<36x128xbf16>
    %cst_375 = arith.constant dense<0.000000e+00> : vector<6x128xf32>
    %590 = tpu.matmul %588, %589, %cst_375 {dimension_numbers = #tpu.dot_dimension_numbers<[1], [0], [0], [1], [0, 0, 1, 1], [], []>} : vector<6x36xbf16>, vector<36x128xbf16>, vector<6x128xf32> -> vector<6x128xf32>
    %c0_376 = arith.constant 0 : index
    %c0_377 = arith.constant 0 : index
    %591 = vector.load %arg30[%c0_376, %c0_377] : memref<6x1xf32, #tpu.memory_space<vmem>>, vector<6x1xf32>
    %592 = vector.broadcast %591 : vector<6x1xf32> to vector<6x128xf32>
    %593 = arith.addf %590, %592 : vector<6x128xf32>
    %c0_378 = arith.constant 0 : index
    %c0_379 = arith.constant 0 : index
    %594 = vector.load %arg31[%c0_378, %c0_379] : memref<6x128xf32, #tpu.memory_space<vmem>>, vector<6x128xf32>
    tpu.vector_store %arg31[%c0_378, %c0_379], %593 {strides = array<i32>} : memref<6x128xf32, #tpu.memory_space<vmem>>, vector<6x128xf32>,
    return
  }
  func.func @transform_0(%arg0: i32) -> (i32, i32, i32) {
    %c0_i32 = arith.constant 0 : i32
    %c0_i32_0 = arith.constant 0 : i32
    %c0_i32_1 = arith.constant 0 : i32
    return %c0_i32, %c0_i32_0, %arg0 : i32, i32, i32
  }
  func.func @transform_1(%arg0: i32) -> (i32, i32, i32) {
    %c0_i32 = arith.constant 0 : i32
    %c0_i32_0 = arith.constant 0 : i32
    %c0_i32_1 = arith.constant 0 : i32
    return %c0_i32, %c0_i32_0, %arg0 : i32, i32, i32
  }
  func.func @transform_2(%arg0: i32) -> (i32, i32, i32) {
    %c0_i32 = arith.constant 0 : i32
    %c0_i32_0 = arith.constant 0 : i32
    %c0_i32_1 = arith.constant 0 : i32
    return %c0_i32, %c0_i32_0, %arg0 : i32, i32, i32
  }
  func.func @transform_3(%arg0: i32) -> (i32, i32) {
    %c0_i32 = arith.constant 0 : i32
    %c0_i32_0 = arith.constant 0 : i32
    return %c0_i32, %arg0 : i32, i32
  }
  func.func @transform_4(%arg0: i32) -> (i32, i32) {
    %c0_i32 = arith.constant 0 : i32
    %c0_i32_0 = arith.constant 0 : i32
    %c0_i32_1 = arith.constant 0 : i32
    return %c0_i32, %c0_i32_0 : i32, i32
  }
  func.func @transform_5(%arg0: i32) -> (i32, i32) {
    %c0_i32 = arith.constant 0 : i32
    %c0_i32_0 = arith.constant 0 : i32
    %c0_i32_1 = arith.constant 0 : i32
    return %c0_i32, %c0_i32_0 : i32, i32
  }
  func.func @transform_6(%arg0: i32) -> (i32, i32) {
    %c0_i32 = arith.constant 0 : i32
    %c0_i32_0 = arith.constant 0 : i32
    %c0_i32_1 = arith.constant 0 : i32
    return %c0_i32, %c0_i32_0 : i32, i32
  }
  func.func @transform_7(%arg0: i32) -> (i32, i32) {
    %c0_i32 = arith.constant 0 : i32
    %c0_i32_0 = arith.constant 0 : i32
    %c0_i32_1 = arith.constant 0 : i32
    return %c0_i32, %c0_i32_0 : i32, i32
  }
  func.func @transform_8(%arg0: i32) -> (i32, i32) {
    %c0_i32 = arith.constant 0 : i32
    %c0_i32_0 = arith.constant 0 : i32
    %c0_i32_1 = arith.constant 0 : i32
    return %c0_i32, %c0_i32_0 : i32, i32
  }
  func.func @transform_9(%arg0: i32) -> (i32, i32) {
    %c0_i32 = arith.constant 0 : i32
    %c0_i32_0 = arith.constant 0 : i32
    %c0_i32_1 = arith.constant 0 : i32
    return %c0_i32, %c0_i32_0 : i32, i32
  }
  func.func @transform_10(%arg0: i32) -> (i32, i32) {
    %c0_i32 = arith.constant 0 : i32
    %c0_i32_0 = arith.constant 0 : i32
    %c0_i32_1 = arith.constant 0 : i32
    return %c0_i32, %c0_i32_0 : i32, i32
  }
  func.func @transform_11(%arg0: i32) -> (i32, i32) {
    %c0_i32 = arith.constant 0 : i32
    %c0_i32_0 = arith.constant 0 : i32
    %c0_i32_1 = arith.constant 0 : i32
    return %c0_i32, %c0_i32_0 : i32, i32
  }
  func.func @transform_12(%arg0: i32) -> (i32, i32) {
    %c0_i32 = arith.constant 0 : i32
    %c0_i32_0 = arith.constant 0 : i32
    %c0_i32_1 = arith.constant 0 : i32
    return %c0_i32, %c0_i32_0 : i32, i32
  }
  func.func @transform_13(%arg0: i32) -> (i32, i32) {
    %c0_i32 = arith.constant 0 : i32
    %c0_i32_0 = arith.constant 0 : i32
    %c0_i32_1 = arith.constant 0 : i32
    return %c0_i32, %c0_i32_0 : i32, i32
  }
  func.func @transform_14(%arg0: i32) -> (i32, i32) {
    %c0_i32 = arith.constant 0 : i32
    %c0_i32_0 = arith.constant 0 : i32
    %c0_i32_1 = arith.constant 0 : i32
    return %c0_i32, %c0_i32_0 : i32, i32
  }
  func.func @transform_15(%arg0: i32) -> (i32, i32) {
    %c0_i32 = arith.constant 0 : i32
    %c0_i32_0 = arith.constant 0 : i32
    %c0_i32_1 = arith.constant 0 : i32
    return %c0_i32, %c0_i32_0 : i32, i32
  }
  func.func @transform_16(%arg0: i32) -> (i32, i32) {
    %c0_i32 = arith.constant 0 : i32
    %c0_i32_0 = arith.constant 0 : i32
    %c0_i32_1 = arith.constant 0 : i32
    return %c0_i32, %c0_i32_0 : i32, i32
  }
  func.func @transform_17(%arg0: i32) -> (i32, i32) {
    %c0_i32 = arith.constant 0 : i32
    %c0_i32_0 = arith.constant 0 : i32
    %c0_i32_1 = arith.constant 0 : i32
    return %c0_i32, %c0_i32_0 : i32, i32
  }
  func.func @transform_18(%arg0: i32) -> (i32, i32) {
    %c0_i32 = arith.constant 0 : i32
    %c0_i32_0 = arith.constant 0 : i32
    %c0_i32_1 = arith.constant 0 : i32
    return %c0_i32, %c0_i32_0 : i32, i32
  }
  func.func @transform_19(%arg0: i32) -> (i32, i32) {
    %c0_i32 = arith.constant 0 : i32
    %c0_i32_0 = arith.constant 0 : i32
    %c0_i32_1 = arith.constant 0 : i32
    return %c0_i32, %c0_i32_0 : i32, i32
  }
  func.func @transform_20(%arg0: i32) -> (i32, i32) {
    %c0_i32 = arith.constant 0 : i32
    %c0_i32_0 = arith.constant 0 : i32
    %c0_i32_1 = arith.constant 0 : i32
    return %c0_i32, %c0_i32_0 : i32, i32
  }
  func.func @transform_21(%arg0: i32) -> (i32, i32) {
    %c0_i32 = arith.constant 0 : i32
    %c0_i32_0 = arith.constant 0 : i32
    %c0_i32_1 = arith.constant 0 : i32
    return %c0_i32, %c0_i32_0 : i32, i32
  }
  func.func @transform_22(%arg0: i32) -> (i32, i32) {
    %c0_i32 = arith.constant 0 : i32
    %c0_i32_0 = arith.constant 0 : i32
    %c0_i32_1 = arith.constant 0 : i32
    return %c0_i32, %c0_i32_0 : i32, i32
  }
  func.func @transform_23(%arg0: i32) -> (i32, i32) {
    %c0_i32 = arith.constant 0 : i32
    %c0_i32_0 = arith.constant 0 : i32
    %c0_i32_1 = arith.constant 0 : i32
    return %c0_i32, %c0_i32_0 : i32, i32
  }
  func.func @transform_24(%arg0: i32) -> (i32, i32) {
    %c0_i32 = arith.constant 0 : i32
    %c0_i32_0 = arith.constant 0 : i32
    %c0_i32_1 = arith.constant 0 : i32
    return %c0_i32, %c0_i32_0 : i32, i32
  }
  func.func @transform_25(%arg0: i32) -> (i32, i32) {
    %c0_i32 = arith.constant 0 : i32
    %c0_i32_0 = arith.constant 0 : i32
    %c0_i32_1 = arith.constant 0 : i32
    return %c0_i32, %c0_i32_0 : i32, i32
  }
  func.func @transform_26(%arg0: i32) -> (i32, i32) {
    %c0_i32 = arith.constant 0 : i32
    %c0_i32_0 = arith.constant 0 : i32
    %c0_i32_1 = arith.constant 0 : i32
    return %c0_i32, %c0_i32_0 : i32, i32
  }
  func.func @transform_27(%arg0: i32) -> (i32, i32) {
    %c0_i32 = arith.constant 0 : i32
    %c0_i32_0 = arith.constant 0 : i32
    %c0_i32_1 = arith.constant 0 : i32
    return %c0_i32, %c0_i32_0 : i32, i32
  }
  func.func @transform_28(%arg0: i32) -> (i32, i32) {
    %c0_i32 = arith.constant 0 : i32
    %c0_i32_0 = arith.constant 0 : i32
    %c0_i32_1 = arith.constant 0 : i32
    return %c0_i32, %c0_i32_0 : i32, i32
  }
  func.func @transform_29(%arg0: i32) -> (i32, i32) {
    %c0_i32 = arith.constant 0 : i32
    %c0_i32_0 = arith.constant 0 : i32
    %c0_i32_1 = arith.constant 0 : i32
    return %c0_i32, %c0_i32_0 : i32, i32
  }
  func.func @transform_30(%arg0: i32) -> (i32, i32) {
    %c0_i32 = arith.constant 0 : i32
    %c0_i32_0 = arith.constant 0 : i32
    return %c0_i32, %arg0 : i32, i32
  }
}

</mosaic_0001>

<bundles_post_ra>
// kernel: _lambda_.1
= control target key start
LH: loop header
LB: loop body
LE: loop exit
PB: predicated region body
PF: predicated region fallthrough
CT: control target
= control target key end

     0   :  { %s5816_s3 = smov 4   ;;  %v5817_v0 = vmov 0   ;;  %s5818_s7 = smov 5   ;;  %vm154_vm0 = vcmask 1040384   ;;  %vm155_vm1 = vcmask 1041408   ;;  %v5821_v12 = vmov 65535   ;;  %s8445_s0 = inlined_call_operand.smem [shape: u32[31], index: -1, kind: input, shape index: {}] }
   0x1   :  { %s5357_s6 = sld [smem:[%s8445_s0 + %s5816_s3]]   ;;  %5655 = vset.pattern.permute.xlu1 %v5817_v0  ;;  %5656 = vset.pattern.permute.xlu0 %v5817_v0  ;;  %s5819_s11 = smov 125   ;;  %v156_v13 = vsel %vm154_vm0, 4294967295, %v5821_v12  ;;  %vm150_vm2 = vcmask 23552  }
   0x2   :  { %5657 = vset.pattern.permute.xlu2 %v5817_v0  ;;  %s5358_s10 = sld [smem:[%s8445_s0 + %s5818_s7]]   ;;  %s5820_s12 = smov 122   ;;  %v5886_v14 = vsel %vm155_vm1, %v156_v13, 0 }
   0x3   :  { %s5879_s15 = sld [smem:[%s8445_s0]]   ;;  %s5822_s16 = smov 8  }
   0x4   :  { %s5361_s19 = sld [smem:[%s8445_s0 + %s5822_s16]]   ;;  %s5823_s20 = smov 12  }
   0x5   :  { %s5365_s23 = sld [smem:[%s8445_s0 + %s5823_s20]]   ;;  %s5824_s24 = smov 17  }
   0x6   :  { %s5370_s27 = sld [smem:[%s8445_s0 + %s5824_s24]]   ;;  %s5825_s28 = smov 22  }
   0x7   :  { %v5864_v1 = vld [vmem:[%s5357_s6] sm:$0x3]  ;;  %s5375_s1 = sld [smem:[%s8445_s0 + %s5825_s28]]   ;;  %s5826_s2 = smov 116  }
   0x8   :  { %145 = vst [vmem:[#allocation1] ss:$4 sm:$0xff] %v5864_v1  ;;  %v142_v2 = vld [vmem:[%s5358_s10] sm:$0x7]  ;;  %s5827_s3 = smov 21   ;;  %s5828_s7 = smov 119  }
   0x9   :  { %221 = vperm.xlu1 %5655, %v142_v2   ;;  %v192_v3 = vld [vmem:[%s5357_s6] sm:$0x3]  ;;  %v5384_v11 = vld [vmem:[%s5879_s15 + $0x2] sm:$0x3]  ;;  %v5385_v27 = vld [vmem:[%s5879_s15 + $0x4] sm:$0x3]  ;;  %s5374_s6 = sld [smem:[%s8445_s0 + %s5827_s3]]  }
   0xa   :  { %v159_v15 = vand.u32 %v5384_v11, %v5886_v14  ;;  %v5900_v20 = vld [vmem:[%s5361_s19] sm:$0x3]  ;;  %v5914_v28 = vand.u32 %v5385_v27, %v5886_v14  ;;  %s5829_s8 = smov 24   ;;  %s5830_s14 = smov 25  }
   0xb   :  { %v127_v22 = vld [vmem:[%s5879_s15] sm:$0x3]  ;;  %s5951_s13 = sld [smem:[%s8445_s0 + %s5829_s8]]   ;;  %s5835_s4 = smov 13  }
   0xc   :  { %168 = vmatpush.bf16.msra.mxu0 %v159_v15  ;;  %536 = vmatpush.bf16.msra.mxu2 %v159_v15  ;;  %v177_v23 = vand.u32 %v5886_v14, %v127_v22  ;;  %v2158_v24 = vld [vmem:[%s5361_s19] sm:$0x3]  ;;  %s5958_s18 = sld [smem:[%s8445_s0 + %s5830_s14]]   ;;  %s5831_s19 = smov 27  }
   0xd   :  { %523 = vmatpush.bf16.msra.mxu1 %v5914_v28  ;;  %v5920_v31 = vld [vmem:[%s5365_s23] sm:$0x3]  ;;  %v5611_v41 = vld [vmem:[%s5375_s1] sm:$0x10]  ;;  %s5967_s22 = sld [smem:[%s8445_s0 + %s5831_s19]]   ;;  %s5836_s9 = smov 16  }
   0xe   :  { %v2852_v33 = vld [vmem:[%s5365_s23] sm:$0x3]  ;;  %s5832_s23 = smov 6   ;;  %s5366_s8 = sld [smem:[%s8445_s0 + %s5835_s4]]  }
   0xf   :  { %v146_v4 = vld.sshfl [vmem:[#allocation1] sm:$0xff pattern:$0x73625140]  ;;  %5407 = vmatmul.msk.bf16.vlgmr.msra.gmra.mxu2 %vm150_vm2, %v5864_v1  ;;  %s5975_s26 = sld [smem:[%s8445_s0 + %s5832_s23]]   ;;  %s5837_s17 = smov 113  }
  0x10   :  { %148 = vrot.lane.b32.xlu0 %v146_v4, %s5819_s11  ;;  %194 = vst [vmem:[#allocation1] ss:$4 sm:$0xff] %v192_v3  ;;  %186 = vmatpush.bf16.msrb.mxu0 %v177_v23  ;;  %v3493_v38 = vld [vmem:[%s5370_s27] sm:$0x7]  ;;  %s5833_s27 = smov 7   ;;  %s5369_s16 = sld [smem:[%s8445_s0 + %s5836_s9]]  }
  0x11   :  { %v5544_v40 = vld [vmem:[%s5375_s1] sm:$0xf]  ;;  %v5614_v46 = vld [vmem:[%s5951_s13 + $0x10] sm:$0xff]  ;;  %s6072_s30 = sld [smem:[%s8445_s0 + %s5833_s27]]   ;;  %s5838_s19 = smov 23  }
  0x12   :  { %v5938_v42 = vor.u32 %v5611_v41, %v5544_v40  ;;  %v4374_v44 = vld [vmem:[%s5374_s6] sm:$0x7]  ;;  %v4554_v49 = vld [vmem:[%s5958_s18 + $0x18] sm:$0xff]  ;;  %s6688_s23 = sld [smem:[%s8445_s0 + %s5838_s19]]   ;;  %s5839_s24 = smov 29  }
  0x13   :  { %v4559_v47 = vld [vmem:[%s5958_s18 + $0x40] sm:$0xff]  ;;  %s5382_s27 = sld [smem:[%s8445_s0 + %s5839_s24]]   ;;  %s5840_s28 = smov 10  }
  0x14   :  { %v4555_v48 = vld [vmem:[%s5958_s18 + $0x20] sm:$0xff]  ;;  %s5841_s1 = smov 11   ;;  %s5842_s5 = smov 1  }
  0x15   :  { %v5024_v50 = vld [vmem:[%s5967_s22 + $0x20] sm:$0xf]  ;;  %s5364_s4 = sld [smem:[%s8445_s0 + %s5841_s1]]   ;;  %s5843_s10 = smov 14  }
  0x16   :  { %v5020_v51 = vld [vmem:[%s5967_s22] sm:$0xff]  ;;  %s7063_s9 = sld [smem:[%s8445_s0 + %s5842_s5]]   ;;  %s5844_s19 = smov 2  }
  0x17   :  { %v195_v5 = vld.sshfl [vmem:[#allocation1] sm:$0xff pattern:$0x73625140]  ;;  %s7201_s24 = sld [smem:[%s8445_s0 + %s5844_s19]]   ;;  %s5845_s25 = smov 15  }
  0x18   :  { %197 = vrot.lane.b32.xlu0 %v195_v5, %s5820_s12  ;;  %508 = vst [vmem:[#allocation1] ss:$4 sm:$0xff] %v5864_v1  ;;  %s5852_s21 = smov 30  }
  0x1f   :  { %v509_v6 = vld.sshfl [vmem:[#allocation1] sm:$0xff pattern:$0x73625140] }
  0x20   :  { %511 = vrot.lane.b32.xlu1 %v509_v6, %s5819_s11  ;;  %542 = vst [vmem:[#allocation1] ss:$4 sm:$0xff] %v192_v3 }
  0x27   :  { %v543_v7 = vld.sshfl [vmem:[#allocation1] sm:$0xff pattern:$0x73625140] }
  0x28   :  { %829 = vst [vmem:[#allocation1] ss:$4 sm:$0xff] %v5864_v1  ;;  %545 = vrot.lane.b32.xlu2 %v543_v7, %s5820_s12 }
  0x2f   :  { %v830_v8 = vld.sshfl [vmem:[#allocation1] sm:$0xff pattern:$0x73625140] }
  0x30   :  { %863 = vst [vmem:[#allocation1] ss:$4 sm:$0xff] %v192_v3  ;;  %832 = vrot.lane.b32.xlu2 %v830_v8, %s5819_s11 }
  0x37   :  { %v864_v9 = vld.sshfl [vmem:[#allocation1] sm:$0xff pattern:$0x73625140] }
  0x38   :  { %1150 = vst [vmem:[#allocation1] ss:$4 sm:$0xff] %v5864_v1  ;;  %866 = vrot.lane.b32.xlu0 %v864_v9, %s5820_s12 }
  0x3f   :  { %v1151_v10 = vld.sshfl [vmem:[#allocation1] sm:$0xff pattern:$0x73625140] }
  0x40   :  { %1153 = vrot.lane.b32.xlu1 %v1151_v10, %s5819_s11  ;;  %1184 = vst [vmem:[#allocation1] ss:$4 sm:$0xff] %v192_v3 }
  0x47   :  { %v1185_v16 = vld.sshfl [vmem:[#allocation1] sm:$0xff pattern:$0x73625140] }
  0x48   :  { %1471 = vst [vmem:[#allocation1] ss:$4 sm:$0xff] %v5864_v1  ;;  %1187 = vrot.lane.b32.xlu2 %v1185_v16, %s5820_s12 }
  0x4f   :  { %v1472_v17 = vld.sshfl [vmem:[#allocation1] sm:$0xff pattern:$0x73625140] }
  0x50   :  { %1505 = vst [vmem:[#allocation1] ss:$4 sm:$0xff] %v192_v3  ;;  %1474 = vrot.lane.b32.xlu0 %v1472_v17, %s5819_s11 }
  0x57   :  { %v1506_v18 = vld.sshfl [vmem:[#allocation1] sm:$0xff pattern:$0x73625140] }
  0x58   :  { %1508 = vrot.lane.b32.xlu1 %v1506_v18, %s5820_s12  ;;  %1792 = vst [vmem:[#allocation1] ss:$4 sm:$0xff] %v5864_v1 }
  0x5f   :  { %v1793_v19 = vld.sshfl [vmem:[#allocation1] sm:$0xff pattern:$0x73625140] }
  0x60   :  { %1826 = vst [vmem:[#allocation1] ss:$4 sm:$0xff] %v192_v3  ;;  %1795 = vrot.lane.b32.xlu2 %v1793_v19, %s5819_s11 }
  0x67   :  { %v1827_v21 = vld.sshfl [vmem:[#allocation1] sm:$0xff pattern:$0x73625140] }
  0x68   :  { %2116 = vst [vmem:[#allocation1] ss:$4 sm:$0xff] %v5900_v20  ;;  %1829 = vrot.lane.b32.xlu0 %v1827_v21, %s5820_s12 }
  0x6f   :  { %v2117_v25 = vld.sshfl [vmem:[#allocation1] sm:$0xff pattern:$0x73625140] }
  0x70   :  { %2119 = vrot.lane.b32.xlu1 %v2117_v25, %s5819_s11  ;;  %2160 = vst [vmem:[#allocation1] ss:$4 sm:$0xff] %v2158_v24 }
  0x77   :  { %v2161_v26 = vld.sshfl [vmem:[#allocation1] sm:$0xff pattern:$0x73625140] }
  0x78   :  { %2473 = vst [vmem:[#allocation1] ss:$4 sm:$0xff] %v5900_v20  ;;  %2163 = vrot.lane.b32.xlu2 %v2161_v26, %s5820_s12 }
  0x7b   :  { %v5946_v43 = vpop.permute.xlu1 %221 }
  0x7f   :  { %v2474_v29 = vld.sshfl [vmem:[#allocation1] sm:$0xff pattern:$0x73625140] }
  0x80   :  { %2476 = vrot.lane.b32.xlu1 %v2474_v29, %s5819_s11  ;;  %2513 = vst [vmem:[#allocation1] ss:$4 sm:$0xff] %v2158_v24 }
  0x82   :  { %v149_v30 = vpop.permute.xlu0 %148 }
  0x83   :  { %5391 = vmatmul.msk.bf16.vlgmr.msra.gmra.mxu0 %vm150_vm2, %v149_v30 }
  0x84   :  { %212 = vmatpush.bf16.msra.mxu0 %v5914_v28 }
  0x87   :  { %v2514_v32 = vld.sshfl [vmem:[#allocation1] sm:$0xff pattern:$0x73625140] }
  0x88   :  { %2810 = vst [vmem:[#allocation1] ss:$4 sm:$0xff] %v5920_v31  ;;  %2516 = vrot.lane.b32.xlu2 %v2514_v32, %s5820_s12 }
  0x8a   :  { %v198_v37 = vpop.permute.xlu0 %197 }
  0x8f   :  { %v2811_v34 = vld.sshfl [vmem:[#allocation1] sm:$0xff pattern:$0x73625140] }
  0x90   :  { %2813 = vrot.lane.b32.xlu1 %v2811_v34, %s5819_s11  ;;  %2854 = vst [vmem:[#allocation1] ss:$4 sm:$0xff] %v2852_v33 }
  0x92   :  { %v512_v45 = vpop.permute.xlu1 %511 }
  0x93   :  { %5392 = vmatmul.msk.bf16.vlgmr.msrb.gmra.mxu0 %vm150_vm2, %v5864_v1  ;;  %5406 = vmatmul.msk.bf16.vlgmr.msra.gmra.mxu1 %vm150_vm2, %v512_v45 }
  0x97   :  { %v2855_v35 = vld.sshfl [vmem:[#allocation1] sm:$0xff pattern:$0x73625140] }
  0x98   :  { %3167 = vst [vmem:[#allocation1] ss:$4 sm:$0xff] %v5920_v31  ;;  %2857 = vrot.lane.b32.xlu2 %v2855_v35, %s5820_s12 }
  0x9f   :  { %v3168_v36 = vld.sshfl [vmem:[#allocation1] sm:$0xff pattern:$0x73625140] }
  0xa0   :  { %3170 = vrot.lane.b32.xlu1 %v3168_v36, %s5819_s11  ;;  %3201 = vst [vmem:[#allocation1] ss:$4 sm:$0xff] %v2852_v33 }
  0xa3   :  { %5393 = vmatmul.msk.bf16.vlgmr.msra.gmra.mxu0 %vm150_vm2, %v198_v37 }
  0xa7   :  { %v3202_v39 = vld.sshfl [vmem:[#allocation1] sm:$0xff pattern:$0x73625140] }
  0xa8   :  { %3540 = vperm.xlu1 %5655, %v3493_v38   ;;  %3204 = vrot.lane.b32.xlu2 %v3202_v39, %s5820_s12 }
  0xb0   :  { %4222 = vrot.lane.b32.xlu1 %v5938_v42, %s5826_s2 }
  0xb8   :  { %4198 = vrot.lane.b32.xlu1 %v5938_v42, %s5828_s7 }
  0xc0   :  { %4377 = vperm.xlu1 %5655, %v4374_v44  }
  0xc8   :  { %4438 = vrot.lane.b32.xlu1 %v5614_v46, %s5828_s7  ;;  %v5979_v46 = vld [vmem:[%s5975_s26] sm:$0xff] }
  0xd0   :  { %4602 = vperm.xlu1 %5655, %v4559_v47   ;;  %v271_v47 = vld [vmem:[%s5975_s26 + $0x8] sm:$0x1] }
  0xd8   :  { %4582 = vperm.xlu1 %5655, %v4555_v48   ;;  %v278_v48 = vunpack.c.l.b16 %v271_v47 }
  0xe0   :  { %4577 = vperm.xlu1 %5655, %v4554_v49   ;;  %v5984_v49 = vpack.c.b16 %v278_v48, %v278_v48 }
  0xe8   :  { %5047 = vperm.xlu1 %5655, %v5024_v50  }
  0xf0   :  { %5027 = vperm.xlu1 %5655, %v5020_v51  }
 0x100   :  { %v170_v52 = vpop.f32.mrf.mxu0 }
 0x108   :  { %v172_v53 = vpop.f32.mrf.mxu0 }
 0x110   :  { %v188_v54 = vpop.f32.mrf.mxu0 }
 0x111   :  { %v189_v56 = vadd.f32 %v188_v54, %v170_v52 }
 0x118   :  { %v190_v55 = vpop.f32.mrf.mxu0 }
 0x120   :  { %v214_v57 = vpop.f32.mrf.mxu0 }
 0x121   :  { %v218_v58 = vadd.f32 %v214_v57, %v189_v56 }
 0x123   :  { %v224_v59 = vadd.f32 %v5946_v43, %v218_v58 }
 0x125   :  { %v226_v60 = vmul.f32 0.70710677, %v224_v59  ;;  %v225_v39 = vmul.f32 0.5, %v224_v59 }
 0x127   :  { %v227_v61 = vmul.f32 %v226_v60, %v226_v60 }
 0x128   :  { %v216_v62 = vpop.f32.mrf.mxu0 }
 0x129   :  { %v228_v63 = vmin.f32 %v227_v61, 16.0 }
 0x12b   :  { %v229_v0 = vmul.f32 2.1237322e-06, %v228_v63  ;;  %v240_v2 = vmul.f32 3.8918573e-05, %v228_v63 }
 0x12d   :  { %v230_v3 = vadd.f32 0.00028619796, %v229_v0  ;;  %v241_v4 = vadd.f32 0.001143296, %v240_v2 }
 0x12f   :  { %v231_v5 = vmul.f32 %v230_v3, %v228_v63  ;;  %v242_v6 = vmul.f32 %v241_v4, %v228_v63 }
 0x131   :  { %v243_v7 = vadd.f32 0.014752088, %v242_v6  ;;  %v232_v8 = vadd.f32 0.0036580483, %v231_v5 }
 0x133   :  { %v244_v9 = vmul.f32 %v243_v7, %v228_v63  ;;  %v233_v11 = vmul.f32 %v232_v8, %v228_v63 }
 0x135   :  { %v245_v10 = vadd.f32 0.112945676, %v244_v9  ;;  %v234_v16 = vadd.f32 0.05243302, %v233_v11 }
 0x137   :  { %v246_v13 = vmul.f32 %v245_v10, %v228_v63  ;;  %v235_v19 = vmul.f32 %v234_v16, %v228_v63 }
 0x139   :  { %v247_v15 = vadd.f32 0.4994258, %v246_v13  ;;  %v236_v21 = vadd.f32 0.18741608, %v235_v19 }
 0x13b   :  { %v248_v17 = vmul.f32 %v247_v15, %v228_v63  ;;  %v237_v23 = vmul.f32 %v236_v21, %v228_v63 }
 0x13d   :  { %v249_v18 = vadd.f32 1.0, %v248_v17  ;;  %v238_v27 = vadd.f32 1.1283791, %v237_v23 }
 0x13f   :  { %5658 = vrcp.f32 %v249_v18  ;;  %v261_v26 = vand.u32 2147483648, %v249_v18  ;;  %v259_v30 = vand.u32 2147483647, %v249_v18  ;;  %vm255_vm4 = vweird.f32 %v249_v18 }
 0x140   :  { %v239_v34 = vmul.f32 %v238_v27, %v226_v60 }
 0x141   :  { %v262_v33 = vor.u32 1.1754944e-38, %v261_v26  ;;  %vm260_vm6 = vcmp.eq.f32.partialorder %v259_v30, 8.507059e+37 }
 0x145   :  { %v5659_v22 = vpop.eup %5658 }
 0x146   :  { %v251_v24 = vmul.f32 %v5659_v22, %v249_v18  ;;  %vm256_vm3 = vweird.f32 %v5659_v22 }
 0x147   :  { %vm257_vm5 = vmor %vm255_vm4, %vm256_vm3 }
 0x148   :  { %v252_v25 = vsub.f32 1.0, %v251_v24 }
 0x14a   :  { %v253_v29 = vmul.f32 %v5659_v22, %v252_v25 }
 0x14c   :  { %v254_v32 = vadd.f32 %v5659_v22, %v253_v29 }
 0x14e   :  { %v258_v35 = vsel %vm257_vm5, %v5659_v22, %v254_v32 }
 0x14f   :  { %v263_v36 = vsel %vm260_vm6, %v262_v33, %v258_v35  ;;  %vm443_vm6 = vcmask 146432  }
 0x150   :  { %v264_v37 = vmul.f32 %v263_v36, %v239_v34 }
 0x152   :  { %v5394_v38 = vclamps-f32 %v264_v37, 1.0 }
 0x154   :  { %v267_v40 = vadd.f32 1.0, %v5394_v38 }
 0x156   :  { %v268_v41 = vmul.f32 %v267_v40, %v225_v39 }
 0x158   :  { %v272_v44 = vpack.c.bf16 %v268_v41, %v268_v41 }
 0x15a   :  { %v288_v45 = vand.u32 %v272_v44, %v5886_v14 }
 0x15c   :  { %297 = vmatpush.bf16.msra.mxu3 %v288_v45 }
 0x15f   :  { %5399 = vmatmul.msk.bf16.vlgmr.msra.gmra.mxu3 %vm150_vm2, %v5979_v46 }
 0x16f   :  { %5400 = vmatmul.msk.bf16.gmra.mxu3 %vm150_vm2, %v5984_v49 }
 0x1e2   :  { %v5988_v50 = vpop.f32.mrf.mxu3 }
 0x1e3   :  { %v5991_v51 = vmul.f32 0.70710677, %v5988_v50 }
 0x1e5   :  { %v314_v52 = vmul.f32 %v5991_v51, %v5991_v51 }
 0x1e7   :  { %v5995_v53 = vmin.f32 %v314_v52, 16.0 }
 0x1e9   :  { %v327_v54 = vmul.f32 3.8918573e-05, %v5995_v53  ;;  %v316_v9 = vmul.f32 2.1237322e-06, %v5995_v53 }
 0x1ea   :  { %v5998_v55 = vpop.f32.mrf.mxu3 }
 0x1eb   :  { %v328_v56 = vadd.f32 0.001143296, %v327_v54  ;;  %v6001_v57 = vmul.f32 0.70710677, %v5998_v55  ;;  %v317_v19 = vadd.f32 0.00028619796, %v316_v9 }
 0x1ed   :  { %v329_v58 = vmul.f32 %v328_v56, %v5995_v53  ;;  %v354_v59 = vmul.f32 %v6001_v57, %v6001_v57  ;;  %v318_v27 = vmul.f32 %v317_v19, %v5995_v53  ;;  %v5386_v19 = vld [vmem:[%s5879_s15 + $0x6] sm:$0x3] }
 0x1ef   :  { %v330_v60 = vadd.f32 0.014752088, %v329_v58  ;;  %v6006_v61 = vmin.f32 %v354_v59, 16.0  ;;  %v319_v37 = vadd.f32 0.0036580483, %v318_v27 }
 0x1f1   :  { %v331_v62 = vmul.f32 %v330_v60, %v5995_v53  ;;  %v367_v63 = vmul.f32 3.8918573e-05, %v6006_v61  ;;  %v356_v6 = vmul.f32 2.1237322e-06, %v6006_v61  ;;  %v320_v45 = vmul.f32 %v319_v37, %v5995_v53 }
 0x1f2   :  { %v6010_v0 = vpop.f32.mrf.mxu3 }
 0x1f3   :  { %v332_v2 = vadd.f32 0.112945676, %v331_v62  ;;  %v368_v3 = vadd.f32 0.001143296, %v367_v63  ;;  %v6013_v4 = vmul.f32 0.70710677, %v6010_v0 }
 0x1f4   :  { %v357_v15 = vadd.f32 0.00028619796, %v356_v6  ;;  %v321_v58 = vadd.f32 0.05243302, %v320_v45 }
 0x1f5   :  { %v333_v5 = vmul.f32 %v332_v2, %v5995_v53  ;;  %v369_v7 = vmul.f32 %v368_v3, %v6006_v61  ;;  %v394_v8 = vmul.f32 %v6013_v4, %v6013_v4 }
 0x1f6   :  { %v358_v25 = vmul.f32 %v357_v15, %v6006_v61  ;;  %v322_v6 = vmul.f32 %v321_v58, %v5995_v53 }
 0x1f7   :  { %v334_v10 = vadd.f32 0.4994258, %v333_v5  ;;  %v370_v11 = vadd.f32 0.014752088, %v369_v7  ;;  %v6021_v13 = vmin.f32 %v394_v8, 16.0 }
 0x1f8   :  { %v359_v35 = vadd.f32 0.0036580483, %v358_v25 }
 0x1f9   :  { %v371_v16 = vmul.f32 %v370_v11, %v6006_v61  ;;  %v396_v17 = vmul.f32 2.1237322e-06, %v6021_v13  ;;  %v335_v21 = vmul.f32 %v334_v10, %v5995_v53  ;;  %v407_v22 = vmul.f32 3.8918573e-05, %v6021_v13 }
 0x1fa   :  { %v306_v18 = vpop.f32.mrf.mxu3  ;;  %v360_v44 = vmul.f32 %v359_v35, %v6006_v61 }
 0x1fb   :  { %v372_v23 = vadd.f32 0.112945676, %v371_v16  ;;  %v397_v24 = vadd.f32 0.00028619796, %v396_v17  ;;  %v6030_v29 = vadd.f32 1.0, %v335_v21 }
 0x1fc   :  { %v408_v30 = vadd.f32 0.001143296, %v407_v22  ;;  %v361_v56 = vadd.f32 0.05243302, %v360_v44  ;;  %v323_v16 = vadd.f32 0.18741608, %v322_v6 }
 0x1fd   :  { %v373_v26 = vmul.f32 %v372_v23, %v6006_v61  ;;  %v398_v33 = vmul.f32 %v397_v24, %v6021_v13  ;;  %5660 = vrcp.f32 %v6030_v29  ;;  %v6049_v23 = vand.u32 %v5386_v19, %v5886_v14  ;;  %v6077_v19 = vld [vmem:[%s6072_s30] sm:$0x3] }
 0x1fe   :  { %v409_v34 = vmul.f32 %v408_v30, %v6021_v13  ;;  %v362_v3 = vmul.f32 %v361_v56, %v6006_v61  ;;  %v324_v24 = vmul.f32 %v323_v16, %v5995_v53  ;;  %v348_v25 = vand.u32 2147483648, %v6030_v29 }
 0x1ff   :  { %v374_v32 = vadd.f32 0.4994258, %v373_v26  ;;  %v399_v40 = vadd.f32 0.0036580483, %v398_v33  ;;  %844 = vmatpush.bf16.msrb.mxu3 %v6049_v23  ;;  %vm342_vm11 = vweird.f32 %v6030_v29  ;;  %v346_v53 = vand.u32 2147483647, %v6030_v29 }
 0x200   :  { %v410_v38 = vadd.f32 0.014752088, %v409_v34  ;;  %v363_v11 = vadd.f32 0.18741608, %v362_v3  ;;  %v325_v37 = vadd.f32 1.1283791, %v324_v24 }
 0x201   :  { %v375_v36 = vmul.f32 %v374_v32, %v6006_v61  ;;  %v400_v48 = vmul.f32 %v399_v40, %v6021_v13  ;;  %vm347_vm15 = vcmp.eq.f32.partialorder %v346_v53, 8.507059e+37 }
 0x202   :  { %v411_v41 = vmul.f32 %v410_v38, %v6021_v13  ;;  %v364_v21 = vmul.f32 %v363_v11, %v6006_v61  ;;  %v349_v38 = vor.u32 1.1754944e-38, %v348_v25  ;;  %v326_v58 = vmul.f32 %v325_v37, %v5991_v51 }
 0x203   :  { %v376_v39 = vadd.f32 1.0, %v375_v36  ;;  %v5661_v52 = vpop.eup %5660  ;;  %v401_v63 = vadd.f32 0.05243302, %v400_v48  ;;  %v309_v51 = vmul.f32 0.5, %v5998_v55  ;;  %v546_v55 = vpop.permute.xlu2 %545 }
 0x204   :  { %v412_v47 = vadd.f32 0.112945676, %v411_v41  ;;  %v338_v62 = vmul.f32 %v5661_v52, %v6030_v29  ;;  %vm343_vm8 = vweird.f32 %v5661_v52  ;;  %v365_v35 = vadd.f32 1.1283791, %v364_v21  ;;  %v538_v21 = vpop.f32.mrf.mxu2 }
 0x205   :  { %5662 = vrcp.f32 %v376_v39  ;;  %v402_v9 = vmul.f32 %v401_v63, %v6021_v13  ;;  %v388_v26 = vand.u32 2147483648, %v376_v39  ;;  %vm382_vm9 = vweird.f32 %v376_v39  ;;  %vm344_vm12 = vmor %vm342_vm11, %vm343_vm8 }
 0x206   :  { %v413_v54 = vmul.f32 %v412_v47, %v6021_v13  ;;  %v339_v8 = vsub.f32 1.0, %v338_v62  ;;  %v386_v32 = vand.u32 2147483647, %v376_v39  ;;  %v366_v29 = vmul.f32 %v365_v35, %v6001_v57 }
 0x207   :  { %v403_v18 = vadd.f32 0.18741608, %v402_v9  ;;  %v310_v57 = vmul.f32 0.5, %v6010_v0 }
 0x208   :  { %v414_v59 = vadd.f32 0.4994258, %v413_v54  ;;  %v340_v17 = vmul.f32 %v5661_v52, %v339_v8  ;;  %vm387_vm13 = vcmp.eq.f32.partialorder %v386_v32, 8.507059e+37 }
 0x209   :  { %v404_v33 = vmul.f32 %v403_v18, %v6021_v13 }
 0x20a   :  { %v415_v5 = vmul.f32 %v414_v59, %v6021_v13  ;;  %v341_v30 = vadd.f32 %v5661_v52, %v340_v17  ;;  %v389_v13 = vor.u32 1.1754944e-38, %v388_v26 }
 0x20b   :  { %v5663_v60 = vpop.eup %5662  ;;  %v405_v41 = vadd.f32 1.1283791, %v404_v33 }
 0x20c   :  { %v378_v2 = vmul.f32 %v5663_v60, %v376_v39  ;;  %v416_v10 = vadd.f32 1.0, %v415_v5  ;;  %vm383_vm7 = vweird.f32 %v5663_v60  ;;  %v345_v40 = vsel %vm344_vm12, %v5661_v52, %v341_v30  ;;  %v540_v24 = vpop.f32.mrf.mxu2 }
 0x20d   :  { %vm6055_vm10 = vmor %vm382_vm9, %vm383_vm7  ;;  %v350_v54 = vsel %vm347_vm15, %v349_v38, %v345_v40  ;;  %v406_v52 = vmul.f32 %v405_v41, %v6013_v4 }
 0x20e   :  { %v379_v7 = vsub.f32 1.0, %v378_v2  ;;  %5664 = vrcp.f32 %v416_v10  ;;  %v428_v44 = vand.u32 2147483648, %v416_v10  ;;  %v426_v48 = vand.u32 2147483647, %v416_v10 }
 0x20f   :  { %vm422_vm3 = vweird.f32 %v416_v10  ;;  %v351_v63 = vmul.f32 %v350_v54, %v326_v58 }
 0x210   :  { %v380_v15 = vmul.f32 %v5663_v60, %v379_v7  ;;  %vm427_vm5 = vcmp.eq.f32.partialorder %v426_v48, 8.507059e+37 }
 0x211   :  { %v5401_v7 = vclamps-f32 %v351_v63, 1.0 }
 0x212   :  { %v381_v22 = vadd.f32 %v5663_v60, %v380_v15  ;;  %v308_v15 = vmul.f32 0.5, %v5988_v50  ;;  %v525_v50 = vpop.f32.mrf.mxu1 }
 0x213   :  { %v434_v11 = vadd.f32 1.0, %v5401_v7 }
 0x214   :  { %v5665_v27 = vpop.eup %5664  ;;  %v385_v36 = vsel %vm6055_vm10, %v5663_v60, %v381_v22  ;;  %v429_v60 = vor.u32 1.1754944e-38, %v428_v44 }
 0x215   :  { %v418_v34 = vmul.f32 %v5665_v27, %v416_v10  ;;  %v390_v45 = vsel %vm387_vm13, %v389_v13, %v385_v36  ;;  %vm423_vm14 = vweird.f32 %v5665_v27  ;;  %v437_v0 = vmul.f32 %v434_v11, %v308_v15 }
 0x216   :  { %v391_v59 = vmul.f32 %v390_v45, %v366_v29  ;;  %vm424_vm4 = vmor %vm422_vm3, %vm423_vm14 }
 0x217   :  { %v419_v39 = vsub.f32 1.0, %v418_v34 }
 0x218   :  { %v5402_v5 = vclamps-f32 %v391_v59, 1.0 }
 0x219   :  { %v420_v47 = vmul.f32 %v5665_v27, %v419_v39 }
 0x21a   :  { %v435_v9 = vadd.f32 1.0, %v5402_v5  ;;  %v527_v22 = vpop.f32.mrf.mxu1 }
 0x21b   :  { %v421_v56 = vadd.f32 %v5665_v27, %v420_v47 }
 0x21c   :  { %v438_v16 = vmul.f32 %v435_v9, %v309_v51 }
 0x21d   :  { %v425_v62 = vsel %vm424_vm4, %v5665_v27, %v421_v56  ;;  %v539_v27 = vadd.f32 %v538_v21, %v525_v50 }
 0x21e   :  { %v430_v2 = vsel %vm427_vm5, %v429_v60, %v425_v62  ;;  %v441_v18 = vpack.c.bf16 %v438_v16, %v437_v0 }
 0x21f   :  { %v431_v3 = vmul.f32 %v430_v2, %v406_v52 }
 0x221   :  { %v5403_v6 = vclamps-f32 %v431_v3, 1.0 }
 0x223   :  { %v436_v8 = vadd.f32 1.0, %v5403_v6 }
 0x225   :  { %v439_v10 = vmul.f32 %v436_v8, %v310_v57 }
 0x227   :  { %v442_v4 = vpack.c.bf16 %v439_v10, %v439_v10 }
 0x229   :  { %v448_v17 = vsel %vm154_vm0, %v442_v4, 0 }
 0x22a   :  { %456 = vmatpush.bf16.msrb.mxu0 %v448_v17 }
 0x22e   :  { %457 = vmatpush.bf16.msrb.mxu0 %v441_v18 }
 0x231   :  { %5404 = vmatmul.msk.bf16.vlgmr.msrb.gmra.mxu0 %vm443_vm6, %v6077_v19 }
 0x232   :  { %560 = vmatpush.bf16.msra.mxu0 %v6049_v23 }
 0x236   :  { %857 = vmatpush.bf16.msrb.mxu0 %v5914_v28 }
 0x241   :  { %5408 = vmatmul.msk.bf16.vlgmr.msra.gmra.mxu0 %vm150_vm2, %v546_v55 }
 0x251   :  { %5418 = vmatmul.msk.bf16.vlgmr.msrb.gmra.mxu0 %vm150_vm2, %v5864_v1 }
 0x2ae   :  { %v6086_v25 = vpop.f32.mrf.mxu0 }
 0x2b6   :  { %v461_v26 = vpop.f32.mrf.mxu0 }
 0x2be   :  { %v562_v30 = vpop.f32.mrf.mxu0 }
 0x2bf   :  { %v566_v32 = vadd.f32 %v562_v30, %v539_v27 }
 0x2c1   :  { %v567_v33 = vadd.f32 %v566_v32, %v5946_v43 }
 0x2c3   :  { %v569_v61 = vmul.f32 0.70710677, %v567_v33  ;;  %v568_v15 = vmul.f32 0.5, %v567_v33 }
 0x2c5   :  { %v570_v28 = vmul.f32 %v569_v61, %v569_v61 }
 0x2c6   :  { %v564_v34 = vpop.f32.mrf.mxu0 }
 0x2c7   :  { %v571_v53 = vmin.f32 %v570_v28, 16.0 }
 0x2c9   :  { %v572_v35 = vmul.f32 2.1237322e-06, %v571_v53  ;;  %v583_v36 = vmul.f32 3.8918573e-05, %v571_v53 }
 0x2cb   :  { %v573_v37 = vadd.f32 0.00028619796, %v572_v35  ;;  %v584_v38 = vadd.f32 0.001143296, %v583_v36 }
 0x2cd   :  { %v574_v13 = vmul.f32 %v573_v37, %v571_v53  ;;  %v585_v39 = vmul.f32 %v584_v38, %v571_v53 }
 0x2cf   :  { %v586_v40 = vadd.f32 0.014752088, %v585_v39  ;;  %v575_v41 = vadd.f32 0.0036580483, %v574_v13 }
 0x2d1   :  { %v587_v44 = vmul.f32 %v586_v40, %v571_v53  ;;  %v576_v47 = vmul.f32 %v575_v41, %v571_v53 }
 0x2d3   :  { %v588_v45 = vadd.f32 0.112945676, %v587_v44  ;;  %v577_v54 = vadd.f32 0.05243302, %v576_v47 }
 0x2d5   :  { %v589_v48 = vmul.f32 %v588_v45, %v571_v53  ;;  %v578_v59 = vmul.f32 %v577_v54, %v571_v53 }
 0x2d7   :  { %v590_v29 = vadd.f32 0.4994258, %v589_v48  ;;  %v579_v60 = vadd.f32 0.18741608, %v578_v59 }
 0x2d9   :  { %v591_v56 = vmul.f32 %v590_v29, %v571_v53  ;;  %v580_v62 = vmul.f32 %v579_v60, %v571_v53 }
 0x2db   :  { %v592_v58 = vadd.f32 1.0, %v591_v56  ;;  %v581_v5 = vadd.f32 1.1283791, %v580_v62 }
 0x2dd   :  { %5666 = vrcp.f32 %v592_v58  ;;  %v604_v3 = vand.u32 2147483648, %v592_v58  ;;  %v602_v7 = vand.u32 2147483647, %v592_v58  ;;  %vm598_vm8 = vweird.f32 %v592_v58 }
 0x2de   :  { %v582_v9 = vmul.f32 %v581_v5, %v569_v61 }
 0x2df   :  { %v605_v8 = vor.u32 1.1754944e-38, %v604_v3  ;;  %vm603_vm10 = vcmp.eq.f32.partialorder %v602_v7, 8.507059e+37 }
 0x2e3   :  { %v5667_v52 = vpop.eup %5666 }
 0x2e4   :  { %v594_v63 = vmul.f32 %v5667_v52, %v592_v58  ;;  %vm599_vm7 = vweird.f32 %v5667_v52 }
 0x2e5   :  { %vm600_vm9 = vmor %vm598_vm8, %vm599_vm7 }
 0x2e6   :  { %v595_v2 = vsub.f32 1.0, %v594_v63 }
 0x2e8   :  { %v596_v6 = vmul.f32 %v5667_v52, %v595_v2 }
 0x2ea   :  { %v597_v57 = vadd.f32 %v5667_v52, %v596_v6 }
 0x2ec   :  { %v601_v10 = vsel %vm600_vm9, %v5667_v52, %v597_v57 }
 0x2ed   :  { %v606_v11 = vsel %vm603_vm10, %v605_v8, %v601_v10 }
 0x2ee   :  { %v607_v51 = vmul.f32 %v606_v11, %v582_v9 }
 0x2f0   :  { %v5409_v4 = vclamps-f32 %v607_v51, 1.0 }
 0x2f2   :  { %v610_v16 = vadd.f32 1.0, %v5409_v4 }
 0x2f4   :  { %v611_v17 = vmul.f32 %v610_v16, %v568_v15 }
 0x2f6   :  { %v612_v0 = vpack.c.bf16 %v611_v17, %v611_v17 }
 0x2f8   :  { %v614_v18 = vand.u32 %v612_v0, %v5886_v14 }
 0x2fa   :  { %623 = vmatpush.bf16.msrb.mxu1 %v614_v18 }
 0x2fd   :  { %5410 = vmatmul.msk.bf16.vlgmr.msrb.gmra.mxu1 %vm150_vm2, %v5979_v46 }
 0x30d   :  { %5411 = vmatmul.msk.bf16.gmra.mxu1 %vm150_vm2, %v5984_v49 }
 0x37a   :  { %v6094_v55 = vpop.f32.mrf.mxu1 }
 0x37b   :  { %v6097_v50 = vmul.f32 0.70710677, %v6094_v55 }
 0x37d   :  { %v640_v21 = vmul.f32 %v6097_v50, %v6097_v50 }
 0x37f   :  { %v6101_v22 = vmin.f32 %v640_v21, 16.0 }
 0x381   :  { %v653_v24 = vmul.f32 3.8918573e-05, %v6101_v22  ;;  %v642_v36 = vmul.f32 2.1237322e-06, %v6101_v22 }
 0x382   :  { %v6104_v26 = vpop.f32.mrf.mxu1 }
 0x383   :  { %v654_v27 = vadd.f32 0.001143296, %v653_v24  ;;  %v6107_v30 = vmul.f32 0.70710677, %v6104_v26  ;;  %v643_v45 = vadd.f32 0.00028619796, %v642_v36 }
 0x385   :  { %v655_v32 = vmul.f32 %v654_v27, %v6101_v22  ;;  %v680_v33 = vmul.f32 %v6107_v30, %v6107_v30  ;;  %v644_v52 = vmul.f32 %v643_v45, %v6101_v22 }
 0x387   :  { %v656_v61 = vadd.f32 0.014752088, %v655_v32  ;;  %v6112_v28 = vmin.f32 %v680_v33, 16.0  ;;  %v645_v57 = vadd.f32 0.0036580483, %v644_v52 }
 0x388   :  { %v5387_v52 = vld [vmem:[%s5879_s15 + $0x8] sm:$0x3] }
 0x389   :  { %v657_v34 = vmul.f32 %v656_v61, %v6101_v22  ;;  %v693_v35 = vmul.f32 3.8918573e-05, %v6112_v28  ;;  %v682_v38 = vmul.f32 2.1237322e-06, %v6112_v28  ;;  %v646_v4 = vmul.f32 %v645_v57, %v6101_v22 }
 0x38a   :  { %v6115_v53 = vpop.f32.mrf.mxu1 }
 0x38b   :  { %v658_v37 = vadd.f32 0.112945676, %v657_v34  ;;  %v6121_v13 = vmul.f32 0.70710677, %v6115_v53  ;;  %v694_v39 = vadd.f32 0.001143296, %v693_v35 }
 0x38c   :  { %v683_v48 = vadd.f32 0.00028619796, %v682_v38  ;;  %v647_v27 = vadd.f32 0.05243302, %v646_v4 }
 0x38d   :  { %v659_v40 = vmul.f32 %v658_v37, %v6101_v22  ;;  %v720_v41 = vmul.f32 %v6121_v13, %v6121_v13  ;;  %v695_v44 = vmul.f32 %v694_v39, %v6112_v28 }
 0x38e   :  { %v684_v62 = vmul.f32 %v683_v48, %v6112_v28  ;;  %v648_v37 = vmul.f32 %v647_v27, %v6101_v22 }
 0x38f   :  { %v660_v47 = vadd.f32 0.4994258, %v659_v40  ;;  %v6127_v29 = vmin.f32 %v720_v41, 16.0  ;;  %v696_v54 = vadd.f32 0.014752088, %v695_v44 }
 0x390   :  { %v685_v8 = vadd.f32 0.0036580483, %v684_v62 }
 0x391   :  { %v661_v56 = vmul.f32 %v660_v47, %v6101_v22  ;;  %v722_v58 = vmul.f32 2.1237322e-06, %v6127_v29  ;;  %v733_v59 = vmul.f32 3.8918573e-05, %v6127_v29  ;;  %v697_v63 = vmul.f32 %v696_v54, %v6112_v28 }
 0x392   :  { %v632_v60 = vpop.f32.mrf.mxu1  ;;  %v686_v15 = vmul.f32 %v685_v8, %v6112_v28  ;;  %v649_v47 = vadd.f32 0.18741608, %v648_v37 }
 0x393   :  { %v6135_v2 = vadd.f32 1.0, %v661_v56  ;;  %v723_v3 = vadd.f32 0.00028619796, %v722_v58  ;;  %v734_v5 = vadd.f32 0.001143296, %v733_v59  ;;  %v833_v60 = vpop.permute.xlu2 %832 }
 0x394   :  { %v698_v9 = vadd.f32 0.112945676, %v697_v63  ;;  %v687_v32 = vadd.f32 0.05243302, %v686_v15  ;;  %v650_v62 = vmul.f32 %v649_v47, %v6101_v22  ;;  %5417 = vmatmul.msk.bf16.vlgmr.msrb.gmra.mxu3 %vm150_vm2, %v833_v60 }
 0x395   :  { %v724_v6 = vmul.f32 %v723_v3, %v6127_v29  ;;  %v735_v7 = vmul.f32 %v734_v5, %v6127_v29  ;;  %5668 = vrcp.f32 %v6135_v2  ;;  %v6161_v3 = vand.u32 %v5387_v52, %v5886_v14 }
 0x396   :  { %v699_v51 = vmul.f32 %v698_v9, %v6112_v28  ;;  %v688_v38 = vmul.f32 %v687_v32, %v6112_v28  ;;  %v674_v5 = vand.u32 2147483648, %v6135_v2  ;;  %vm668_vm14 = vweird.f32 %v6135_v2 }
 0x397   :  { %v725_v10 = vadd.f32 0.0036580483, %v724_v6  ;;  %v736_v11 = vadd.f32 0.014752088, %v735_v7  ;;  %1165 = vmatpush.bf16.msra.mxu1 %v6161_v3  ;;  %v672_v4 = vand.u32 2147483647, %v6135_v2 }
 0x398   :  { %v700_v17 = vadd.f32 0.4994258, %v699_v51  ;;  %v689_v48 = vadd.f32 0.18741608, %v688_v38  ;;  %v651_v51 = vadd.f32 1.1283791, %v650_v62 }
 0x399   :  { %v737_v16 = vmul.f32 %v736_v11, %v6127_v29  ;;  %v726_v0 = vmul.f32 %v725_v10, %v6127_v29  ;;  %v1154_v11 = vpop.permute.xlu1 %1153  ;;  %vm673_vm7 = vcmp.eq.f32.partialorder %v672_v4, 8.507059e+37  ;;  %v634_v62 = vmul.f32 0.5, %v6094_v55 }
 0x39a   :  { %v701_v21 = vmul.f32 %v700_v17, %v6112_v28  ;;  %v690_v63 = vmul.f32 %v689_v48, %v6112_v28  ;;  %5428 = vmatmul.msk.bf16.vlgmr.msra.gmra.mxu1 %vm150_vm2, %v1154_v11  ;;  %v652_v37 = vmul.f32 %v651_v51, %v6097_v50  ;;  %v635_v50 = vmul.f32 0.5, %v6104_v26  ;;  %v859_v26 = vpop.f32.mrf.mxu0 }
 0x39b   :  { %v738_v18 = vadd.f32 0.112945676, %v737_v16  ;;  %v6146_v24 = vpop.eup %5668  ;;  %v727_v35 = vadd.f32 0.05243302, %v726_v0 }
 0x39c   :  { %v702_v61 = vadd.f32 1.0, %v701_v21  ;;  %v664_v34 = vmul.f32 %v6146_v24, %v6135_v2  ;;  %vm669_vm12 = vweird.f32 %v6146_v24  ;;  %v691_v15 = vadd.f32 1.1283791, %v690_v63 }
 0x39d   :  { %v739_v33 = vmul.f32 %v738_v18, %v6127_v29  ;;  %v728_v41 = vmul.f32 %v727_v35, %v6127_v29  ;;  %vm6171_vm3 = vmor %vm668_vm14, %vm669_vm12 }
 0x39e   :  { %5670 = vrcp.f32 %v702_v61  ;;  %v665_v40 = vsub.f32 1.0, %v664_v34  ;;  %v714_v7 = vand.u32 2147483648, %v702_v61  ;;  %v712_v22 = vand.u32 2147483647, %v702_v61 }
 0x39f   :  { %v740_v36 = vadd.f32 0.4994258, %v739_v33  ;;  %v729_v58 = vadd.f32 0.18741608, %v728_v41  ;;  %vm708_vm13 = vweird.f32 %v702_v61  ;;  %v692_v34 = vmul.f32 %v691_v15, %v6107_v30 }
 0x3a0   :  { %v666_v56 = vmul.f32 %v6146_v24, %v665_v40  ;;  %v715_v18 = vor.u32 1.1754944e-38, %v714_v7  ;;  %vm713_vm4 = vcmp.eq.f32.partialorder %v712_v22, 8.507059e+37  ;;  %v636_v30 = vmul.f32 0.5, %v6115_v53  ;;  %v867_v53 = vpop.permute.xlu0 %866 }
 0x3a1   :  { %v741_v39 = vmul.f32 %v740_v36, %v6127_v29  ;;  %v730_v9 = vmul.f32 %v729_v58, %v6127_v29  ;;  %v675_v29 = vor.u32 1.1754944e-38, %v674_v5 }
 0x3a2   :  { %v667_v8 = vadd.f32 %v6146_v24, %v666_v56 }
 0x3a3   :  { %v742_v44 = vadd.f32 1.0, %v741_v39  ;;  %v731_v27 = vadd.f32 1.1283791, %v730_v9 }
 0x3a4   :  { %v5671_v45 = vpop.eup %5670  ;;  %v671_v21 = vsel %vm6171_vm3, %v6146_v24, %v667_v8 }
 0x3a5   :  { %5672 = vrcp.f32 %v742_v44  ;;  %v704_v54 = vmul.f32 %v5671_v45, %v702_v61  ;;  %vm709_vm11 = vweird.f32 %v5671_v45  ;;  %v754_v32 = vand.u32 2147483648, %v742_v44 }
 0x3a6   :  { %vm710_vm15 = vmor %vm708_vm13, %vm709_vm11  ;;  %v752_v33 = vand.u32 2147483647, %v742_v44  ;;  %v676_v35 = vsel %vm673_vm7, %v675_v29, %v671_v21  ;;  %vm748_vm8 = vweird.f32 %v742_v44  ;;  %v732_v24 = vmul.f32 %v731_v27, %v6121_v13 }
 0x3a7   :  { %v705_v59 = vsub.f32 1.0, %v704_v54  ;;  %v755_v38 = vor.u32 1.1754944e-38, %v754_v32  ;;  %v677_v41 = vmul.f32 %v676_v35, %v652_v37 }
 0x3a8   :  { %vm753_vm10 = vcmp.eq.f32.partialorder %v752_v33, 8.507059e+37 }
 0x3a9   :  { %v706_v6 = vmul.f32 %v5671_v45, %v705_v59  ;;  %v5412_v56 = vclamps-f32 %v677_v41, 1.0 }
 0x3ab   :  { %v5673_v57 = vpop.eup %5672  ;;  %v707_v10 = vadd.f32 %v5671_v45, %v706_v6  ;;  %v760_v60 = vadd.f32 1.0, %v5412_v56 }
 0x3ac   :  { %v744_v28 = vmul.f32 %v5673_v57, %v742_v44  ;;  %vm749_vm5 = vweird.f32 %v5673_v57 }
 0x3ad   :  { %v711_v0 = vsel %vm710_vm15, %v5671_v45, %v707_v10  ;;  %vm750_vm9 = vmor %vm748_vm8, %vm749_vm5  ;;  %v763_v5 = vmul.f32 %v760_v60, %v634_v62 }
 0x3ae   :  { %v745_v17 = vsub.f32 1.0, %v744_v28  ;;  %v716_v61 = vsel %vm713_vm4, %v715_v18, %v711_v0 }
 0x3af   :  { %v717_v39 = vmul.f32 %v716_v61, %v692_v34 }
 0x3b0   :  { %v746_v2 = vmul.f32 %v5673_v57, %v745_v17 }
 0x3b1   :  { %v5413_v48 = vclamps-f32 %v717_v39, 1.0 }
 0x3b2   :  { %v747_v36 = vadd.f32 %v5673_v57, %v746_v2 }
 0x3b3   :  { %v761_v59 = vadd.f32 1.0, %v5413_v48 }
 0x3b4   :  { %v751_v40 = vsel %vm750_vm9, %v5673_v57, %v747_v36  ;;  %v861_v57 = vpop.f32.mrf.mxu0 }
 0x3b5   :  { %v756_v45 = vsel %vm753_vm10, %v755_v38, %v751_v40  ;;  %v764_v13 = vmul.f32 %v761_v59, %v635_v50 }
 0x3b6   :  { %v757_v47 = vmul.f32 %v756_v45, %v732_v24 }
 0x3b7   :  { %v766_v6 = vpack.c.bf16 %v764_v13, %v763_v5 }
 0x3b8   :  { %v5414_v54 = vclamps-f32 %v757_v47, 1.0 }
 0x3ba   :  { %v762_v58 = vadd.f32 1.0, %v5414_v54 }
 0x3bc   :  { %v765_v44 = vmul.f32 %v762_v58, %v636_v30 }
 0x3be   :  { %v767_v52 = vpack.c.bf16 %v765_v44, %v765_v44 }
 0x3c0   :  { %v769_v63 = vsel %vm154_vm0, %v767_v52, 0 }
 0x3c1   :  { %777 = vmatpush.bf16.msrb.mxu2 %v769_v63 }
 0x3c5   :  { %778 = vmatpush.bf16.msrb.mxu2 %v766_v6 }
 0x3c8   :  { %5415 = vmatmul.msk.bf16.vlgmr.msrb.gmra.mxu2 %vm443_vm6, %v6077_v19 }
 0x3c9   :  { %881 = vmatpush.bf16.msra.mxu2 %v6161_v3 }
 0x3cd   :  { %1178 = vmatpush.bf16.msrb.mxu2 %v6049_v23 }
 0x3d8   :  { %5419 = vmatmul.msk.bf16.vlgmr.msra.gmra.mxu2 %vm150_vm2, %v867_v53 }
 0x3e8   :  { %5429 = vmatmul.msk.bf16.vlgmr.msrb.gmra.mxu2 %vm150_vm2, %v5864_v1 }
 0x417   :  { %v846_v55 = vpop.f32.mrf.mxu3 }
 0x418   :  { %v860_v22 = vadd.f32 %v859_v26, %v846_v55 }
 0x41f   :  { %v848_v7 = vpop.f32.mrf.mxu3 }
 0x44b   :  { %v6193_v8 = vpop.f32.mrf.mxu2 }
 0x453   :  { %v782_v9 = vpop.f32.mrf.mxu2 }
 0x45b   :  { %v883_v28 = vpop.f32.mrf.mxu2 }
 0x45c   :  { %v887_v10 = vadd.f32 %v883_v28, %v860_v22 }
 0x45e   :  { %v888_v11 = vadd.f32 %v887_v10, %v5946_v43 }
 0x460   :  { %v890_v51 = vmul.f32 0.70710677, %v888_v11  ;;  %v889_v13 = vmul.f32 0.5, %v888_v11 }
 0x462   :  { %v891_v23 = vmul.f32 %v890_v51, %v890_v51 }
 0x463   :  { %v885_v4 = vpop.f32.mrf.mxu2 }
 0x464   :  { %v892_v15 = vmin.f32 %v891_v23, 16.0 }
 0x466   :  { %v893_v16 = vmul.f32 2.1237322e-06, %v892_v15  ;;  %v904_v29 = vmul.f32 3.8918573e-05, %v892_v15 }
 0x468   :  { %v894_v17 = vadd.f32 0.00028619796, %v893_v16  ;;  %v905_v0 = vadd.f32 0.001143296, %v904_v29 }
 0x46a   :  { %v895_v18 = vmul.f32 %v894_v17, %v892_v15  ;;  %v906_v21 = vmul.f32 %v905_v0, %v892_v15 }
 0x46c   :  { %v907_v27 = vadd.f32 0.014752088, %v906_v21  ;;  %v896_v32 = vadd.f32 0.0036580483, %v895_v18 }
 0x46e   :  { %v908_v2 = vmul.f32 %v907_v27, %v892_v15  ;;  %v897_v61 = vmul.f32 %v896_v32, %v892_v15 }
 0x470   :  { %v909_v33 = vadd.f32 0.112945676, %v908_v2  ;;  %v898_v36 = vadd.f32 0.05243302, %v897_v61 }
 0x472   :  { %v910_v34 = vmul.f32 %v909_v33, %v892_v15  ;;  %v899_v39 = vmul.f32 %v898_v36, %v892_v15 }
 0x474   :  { %v911_v35 = vadd.f32 0.4994258, %v910_v34  ;;  %v900_v24 = vadd.f32 0.18741608, %v899_v39 }
 0x476   :  { %v912_v37 = vmul.f32 %v911_v35, %v892_v15  ;;  %v901_v41 = vmul.f32 %v900_v24, %v892_v15 }
 0x478   :  { %v913_v38 = vadd.f32 1.0, %v912_v37  ;;  %v902_v54 = vadd.f32 1.1283791, %v901_v41 }
 0x47a   :  { %5674 = vrcp.f32 %v913_v38  ;;  %v925_v48 = vand.u32 2147483648, %v913_v38  ;;  %v923_v30 = vand.u32 2147483647, %v913_v38  ;;  %vm919_vm12 = vweird.f32 %v913_v38 }
 0x47b   :  { %v903_v44 = vmul.f32 %v902_v54, %v890_v51 }
 0x47c   :  { %v926_v59 = vor.u32 1.1754944e-38, %v925_v48  ;;  %vm924_vm14 = vcmp.eq.f32.partialorder %v923_v30, 8.507059e+37 }
 0x480   :  { %v5675_v40 = vpop.eup %5674 }
 0x481   :  { %v915_v45 = vmul.f32 %v5675_v40, %v913_v38  ;;  %vm920_vm11 = vweird.f32 %v5675_v40 }
 0x482   :  { %vm921_vm13 = vmor %vm919_vm12, %vm920_vm11 }
 0x483   :  { %v916_v47 = vsub.f32 1.0, %v915_v45 }
 0x485   :  { %v917_v56 = vmul.f32 %v5675_v40, %v916_v47 }
 0x487   :  { %v918_v58 = vadd.f32 %v5675_v40, %v917_v56 }
 0x489   :  { %v922_v50 = vsel %vm921_vm13, %v5675_v40, %v918_v58 }
 0x48a   :  { %v927_v60 = vsel %vm924_vm14, %v926_v59, %v922_v50 }
 0x48b   :  { %v928_v52 = vmul.f32 %v927_v60, %v903_v44 }
 0x48d   :  { %v5420_v62 = vclamps-f32 %v928_v52, 1.0 }
 0x48f   :  { %v931_v63 = vadd.f32 1.0, %v5420_v62 }
 0x491   :  { %v932_v5 = vmul.f32 %v931_v63, %v889_v13 }
 0x493   :  { %v933_v6 = vpack.c.bf16 %v932_v5, %v932_v5 }
 0x495   :  { %v935_v53 = vand.u32 %v933_v6, %v5886_v14 }
 0x497   :  { %944 = vmatpush.bf16.msra.mxu3 %v935_v53 }
 0x49a   :  { %5421 = vmatmul.msk.bf16.vlgmr.msra.gmra.mxu3 %vm150_vm2, %v5979_v46 }
 0x4aa   :  { %5422 = vmatmul.msk.bf16.gmra.mxu3 %vm150_vm2, %v5984_v49 }
 0x51d   :  { %v6201_v55 = vpop.f32.mrf.mxu3 }
 0x51e   :  { %v6204_v26 = vmul.f32 0.70710677, %v6201_v55 }
 0x520   :  { %v961_v7 = vmul.f32 %v6204_v26, %v6204_v26 }
 0x522   :  { %v6208_v57 = vmin.f32 %v961_v7, 16.0 }
 0x524   :  { %v974_v9 = vmul.f32 3.8918573e-05, %v6208_v57  ;;  %v963_v2 = vmul.f32 2.1237322e-06, %v6208_v57 }
 0x525   :  { %v6211_v22 = vpop.f32.mrf.mxu3 }
 0x526   :  { %v975_v28 = vadd.f32 0.001143296, %v974_v9  ;;  %v6214_v46 = vmul.f32 0.70710677, %v6211_v22  ;;  %v964_v39 = vadd.f32 0.00028619796, %v963_v2 }
 0x528   :  { %v976_v10 = vmul.f32 %v975_v28, %v6208_v57  ;;  %v1001_v11 = vmul.f32 %v6214_v46, %v6214_v46  ;;  %v965_v54 = vmul.f32 %v964_v39, %v6208_v57 }
 0x52a   :  { %v977_v51 = vadd.f32 0.014752088, %v976_v10  ;;  %v6219_v23 = vmin.f32 %v1001_v11, 16.0  ;;  %v966_v52 = vadd.f32 0.0036580483, %v965_v54 }
 0x52c   :  { %v978_v4 = vmul.f32 %v977_v51, %v6208_v57  ;;  %v1014_v15 = vmul.f32 3.8918573e-05, %v6219_v23  ;;  %v1003_v21 = vmul.f32 2.1237322e-06, %v6219_v23  ;;  %v967_v53 = vmul.f32 %v966_v52, %v6208_v57 }
 0x52d   :  { %v6223_v16 = vpop.f32.mrf.mxu3 }
 0x52e   :  { %v979_v29 = vadd.f32 0.112945676, %v978_v4  ;;  %v1015_v17 = vadd.f32 0.001143296, %v1014_v15  ;;  %v6226_v0 = vmul.f32 0.70710677, %v6223_v16 }
 0x52f   :  { %v1004_v35 = vadd.f32 0.00028619796, %v1003_v21  ;;  %v968_v51 = vadd.f32 0.05243302, %v967_v53 }
 0x530   :  { %v980_v18 = vmul.f32 %v979_v29, %v6208_v57  ;;  %v1016_v27 = vmul.f32 %v1015_v17, %v6219_v23  ;;  %v1041_v32 = vmul.f32 %v6226_v0, %v6226_v0 }
 0x531   :  { %v1005_v47 = vmul.f32 %v1004_v35, %v6219_v23 }
 0x532   :  { %v981_v33 = vadd.f32 0.4994258, %v980_v18  ;;  %v1017_v61 = vadd.f32 0.014752088, %v1016_v27  ;;  %v6234_v34 = vmin.f32 %v1041_v32, 16.0  ;;  %v969_v32 = vmul.f32 %v968_v51, %v6208_v57 }
 0x533   :  { %v1006_v50 = vadd.f32 0.0036580483, %v1005_v47 }
 0x534   :  { %v1018_v36 = vmul.f32 %v1017_v61, %v6219_v23  ;;  %v1043_v37 = vmul.f32 2.1237322e-06, %v6234_v34  ;;  %v982_v24 = vmul.f32 %v981_v33, %v6208_v57  ;;  %v1054_v40 = vmul.f32 3.8918573e-05, %v6234_v34 }
 0x535   :  { %v953_v38 = vpop.f32.mrf.mxu3  ;;  %v1007_v6 = vmul.f32 %v1006_v50, %v6219_v23 }
 0x536   :  { %v1019_v41 = vadd.f32 0.112945676, %v1018_v36  ;;  %v1044_v45 = vadd.f32 0.00028619796, %v1043_v37  ;;  %v6243_v56 = vadd.f32 1.0, %v982_v24 }
 0x537   :  { %v1055_v30 = vadd.f32 0.001143296, %v1054_v40  ;;  %v1008_v11 = vadd.f32 0.05243302, %v1007_v6  ;;  %v970_v38 = vadd.f32 0.18741608, %v969_v32 }
 0x538   :  { %v1020_v48 = vmul.f32 %v1019_v41, %v6219_v23  ;;  %v1045_v59 = vmul.f32 %v1044_v45, %v6234_v34  ;;  %5676 = vrcp.f32 %v6243_v56  ;;  %v5388_v40 = vld [vmem:[%s5879_s15 + $0xa] sm:$0x3]  ;;  %v995_v54 = vand.u32 2147483648, %v6243_v56 }
 0x539   :  { %v1056_v44 = vmul.f32 %v1055_v30, %v6234_v34  ;;  %v1009_v21 = vmul.f32 %v1008_v11, %v6219_v23  ;;  %v6262_v47 = vand.u32 %v5388_v40, %v5886_v14  ;;  %vm989_vm7 = vweird.f32 %v6243_v56 }
 0x53a   :  { %v1021_v58 = vadd.f32 0.4994258, %v1020_v48  ;;  %v1046_v63 = vadd.f32 0.0036580483, %v1045_v59  ;;  %v971_v48 = vmul.f32 %v970_v38, %v6208_v57  ;;  %v993_v57 = vand.u32 2147483647, %v6243_v56 }
 0x53b   :  { %v1057_v62 = vadd.f32 0.014752088, %v1056_v44  ;;  %v1010_v36 = vadd.f32 0.18741608, %v1009_v21  ;;  %1486 = vmatpush.bf16.msrb.mxu3 %v6262_v47 }
 0x53c   :  { %v1022_v60 = vmul.f32 %v1021_v58, %v6219_v23  ;;  %v1047_v9 = vmul.f32 %v1046_v63, %v6234_v34  ;;  %v972_v63 = vadd.f32 1.1283791, %v971_v48  ;;  %vm994_vm11 = vcmp.eq.f32.partialorder %v993_v57, 8.507059e+37 }
 0x53d   :  { %v1058_v5 = vmul.f32 %v1057_v62, %v6234_v34  ;;  %v1011_v41 = vmul.f32 %v1010_v36, %v6219_v23 }
 0x53e   :  { %v1023_v13 = vadd.f32 1.0, %v1022_v60  ;;  %v5677_v28 = vpop.eup %5676  ;;  %v1048_v17 = vadd.f32 0.05243302, %v1047_v9 }
 0x53f   :  { %v1059_v7 = vadd.f32 0.112945676, %v1058_v5  ;;  %v985_v29 = vmul.f32 %v5677_v28, %v6243_v56  ;;  %vm990_vm3 = vweird.f32 %v5677_v28  ;;  %v1012_v52 = vadd.f32 1.1283791, %v1011_v41 }
 0x540   :  { %5678 = vrcp.f32 %v1023_v13  ;;  %v1049_v61 = vmul.f32 %v1048_v17, %v6234_v34  ;;  %v1035_v30 = vand.u32 2147483648, %v1023_v13  ;;  %vm1029_vm4 = vweird.f32 %v1023_v13  ;;  %vm991_vm8 = vmor %vm989_vm7, %vm990_vm3 }
 0x541   :  { %v1060_v10 = vmul.f32 %v1059_v7, %v6234_v34  ;;  %v986_v33 = vsub.f32 1.0, %v985_v29  ;;  %v1033_v44 = vand.u32 2147483647, %v1023_v13  ;;  %v1013_v56 = vmul.f32 %v1012_v52, %v6214_v46 }
 0x542   :  { %v1050_v24 = vadd.f32 0.18741608, %v1049_v61  ;;  %v957_v46 = vmul.f32 0.5, %v6223_v16  ;;  %v1188_v16 = vpop.permute.xlu2 %1187 }
 0x543   :  { %v1061_v4 = vadd.f32 0.4994258, %v1060_v10  ;;  %v987_v39 = vmul.f32 %v5677_v28, %v986_v33  ;;  %vm1034_vm9 = vcmp.eq.f32.partialorder %v1033_v44, 8.507059e+37 }
 0x544   :  { %v1051_v50 = vmul.f32 %v1050_v24, %v6234_v34  ;;  %v955_v24 = vmul.f32 0.5, %v6201_v55  ;;  %v1167_v55 = vpop.f32.mrf.mxu1 }
 0x545   :  { %v1062_v27 = vmul.f32 %v1061_v4, %v6234_v34  ;;  %v988_v59 = vadd.f32 %v5677_v28, %v987_v39  ;;  %v1036_v34 = vor.u32 1.1754944e-38, %v1035_v30 }
 0x546   :  { %v5679_v15 = vpop.eup %5678  ;;  %v1052_v53 = vadd.f32 1.1283791, %v1051_v50 }
 0x547   :  { %v1025_v18 = vmul.f32 %v5679_v15, %v1023_v13  ;;  %v1063_v35 = vadd.f32 1.0, %v1062_v27  ;;  %vm1030_vm15 = vweird.f32 %v5679_v15  ;;  %v996_v13 = vor.u32 1.1754944e-38, %v995_v54 }
 0x548   :  { %vm6268_vm5 = vmor %vm1029_vm4, %vm1030_vm15  ;;  %v992_v6 = vsel %vm991_vm8, %v5677_v28, %v988_v59  ;;  %v1053_v28 = vmul.f32 %v1052_v53, %v6226_v0 }
 0x549   :  { %v1026_v2 = vsub.f32 1.0, %v1025_v18  ;;  %5680 = vrcp.f32 %v1063_v35  ;;  %v1075_v7 = vand.u32 2147483648, %v1063_v35  ;;  %v1073_v11 = vand.u32 2147483647, %v1063_v35 }
 0x54a   :  { %v997_v51 = vsel %vm994_vm11, %v996_v13, %v992_v6  ;;  %vm1069_vm12 = vweird.f32 %v1063_v35 }
 0x54b   :  { %v1027_v37 = vmul.f32 %v5679_v15, %v1026_v2  ;;  %v1076_v17 = vor.u32 1.1754944e-38, %v1075_v7  ;;  %vm1074_vm14 = vcmp.eq.f32.partialorder %v1073_v11, 8.507059e+37 }
 0x54c   :  { %v1169_v48 = vpop.f32.mrf.mxu1 }
 0x54d   :  { %v1028_v45 = vadd.f32 %v5679_v15, %v1027_v37 }
 0x54f   :  { %v5681_v58 = vpop.eup %5680  ;;  %v1032_v62 = vsel %vm6268_vm5, %v5679_v15, %v1028_v45  ;;  %v973_v15 = vmul.f32 %v972_v63, %v6204_v26  ;;  %v956_v26 = vmul.f32 0.5, %v6211_v22  ;;  %v1180_v22 = vpop.f32.mrf.mxu2 }
 0x550   :  { %v1065_v60 = vmul.f32 %v5681_v58, %v1063_v35  ;;  %v1037_v9 = vsel %vm1034_vm9, %v1036_v34, %v1032_v62  ;;  %vm1070_vm10 = vweird.f32 %v5681_v58  ;;  %v1181_v59 = vadd.f32 %v1180_v22, %v1167_v55 }
 0x551   :  { %v1038_v29 = vmul.f32 %v1037_v9, %v1013_v56  ;;  %vm1071_vm13 = vmor %vm1069_vm12, %vm1070_vm10  ;;  %v998_v21 = vmul.f32 %v997_v51, %v973_v15 }
 0x552   :  { %v1066_v5 = vsub.f32 1.0, %v1065_v60 }
 0x553   :  { %v5424_v2 = vclamps-f32 %v1038_v29, 1.0  ;;  %v5423_v61 = vclamps-f32 %v998_v21, 1.0 }
 0x554   :  { %v1067_v10 = vmul.f32 %v5681_v58, %v1066_v5 }
 0x555   :  { %v1082_v37 = vadd.f32 1.0, %v5424_v2  ;;  %v1081_v38 = vadd.f32 1.0, %v5423_v61 }
 0x556   :  { %v1068_v4 = vadd.f32 %v5681_v58, %v1067_v10 }
 0x557   :  { %v1085_v0 = vmul.f32 %v1082_v37, %v956_v26  ;;  %v1084_v41 = vmul.f32 %v1081_v38, %v955_v24  ;;  %v1182_v54 = vpop.f32.mrf.mxu2 }
 0x558   :  { %v1072_v18 = vsel %vm1071_vm13, %v5681_v58, %v1068_v4 }
 0x559   :  { %v1077_v27 = vsel %vm1074_vm14, %v1076_v17, %v1072_v18  ;;  %v1087_v45 = vpack.c.bf16 %v1085_v0, %v1084_v41 }
 0x55a   :  { %v1078_v32 = vmul.f32 %v1077_v27, %v1053_v28 }
 0x55c   :  { %v5425_v33 = vclamps-f32 %v1078_v32, 1.0 }
 0x55e   :  { %v1083_v36 = vadd.f32 1.0, %v5425_v33 }
 0x560   :  { %v1086_v35 = vmul.f32 %v1083_v36, %v957_v46 }
 0x562   :  { %v1088_v39 = vpack.c.bf16 %v1086_v35, %v1086_v35 }
 0x564   :  { %v1090_v40 = vsel %vm154_vm0, %v1088_v39, 0 }
 0x565   :  { %1098 = vmatpush.bf16.msra.mxu0 %v1090_v40 }
 0x569   :  { %1099 = vmatpush.bf16.msra.mxu0 %v1087_v45 }
 0x56c   :  { %5426 = vmatmul.msk.bf16.vlgmr.msra.gmra.mxu0 %vm443_vm6, %v6077_v19 }
 0x56d   :  { %1202 = vmatpush.bf16.msrb.mxu0 %v6262_v47 }
 0x571   :  { %1499 = vmatpush.bf16.msra.mxu0 %v6161_v3 }
 0x57c   :  { %5430 = vmatmul.msk.bf16.vlgmr.msrb.gmra.mxu0 %vm150_vm2, %v1188_v16  ;;  %v6296_v16 = vld [vmem:[%s5975_s26] sm:$0xff] }
 0x58c   :  { %5440 = vmatmul.msk.bf16.vlgmr.msra.gmra.mxu0 %vm150_vm2, %v5864_v1 }
 0x5e9   :  { %v6291_v30 = vpop.f32.mrf.mxu0 }
 0x5f1   :  { %v1103_v58 = vpop.f32.mrf.mxu0 }
 0x5f9   :  { %v1204_v44 = vpop.f32.mrf.mxu0 }
 0x5fa   :  { %v1208_v50 = vadd.f32 %v1204_v44, %v1181_v59 }
 0x5fc   :  { %v1209_v19 = vadd.f32 %v1208_v50, %v5946_v43 }
 0x5fe   :  { %v1211_v23 = vmul.f32 0.70710677, %v1209_v19  ;;  %v1210_v24 = vmul.f32 0.5, %v1209_v19 }
 0x600   :  { %v1212_v3 = vmul.f32 %v1211_v23, %v1211_v23 }
 0x601   :  { %v1206_v60 = vpop.f32.mrf.mxu0 }
 0x602   :  { %v1213_v57 = vmin.f32 %v1212_v3, 16.0 }
 0x604   :  { %v1214_v52 = vmul.f32 2.1237322e-06, %v1213_v57  ;;  %v1225_v62 = vmul.f32 3.8918573e-05, %v1213_v57 }
 0x606   :  { %v1215_v63 = vadd.f32 0.00028619796, %v1214_v52  ;;  %v1226_v13 = vadd.f32 0.001143296, %v1225_v62 }
 0x608   :  { %v1216_v34 = vmul.f32 %v1215_v63, %v1213_v57  ;;  %v1227_v5 = vmul.f32 %v1226_v13, %v1213_v57 }
 0x60a   :  { %v1228_v6 = vadd.f32 0.014752088, %v1227_v5  ;;  %v1217_v53 = vadd.f32 0.0036580483, %v1216_v34 }
 0x60c   :  { %v1229_v7 = vmul.f32 %v1228_v6, %v1213_v57  ;;  %v1218_v10 = vmul.f32 %v1217_v53, %v1213_v57 }
 0x60e   :  { %v1230_v9 = vadd.f32 0.112945676, %v1229_v7  ;;  %v1219_v51 = vadd.f32 0.05243302, %v1218_v10 }
 0x610   :  { %v1231_v11 = vmul.f32 %v1230_v9, %v1213_v57  ;;  %v1220_v29 = vmul.f32 %v1219_v51, %v1213_v57 }
 0x612   :  { %v1232_v56 = vadd.f32 0.4994258, %v1231_v11  ;;  %v1221_v17 = vadd.f32 0.18741608, %v1220_v29 }
 0x614   :  { %v1233_v4 = vmul.f32 %v1232_v56, %v1213_v57  ;;  %v1222_v18 = vmul.f32 %v1221_v17, %v1213_v57 }
 0x616   :  { %v1234_v15 = vadd.f32 1.0, %v1233_v4  ;;  %v1223_v2 = vadd.f32 1.1283791, %v1222_v18 }
 0x618   :  { %5682 = vrcp.f32 %v1234_v15  ;;  %v1246_v32 = vand.u32 2147483648, %v1234_v15  ;;  %v1244_v61 = vand.u32 2147483647, %v1234_v15  ;;  %vm1240_vm3 = vweird.f32 %v1234_v15 }
 0x619   :  { %v1224_v37 = vmul.f32 %v1223_v2, %v1211_v23 }
 0x61a   :  { %v1247_v36 = vor.u32 1.1754944e-38, %v1246_v32  ;;  %vm1245_vm5 = vcmp.eq.f32.partialorder %v1244_v61, 8.507059e+37 }
 0x61e   :  { %v5683_v28 = vpop.eup %5682 }
 0x61f   :  { %v1236_v21 = vmul.f32 %v5683_v28, %v1234_v15  ;;  %vm1241_vm15 = vweird.f32 %v5683_v28 }
 0x620   :  { %vm1242_vm4 = vmor %vm1240_vm3, %vm1241_vm15 }
 0x621   :  { %v1237_v27 = vsub.f32 1.0, %v1236_v21 }
 0x623   :  { %v1238_v33 = vmul.f32 %v5683_v28, %v1237_v27 }
 0x625   :  { %v1239_v46 = vadd.f32 %v5683_v28, %v1238_v33 }
 0x627   :  { %v1243_v35 = vsel %vm1242_vm4, %v5683_v28, %v1239_v46 }
 0x628   :  { %v1248_v38 = vsel %vm1245_vm5, %v1247_v36, %v1243_v35 }
 0x629   :  { %v1249_v26 = vmul.f32 %v1248_v38, %v1224_v37 }
 0x62b   :  { %v5431_v39 = vclamps-f32 %v1249_v26, 1.0 }
 0x62d   :  { %v1252_v0 = vadd.f32 1.0, %v5431_v39 }
 0x62f   :  { %v1253_v40 = vmul.f32 %v1252_v0, %v1210_v24 }
 0x631   :  { %v1254_v41 = vpack.c.bf16 %v1253_v40, %v1253_v40 }
 0x633   :  { %v1256_v45 = vand.u32 %v1254_v41, %v5886_v14 }
 0x635   :  { %1265 = vmatpush.bf16.msrb.mxu1 %v1256_v45 }
 0x638   :  { %5432 = vmatmul.msk.bf16.vlgmr.msrb.gmra.mxu1 %vm150_vm2, %v6296_v16 }
 0x648   :  { %5433 = vmatmul.msk.bf16.gmra.mxu1 %vm150_vm2, %v5984_v49 }
 0x6b5   :  { %v6302_v55 = vpop.f32.mrf.mxu1 }
 0x6b6   :  { %v6305_v22 = vmul.f32 0.70710677, %v6302_v55 }
 0x6b8   :  { %v1282_v48 = vmul.f32 %v6305_v22, %v6305_v22 }
 0x6ba   :  { %v6309_v54 = vmin.f32 %v1282_v48, 16.0 }
 0x6bc   :  { %v1295_v58 = vmul.f32 3.8918573e-05, %v6309_v54  ;;  %v1284_v9 = vmul.f32 2.1237322e-06, %v6309_v54 }
 0x6bd   :  { %v6312_v59 = vpop.f32.mrf.mxu1 }
 0x6be   :  { %v1296_v44 = vadd.f32 0.001143296, %v1295_v58  ;;  %v6315_v50 = vmul.f32 0.70710677, %v6312_v59  ;;  %v1285_v17 = vadd.f32 0.00028619796, %v1284_v9 }
 0x6c0   :  { %v1297_v19 = vmul.f32 %v1296_v44, %v6309_v54  ;;  %v1322_v23 = vmul.f32 %v6315_v50, %v6315_v50  ;;  %v1286_v33 = vmul.f32 %v1285_v17, %v6309_v54 }
 0x6c2   :  { %v1298_v3 = vadd.f32 0.014752088, %v1297_v19  ;;  %v6320_v60 = vmin.f32 %v1322_v23, 16.0  ;;  %v1287_v39 = vadd.f32 0.0036580483, %v1286_v33 }
 0x6c4   :  { %v1299_v57 = vmul.f32 %v1298_v3, %v6309_v54  ;;  %v1335_v52 = vmul.f32 3.8918573e-05, %v6320_v60  ;;  %v1324_v6 = vmul.f32 2.1237322e-06, %v6320_v60  ;;  %v1288_v48 = vmul.f32 %v1287_v39, %v6309_v54 }
 0x6c5   :  { %v6324_v62 = vpop.f32.mrf.mxu1 }
 0x6c6   :  { %v1300_v63 = vadd.f32 0.112945676, %v1299_v57  ;;  %v1336_v13 = vadd.f32 0.001143296, %v1335_v52  ;;  %v6327_v34 = vmul.f32 0.70710677, %v6324_v62 }
 0x6c7   :  { %v1325_v51 = vadd.f32 0.00028619796, %v1324_v6  ;;  %v1289_v57 = vadd.f32 0.05243302, %v1288_v48 }
 0x6c8   :  { %v1301_v5 = vmul.f32 %v1300_v63, %v6309_v54  ;;  %v1337_v53 = vmul.f32 %v1336_v13, %v6320_v60  ;;  %v1362_v7 = vmul.f32 %v6327_v34, %v6327_v34 }
 0x6c9   :  { %v1326_v32 = vmul.f32 %v1325_v51, %v6320_v60  ;;  %v1290_v9 = vmul.f32 %v1289_v57, %v6309_v54 }
 0x6ca   :  { %v1302_v10 = vadd.f32 0.4994258, %v1301_v5  ;;  %v1338_v11 = vadd.f32 0.014752088, %v1337_v53  ;;  %v6335_v56 = vmin.f32 %v1362_v7, 16.0 }
 0x6cb   :  { %v1327_v38 = vadd.f32 0.0036580483, %v1326_v32  ;;  %v1291_v17 = vadd.f32 0.18741608, %v1290_v9 }
 0x6cc   :  { %v1339_v4 = vmul.f32 %v1338_v11, %v6320_v60  ;;  %v1364_v15 = vmul.f32 2.1237322e-06, %v6335_v56  ;;  %v1303_v28 = vmul.f32 %v1302_v10, %v6309_v54  ;;  %v1375_v18 = vmul.f32 3.8918573e-05, %v6335_v56 }
 0x6cd   :  { %v1274_v29 = vpop.f32.mrf.mxu1  ;;  %v1328_v45 = vmul.f32 %v1327_v38, %v6320_v60 }
 0x6ce   :  { %v1340_v21 = vadd.f32 0.112945676, %v1339_v4  ;;  %v1365_v27 = vadd.f32 0.00028619796, %v1364_v15  ;;  %v6344_v61 = vadd.f32 1.0, %v1303_v28 }
 0x6cf   :  { %v1376_v46 = vadd.f32 0.001143296, %v1375_v18  ;;  %v1329_v3 = vadd.f32 0.05243302, %v1328_v45 }
 0x6d0   :  { %v1341_v2 = vmul.f32 %v1340_v21, %v6320_v60  ;;  %v1366_v37 = vmul.f32 %v1365_v27, %v6335_v56  ;;  %5684 = vrcp.f32 %v6344_v61  ;;  %v1475_v21 = vpop.permute.xlu0 %1474  ;;  %v5389_v27 = vld [vmem:[%s5879_s15 + $0xc] sm:$0x3]  ;;  %vm1310_vm11 = vweird.f32 %v6344_v61 }
 0x6d1   :  { %v1377_v35 = vmul.f32 %v1376_v46, %v6335_v56  ;;  %v1330_v53 = vmul.f32 %v1329_v3, %v6320_v60  ;;  %5439 = vmatmul.msk.bf16.vlgmr.msrb.gmra.mxu3 %vm150_vm2, %v1475_v21  ;;  %v1514_v33 = vand.u32 %v5389_v27, %v5886_v14  ;;  %v1292_v46 = vmul.f32 %v1291_v17, %v6309_v54 }
 0x6d2   :  { %v1342_v36 = vadd.f32 0.4994258, %v1341_v2  ;;  %v1367_v40 = vadd.f32 0.0036580483, %v1366_v37  ;;  %v1314_v54 = vand.u32 2147483647, %v6344_v61 }
 0x6d3   :  { %v1378_v24 = vadd.f32 0.014752088, %v1377_v35  ;;  %v1331_v15 = vadd.f32 0.18741608, %v1330_v53  ;;  %1807 = vmatpush.bf16.msra.mxu1 %v1514_v33  ;;  %v1293_v45 = vadd.f32 1.1283791, %v1292_v46 }
 0x6d4   :  { %v1343_v26 = vmul.f32 %v1342_v36, %v6320_v60  ;;  %v1368_v44 = vmul.f32 %v1367_v40, %v6335_v56  ;;  %v1316_v36 = vand.u32 2147483648, %v6344_v61  ;;  %vm1315_vm15 = vcmp.eq.f32.partialorder %v1314_v54, 8.507059e+37 }
 0x6d5   :  { %v1379_v41 = vmul.f32 %v1378_v24, %v6335_v56  ;;  %v1332_v32 = vmul.f32 %v1331_v15, %v6320_v60 }
 0x6d6   :  { %v1344_v0 = vadd.f32 1.0, %v1343_v26  ;;  %v5685_v19 = vpop.eup %5684  ;;  %v1369_v5 = vadd.f32 0.05243302, %v1368_v44 }
 0x6d7   :  { %v1380_v58 = vadd.f32 0.112945676, %v1379_v41  ;;  %v1306_v13 = vmul.f32 %v5685_v19, %v6344_v61  ;;  %vm1311_vm8 = vweird.f32 %v5685_v19  ;;  %v1333_v40 = vadd.f32 1.1283791, %v1332_v32 }
 0x6d8   :  { %5686 = vrcp.f32 %v1344_v0  ;;  %v1370_v51 = vmul.f32 %v1369_v5, %v6335_v56  ;;  %v1356_v37 = vand.u32 2147483648, %v1344_v0  ;;  %vm1350_vm9 = vweird.f32 %v1344_v0  ;;  %vm1312_vm12 = vmor %vm1310_vm11, %vm1311_vm8 }
 0x6d9   :  { %v1381_v23 = vmul.f32 %v1380_v58, %v6335_v56  ;;  %v1307_v11 = vsub.f32 1.0, %v1306_v13  ;;  %v1354_v26 = vand.u32 2147483647, %v1344_v0  ;;  %v1334_v61 = vmul.f32 %v1333_v40, %v6315_v50 }
 0x6da   :  { %v1371_v18 = vadd.f32 0.18741608, %v1370_v51  ;;  %v1357_v48 = vor.u32 1.1754944e-38, %v1356_v37  ;;  %v1278_v50 = vmul.f32 0.5, %v6324_v62  ;;  %v1509_v62 = vpop.permute.xlu1 %1508  ;;  %v1501_v37 = vpop.f32.mrf.mxu0 }
 0x6db   :  { %v1382_v52 = vadd.f32 0.4994258, %v1381_v23  ;;  %v1308_v28 = vmul.f32 %v5685_v19, %v1307_v11  ;;  %vm1355_vm13 = vcmp.eq.f32.partialorder %v1354_v26, 8.507059e+37 }
 0x6dc   :  { %v1372_v39 = vmul.f32 %v1371_v18, %v6335_v56  ;;  %v1277_v18 = vmul.f32 0.5, %v6312_v59 }
 0x6dd   :  { %v1383_v7 = vmul.f32 %v1382_v52, %v6335_v56  ;;  %v1309_v38 = vadd.f32 %v5685_v19, %v1308_v28 }
 0x6de   :  { %v5687_v63 = vpop.eup %5686  ;;  %v1373_v44 = vadd.f32 1.1283791, %v1372_v39 }
 0x6df   :  { %v1346_v6 = vmul.f32 %v5687_v63, %v1344_v0  ;;  %v1384_v4 = vadd.f32 1.0, %v1383_v7  ;;  %vm1351_vm7 = vweird.f32 %v5687_v63  ;;  %v1317_v0 = vor.u32 1.1754944e-38, %v1316_v36  ;;  %v6384_v36 = vld [vmem:[%s6072_s30] sm:$0x3] }
 0x6e0   :  { %vm6367_vm10 = vmor %vm1350_vm9, %vm1351_vm7  ;;  %v1313_v58 = vsel %vm1312_vm12, %v5685_v19, %v1309_v38  ;;  %v1374_v19 = vmul.f32 %v1373_v44, %v6327_v34  ;;  %v1276_v34 = vmul.f32 0.5, %v6302_v55  ;;  %v6393_v55 = vmul.f32 0.70710677, %v6291_v30 }
 0x6e1   :  { %v1347_v10 = vsub.f32 1.0, %v1346_v6  ;;  %5688 = vrcp.f32 %v1384_v4  ;;  %v1396_v23 = vand.u32 2147483648, %v1384_v4  ;;  %v1394_v52 = vand.u32 2147483647, %v1384_v4 }
 0x6e2   :  { %v1318_v13 = vsel %vm1315_vm15, %v1317_v0, %v1313_v58  ;;  %vm1390_vm3 = vweird.f32 %v1384_v4  ;;  %v1503_v26 = vpop.f32.mrf.mxu0 }
 0x6e3   :  { %v1348_v29 = vmul.f32 %v5687_v63, %v1347_v10  ;;  %v1397_v53 = vor.u32 1.1754944e-38, %v1396_v23  ;;  %vm1395_vm5 = vcmp.eq.f32.partialorder %v1394_v52, 8.507059e+37 }
 0x6e5   :  { %v1349_v2 = vadd.f32 %v5687_v63, %v1348_v29 }
 0x6e7   :  { %v5689_v35 = vpop.eup %5688  ;;  %v1353_v41 = vsel %vm6367_vm10, %v5687_v63, %v1349_v2  ;;  %v1294_v63 = vmul.f32 %v1293_v45, %v6305_v22 }
 0x6e8   :  { %v1386_v24 = vmul.f32 %v5689_v35, %v1384_v4  ;;  %v1358_v3 = vsel %vm1355_vm13, %v1357_v48, %v1353_v41  ;;  %vm1391_vm14 = vweird.f32 %v5689_v35 }
 0x6e9   :  { %v1359_v6 = vmul.f32 %v1358_v3, %v1334_v61  ;;  %vm1392_vm4 = vmor %vm1390_vm3, %vm1391_vm14  ;;  %v1319_v9 = vmul.f32 %v1318_v13, %v1294_v63 }
 0x6ea   :  { %v1387_v56 = vsub.f32 1.0, %v1386_v24 }
 0x6eb   :  { %v5435_v51 = vclamps-f32 %v1359_v6, 1.0  ;;  %v5434_v29 = vclamps-f32 %v1319_v9, 1.0 }
 0x6ec   :  { %v1388_v57 = vmul.f32 %v5689_v35, %v1387_v56 }
 0x6ed   :  { %v1403_v4 = vadd.f32 1.0, %v5435_v51  ;;  %v1402_v22 = vadd.f32 1.0, %v5434_v29 }
 0x6ee   :  { %v1389_v5 = vadd.f32 %v5689_v35, %v1388_v57 }
 0x6ef   :  { %v1406_v27 = vmul.f32 %v1403_v4, %v1277_v18  ;;  %v1405_v2 = vmul.f32 %v1402_v22, %v1276_v34 }
 0x6f0   :  { %v1393_v7 = vsel %vm1392_vm4, %v5689_v35, %v1389_v5 }
 0x6f1   :  { %v1398_v10 = vsel %vm1395_vm5, %v1397_v53, %v1393_v7  ;;  %v1408_v46 = vpack.c.bf16 %v1406_v27, %v1405_v2 }
 0x6f2   :  { %v1399_v11 = vmul.f32 %v1398_v10, %v1374_v19 }
 0x6f4   :  { %v5436_v15 = vclamps-f32 %v1399_v11, 1.0 }
 0x6f6   :  { %v1404_v17 = vadd.f32 1.0, %v5436_v15 }
 0x6f8   :  { %v1407_v28 = vmul.f32 %v1404_v17, %v1278_v50 }
 0x6fa   :  { %v1409_v21 = vpack.c.bf16 %v1407_v28, %v1407_v28 }
 0x6fc   :  { %v1411_v32 = vsel %vm154_vm0, %v1409_v21, 0 }
 0x6fd   :  { %1419 = vmatpush.bf16.msra.mxu2 %v1411_v32 }
 0x701   :  { %1420 = vmatpush.bf16.msra.mxu2 %v1408_v46 }
 0x704   :  { %5437 = vmatmul.msk.bf16.vlgmr.msra.gmra.mxu2 %vm443_vm6, %v6384_v36 }
 0x705   :  { %1523 = vmatpush.bf16.msrb.mxu2 %v1514_v33  ;;  %v1107_v33 = vmul.f32 %v6393_v55, %v6393_v55 }
 0x707   :  { %v1108_v35 = vmin.f32 %v1107_v33, 16.0 }
 0x709   :  { %1820 = vmatpush.bf16.msra.mxu2 %v6262_v47  ;;  %v1120_v39 = vmul.f32 3.8918573e-05, %v1108_v35  ;;  %v1109_v56 = vmul.f32 2.1237322e-06, %v1108_v35 }
 0x70b   :  { %v1121_v60 = vadd.f32 0.001143296, %v1120_v39  ;;  %v1110_v3 = vadd.f32 0.00028619796, %v1109_v56 }
 0x70d   :  { %v1122_v47 = vmul.f32 %v1121_v60, %v1108_v35  ;;  %v1111_v61 = vmul.f32 %v1110_v3, %v1108_v35 }
 0x70f   :  { %v1123_v24 = vadd.f32 0.014752088, %v1122_v47  ;;  %v1112_v6 = vadd.f32 0.0036580483, %v1111_v61 }
 0x711   :  { %v1124_v40 = vmul.f32 %v1123_v24, %v1108_v35  ;;  %v1113_v9 = vmul.f32 %v1112_v6, %v1108_v35 }
 0x713   :  { %v1125_v41 = vadd.f32 0.112945676, %v1124_v40  ;;  %v1114_v50 = vadd.f32 0.05243302, %v1113_v9 }
 0x714   :  { %5441 = vmatmul.msk.bf16.vlgmr.msrb.gmra.mxu2 %vm150_vm2, %v1509_v62 }
 0x715   :  { %v1126_v45 = vmul.f32 %v1125_v41, %v1108_v35  ;;  %v1115_v18 = vmul.f32 %v1114_v50, %v1108_v35 }
 0x717   :  { %v1127_v0 = vadd.f32 0.4994258, %v1126_v45  ;;  %v1116_v2 = vadd.f32 0.18741608, %v1115_v18 }
 0x719   :  { %v1128_v44 = vmul.f32 %v1127_v0, %v1108_v35  ;;  %v1117_v33 = vmul.f32 %v1116_v2, %v1108_v35 }
 0x71b   :  { %v1129_v52 = vadd.f32 1.0, %v1128_v44  ;;  %v1118_v24 = vadd.f32 1.1283791, %v1117_v33 }
 0x71d   :  { %5690 = vrcp.f32 %v1129_v52  ;;  %v1141_v39 = vand.u32 2147483648, %v1129_v52  ;;  %vm1135_vm8 = vweird.f32 %v1129_v52  ;;  %v1139_v47 = vand.u32 2147483647, %v1129_v52 }
 0x71f   :  { %v1142_v41 = vor.u32 1.1754944e-38, %v1141_v39  ;;  %vm1140_vm10 = vcmp.eq.f32.partialorder %v1139_v47, 8.507059e+37 }
 0x723   :  { %v5691_v51 = vpop.eup %5690 }
 0x724   :  { %5451 = vmatmul.msk.bf16.vlgmr.msra.gmra.mxu2 %vm150_vm2, %v5864_v1  ;;  %v1131_v17 = vmul.f32 %v5691_v51, %v1129_v52  ;;  %vm1136_vm7 = vweird.f32 %v5691_v51 }
 0x725   :  { %vm1137_vm9 = vmor %vm1135_vm8, %vm1136_vm7 }
 0x726   :  { %v1132_v21 = vsub.f32 1.0, %v1131_v17 }
 0x728   :  { %v1133_v46 = vmul.f32 %v5691_v51, %v1132_v21 }
 0x754   :  { %v1488_v59 = vpop.f32.mrf.mxu3 }
 0x755   :  { %v1502_v48 = vadd.f32 %v1501_v37, %v1488_v59 }
 0x75c   :  { %v1490_v38 = vpop.f32.mrf.mxu3 }
 0x75d   :  { %v1134_v38 = vadd.f32 %v5691_v51, %v1133_v46 }
 0x75f   :  { %v1138_v40 = vsel %vm1137_vm9, %v5691_v51, %v1134_v38 }
 0x760   :  { %v1143_v45 = vsel %vm1140_vm10, %v1142_v41, %v1138_v40 }
 0x787   :  { %v6397_v54 = vpop.f32.mrf.mxu2 }
 0x78f   :  { %v1424_v1 = vpop.f32.mrf.mxu2 }
 0x797   :  { %v1525_v58 = vpop.f32.mrf.mxu2 }
 0x798   :  { %v1529_v23 = vadd.f32 %v1525_v58, %v1502_v48  ;;  %v1119_v48 = vmul.f32 %v1118_v24, %v6393_v55 }
 0x79a   :  { %v6400_v57 = vadd.f32 %v1529_v23, %v5946_v43  ;;  %v1144_v58 = vmul.f32 %v1143_v45, %v1119_v48 }
 0x79c   :  { %v1532_v13 = vmul.f32 0.70710677, %v6400_v57 }
 0x79e   :  { %v1533_v5 = vmul.f32 %v1532_v13, %v1532_v13 }
 0x79f   :  { %v1527_v63 = vpop.f32.mrf.mxu2 }
 0x7a0   :  { %v1534_v53 = vmin.f32 %v1533_v5, 16.0  ;;  %v5427_v5 = vclamps-f32 %v1144_v58, 1.0 }
 0x7a2   :  { %v1535_v19 = vmul.f32 2.1237322e-06, %v1534_v53  ;;  %v1546_v7 = vmul.f32 3.8918573e-05, %v1534_v53  ;;  %v1147_v9 = vadd.f32 1.0, %v5427_v5 }
 0x7a4   :  { %v1536_v10 = vadd.f32 0.00028619796, %v1535_v19  ;;  %v1547_v11 = vadd.f32 0.001143296, %v1546_v7 }
 0x7a6   :  { %v1537_v15 = vmul.f32 %v1536_v10, %v1534_v53  ;;  %v1548_v29 = vmul.f32 %v1547_v11, %v1534_v53 }
 0x7a8   :  { %v1549_v4 = vadd.f32 0.014752088, %v1548_v29  ;;  %v1538_v28 = vadd.f32 0.0036580483, %v1537_v15  ;;  %v1531_v15 = vmul.f32 0.5, %v6400_v57 }
 0x7a9   :  { %v6414_v57 = vmul.f32 0.70710677, %v6086_v25 }
 0x7aa   :  { %v1550_v22 = vmul.f32 %v1549_v4, %v1534_v53  ;;  %v1539_v27 = vmul.f32 %v1538_v28, %v1534_v53 }
 0x7ac   :  { %v1551_v34 = vadd.f32 0.112945676, %v1550_v22  ;;  %v1540_v59 = vadd.f32 0.05243302, %v1539_v27 }
 0x7ae   :  { %v1552_v32 = vmul.f32 %v1551_v34, %v1534_v53  ;;  %v1541_v60 = vmul.f32 %v1540_v59, %v1534_v53 }
 0x7b0   :  { %v1553_v62 = vadd.f32 0.4994258, %v1552_v32  ;;  %v1542_v1 = vadd.f32 0.18741608, %v1541_v60 }
 0x7b2   :  { %v1554_v37 = vmul.f32 %v1553_v62, %v1534_v53  ;;  %v1543_v56 = vmul.f32 %v1542_v1, %v1534_v53  ;;  %v1105_v53 = vmul.f32 0.5, %v6291_v30  ;;  %v2120_v30 = vpop.permute.xlu1 %2119 }
 0x7b4   :  { %v1555_v26 = vadd.f32 1.0, %v1554_v37  ;;  %v1544_v3 = vadd.f32 1.1283791, %v1543_v56  ;;  %v1148_v51 = vmul.f32 %v1147_v9, %v1105_v53 }
 0x7b6   :  { %5692 = vrcp.f32 %v1555_v26  ;;  %v1567_v23 = vand.u32 2147483648, %v1555_v26  ;;  %v1565_v52 = vand.u32 2147483647, %v1555_v26  ;;  %vm1561_vm12 = vweird.f32 %v1555_v26 }
 0x7b7   :  { %v1545_v19 = vmul.f32 %v1544_v3, %v1532_v13  ;;  %v1149_v17 = vpack.c.bf16 %v1148_v51, %v1148_v51  ;;  %v465_v13 = vmul.f32 %v6414_v57, %v6414_v57 }
 0x7b8   :  { %v1568_v6 = vor.u32 1.1754944e-38, %v1567_v23  ;;  %vm1566_vm14 = vcmp.eq.f32.partialorder %v1565_v52, 8.507059e+37 }
 0x7b9   :  { %v2125_v22 = vand.u32 %v1149_v17, %v5886_v14  ;;  %v6418_v18 = vmin.f32 %v465_v13, 16.0 }
 0x7bb   :  { %v478_v21 = vmul.f32 3.8918573e-05, %v6418_v18 }
 0x7bc   :  { %v5693_v0 = vpop.eup %5692 }
 0x7bd   :  { %v1557_v35 = vmul.f32 %v5693_v0, %v1555_v26  ;;  %vm1562_vm11 = vweird.f32 %v5693_v0  ;;  %v479_v34 = vadd.f32 0.001143296, %v478_v21 }
 0x7be   :  { %vm1563_vm13 = vmor %vm1561_vm12, %vm1562_vm11 }
 0x7bf   :  { %v1558_v44 = vsub.f32 1.0, %v1557_v35  ;;  %v480_v27 = vmul.f32 %v479_v34, %v6418_v18 }
 0x7c1   :  { %v1559_v61 = vmul.f32 %v5693_v0, %v1558_v44  ;;  %v467_v44 = vmul.f32 2.1237322e-06, %v6418_v18 }
 0x7c3   :  { %v1560_v63 = vadd.f32 %v5693_v0, %v1559_v61  ;;  %v468_v9 = vadd.f32 0.00028619796, %v467_v44 }
 0x7c5   :  { %v1564_v7 = vsel %vm1563_vm13, %v5693_v0, %v1560_v63 }
 0x7c6   :  { %v1569_v10 = vsel %vm1566_vm14, %v1568_v6, %v1564_v7 }
 0x7c7   :  { %v1570_v55 = vmul.f32 %v1569_v10, %v1545_v19 }
 0x7c9   :  { %v5442_v11 = vclamps-f32 %v1570_v55, 1.0 }
 0x7cb   :  { %v1573_v29 = vadd.f32 1.0, %v5442_v11 }
 0x7cd   :  { %v1574_v50 = vmul.f32 %v1573_v29, %v1531_v15 }
 0x7cf   :  { %v1575_v4 = vpack.c.bf16 %v1574_v50, %v1574_v50 }
 0x7d1   :  { %v1577_v28 = vand.u32 %v1575_v4, %v5886_v14 }
 0x7d3   :  { %1586 = vmatpush.bf16.msra.mxu3 %v1577_v28  ;;  %v469_v28 = vmul.f32 %v468_v9, %v6418_v18 }
 0x7d6   :  { %5443 = vmatmul.msk.bf16.vlgmr.msra.gmra.mxu3 %vm150_vm2, %v6296_v16  ;;  %v481_v16 = vadd.f32 0.014752088, %v480_v27 }
 0x7d7   :  { %2134 = vmatpush.bf16.msrb.mxu3 %v2125_v22 }
 0x7d8   :  { %v482_v46 = vmul.f32 %v481_v16, %v6418_v18 }
 0x7da   :  { %v483_v37 = vadd.f32 0.112945676, %v482_v46  ;;  %v470_v46 = vadd.f32 0.0036580483, %v469_v28 }
 0x7dc   :  { %v484_v60 = vmul.f32 %v483_v37, %v6418_v18 }
 0x7de   :  { %v485_v1 = vadd.f32 0.4994258, %v484_v60 }
 0x7e0   :  { %v486_v23 = vmul.f32 %v485_v1, %v6418_v18  ;;  %v471_v1 = vmul.f32 %v470_v46, %v6418_v18 }
 0x7e2   :  { %v6461_v10 = vadd.f32 1.0, %v486_v23 }
 0x7e4   :  { %5694 = vrcp.f32 %v6461_v10  ;;  %vm493_vm3 = vweird.f32 %v6461_v10 }
 0x7e6   :  { %5444 = vmatmul.msk.bf16.gmra.mxu3 %vm150_vm2, %v5984_v49 }
 0x7f6   :  { %5461 = vmatmul.msk.bf16.vlgmr.msrb.gmra.mxu3 %vm150_vm2, %v2120_v30 }
 0x859   :  { %v6422_v32 = vpop.f32.mrf.mxu3 }
 0x85a   :  { %v6425_v2 = vmul.f32 0.70710677, %v6422_v32 }
 0x85c   :  { %v1603_v62 = vmul.f32 %v6425_v2, %v6425_v2 }
 0x85e   :  { %v6430_v59 = vmin.f32 %v1603_v62, 16.0 }
 0x860   :  { %v1616_v33 = vmul.f32 3.8918573e-05, %v6430_v59  ;;  %v1605_v63 = vmul.f32 2.1237322e-06, %v6430_v59 }
 0x861   :  { %v6433_v38 = vpop.f32.mrf.mxu3 }
 0x862   :  { %v1617_v26 = vadd.f32 0.001143296, %v1616_v33  ;;  %v6436_v39 = vmul.f32 0.70710677, %v6433_v38  ;;  %v1606_v15 = vadd.f32 0.00028619796, %v1605_v63 }
 0x864   :  { %v1618_v47 = vmul.f32 %v1617_v26, %v6430_v59  ;;  %v1643_v24 = vmul.f32 %v6436_v39, %v6436_v39  ;;  %v1607_v13 = vmul.f32 %v1606_v15, %v6430_v59  ;;  %v6477_v26 = vpop.eup %5694 }
 0x865   :  { %vm494_vm15 = vweird.f32 %v6477_v26 }
 0x866   :  { %v1619_v40 = vadd.f32 0.014752088, %v1618_v47  ;;  %v6442_v41 = vmin.f32 %v1643_v24, 16.0  ;;  %v1608_v60 = vadd.f32 0.0036580483, %v1607_v13  ;;  %vm6516_vm4 = vmor %vm493_vm3, %vm494_vm15 }
 0x868   :  { %v1620_v45 = vmul.f32 %v1619_v40, %v6430_v59  ;;  %v1656_v0 = vmul.f32 3.8918573e-05, %v6442_v41  ;;  %v1645_v61 = vmul.f32 2.1237322e-06, %v6442_v41 }
 0x869   :  { %v6446_v48 = vpop.f32.mrf.mxu3 }
 0x86a   :  { %v1621_v56 = vadd.f32 0.112945676, %v1620_v45  ;;  %v1657_v35 = vadd.f32 0.001143296, %v1656_v0  ;;  %v6449_v58 = vmul.f32 0.70710677, %v6446_v48  ;;  %v489_v0 = vmul.f32 %v6477_v26, %v6461_v10 }
 0x86b   :  { %v1646_v55 = vadd.f32 0.00028619796, %v1645_v61  ;;  %v472_v61 = vadd.f32 0.05243302, %v471_v1 }
 0x86c   :  { %v1622_v3 = vmul.f32 %v1621_v56, %v6430_v59  ;;  %v1658_v52 = vmul.f32 %v1657_v35, %v6442_v41  ;;  %v1683_v5 = vmul.f32 %v6449_v58, %v6449_v58  ;;  %v1609_v35 = vmul.f32 %v1608_v60, %v6430_v59 }
 0x86d   :  { %v1647_v22 = vmul.f32 %v1646_v55, %v6442_v41 }
 0x86e   :  { %v1623_v6 = vadd.f32 0.4994258, %v1622_v3  ;;  %v1659_v19 = vadd.f32 0.014752088, %v1658_v52  ;;  %v6459_v7 = vmin.f32 %v1683_v5, 16.0  ;;  %v490_v5 = vsub.f32 1.0, %v489_v0 }
 0x86f   :  { %v1648_v37 = vadd.f32 0.0036580483, %v1647_v22 }
 0x870   :  { %v1660_v53 = vmul.f32 %v1659_v19, %v6442_v41  ;;  %v1685_v11 = vmul.f32 2.1237322e-06, %v6459_v7  ;;  %v1624_v29 = vmul.f32 %v1623_v6, %v6430_v59  ;;  %v1696_v50 = vmul.f32 3.8918573e-05, %v6459_v7 }
 0x871   :  { %v1595_v51 = vpop.f32.mrf.mxu3  ;;  %v1649_v56 = vmul.f32 %v1648_v37, %v6442_v41  ;;  %v1610_v6 = vadd.f32 0.05243302, %v1609_v35  ;;  %v491_v15 = vmul.f32 %v6477_v26, %v490_v5 }
 0x872   :  { %v1661_v17 = vadd.f32 0.112945676, %v1660_v53  ;;  %v1686_v4 = vadd.f32 0.00028619796, %v1685_v11  ;;  %v6472_v21 = vadd.f32 1.0, %v1624_v29  ;;  %v473_v11 = vmul.f32 %v472_v61, %v6418_v18 }
 0x873   :  { %v1697_v34 = vadd.f32 0.001143296, %v1696_v50  ;;  %v1650_v63 = vadd.f32 0.05243302, %v1649_v56 }
 0x874   :  { %v1662_v30 = vmul.f32 %v1661_v17, %v6442_v41  ;;  %v1687_v16 = vmul.f32 %v1686_v4, %v6459_v7  ;;  %5696 = vrcp.f32 %v6472_v21  ;;  %v1611_v17 = vmul.f32 %v1610_v6, %v6430_v59 }
 0x875   :  { %v1698_v62 = vmul.f32 %v1697_v34, %v6459_v7  ;;  %v1651_v29 = vmul.f32 %v1650_v63, %v6442_v41  ;;  %v474_v13 = vadd.f32 0.18741608, %v473_v11  ;;  %v497_v34 = vand.u32 2147483647, %v6461_v10 }
 0x876   :  { %v1663_v27 = vadd.f32 0.4994258, %v1662_v30  ;;  %v1688_v40 = vadd.f32 0.0036580483, %v1687_v16  ;;  %v492_v16 = vadd.f32 %v6477_v26, %v491_v15  ;;  %v1612_v37 = vadd.f32 0.18741608, %v1611_v17 }
 0x877   :  { %v1699_v47 = vadd.f32 0.014752088, %v1698_v62  ;;  %v1652_v46 = vadd.f32 0.18741608, %v1651_v29  ;;  %vm6520_vm5 = vcmp.eq.f32.partialorder %v497_v34, 8.507059e+37  ;;  %vm1631_vm11 = vweird.f32 %v6472_v21 }
 0x878   :  { %v1664_v33 = vmul.f32 %v1663_v27, %v6442_v41  ;;  %v1689_v23 = vmul.f32 %v1688_v40, %v6459_v7  ;;  %v499_v27 = vand.u32 2147483648, %v6461_v10  ;;  %v496_v0 = vsel %vm6516_vm4, %v6477_v26, %v492_v16 }
 0x879   :  { %v1700_v45 = vmul.f32 %v1699_v47, %v6459_v7  ;;  %v475_v47 = vmul.f32 %v474_v13, %v6418_v18  ;;  %v1653_v10 = vmul.f32 %v1652_v46, %v6442_v41  ;;  %v1796_v18 = vpop.permute.xlu2 %1795  ;;  %v1613_v35 = vmul.f32 %v1612_v37, %v6430_v59 }
 0x87a   :  { %v6480_v24 = vadd.f32 1.0, %v1664_v33  ;;  %v6490_v3 = vpop.eup %5696  ;;  %v1690_v53 = vadd.f32 0.05243302, %v1689_v23  ;;  %5450 = vmatmul.msk.bf16.vlgmr.msra.gmra.mxu1 %vm150_vm2, %v1796_v18 }
 0x87b   :  { %v1701_v44 = vadd.f32 0.112945676, %v1700_v45  ;;  %v1627_v55 = vmul.f32 %v6490_v3, %v6472_v21  ;;  %v500_v45 = vor.u32 1.1754944e-38, %v499_v27  ;;  %vm1632_vm8 = vweird.f32 %v6490_v3 }
 0x87c   :  { %5698 = vrcp.f32 %v6480_v24  ;;  %v1691_v22 = vmul.f32 %v1690_v53, %v6459_v7  ;;  %v1677_v23 = vand.u32 2147483648, %v6480_v24  ;;  %vm1671_vm9 = vweird.f32 %v6480_v24  ;;  %vm6553_vm12 = vmor %vm1631_vm11, %vm1632_vm8 }
 0x87d   :  { %v1702_v52 = vmul.f32 %v1701_v44, %v6459_v7  ;;  %v1628_v28 = vsub.f32 1.0, %v1627_v55  ;;  %v1637_v44 = vand.u32 2147483648, %v6472_v21  ;;  %v1675_v41 = vand.u32 2147483647, %v6480_v24 }
 0x87e   :  { %v1692_v60 = vadd.f32 0.18741608, %v1691_v22  ;;  %v476_v5 = vadd.f32 1.1283791, %v475_v47  ;;  %v501_v59 = vsel %vm6520_vm5, %v500_v45, %v496_v0  ;;  %v1654_v55 = vadd.f32 1.1283791, %v1653_v10 }
 0x87f   :  { %v1703_v19 = vadd.f32 0.4994258, %v1702_v52  ;;  %v1629_v33 = vmul.f32 %v6490_v3, %v1628_v28  ;;  %v1638_v11 = vor.u32 1.1754944e-38, %v1637_v44  ;;  %vm1676_vm13 = vcmp.eq.f32.partialorder %v1675_v41, 8.507059e+37 }
 0x880   :  { %v1693_v52 = vmul.f32 %v1692_v60, %v6459_v7  ;;  %v477_v28 = vmul.f32 %v476_v5, %v6414_v57  ;;  %v1655_v22 = vmul.f32 %v1654_v55, %v6436_v39 }
 0x881   :  { %v1704_v50 = vmul.f32 %v1703_v19, %v6459_v7  ;;  %v1630_v26 = vadd.f32 %v6490_v3, %v1629_v33  ;;  %v1635_v19 = vand.u32 2147483647, %v6472_v21  ;;  %v1614_v7 = vadd.f32 1.1283791, %v1613_v35 }
 0x882   :  { %v6493_v9 = vpop.eup %5698  ;;  %v1694_v21 = vadd.f32 1.1283791, %v1693_v52  ;;  %v502_v27 = vmul.f32 %v501_v59, %v477_v28 }
 0x883   :  { %v1667_v51 = vmul.f32 %v6493_v9, %v6480_v24  ;;  %v6505_v30 = vadd.f32 1.0, %v1704_v50  ;;  %vm1672_vm7 = vweird.f32 %v6493_v9  ;;  %v1634_v29 = vsel %vm6553_vm12, %v6490_v3, %v1630_v26  ;;  %v5390_v26 = vld [vmem:[%s5879_s15 + $0xe] sm:$0x3]  ;;  %s5834_s15 = smov 9  }
 0x884   :  { %vm6541_vm10 = vmor %vm1671_vm9, %vm1672_vm7  ;;  %vm1636_vm15 = vcmp.eq.f32.partialorder %v1635_v19, 8.507059e+37  ;;  %v1615_v3 = vmul.f32 %v1614_v7, %v6425_v2  ;;  %v5405_v47 = vclamps-f32 %v502_v27, 1.0  ;;  %s5362_s3 = sld [smem:[%s8445_s0 + %s5834_s15]]  }
 0x885   :  { %v1668_v4 = vsub.f32 1.0, %v1667_v51  ;;  %5700 = vrcp.f32 %v6505_v30  ;;  %v1678_v51 = vor.u32 1.1754944e-38, %v1677_v23  ;;  %v1717_v50 = vand.u32 2147483648, %v6505_v30  ;;  %s5363_s15 = sld [smem:[%s8445_s0 + %s5840_s28]]  }
 0x886   :  { %v1639_v13 = vsel %vm1636_vm15, %v1638_v11, %v1634_v29  ;;  %vm1711_vm3 = vweird.f32 %v6505_v30  ;;  %v505_v0 = vadd.f32 1.0, %v5405_v47  ;;  %v1597_v23 = vmul.f32 0.5, %v6422_v32  ;;  %s5368_s28 = sld [smem:[%s8445_s0 + %s5845_s25]]  }
 0x887   :  { %v1669_v62 = vmul.f32 %v6493_v9, %v1668_v4  ;;  %v1715_v4 = vand.u32 2147483647, %v6505_v30  ;;  %v1718_v46 = vor.u32 1.1754944e-38, %v1717_v50  ;;  %v1640_v33 = vmul.f32 %v1639_v13, %v1615_v3 }
 0x888   :  { %v6581_v32 = vmul.f32 0.70710677, %v6397_v54 }
 0x889   :  { %v1670_v56 = vadd.f32 %v6493_v9, %v1669_v62  ;;  %v1695_v62 = vmul.f32 %v1694_v21, %v6449_v58  ;;  %vm1716_vm5 = vcmp.eq.f32.partialorder %v1715_v4, 8.507059e+37  ;;  %v5445_v1 = vclamps-f32 %v1640_v33, 1.0 }
 0x88a   :  { %v1598_v58 = vmul.f32 0.5, %v6433_v38  ;;  %v1830_v38 = vpop.permute.xlu0 %1829  ;;  %v1428_v19 = vmul.f32 %v6581_v32, %v6581_v32 }
 0x88b   :  { %v5701_v61 = vpop.eup %5700  ;;  %v1674_v24 = vsel %vm6541_vm10, %v6493_v9, %v1670_v56  ;;  %v463_v56 = vmul.f32 0.5, %v6086_v25  ;;  %v1723_v18 = vadd.f32 1.0, %v5445_v1 }
 0x88c   :  { %v1707_v6 = vmul.f32 %v5701_v61, %v6505_v30  ;;  %v1679_v17 = vsel %vm1676_vm13, %v1678_v51, %v1674_v24  ;;  %vm1712_vm14 = vweird.f32 %v5701_v61  ;;  %v1599_v30 = vmul.f32 0.5, %v6446_v48 }
 0x88d   :  { %v1680_v16 = vmul.f32 %v1679_v17, %v1655_v22  ;;  %vm1713_vm4 = vmor %vm1711_vm3, %vm1712_vm14  ;;  %v506_v44 = vmul.f32 %v505_v0, %v463_v56  ;;  %v1726_v52 = vmul.f32 %v1723_v18, %v1597_v23  ;;  %v1835_v48 = vand.u32 %v5390_v26, %v5886_v14 }
 0x88e   :  { %v1708_v15 = vsub.f32 1.0, %v1707_v6  ;;  %v1822_v6 = vpop.f32.mrf.mxu2  ;;  %v1429_v55 = vmin.f32 %v1428_v19, 16.0 }
 0x88f   :  { %v5446_v39 = vclamps-f32 %v1680_v16, 1.0  ;;  %v507_v5 = vpack.c.bf16 %v506_v44, %v506_v44 }
 0x890   :  { %v1709_v9 = vmul.f32 %v5701_v61, %v1708_v15  ;;  %v1441_v53 = vmul.f32 3.8918573e-05, %v1429_v55  ;;  %v1430_v28 = vmul.f32 2.1237322e-06, %v1429_v55 }
 0x891   :  { %v1724_v2 = vadd.f32 1.0, %v5446_v39  ;;  %v2143_v25 = vand.u32 %v507_v5, %v5886_v14 }
 0x892   :  { %v1710_v34 = vadd.f32 %v5701_v61, %v1709_v9  ;;  %v1431_v27 = vadd.f32 0.00028619796, %v1430_v28 }
 0x894   :  { %v1714_v37 = vsel %vm1713_vm4, %v5701_v61, %v1710_v34  ;;  %v1727_v61 = vmul.f32 %v1724_v2, %v1598_v58 }
 0x895   :  { %v1719_v60 = vsel %vm1716_vm5, %v1718_v46, %v1714_v37  ;;  %v1432_v46 = vmul.f32 %v1431_v27, %v1429_v55 }
 0x896   :  { %v1720_v57 = vmul.f32 %v1719_v60, %v1695_v62  ;;  %v1729_v59 = vpack.c.bf16 %v1727_v61, %v1726_v52  ;;  %v1824_v7 = vpop.f32.mrf.mxu2 }
 0x897   :  { %v1433_v60 = vadd.f32 0.0036580483, %v1432_v46 }
 0x898   :  { %v5447_v40 = vclamps-f32 %v1720_v57, 1.0 }
 0x89a   :  { %v1725_v45 = vadd.f32 1.0, %v5447_v40  ;;  %v1434_v40 = vmul.f32 %v1433_v60, %v1429_v55 }
 0x89c   :  { %v1728_v10 = vmul.f32 %v1725_v45, %v1599_v30 }
 0x89e   :  { %v1730_v35 = vpack.c.bf16 %v1728_v10, %v1728_v10  ;;  %v1435_v10 = vadd.f32 0.05243302, %v1434_v40 }
 0x8a0   :  { %v1732_v41 = vsel %vm154_vm0, %v1730_v35, 0  ;;  %v1436_v35 = vmul.f32 %v1435_v10, %v1429_v55  ;;  %v5812_v10 = vld [vmem:[%s5975_s26] sm:$0xff]  ;;  %s5383_s26 = sld [smem:[%s8445_s0 + %s5852_s21]]  }
 0x8a1   :  { %1740 = vmatpush.bf16.msrb.mxu0 %v1732_v41 }
 0x8a2   :  { %v1437_v41 = vadd.f32 0.18741608, %v1436_v35 }
 0x8a5   :  { %1741 = vmatpush.bf16.msrb.mxu0 %v1729_v59 }
 0x8a8   :  { %5448 = vmatmul.msk.bf16.vlgmr.msrb.gmra.mxu0 %vm443_vm6, %v6384_v36  ;;  %v1442_v36 = vadd.f32 0.001143296, %v1441_v53 }
 0x8a9   :  { %1844 = vmatpush.bf16.msra.mxu0 %v1835_v48 }
 0x8aa   :  { %v1443_v11 = vmul.f32 %v1442_v36, %v1429_v55 }
 0x8ac   :  { %v1444_v51 = vadd.f32 0.014752088, %v1443_v11 }
 0x8ad   :  { %2152 = vmatpush.bf16.msrb.mxu0 %v2143_v25  ;;  %v1438_v25 = vmul.f32 %v1437_v41, %v1429_v55 }
 0x8ae   :  { %v1445_v29 = vmul.f32 %v1444_v51, %v1429_v55 }
 0x8af   :  { %v1439_v7 = vadd.f32 1.1283791, %v1438_v25  ;;  %v6628_v25 = vld [vmem:[%s5369_s16] sm:$0x3] }
 0x8b0   :  { %v1446_v21 = vadd.f32 0.112945676, %v1445_v29  ;;  %3496 = vst [vmem:[#allocation1] ss:$4 sm:$0xff] %v6628_v25 }
 0x8b2   :  { %v1447_v17 = vmul.f32 %v1446_v21, %v1429_v55  ;;  %v1440_v21 = vmul.f32 %v1439_v7, %v6581_v32 }
 0x8b4   :  { %v1448_v9 = vadd.f32 0.4994258, %v1447_v17 }
 0x8b6   :  { %v1449_v13 = vmul.f32 %v1448_v9, %v1429_v55 }
 0x8b8   :  { %5452 = vmatmul.msk.bf16.vlgmr.msra.gmra.mxu0 %vm150_vm2, %v1830_v38  ;;  %v1450_v16 = vadd.f32 1.0, %v1449_v13 }
 0x8ba   :  { %5702 = vrcp.f32 %v1450_v16  ;;  %vm1456_vm8 = vweird.f32 %v1450_v16 }
 0x8c0   :  { %v5703_v45 = vpop.eup %5702 }
 0x8c1   :  { %vm1457_vm7 = vweird.f32 %v5703_v45 }
 0x8c2   :  { %vm1458_vm9 = vmor %vm1456_vm8, %vm1457_vm7 }
 0x8c8   :  { %5462 = vmatmul.msk.bf16.vlgmr.msrb.gmra.mxu0 %vm150_vm2, %v5900_v20 }
 0x8f7   :  { %v1809_v63 = vpop.f32.mrf.mxu1 }
 0x8f8   :  { %v1823_v4 = vadd.f32 %v1822_v6, %v1809_v63  ;;  %v1462_v6 = vand.u32 2147483648, %v1450_v16 }
 0x8fa   :  { %v1463_v36 = vor.u32 1.1754944e-38, %v1462_v6 }
 0x8ff   :  { %v1811_v24 = vpop.f32.mrf.mxu1 }
 0x900   :  { %v1460_v24 = vand.u32 2147483647, %v1450_v16 }
 0x902   :  { %vm1461_vm10 = vcmp.eq.f32.partialorder %v1460_v24, 8.507059e+37 }
 0x925   :  { %v6585_v15 = vpop.f32.mrf.mxu0 }
 0x92d   :  { %v1745_v50 = vpop.f32.mrf.mxu0 }
 0x935   :  { %v1846_v22 = vpop.f32.mrf.mxu0 }
 0x936   :  { %v1850_v34 = vadd.f32 %v1846_v22, %v1823_v4 }
 0x938   :  { %v6588_v3 = vadd.f32 %v1850_v34, %v5946_v43  ;;  %v1452_v43 = vmul.f32 %v5703_v45, %v1450_v16 }
 0x93a   :  { %v1853_v62 = vmul.f32 0.70710677, %v6588_v3  ;;  %v1453_v44 = vsub.f32 1.0, %v1452_v43  ;;  %v1852_v40 = vmul.f32 0.5, %v6588_v3  ;;  %v6602_v3 = vmul.f32 0.70710677, %v6585_v15 }
 0x93b   :  { %v6605_v43 = vmul.f32 0.70710677, %v6193_v8 }
 0x93c   :  { %v1854_v37 = vmul.f32 %v1853_v62, %v1853_v62  ;;  %v1454_v52 = vmul.f32 %v5703_v45, %v1453_v44 }
 0x93d   :  { %v1848_v33 = vpop.f32.mrf.mxu0 }
 0x93e   :  { %v1855_v57 = vmin.f32 %v1854_v37, 16.0  ;;  %v1455_v38 = vadd.f32 %v5703_v45, %v1454_v52 }
 0x940   :  { %v1856_v47 = vmul.f32 2.1237322e-06, %v1855_v57  ;;  %v1867_v39 = vmul.f32 3.8918573e-05, %v1855_v57  ;;  %v1459_v53 = vsel %vm1458_vm9, %v5703_v45, %v1455_v38 }
 0x941   :  { %v1464_v51 = vsel %vm1461_vm10, %v1463_v36, %v1459_v53 }
 0x942   :  { %v1857_v1 = vadd.f32 0.00028619796, %v1856_v47  ;;  %v1868_v30 = vadd.f32 0.001143296, %v1867_v39  ;;  %v1465_v17 = vmul.f32 %v1464_v51, %v1440_v21 }
 0x944   :  { %v1858_v0 = vmul.f32 %v1857_v1, %v1855_v57  ;;  %v1869_v2 = vmul.f32 %v1868_v30, %v1855_v57  ;;  %v5438_v34 = vclamps-f32 %v1465_v17, 1.0 }
 0x946   :  { %v1870_v56 = vadd.f32 0.014752088, %v1869_v2  ;;  %v1859_v18 = vadd.f32 0.0036580483, %v1858_v0  ;;  %v1468_v33 = vadd.f32 1.0, %v5438_v34 }
 0x948   :  { %v1871_v58 = vmul.f32 %v1870_v56, %v1855_v57  ;;  %v1860_v61 = vmul.f32 %v1859_v18, %v1855_v57  ;;  %v1749_v56 = vmul.f32 %v6602_v3, %v6602_v3  ;;  %v786_v18 = vmul.f32 %v6605_v43, %v6605_v43 }
 0x94a   :  { %v1872_v23 = vadd.f32 0.112945676, %v1871_v58  ;;  %v1861_v5 = vadd.f32 0.05243302, %v1860_v61  ;;  %v6611_v58 = vmin.f32 %v1749_v56, 16.0  ;;  %v6613_v35 = vmin.f32 %v786_v18, 16.0 }
 0x94c   :  { %v1873_v26 = vmul.f32 %v1872_v23, %v1855_v57  ;;  %v1862_v19 = vmul.f32 %v1861_v5, %v1855_v57  ;;  %v799_v44 = vmul.f32 3.8918573e-05, %v6613_v35 }
 0x94e   :  { %v1874_v48 = vadd.f32 0.4994258, %v1873_v26  ;;  %v1863_v11 = vadd.f32 0.18741608, %v1862_v19  ;;  %v800_v61 = vadd.f32 0.001143296, %v799_v44 }
 0x94f   :  { %v2113_v26 = vld [vmem:[%s5362_s3] sm:$0x7] }
 0x950   :  { %v1875_v59 = vmul.f32 %v1874_v48, %v1855_v57  ;;  %v1864_v50 = vmul.f32 %v1863_v11, %v1855_v57  ;;  %v1426_v57 = vmul.f32 0.5, %v6397_v54  ;;  %v2477_v54 = vpop.permute.xlu1 %2476  ;;  %2187 = vperm.xlu0 %5656, %v2113_v26   ;;  %v801_v52 = vmul.f32 %v800_v61, %v6613_v35  ;;  %v3497_v11 = vld.sshfl [vmem:[#allocation1] sm:$0xff pattern:$0x73625140] }
 0x951   :  { %3826 = vst [vmem:[#allocation1] ss:$4 sm:$0xff] %v6628_v25 }
 0x952   :  { %v1876_v63 = vadd.f32 1.0, %v1875_v59  ;;  %v1865_v28 = vadd.f32 1.1283791, %v1864_v50  ;;  %v1469_v39 = vmul.f32 %v1468_v33, %v1426_v57  ;;  %v802_v5 = vadd.f32 0.014752088, %v801_v52 }
 0x953   :  { %v2807_v59 = vld [vmem:[%s5366_s8] sm:$0x7] }
 0x954   :  { %5704 = vrcp.f32 %v1876_v63  ;;  %v1888_v4 = vand.u32 2147483648, %v1876_v63  ;;  %v1886_v13 = vand.u32 2147483647, %v1876_v63  ;;  %vm1882_vm12 = vweird.f32 %v1876_v63 }
 0x955   :  { %v1866_v46 = vmul.f32 %v1865_v28, %v1853_v62  ;;  %v1470_v45 = vpack.c.bf16 %v1469_v39, %v1469_v39  ;;  %v803_v19 = vmul.f32 %v802_v5, %v6613_v35 }
 0x956   :  { %v1889_v16 = vor.u32 1.1754944e-38, %v1888_v4  ;;  %vm1887_vm14 = vcmp.eq.f32.partialorder %v1886_v13, 8.507059e+37  ;;  %v1751_v4 = vmul.f32 2.1237322e-06, %v6611_v58 }
 0x957   :  { %v2482_v62 = vand.u32 %v1470_v45, %v5886_v14  ;;  %v804_v36 = vadd.f32 0.112945676, %v803_v19 }
 0x958   :  { %2881 = vperm.xlu0 %5656, %v2807_v59  }
 0x95a   :  { %v5705_v29 = vpop.eup %5704 }
 0x95b   :  { %v1878_v55 = vmul.f32 %v5705_v29, %v1876_v63  ;;  %vm1883_vm11 = vweird.f32 %v5705_v29 }
 0x95c   :  { %vm1884_vm13 = vmor %vm1882_vm12, %vm1883_vm11 }
 0x95d   :  { %v1879_v9 = vsub.f32 1.0, %v1878_v55  ;;  %v805_v55 = vmul.f32 %v804_v36, %v6613_v35 }
 0x95f   :  { %v1880_v22 = vmul.f32 %v5705_v29, %v1879_v9  ;;  %v788_v9 = vmul.f32 2.1237322e-06, %v6613_v35 }
 0x960   :  { %3499 = vrot.lane.b32.xlu0 %v3497_v11, %s5819_s11 }
 0x961   :  { %v1881_v27 = vadd.f32 %v5705_v29, %v1880_v22 }
 0x963   :  { %v1885_v37 = vsel %vm1884_vm13, %v5705_v29, %v1881_v27  ;;  %v806_v27 = vadd.f32 0.4994258, %v805_v55 }
 0x964   :  { %v1890_v32 = vsel %vm1887_vm14, %v1889_v16, %v1885_v37  ;;  %v1752_v37 = vadd.f32 0.00028619796, %v1751_v4 }
 0x965   :  { %v1891_v60 = vmul.f32 %v1890_v32, %v1866_v46  ;;  %v789_v46 = vadd.f32 0.00028619796, %v788_v9  ;;  %v807_v39 = vmul.f32 %v806_v27, %v6613_v35  ;;  %v4271_v27 = vld [vmem:[%s6688_s23 + $0x8] sm:$0x1] }
 0x966   :  { %v1753_v45 = vmul.f32 %v1752_v37, %v6611_v58 }
 0x967   :  { %v5453_v47 = vclamps-f32 %v1891_v60, 1.0 }
 0x968   :  { %4132 = vrot.lane.b32.xlu0 %v5938_v42, %s5819_s11  ;;  %v1754_v26 = vadd.f32 0.0036580483, %v1753_v45 }
 0x969   :  { %v1894_v1 = vadd.f32 1.0, %v5453_v47 }
 0x96a   :  { %v1755_v36 = vmul.f32 %v1754_v26, %v6611_v58 }
 0x96b   :  { %v1895_v30 = vmul.f32 %v1894_v1, %v1852_v40 }
 0x96d   :  { %v1896_v0 = vpack.c.bf16 %v1895_v30, %v1895_v30  ;;  %v790_v30 = vmul.f32 %v789_v46, %v6613_v35 }
 0x96f   :  { %v1898_v2 = vand.u32 %v1896_v0, %v5886_v14  ;;  %v791_v61 = vadd.f32 0.0036580483, %v790_v30 }
 0x970   :  { %4246 = vrot.lane.b32.xlu0 %v5938_v42, %s5837_s17  ;;  %s5367_s17 = sld [smem:[%s8445_s0 + %s5843_s10]]  }
 0x971   :  { %1907 = vmatpush.bf16.msrb.mxu1 %v1898_v2  ;;  %v792_v11 = vmul.f32 %v791_v61, %v6613_v35  ;;  %v5613_v61 = vld [vmem:[%s5951_s13 + $0x8] sm:$0xff] }
 0x973   :  { %v793_v37 = vadd.f32 0.05243302, %v792_v11 }
 0x974   :  { %5454 = vmatmul.msk.bf16.vlgmr.msrb.gmra.mxu1 %vm150_vm2, %v5812_v10 }
 0x975   :  { %2491 = vmatpush.bf16.msra.mxu1 %v2482_v62 }
 0x978   :  { %4279 = vperm.xlu0 %5656, %v4271_v27  }
 0x980   :  { %4436 = vrot.lane.b32.xlu0 %v5613_v61, %s5828_s7 }
 0x984   :  { %5455 = vmatmul.msk.bf16.gmra.mxu1 %vm150_vm2, %v5984_v49  ;;  %v1762_v49 = vmul.f32 3.8918573e-05, %v6611_v58 }
 0x986   :  { %v1763_v23 = vadd.f32 0.001143296, %v1762_v49  ;;  %v6680_v49 = vadd.f32 1.0, %v807_v39 }
 0x988   :  { %v1764_v41 = vmul.f32 %v1763_v23, %v6611_v58  ;;  %vm814_vm7 = vweird.f32 %v6680_v49 }
 0x98a   :  { %v1765_v48 = vadd.f32 0.014752088, %v1764_v41 }
 0x98c   :  { %v1766_v38 = vmul.f32 %v1765_v48, %v6611_v58 }
 0x98e   :  { %v1767_v7 = vadd.f32 0.112945676, %v1766_v38 }
 0x990   :  { %v1768_v29 = vmul.f32 %v1767_v7, %v6611_v58 }
 0x992   :  { %v1769_v22 = vadd.f32 0.4994258, %v1768_v29 }
 0x994   :  { %5476 = vmatmul.msk.bf16.vlgmr.msra.gmra.mxu1 %vm150_vm2, %v2477_v54  ;;  %v1770_v32 = vmul.f32 %v1769_v22, %v6611_v58 }
 0x996   :  { %v6673_v2 = vadd.f32 1.0, %v1770_v32 }
 0x998   :  { %5706 = vrcp.f32 %v6673_v2  ;;  %vm1777_vm4 = vweird.f32 %v6673_v2 }
 0x999   :  { %5708 = vrcp.f32 %v6680_v49 }
 0x99e   :  { %v6703_v4 = vpop.eup %5706 }
 0x99f   :  { %v6708_v46 = vpop.eup %5708  ;;  %vm1778_vm3 = vweird.f32 %v6703_v4 }
 0x9a0   :  { %v810_v45 = vmul.f32 %v6708_v46, %v6680_v49  ;;  %vm815_vm15 = vweird.f32 %v6708_v46  ;;  %vm6757_vm5 = vmor %vm1777_vm4, %vm1778_vm3 }
 0x9a1   :  { %vm6772_vm8 = vmor %vm814_vm7, %vm815_vm15 }
 0x9f1   :  { %v6632_v63 = vpop.f32.mrf.mxu1 }
 0x9f2   :  { %v6635_v6 = vmul.f32 0.70710677, %v6632_v63 }
 0x9f4   :  { %v1924_v24 = vmul.f32 %v6635_v6, %v6635_v6 }
 0x9f6   :  { %v6640_v53 = vmin.f32 %v1924_v24, 16.0 }
 0x9f8   :  { %v1937_v51 = vmul.f32 3.8918573e-05, %v6640_v53  ;;  %v1926_v56 = vmul.f32 2.1237322e-06, %v6640_v53 }
 0x9f9   :  { %v6646_v21 = vpop.f32.mrf.mxu1 }
 0x9fa   :  { %v1938_v50 = vadd.f32 0.001143296, %v1937_v51  ;;  %v6650_v17 = vmul.f32 0.70710677, %v6646_v21  ;;  %v1927_v59 = vadd.f32 0.00028619796, %v1926_v56 }
 0x9fc   :  { %v1939_v28 = vmul.f32 %v1938_v50, %v6640_v53  ;;  %v1964_v13 = vmul.f32 %v6650_v17, %v6650_v17  ;;  %v1928_v50 = vmul.f32 %v1927_v59, %v6640_v53 }
 0x9fe   :  { %v1940_v34 = vadd.f32 0.014752088, %v1939_v28  ;;  %v6657_v16 = vmin.f32 %v1964_v13, 16.0  ;;  %v1756_v13 = vadd.f32 0.05243302, %v1755_v36 }
 0xa00   :  { %v1941_v33 = vmul.f32 %v1940_v34, %v6640_v53  ;;  %v1977_v60 = vmul.f32 3.8918573e-05, %v6657_v16  ;;  %v1966_v62 = vmul.f32 2.1237322e-06, %v6657_v16 }
 0xa01   :  { %v6664_v57 = vpop.f32.mrf.mxu1 }
 0xa02   :  { %v1942_v47 = vadd.f32 0.112945676, %v1941_v33  ;;  %v1978_v40 = vadd.f32 0.001143296, %v1977_v60  ;;  %v6668_v1 = vmul.f32 0.70710677, %v6664_v57  ;;  %v1773_v60 = vmul.f32 %v6703_v4, %v6673_v2 }
 0xa03   :  { %v1967_v41 = vadd.f32 0.00028619796, %v1966_v62 }
 0xa04   :  { %v1943_v0 = vmul.f32 %v1942_v47, %v6640_v53  ;;  %v1979_v10 = vmul.f32 %v1978_v40, %v6657_v16  ;;  %v2004_v54 = vmul.f32 %v6668_v1, %v6668_v1  ;;  %v1929_v47 = vadd.f32 0.0036580483, %v1928_v50 }
 0xa05   :  { %v1968_v51 = vmul.f32 %v1967_v41, %v6657_v16  ;;  %v1774_v56 = vsub.f32 1.0, %v1773_v60 }
 0xa06   :  { %v1944_v18 = vadd.f32 0.4994258, %v1943_v0  ;;  %v1980_v44 = vadd.f32 0.014752088, %v1979_v10  ;;  %v6682_v23 = vmin.f32 %v2004_v54, 16.0  ;;  %v1757_v0 = vmul.f32 %v1756_v13, %v6611_v58 }
 0xa07   :  { %v1969_v33 = vadd.f32 0.0036580483, %v1968_v51  ;;  %v794_v10 = vmul.f32 %v793_v37, %v6613_v35  ;;  %v820_v51 = vand.u32 2147483648, %v6680_v49 }
 0xa08   :  { %v1981_v52 = vmul.f32 %v1980_v44, %v6657_v16  ;;  %v2006_v48 = vmul.f32 2.1237322e-06, %v6682_v23  ;;  %v1945_v38 = vmul.f32 %v1944_v18, %v6640_v53  ;;  %v2017_v19 = vmul.f32 3.8918573e-05, %v6682_v23 }
 0xa09   :  { %v1916_v5 = vpop.f32.mrf.mxu1  ;;  %v1970_v54 = vmul.f32 %v1969_v33, %v6657_v16  ;;  %v1930_v18 = vmul.f32 %v1929_v47, %v6640_v53  ;;  %v795_v59 = vadd.f32 0.18741608, %v794_v10  ;;  %v1781_v10 = vand.u32 2147483647, %v6673_v2 }
 0xa0a   :  { %v1982_v24 = vadd.f32 0.112945676, %v1981_v52  ;;  %v2007_v7 = vadd.f32 0.00028619796, %v2006_v48  ;;  %v6701_v55 = vadd.f32 1.0, %v1945_v38  ;;  %v811_v52 = vsub.f32 1.0, %v810_v45 }
 0xa0b   :  { %v2018_v9 = vadd.f32 0.001143296, %v2017_v19  ;;  %v1758_v48 = vadd.f32 0.18741608, %v1757_v0  ;;  %v1971_v38 = vadd.f32 0.05243302, %v1970_v54 }
 0xa0c   :  { %v1983_v29 = vmul.f32 %v1982_v24, %v6657_v16  ;;  %v2008_v22 = vmul.f32 %v2007_v7, %v6682_v23  ;;  %5710 = vrcp.f32 %v6701_v55  ;;  %v818_v19 = vand.u32 2147483647, %v6680_v49 }
 0xa0d   :  { %v2019_v34 = vmul.f32 %v2018_v9, %v6682_v23  ;;  %v1775_v24 = vmul.f32 %v6703_v4, %v1774_v56  ;;  %v1931_v7 = vadd.f32 0.05243302, %v1930_v18  ;;  %v4408_v9 = vld [vmem:[%s5951_s13 + $0x20] sm:$0xf]  ;;  %v1972_v27 = vmul.f32 %v1971_v38, %v6657_v16 }
 0xa0e   :  { %v1984_v28 = vadd.f32 0.4994258, %v1983_v29  ;;  %v2009_v30 = vadd.f32 0.0036580483, %v2008_v22  ;;  %v1759_v22 = vmul.f32 %v1758_v48, %v6611_v58  ;;  %v4428_v33 = vunpack.c.l.b16 %v4408_v9 }
 0xa0f   :  { %v2020_v39 = vadd.f32 0.014752088, %v2019_v34  ;;  %v1783_v34 = vand.u32 2147483648, %v6673_v2  ;;  %v1932_v60 = vmul.f32 %v1931_v7, %v6640_v53  ;;  %v1973_v56 = vadd.f32 0.18741608, %v1972_v27 }
 0xa10   :  { %v1985_v32 = vmul.f32 %v1984_v28, %v6657_v16  ;;  %v2010_v26 = vmul.f32 %v2009_v30, %v6682_v23  ;;  %v812_v28 = vmul.f32 %v6708_v46, %v811_v52  ;;  %v6752_v45 = vpack.c.b16 %v4428_v33, %v4428_v33 }
 0xa11   :  { %v2021_v62 = vmul.f32 %v2020_v39, %v6682_v23  ;;  %v1933_v61 = vadd.f32 0.18741608, %v1932_v60  ;;  %vm6776_vm9 = vcmp.eq.f32.partialorder %v818_v19, 8.507059e+37  ;;  %v1784_v48 = vor.u32 1.1754944e-38, %v1783_v34 }
 0xa12   :  { %v6714_v40 = vadd.f32 1.0, %v1985_v32  ;;  %v6726_v41 = vpop.eup %5710  ;;  %v2011_v50 = vadd.f32 0.05243302, %v2010_v26  ;;  %v1776_v32 = vadd.f32 %v6703_v4, %v1775_v24  ;;  %v813_v0 = vadd.f32 %v6708_v46, %v812_v28  ;;  %4442 = vrot.lane.b32.xlu0 %v6752_v45, %s5828_s7 }
 0xa13   :  { %v2022_v44 = vadd.f32 0.112945676, %v2021_v62  ;;  %v1948_v29 = vmul.f32 %v6726_v41, %v6701_v55  ;;  %v1760_v62 = vadd.f32 1.1283791, %v1759_v22  ;;  %vm1782_vm10 = vcmp.eq.f32.partialorder %v1781_v10, 8.507059e+37  ;;  %v5023_v22 = vld [vmem:[%s5967_s22 + $0x18] sm:$0xff] }
 0xa14   :  { %5712 = vrcp.f32 %v6714_v40  ;;  %v2012_v58 = vmul.f32 %v2011_v50, %v6682_v23  ;;  %v1780_v2 = vsel %vm6757_vm5, %v6703_v4, %v1776_v32  ;;  %v817_v4 = vsel %vm6772_vm8, %v6708_v46, %v813_v0  ;;  %v4558_v46 = vld [vmem:[%s5958_s18 + $0x38] sm:$0xff] }
 0xa15   :  { %v2023_v5 = vmul.f32 %v2022_v44, %v6682_v23  ;;  %v1949_v39 = vsub.f32 1.0, %v1948_v29  ;;  %v796_v44 = vmul.f32 %v795_v59, %v6613_v35  ;;  %v1761_v59 = vmul.f32 %v1760_v62, %v6602_v3 }
 0xa16   :  { %v2013_v49 = vadd.f32 0.18741608, %v2012_v58  ;;  %v1785_v38 = vsel %vm1782_vm10, %v1784_v48, %v1780_v2  ;;  %v1974_v24 = vmul.f32 %v1973_v56, %v6657_v16  ;;  %v1934_v7 = vmul.f32 %v1933_v61, %v6640_v53 }
 0xa17   :  { %v2024_v36 = vadd.f32 0.4994258, %v2023_v5  ;;  %v1950_v35 = vmul.f32 %v6726_v41, %v1949_v39  ;;  %v821_v5 = vor.u32 1.1754944e-38, %v820_v51  ;;  %vm1953_vm12 = vweird.f32 %v6726_v41 }
 0xa18   :  { %v1998_v29 = vand.u32 2147483648, %v6714_v40  ;;  %vm1992_vm13 = vweird.f32 %v6714_v40  ;;  %v1996_v16 = vand.u32 2147483647, %v6714_v40  ;;  %v2014_v50 = vmul.f32 %v2013_v49, %v6682_v23 }
 0xa19   :  { %v2025_v37 = vmul.f32 %v2024_v36, %v6682_v23  ;;  %v1958_v36 = vand.u32 2147483648, %v6701_v55  ;;  %v1951_v3 = vadd.f32 %v6726_v41, %v1950_v35  ;;  %v797_v9 = vadd.f32 1.1283791, %v796_v44 }
 0xa1a   :  { %v6732_v11 = vpop.eup %5712  ;;  %v822_v53 = vsel %vm6776_vm9, %v821_v5, %v817_v4  ;;  %v1786_v28 = vmul.f32 %v1785_v38, %v1761_v59  ;;  %vm1952_vm15 = vweird.f32 %v6701_v55  ;;  %v1956_v34 = vand.u32 2147483647, %v6701_v55  ;;  %4597 = vperm.xlu0 %5656, %v4558_v46  }
 0xa1b   :  { %v1988_v13 = vmul.f32 %v6732_v11, %v6714_v40  ;;  %v6750_v30 = vadd.f32 1.0, %v2025_v37  ;;  %vm1993_vm11 = vweird.f32 %v6732_v11  ;;  %v1975_v27 = vadd.f32 1.1283791, %v1974_v24  ;;  %vm6811_vm3 = vmor %vm1952_vm15, %vm1953_vm12  ;;  %v2154_v37 = vpop.f32.mrf.mxu0 }
 0xa1c   :  { %vm6799_vm14 = vmor %vm1992_vm13, %vm1993_vm11  ;;  %v1935_v40 = vadd.f32 1.1283791, %v1934_v7  ;;  %v1959_v33 = vor.u32 1.1754944e-38, %v1958_v36  ;;  %v1999_v32 = vor.u32 1.1754944e-38, %v1998_v29  ;;  %v1955_v55 = vsel %vm6811_vm3, %v6726_v41, %v1951_v3 }
 0xa1d   :  { %v1989_v47 = vsub.f32 1.0, %v1988_v13  ;;  %5714 = vrcp.f32 %v6750_v30  ;;  %vm1997_vm4 = vcmp.eq.f32.partialorder %v1996_v16, 8.507059e+37  ;;  %v2036_v0 = vand.u32 2147483647, %v6750_v30 }
 0xa1e   :  { %v798_v62 = vmul.f32 %v797_v9, %v6605_v43  ;;  %vm1957_vm7 = vcmp.eq.f32.partialorder %v1956_v34, 8.507059e+37  ;;  %v1976_v10 = vmul.f32 %v1975_v27, %v6650_v17  ;;  %vm2032_vm8 = vweird.f32 %v6750_v30  ;;  %v5813_v34 = vld [vmem:[%s6072_s30] sm:$0x3] }
 0xa1f   :  { %v1990_v18 = vmul.f32 %v6732_v11, %v1989_v47  ;;  %v2015_v47 = vadd.f32 1.1283791, %v2014_v50  ;;  %v1960_v54 = vsel %vm1957_vm7, %v1959_v33, %v1955_v55  ;;  %v1936_v44 = vmul.f32 %v1935_v40, %v6635_v6  ;;  %v5323_v27 = vld [vmem:[%s5382_s27] sm:$0x3f]  ;;  %v2136_v40 = vpop.f32.mrf.mxu3 }
 0xa20   :  { %v823_v41 = vmul.f32 %v822_v53, %v798_v62  ;;  %v5449_v26 = vclamps-f32 %v1786_v28, 1.0  ;;  %vm2037_vm10 = vcmp.eq.f32.partialorder %v2036_v0, 8.507059e+37  ;;  %v1747_v6 = vmul.f32 0.5, %v6585_v15 }
 0xa21   :  { %v1991_v19 = vadd.f32 %v6732_v11, %v1990_v18  ;;  %v4553_v18 = vld [vmem:[%s5958_s18 + $0x10] sm:$0xff]  ;;  %v2016_v52 = vmul.f32 %v2015_v47, %v6668_v1  ;;  %v1961_v43 = vmul.f32 %v1960_v54, %v1936_v44  ;;  %v1920_v38 = vmul.f32 0.5, %v6664_v57 }
 0xa22   :  { %4572 = vperm.xlu0 %5656, %v4553_v18   ;;  %v5416_v49 = vclamps-f32 %v823_v41, 1.0  ;;  %v784_v46 = vmul.f32 0.5, %v6193_v8  ;;  %v1919_v3 = vmul.f32 0.5, %v6646_v21  ;;  %v1918_v9 = vmul.f32 0.5, %v6632_v63 }
 0xa23   :  { %v5715_v51 = vpop.eup %5714  ;;  %v1995_v23 = vsel %vm6799_vm14, %v6732_v11, %v1991_v19  ;;  %v2038_v11 = vand.u32 2147483648, %v6750_v30  ;;  %v5456_v59 = vclamps-f32 %v1961_v43, 1.0  ;;  %v4552_v19 = vld [vmem:[%s5958_s18 + $0x8] sm:$0xff]  ;;  %v2155_v47 = vadd.f32 %v2154_v37, %v2136_v40 }
 0xa24   :  { %v2028_v13 = vmul.f32 %v5715_v51, %v6750_v30  ;;  %v2000_v39 = vsel %vm1997_vm4, %v1999_v32, %v1995_v23  ;;  %vm2033_vm5 = vweird.f32 %v5715_v51  ;;  %v1789_v30 = vadd.f32 1.0, %v5449_v26  ;;  %v2164_v23 = vpop.permute.xlu2 %2163  ;;  %v2156_v32 = vpop.f32.mrf.mxu0 }
 0xa25   :  { %v2001_v2 = vmul.f32 %v2000_v39, %v1976_v10  ;;  %vm2034_vm9 = vmor %vm2032_vm8, %vm2033_vm5  ;;  %v2039_v61 = vor.u32 1.1754944e-38, %v2038_v11  ;;  %v826_v7 = vadd.f32 1.0, %v5416_v49 }
 0xa26   :  { %v2029_v60 = vsub.f32 1.0, %v2028_v13  ;;  %v1790_v36 = vmul.f32 %v1789_v30, %v1747_v6 }
 0xa27   :  { %v5457_v4 = vclamps-f32 %v2001_v2, 1.0  ;;  %v827_v50 = vmul.f32 %v826_v7, %v784_v46  ;;  %v2138_v33 = vpop.f32.mrf.mxu3 }
 0xa28   :  { %v2030_v58 = vmul.f32 %v5715_v51, %v2029_v60  ;;  %v1791_v57 = vpack.c.bf16 %v1790_v36, %v1790_v36 }
 0xa29   :  { %v2045_v1 = vadd.f32 1.0, %v5457_v4  ;;  %v828_v8 = vpack.c.bf16 %v827_v50, %v827_v50 }
 0xa2a   :  { %v2031_v56 = vadd.f32 %v5715_v51, %v2030_v58  ;;  %4567 = vperm.xlu0 %5656, %v4552_v19   ;;  %v2169_v13 = vand.u32 %v1791_v57, %v5886_v14  ;;  %v6846_v58 = vpop.permute.xlu0 %2187 }
 0xa2b   :  { %v2048_v15 = vmul.f32 %v2045_v1, %v1919_v3  ;;  %v2498_v63 = vand.u32 %v828_v8, %v5886_v14 }
 0xa2c   :  { %v2035_v48 = vsel %vm2034_vm9, %v5715_v51, %v2031_v56  ;;  %v2044_v51 = vadd.f32 1.0, %v5456_v59 }
 0xa2d   :  { %v2040_v35 = vsel %vm2037_vm10, %v2039_v61, %v2035_v48 }
 0xa2e   :  { %v2041_v17 = vmul.f32 %v2040_v35, %v2016_v52  ;;  %v2047_v28 = vmul.f32 %v2044_v51, %v1918_v9 }
 0xa30   :  { %v5458_v5 = vclamps-f32 %v2041_v17, 1.0  ;;  %v2050_v21 = vpack.c.bf16 %v2048_v15, %v2047_v28 }
 0xa32   :  { %v2046_v24 = vadd.f32 1.0, %v5458_v5  ;;  %5042 = vperm.xlu0 %5656, %v5023_v22  }
 0xa34   :  { %v2049_v29 = vmul.f32 %v2046_v24, %v1920_v38 }
 0xa36   :  { %v2051_v16 = vpack.c.bf16 %v2049_v29, %v2049_v29 }
 0xa38   :  { %v2053_v53 = vsel %vm154_vm0, %v2051_v16, 0 }
 0xa39   :  { %2061 = vmatpush.bf16.msrb.mxu2 %v2053_v53 }
 0xa3a   :  { %5326 = vperm.xlu0 %5656, %v5323_v27  }
 0xa3d   :  { %2062 = vmatpush.bf16.msrb.mxu2 %v2050_v21 }
 0xa40   :  { %5459 = vmatmul.msk.bf16.vlgmr.msrb.gmra.mxu2 %vm443_vm6, %v5813_v34 }
 0xa41   :  { %2178 = vmatpush.bf16.msra.mxu2 %v2169_v13  ;;  %v6853_v13 = vld [vmem:[%s5363_s15] sm:$0xff] }
 0xa45   :  { %2507 = vmatpush.bf16.msrb.mxu2 %v2498_v63  ;;  %v2237_v63 = vld [vmem:[%s5363_s15 + $0x8] sm:$0x1]  ;;  %s5847_s15 = smov 19  }
 0xa46   :  { %v2244_v34 = vunpack.c.l.b16 %v2237_v63  ;;  %s5372_s3 = sld [smem:[%s8445_s0 + %s5847_s15]]  }
 0xa48   :  { %v6857_v27 = vpack.c.b16 %v2244_v34, %v2244_v34 }
 0xa50   :  { %5463 = vmatmul.msk.bf16.vlgmr.msra.gmra.mxu2 %vm150_vm2, %v2164_v23 }
 0xa60   :  { %5477 = vmatmul.msk.bf16.vlgmr.msrb.gmra.mxu2 %vm150_vm2, %v5900_v20 }
 0xac3   :  { %v6844_v60 = vpop.f32.mrf.mxu2 }
 0xac4   :  { %v6862_v23 = vmul.f32 0.70710677, %v6844_v60 }
 0xac6   :  { %v2070_v40 = vmul.f32 %v6862_v23, %v6862_v23 }
 0xac8   :  { %v6866_v37 = vmin.f32 %v2070_v40, 16.0 }
 0xaca   :  { %v2083_v33 = vmul.f32 3.8918573e-05, %v6866_v37 }
 0xacb   :  { %v2066_v55 = vpop.f32.mrf.mxu2 }
 0xacc   :  { %v2084_v32 = vadd.f32 0.001143296, %v2083_v33 }
 0xace   :  { %v2085_v55 = vmul.f32 %v2084_v32, %v6866_v37 }
 0xad3   :  { %v2180_v11 = vpop.f32.mrf.mxu2 }
 0xad4   :  { %v2184_v39 = vadd.f32 %v2180_v11, %v2155_v47  ;;  %v2086_v47 = vadd.f32 0.014752088, %v2085_v55 }
 0xad6   :  { %v2190_v0 = vadd.f32 %v6846_v58, %v2184_v39  ;;  %v2087_v11 = vmul.f32 %v2086_v47, %v6866_v37 }
 0xad8   :  { %v2192_v62 = vmul.f32 0.70710677, %v2190_v0  ;;  %v2191_v53 = vmul.f32 0.5, %v2190_v0 }
 0xada   :  { %v2193_v10 = vmul.f32 %v2192_v62, %v2192_v62 }
 0xadb   :  { %v2182_v54 = vpop.f32.mrf.mxu2 }
 0xadc   :  { %v2194_v56 = vmin.f32 %v2193_v10, 16.0  ;;  %v2088_v10 = vadd.f32 0.112945676, %v2087_v11 }
 0xade   :  { %v2195_v18 = vmul.f32 2.1237322e-06, %v2194_v56  ;;  %v2206_v20 = vmul.f32 3.8918573e-05, %v2194_v56 }
 0xae0   :  { %v2196_v41 = vadd.f32 0.00028619796, %v2195_v18  ;;  %v2207_v44 = vadd.f32 0.001143296, %v2206_v20  ;;  %v2089_v18 = vmul.f32 %v2088_v10, %v6866_v37 }
 0xae2   :  { %v2197_v2 = vmul.f32 %v2196_v41, %v2194_v56  ;;  %v2208_v61 = vmul.f32 %v2207_v44, %v2194_v56 }
 0xae4   :  { %v2209_v26 = vadd.f32 0.014752088, %v2208_v61  ;;  %v2198_v52 = vadd.f32 0.0036580483, %v2197_v2  ;;  %v2072_v2 = vmul.f32 2.1237322e-06, %v6866_v37 }
 0xae6   :  { %v2210_v48 = vmul.f32 %v2209_v26, %v2194_v56  ;;  %v2199_v35 = vmul.f32 %v2198_v52, %v2194_v56  ;;  %v2090_v26 = vadd.f32 0.4994258, %v2089_v18 }
 0xae8   :  { %v2211_v43 = vadd.f32 0.112945676, %v2210_v48  ;;  %v2200_v4 = vadd.f32 0.05243302, %v2199_v35  ;;  %v2073_v35 = vadd.f32 0.00028619796, %v2072_v2 }
 0xaea   :  { %v2212_v17 = vmul.f32 %v2211_v43, %v2194_v56  ;;  %v2201_v59 = vmul.f32 %v2200_v4, %v2194_v56 }
 0xaec   :  { %v2213_v49 = vadd.f32 0.4994258, %v2212_v17  ;;  %v2202_v6 = vadd.f32 0.18741608, %v2201_v59 }
 0xaee   :  { %v2214_v30 = vmul.f32 %v2213_v49, %v2194_v56  ;;  %v2203_v24 = vmul.f32 %v2202_v6, %v2194_v56  ;;  %v2091_v49 = vmul.f32 %v2090_v26, %v6866_v37 }
 0xaf0   :  { %v2215_v5 = vadd.f32 1.0, %v2214_v30  ;;  %v2204_v36 = vadd.f32 1.1283791, %v2203_v24 }
 0xaf2   :  { %5716 = vrcp.f32 %v2215_v5  ;;  %v2227_v1 = vand.u32 2147483648, %v2215_v5  ;;  %v2225_v46 = vand.u32 2147483647, %v2215_v5  ;;  %vm2221_vm12 = vweird.f32 %v2215_v5 }
 0xaf3   :  { %v2205_v16 = vmul.f32 %v2204_v36, %v2192_v62 }
 0xaf4   :  { %v2228_v3 = vor.u32 1.1754944e-38, %v2227_v1  ;;  %vm2226_vm14 = vcmp.eq.f32.partialorder %v2225_v46, 8.507059e+37 }
 0xaf8   :  { %v5717_v38 = vpop.eup %5716 }
 0xaf9   :  { %v2217_v19 = vmul.f32 %v5717_v38, %v2215_v5  ;;  %vm2222_vm11 = vweird.f32 %v5717_v38 }
 0xafa   :  { %vm2223_vm13 = vmor %vm2221_vm12, %vm2222_vm11 }
 0xafb   :  { %v2218_v7 = vsub.f32 1.0, %v2217_v19  ;;  %v6903_v19 = vadd.f32 1.0, %v2091_v49 }
 0xafd   :  { %v2219_v29 = vmul.f32 %v5717_v38, %v2218_v7  ;;  %5718 = vrcp.f32 %v6903_v19  ;;  %vm2098_vm3 = vweird.f32 %v6903_v19 }
 0xaff   :  { %v2220_v51 = vadd.f32 %v5717_v38, %v2219_v29 }
 0xb01   :  { %v2224_v50 = vsel %vm2223_vm13, %v5717_v38, %v2220_v51  ;;  %v2074_v38 = vmul.f32 %v2073_v35, %v6866_v37 }
 0xb02   :  { %v2229_v9 = vsel %vm2226_vm14, %v2228_v3, %v2224_v50 }
 0xb03   :  { %v2230_v15 = vmul.f32 %v2229_v9, %v2205_v16  ;;  %v2075_v16 = vadd.f32 0.0036580483, %v2074_v38  ;;  %v5719_v47 = vpop.eup %5718 }
 0xb04   :  { %v2094_v2 = vmul.f32 %v5719_v47, %v6903_v19  ;;  %vm2099_vm15 = vweird.f32 %v5719_v47 }
 0xb05   :  { %v5464_v57 = vclamps-f32 %v2230_v15, 1.0  ;;  %v2076_v63 = vmul.f32 %v2075_v16, %v6866_v37  ;;  %vm2100_vm4 = vmor %vm2098_vm3, %vm2099_vm15 }
 0xb07   :  { %v2233_v28 = vadd.f32 1.0, %v5464_v57  ;;  %v2077_v10 = vadd.f32 0.05243302, %v2076_v63  ;;  %v2104_v63 = vand.u32 2147483648, %v6903_v19 }
 0xb09   :  { %v2234_v22 = vmul.f32 %v2233_v28, %v2191_v53  ;;  %v2078_v35 = vmul.f32 %v2077_v10, %v6866_v37 }
 0xb0b   :  { %v2238_v8 = vpack.c.bf16 %v2234_v22, %v2234_v22 }
 0xb0d   :  { %v2254_v21 = vand.u32 %v2238_v8, %v5886_v14 }
 0xb0f   :  { %2263 = vmatpush.bf16.msra.mxu3 %v2254_v21 }
 0xb12   :  { %5469 = vmatmul.msk.bf16.vlgmr.msra.gmra.mxu3 %vm150_vm2, %v6853_v13 }
 0xb22   :  { %5470 = vmatmul.msk.bf16.gmra.mxu3 %vm150_vm2, %v6857_v27 }
 0xb95   :  { %v6871_v39 = vpop.f32.mrf.mxu3 }
 0xb96   :  { %v6874_v0 = vmul.f32 0.70710677, %v6871_v39 }
 0xb98   :  { %v2280_v62 = vmul.f32 %v6874_v0, %v6874_v0 }
 0xb9a   :  { %v6878_v54 = vmin.f32 %v2280_v62, 16.0 }
 0xb9c   :  { %v2293_v56 = vmul.f32 3.8918573e-05, %v6878_v54  ;;  %v2282_v29 = vmul.f32 2.1237322e-06, %v6878_v54 }
 0xb9d   :  { %v6882_v20 = vpop.f32.mrf.mxu3 }
 0xb9e   :  { %v2294_v41 = vadd.f32 0.001143296, %v2293_v56  ;;  %v6885_v44 = vmul.f32 0.70710677, %v6882_v20  ;;  %v2283_v53 = vadd.f32 0.00028619796, %v2282_v29 }
 0xba0   :  { %v2295_v61 = vmul.f32 %v2294_v41, %v6878_v54  ;;  %v2320_v52 = vmul.f32 %v6885_v44, %v6885_v44  ;;  %v2284_v33 = vmul.f32 %v2283_v53, %v6878_v54 }
 0xba2   :  { %v2296_v48 = vadd.f32 0.014752088, %v2295_v61  ;;  %v6891_v43 = vmin.f32 %v2320_v52, 16.0  ;;  %v2285_v61 = vadd.f32 0.0036580483, %v2284_v33 }
 0xba4   :  { %v2297_v17 = vmul.f32 %v2296_v48, %v6878_v54  ;;  %v2333_v4 = vmul.f32 3.8918573e-05, %v6891_v43  ;;  %v2322_v7 = vmul.f32 2.1237322e-06, %v6891_v43 }
 0xba5   :  { %v6896_v30 = vpop.f32.mrf.mxu3 }
 0xba6   :  { %v2298_v5 = vadd.f32 0.112945676, %v2297_v17  ;;  %v2334_v59 = vadd.f32 0.001143296, %v2333_v4  ;;  %v6899_v6 = vmul.f32 0.70710677, %v6896_v30 }
 0xba7   :  { %v2323_v50 = vadd.f32 0.00028619796, %v2322_v7  ;;  %v2095_v4 = vsub.f32 1.0, %v2094_v2  ;;  %v2079_v7 = vadd.f32 0.18741608, %v2078_v35 }
 0xba8   :  { %v2299_v24 = vmul.f32 %v2298_v5, %v6878_v54  ;;  %v2335_v1 = vmul.f32 %v2334_v59, %v6891_v43  ;;  %v2360_v36 = vmul.f32 %v6899_v6, %v6899_v6  ;;  %v2286_v5 = vmul.f32 %v2285_v61, %v6878_v54 }
 0xba9   :  { %v2324_v34 = vmul.f32 %v2323_v50, %v6891_v43  ;;  %v2096_v29 = vmul.f32 %v5719_v47, %v2095_v4 }
 0xbaa   :  { %v2300_v46 = vadd.f32 0.4994258, %v2299_v24  ;;  %v2336_v51 = vadd.f32 0.014752088, %v2335_v1  ;;  %v6910_v3 = vmin.f32 %v2360_v36, 16.0 }
 0xbab   :  { %v2325_v18 = vadd.f32 0.0036580483, %v2324_v34 }
 0xbac   :  { %v2337_v9 = vmul.f32 %v2336_v51, %v6891_v43  ;;  %v2362_v15 = vmul.f32 2.1237322e-06, %v6910_v3  ;;  %v2301_v28 = vmul.f32 %v2300_v46, %v6878_v54  ;;  %v2373_v22 = vmul.f32 3.8918573e-05, %v6910_v3 }
 0xbad   :  { %v2272_v57 = vpop.f32.mrf.mxu3  ;;  %v2326_v49 = vmul.f32 %v2325_v18, %v6891_v43  ;;  %v2287_v46 = vadd.f32 0.05243302, %v2286_v5  ;;  %v2105_v18 = vor.u32 1.1754944e-38, %v2104_v63 }
 0xbae   :  { %v2338_v8 = vadd.f32 0.112945676, %v2337_v9  ;;  %v2363_v21 = vadd.f32 0.00028619796, %v2362_v15  ;;  %v6921_v32 = vadd.f32 1.0, %v2301_v28  ;;  %v2080_v15 = vmul.f32 %v2079_v7, %v6866_v37 }
 0xbaf   :  { %v2374_v55 = vadd.f32 0.001143296, %v2373_v22  ;;  %v2327_v36 = vadd.f32 0.05243302, %v2326_v49  ;;  %v2097_v22 = vadd.f32 %v5719_v47, %v2096_v29  ;;  %v2102_v37 = vand.u32 2147483647, %v6903_v19 }
 0xbb0   :  { %v2339_v40 = vmul.f32 %v2338_v8, %v6891_v43  ;;  %v2364_v62 = vmul.f32 %v2363_v21, %v6910_v3  ;;  %5720 = vrcp.f32 %v6921_v32  ;;  %v2288_v8 = vmul.f32 %v2287_v46, %v6878_v54 }
 0xbb1   :  { %v2375_v56 = vmul.f32 %v2374_v55, %v6910_v3  ;;  %v2328_v53 = vmul.f32 %v2327_v36, %v6891_v43  ;;  %v2081_v55 = vadd.f32 1.1283791, %v2080_v15  ;;  %v2101_v10 = vsel %vm2100_vm4, %v5719_v47, %v2097_v22 }
 0xbb2   :  { %v2340_v11 = vadd.f32 0.4994258, %v2339_v40  ;;  %v2365_v48 = vadd.f32 0.0036580483, %v2364_v62  ;;  %vm2103_vm5 = vcmp.eq.f32.partialorder %v2102_v37, 8.507059e+37  ;;  %vm2308_vm11 = vweird.f32 %v6921_v32 }
 0xbb3   :  { %v2376_v26 = vadd.f32 0.014752088, %v2375_v56  ;;  %v2289_v56 = vadd.f32 0.18741608, %v2288_v8  ;;  %v2082_v61 = vmul.f32 %v2081_v55, %v6862_v23 }
 0xbb4   :  { %v2341_v41 = vmul.f32 %v2340_v11, %v6891_v43  ;;  %v2366_v38 = vmul.f32 %v2365_v48, %v6910_v3  ;;  %v2329_v11 = vadd.f32 0.18741608, %v2328_v53 }
 0xbb5   :  { %v2377_v17 = vmul.f32 %v2376_v26, %v6910_v3  ;;  %v2106_v26 = vsel %vm2103_vm5, %v2105_v18, %v2101_v10  ;;  %v2290_v19 = vmul.f32 %v2289_v56, %v6878_v54  ;;  %v2068_v10 = vmul.f32 0.5, %v6844_v60 }
 0xbb6   :  { %v6928_v52 = vadd.f32 1.0, %v2341_v41  ;;  %v6936_v24 = vpop.eup %5720  ;;  %v2367_v9 = vadd.f32 0.05243302, %v2366_v38  ;;  %v2330_v48 = vmul.f32 %v2329_v11, %v6891_v43  ;;  %v2107_v43 = vmul.f32 %v2106_v26, %v2082_v61 }
 0xbb7   :  { %v2378_v59 = vadd.f32 0.112945676, %v2377_v17  ;;  %v2304_v50 = vmul.f32 %v6936_v24, %v6921_v32  ;;  %vm2309_vm8 = vweird.f32 %v6936_v24  ;;  %v2314_v17 = vand.u32 2147483648, %v6921_v32 }
 0xbb8   :  { %5722 = vrcp.f32 %v6928_v52  ;;  %v2368_v40 = vmul.f32 %v2367_v9, %v6910_v3  ;;  %v2354_v47 = vand.u32 2147483648, %v6928_v52  ;;  %vm2348_vm9 = vweird.f32 %v6928_v52  ;;  %vm2310_vm12 = vmor %vm2308_vm11, %vm2309_vm8 }
 0xbb9   :  { %v2379_v1 = vmul.f32 %v2378_v59, %v6910_v3  ;;  %v2305_v34 = vsub.f32 1.0, %v2304_v50  ;;  %v2352_v23 = vand.u32 2147483647, %v6928_v52  ;;  %v2312_v38 = vand.u32 2147483647, %v6921_v32 }
 0xbba   :  { %v2369_v2 = vadd.f32 0.18741608, %v2368_v40  ;;  %v2331_v7 = vadd.f32 1.1283791, %v2330_v48  ;;  %v2291_v36 = vadd.f32 1.1283791, %v2290_v19 }
 0xbbb   :  { %v2380_v51 = vadd.f32 0.4994258, %v2379_v1  ;;  %v2306_v41 = vmul.f32 %v6936_v24, %v2305_v34  ;;  %vm2353_vm13 = vcmp.eq.f32.partialorder %v2352_v23, 8.507059e+37  ;;  %vm2313_vm15 = vcmp.eq.f32.partialorder %v2312_v38, 8.507059e+37 }
 0xbbc   :  { %v2370_v5 = vmul.f32 %v2369_v2, %v6910_v3  ;;  %v2274_v26 = vmul.f32 0.5, %v6871_v39  ;;  %v2493_v39 = vpop.f32.mrf.mxu1 }
 0xbbd   :  { %v2381_v28 = vmul.f32 %v2380_v51, %v6910_v3  ;;  %v2307_v4 = vadd.f32 %v6936_v24, %v2306_v41  ;;  %v2355_v3 = vor.u32 1.1754944e-38, %v2354_v47  ;;  %v6984_v47 = vld [vmem:[%s5364_s4] sm:$0x3]  ;;  %s5848_s4 = smov 3  }
 0xbbe   :  { %v5723_v16 = vpop.eup %5722  ;;  %v2371_v51 = vadd.f32 1.1283791, %v2370_v5  ;;  %s5356_s8 = sld [smem:[%s8445_s0 + %s5848_s4]]  }
 0xbbf   :  { %v2344_v57 = vmul.f32 %v5723_v16, %v6928_v52  ;;  %v2382_v33 = vadd.f32 1.0, %v2381_v28  ;;  %vm2349_vm7 = vweird.f32 %v5723_v16  ;;  %v2315_v52 = vor.u32 1.1754944e-38, %v2314_v17 }
 0xbc0   :  { %vm6961_vm10 = vmor %vm2348_vm9, %vm2349_vm7  ;;  %v2311_v46 = vsel %vm2310_vm12, %v6936_v24, %v2307_v4  ;;  %v2292_v28 = vmul.f32 %v2291_v36, %v6874_v0  ;;  %v2372_v24 = vmul.f32 %v2371_v51, %v6899_v6  ;;  %v2275_v6 = vmul.f32 0.5, %v6882_v20  ;;  %v2517_v20 = vpop.permute.xlu2 %2516 }
 0xbc1   :  { %v2345_v21 = vsub.f32 1.0, %v2344_v57  ;;  %5724 = vrcp.f32 %v2382_v33  ;;  %v2394_v50 = vand.u32 2147483648, %v2382_v33  ;;  %v2392_v32 = vand.u32 2147483647, %v2382_v33 }
 0xbc2   :  { %v2332_v57 = vmul.f32 %v2331_v7, %v6885_v44  ;;  %vm2388_vm3 = vweird.f32 %v2382_v33 }
 0xbc3   :  { %v2346_v62 = vmul.f32 %v5723_v16, %v2345_v21  ;;  %v2395_v8 = vor.u32 1.1754944e-38, %v2394_v50  ;;  %v5460_v21 = vclamps-f32 %v2107_v43, 1.0  ;;  %vm2393_vm5 = vcmp.eq.f32.partialorder %v2392_v32, 8.507059e+37 }
 0xbc4   :  { %v2495_v4 = vpop.f32.mrf.mxu1 }
 0xbc5   :  { %v2347_v35 = vadd.f32 %v5723_v16, %v2346_v62  ;;  %v2110_v11 = vadd.f32 1.0, %v5460_v21 }
 0xbc7   :  { %v5725_v49 = vpop.eup %5724  ;;  %v2351_v1 = vsel %vm6961_vm10, %v5723_v16, %v2347_v35  ;;  %v2316_v16 = vsel %vm2313_vm15, %v2315_v52, %v2311_v46  ;;  %v2111_v18 = vmul.f32 %v2110_v11, %v2068_v10 }
 0xbc8   :  { %v2384_v54 = vmul.f32 %v5725_v49, %v2382_v33  ;;  %v2356_v9 = vsel %vm2353_vm13, %v2355_v3, %v2351_v1  ;;  %vm2389_vm14 = vweird.f32 %v5725_v49  ;;  %v2317_v34 = vmul.f32 %v2316_v16, %v2292_v28 }
 0xbc9   :  { %v2357_v22 = vmul.f32 %v2356_v9, %v2332_v57  ;;  %vm2390_vm4 = vmor %vm2388_vm3, %vm2389_vm14  ;;  %v2276_v33 = vmul.f32 0.5, %v6896_v30  ;;  %v2112_v35 = vpack.c.bf16 %v2111_v18, %v2111_v18 }
 0xbca   :  { %v2385_v29 = vsub.f32 1.0, %v2384_v54  ;;  %v5471_v44 = vclamps-f32 %v2317_v34, 1.0 }
 0xbcb   :  { %v5472_v37 = vclamps-f32 %v2357_v22, 1.0  ;;  %v2522_v17 = vand.u32 %v2112_v35, %v5886_v14 }
 0xbcc   :  { %v2386_v15 = vmul.f32 %v5725_v49, %v2385_v29  ;;  %v2400_v2 = vadd.f32 1.0, %v5471_v44 }
 0xbcd   :  { %v2401_v56 = vadd.f32 1.0, %v5472_v37 }
 0xbce   :  { %v2387_v53 = vadd.f32 %v5725_v49, %v2386_v15  ;;  %v2403_v30 = vmul.f32 %v2400_v2, %v2274_v26 }
 0xbcf   :  { %v2404_v48 = vmul.f32 %v2401_v56, %v2275_v6 }
 0xbd0   :  { %v2391_v63 = vsel %vm2390_vm4, %v5725_v49, %v2387_v53  ;;  %v2509_v49 = vpop.f32.mrf.mxu2 }
 0xbd1   :  { %v2396_v40 = vsel %vm2393_vm5, %v2395_v8, %v2391_v63  ;;  %v2407_v19 = vpack.c.bf16 %v2404_v48, %v2403_v30  ;;  %v2510_v59 = vadd.f32 %v2509_v49, %v2493_v39 }
 0xbd2   :  { %v2397_v55 = vmul.f32 %v2396_v40, %v2372_v24 }
 0xbd4   :  { %v5473_v62 = vclamps-f32 %v2397_v55, 1.0 }
 0xbd6   :  { %v2402_v0 = vadd.f32 1.0, %v5473_v62 }
 0xbd8   :  { %v2405_v41 = vmul.f32 %v2402_v0, %v2276_v33  ;;  %v2511_v23 = vpop.f32.mrf.mxu2 }
 0xbda   :  { %v2408_v61 = vpack.c.bf16 %v2405_v41, %v2405_v41 }
 0xbdc   :  { %v2413_v60 = vsel %vm154_vm0, %v2408_v61, 0 }
 0xbdd   :  { %2421 = vmatpush.bf16.msra.mxu0 %v2413_v60 }
 0xbe1   :  { %2422 = vmatpush.bf16.msra.mxu0 %v2407_v19 }
 0xbe4   :  { %5474 = vmatmul.msk.bf16.vlgmr.msra.gmra.mxu0 %vm443_vm6, %v6984_v47 }
 0xbe5   :  { %2531 = vmatpush.bf16.msrb.mxu0 %v2522_v17 }
 0xbf4   :  { %5478 = vmatmul.msk.bf16.vlgmr.msrb.gmra.mxu0 %vm150_vm2, %v2517_v20 }
 0xc61   :  { %v6989_v5 = vpop.f32.mrf.mxu0 }
 0xc69   :  { %v2426_v43 = vpop.f32.mrf.mxu0 }
 0xc71   :  { %v2533_v54 = vpop.f32.mrf.mxu0 }
 0xc72   :  { %v2537_v38 = vadd.f32 %v2533_v54, %v2510_v59 }
 0xc74   :  { %v2538_v7 = vadd.f32 %v2537_v38, %v6846_v58 }
 0xc76   :  { %v2540_v1 = vmul.f32 0.70710677, %v2538_v7  ;;  %v2539_v26 = vmul.f32 0.5, %v2538_v7 }
 0xc78   :  { %v2541_v36 = vmul.f32 %v2540_v1, %v2540_v1 }
 0xc79   :  { %v2535_v52 = vpop.f32.mrf.mxu0 }
 0xc7a   :  { %v2542_v3 = vmin.f32 %v2541_v36, 16.0 }
 0xc7c   :  { %v2543_v29 = vmul.f32 2.1237322e-06, %v2542_v3  ;;  %v2554_v46 = vmul.f32 3.8918573e-05, %v2542_v3 }
 0xc7e   :  { %v2544_v51 = vadd.f32 0.00028619796, %v2543_v29  ;;  %v2555_v50 = vadd.f32 0.001143296, %v2554_v46 }
 0xc80   :  { %v2545_v9 = vmul.f32 %v2544_v51, %v2542_v3  ;;  %v2556_v15 = vmul.f32 %v2555_v50, %v2542_v3 }
 0xc82   :  { %v2557_v32 = vadd.f32 0.014752088, %v2556_v15  ;;  %v2546_v57 = vadd.f32 0.0036580483, %v2545_v9 }
 0xc84   :  { %v2558_v16 = vmul.f32 %v2557_v32, %v2542_v3  ;;  %v2547_v28 = vmul.f32 %v2546_v57, %v2542_v3 }
 0xc86   :  { %v2559_v53 = vadd.f32 0.112945676, %v2558_v16  ;;  %v2548_v21 = vadd.f32 0.05243302, %v2547_v28 }
 0xc88   :  { %v2560_v22 = vmul.f32 %v2559_v53, %v2542_v3  ;;  %v2549_v63 = vmul.f32 %v2548_v21, %v2542_v3 }
 0xc8a   :  { %v2561_v8 = vadd.f32 0.4994258, %v2560_v22  ;;  %v2550_v34 = vadd.f32 0.18741608, %v2549_v63 }
 0xc8c   :  { %v2562_v24 = vmul.f32 %v2561_v8, %v2542_v3  ;;  %v2551_v55 = vmul.f32 %v2550_v34, %v2542_v3 }
 0xc8e   :  { %v2563_v58 = vadd.f32 1.0, %v2562_v24  ;;  %v2552_v44 = vadd.f32 1.1283791, %v2551_v55 }
 0xc90   :  { %5726 = vrcp.f32 %v2563_v58  ;;  %v2575_v62 = vand.u32 2147483648, %v2563_v58  ;;  %v2573_v33 = vand.u32 2147483647, %v2563_v58  ;;  %vm2569_vm8 = vweird.f32 %v2563_v58 }
 0xc91   :  { %v2553_v18 = vmul.f32 %v2552_v44, %v2540_v1 }
 0xc92   :  { %v2576_v56 = vor.u32 1.1754944e-38, %v2575_v62  ;;  %vm2574_vm10 = vcmp.eq.f32.partialorder %v2573_v33, 8.507059e+37 }
 0xc96   :  { %v5727_v40 = vpop.eup %5726 }
 0xc97   :  { %v2565_v37 = vmul.f32 %v5727_v40, %v2563_v58  ;;  %vm2570_vm7 = vweird.f32 %v5727_v40 }
 0xc98   :  { %vm2571_vm9 = vmor %vm2569_vm8, %vm2570_vm7 }
 0xc99   :  { %v2566_v11 = vsub.f32 1.0, %v2565_v37 }
 0xc9b   :  { %v2567_v10 = vmul.f32 %v5727_v40, %v2566_v11 }
 0xc9d   :  { %v2568_v0 = vadd.f32 %v5727_v40, %v2567_v10 }
 0xc9f   :  { %v2572_v41 = vsel %vm2571_vm9, %v5727_v40, %v2568_v0 }
 0xca0   :  { %v2577_v2 = vsel %vm2574_vm10, %v2576_v56, %v2572_v41 }
 0xca1   :  { %v2578_v6 = vmul.f32 %v2577_v2, %v2553_v18 }
 0xca3   :  { %v5479_v61 = vclamps-f32 %v2578_v6, 1.0 }
 0xca5   :  { %v2581_v48 = vadd.f32 1.0, %v5479_v61 }
 0xca7   :  { %v2582_v35 = vmul.f32 %v2581_v48, %v2539_v26 }
 0xca9   :  { %v2583_v60 = vpack.c.bf16 %v2582_v35, %v2582_v35 }
 0xcab   :  { %v2585_v30 = vand.u32 %v2583_v60, %v5886_v14 }
 0xcad   :  { %2594 = vmatpush.bf16.msrb.mxu1 %v2585_v30 }
 0xcb0   :  { %5480 = vmatmul.msk.bf16.vlgmr.msrb.gmra.mxu1 %vm150_vm2, %v6853_v13 }
 0xcc0   :  { %5481 = vmatmul.msk.bf16.gmra.mxu1 %vm150_vm2, %v6857_v27 }
 0xd2d   :  { %v6997_v19 = vpop.f32.mrf.mxu1 }
 0xd2e   :  { %v7000_v17 = vmul.f32 0.70710677, %v6997_v19 }
 0xd30   :  { %v2611_v20 = vmul.f32 %v7000_v17, %v7000_v17 }
 0xd32   :  { %v7004_v39 = vmin.f32 %v2611_v20, 16.0 }
 0xd34   :  { %v2624_v49 = vmul.f32 3.8918573e-05, %v7004_v39  ;;  %v2613_v29 = vmul.f32 2.1237322e-06, %v7004_v39 }
 0xd35   :  { %v7007_v4 = vpop.f32.mrf.mxu1 }
 0xd36   :  { %v2625_v23 = vadd.f32 0.001143296, %v2624_v49  ;;  %v7010_v13 = vmul.f32 0.70710677, %v7007_v4  ;;  %v2614_v16 = vadd.f32 0.00028619796, %v2613_v29 }
 0xd38   :  { %v2626_v27 = vmul.f32 %v2625_v23, %v7004_v39  ;;  %v2651_v43 = vmul.f32 %v7010_v13, %v7010_v13  ;;  %v2615_v34 = vmul.f32 %v2614_v16, %v7004_v39 }
 0xd3a   :  { %v2627_v59 = vadd.f32 0.014752088, %v2626_v27  ;;  %v7015_v54 = vmin.f32 %v2651_v43, 16.0  ;;  %v2616_v10 = vadd.f32 0.0036580483, %v2615_v34 }
 0xd3c   :  { %v2628_v38 = vmul.f32 %v2627_v59, %v7004_v39  ;;  %v2664_v7 = vmul.f32 3.8918573e-05, %v7015_v54  ;;  %v2653_v51 = vmul.f32 2.1237322e-06, %v7015_v54  ;;  %v2617_v6 = vmul.f32 %v2616_v10, %v7004_v39 }
 0xd3d   :  { %v7019_v1 = vpop.f32.mrf.mxu1 }
 0xd3e   :  { %v2629_v36 = vadd.f32 0.112945676, %v2628_v38  ;;  %v2665_v52 = vadd.f32 0.001143296, %v2664_v7  ;;  %v7022_v3 = vmul.f32 0.70710677, %v7019_v1 }
 0xd3f   :  { %v2654_v53 = vadd.f32 0.00028619796, %v2653_v51  ;;  %v2618_v30 = vadd.f32 0.05243302, %v2617_v6 }
 0xd40   :  { %v2630_v46 = vmul.f32 %v2629_v36, %v7004_v39  ;;  %v2666_v50 = vmul.f32 %v2665_v52, %v7015_v54  ;;  %v2691_v9 = vmul.f32 %v7022_v3, %v7022_v3 }
 0xd41   :  { %v2655_v40 = vmul.f32 %v2654_v53, %v7015_v54  ;;  %v2619_v38 = vmul.f32 %v2618_v30, %v7004_v39 }
 0xd42   :  { %v2631_v15 = vadd.f32 0.4994258, %v2630_v46  ;;  %v2667_v32 = vadd.f32 0.014752088, %v2666_v50  ;;  %v7030_v57 = vmin.f32 %v2691_v9, 16.0  ;;  %v2814_v9 = vpop.permute.xlu1 %2813 }
 0xd43   :  { %v2656_v33 = vadd.f32 0.0036580483, %v2655_v40  ;;  %v5488_v40 = vld [vmem:[%s7063_s9 + $0x4] sm:$0x3] }
 0xd44   :  { %v2668_v28 = vmul.f32 %v2667_v32, %v7015_v54  ;;  %v2693_v22 = vmul.f32 2.1237322e-06, %v7030_v57  ;;  %v2632_v21 = vmul.f32 %v2631_v15, %v7004_v39  ;;  %v2704_v24 = vmul.f32 3.8918573e-05, %v7030_v57 }
 0xd45   :  { %v2603_v8 = vpop.f32.mrf.mxu1  ;;  %v2657_v61 = vmul.f32 %v2656_v33, %v7015_v54  ;;  %v2620_v15 = vadd.f32 0.18741608, %v2619_v38 }
 0xd46   :  { %v2669_v58 = vadd.f32 0.112945676, %v2668_v28  ;;  %v2694_v63 = vadd.f32 0.00028619796, %v2693_v22  ;;  %v7039_v37 = vadd.f32 1.0, %v2632_v21 }
 0xd47   :  { %v2705_v11 = vadd.f32 0.001143296, %v2704_v24  ;;  %v2658_v20 = vadd.f32 0.05243302, %v2657_v61  ;;  %v2621_v22 = vmul.f32 %v2620_v15, %v7004_v39  ;;  %v5487_v21 = vld [vmem:[%s7063_s9 + $0x2] sm:$0x3]  ;;  %v7084_v39 = vand.u32 %v5488_v40, %v5886_v14 }
 0xd48   :  { %v2670_v55 = vmul.f32 %v2669_v58, %v7015_v54  ;;  %v2695_v44 = vmul.f32 %v2694_v63, %v7030_v57  ;;  %5728 = vrcp.f32 %v7039_v37  ;;  %v2800_v24 = vld [vmem:[%s7063_s9] sm:$0x3]  ;;  %v7076_v63 = vand.u32 %v5487_v21, %v5886_v14 }
 0xd49   :  { %v2706_v0 = vmul.f32 %v2705_v11, %v7030_v57  ;;  %v2659_v7 = vmul.f32 %v2658_v20, %v7015_v54  ;;  %v2837_v34 = vand.u32 %v2800_v24, %v5886_v14  ;;  %3182 = vmatpush.bf16.msra.mxu1 %v7084_v39  ;;  %vm2639_vm15 = vweird.f32 %v7039_v37 }
 0xd4a   :  { %v2671_v62 = vadd.f32 0.4994258, %v2670_v55  ;;  %v2696_v2 = vadd.f32 0.0036580483, %v2695_v44  ;;  %v2645_v55 = vand.u32 2147483648, %v7039_v37  ;;  %2828 = vmatpush.bf16.msrb.mxu3 %v7076_v63 }
 0xd4b   :  { %v2707_v18 = vadd.f32 0.014752088, %v2706_v0  ;;  %v2660_v32 = vadd.f32 0.18741608, %v2659_v7  ;;  %2846 = vmatpush.bf16.msra.mxu0 %v2837_v34 }
 0xd4c   :  { %v2672_v56 = vmul.f32 %v2671_v62, %v7015_v54  ;;  %v2697_v35 = vmul.f32 %v2696_v2, %v7030_v57  ;;  %v2622_v2 = vadd.f32 1.1283791, %v2621_v22  ;;  %v2646_v61 = vor.u32 1.1754944e-38, %v2645_v55 }
 0xd4d   :  { %v2708_v26 = vmul.f32 %v2707_v18, %v7030_v57  ;;  %v2661_v8 = vmul.f32 %v2660_v32, %v7015_v54  ;;  %5490 = vmatmul.msk.bf16.vlgmr.msrb.gmra.mxu3 %vm150_vm2, %v2814_v9 }
 0xd4e   :  { %v7045_v41 = vadd.f32 1.0, %v2672_v56  ;;  %v7052_v60 = vpop.eup %5728  ;;  %v2698_v59 = vadd.f32 0.05243302, %v2697_v35  ;;  %v2643_v56 = vand.u32 2147483647, %v7039_v37  ;;  %5491 = vmatmul.msk.bf16.vlgmr.msra.gmra.mxu0 %vm150_vm2, %v5920_v31 }
 0xd4f   :  { %v2709_v48 = vadd.f32 0.112945676, %v2708_v26  ;;  %v2635_v43 = vmul.f32 %v7052_v60, %v7039_v37  ;;  %vm2640_vm12 = vweird.f32 %v7052_v60  ;;  %v2662_v18 = vadd.f32 1.1283791, %v2661_v8 }
 0xd50   :  { %5730 = vrcp.f32 %v7045_v41  ;;  %v2699_v51 = vmul.f32 %v2698_v59, %v7030_v57  ;;  %v2685_v11 = vand.u32 2147483648, %v7045_v41  ;;  %vm2679_vm13 = vweird.f32 %v7045_v41  ;;  %vm7104_vm3 = vmor %vm2639_vm15, %vm2640_vm12 }
 0xd51   :  { %v2710_v49 = vmul.f32 %v2709_v48, %v7030_v57  ;;  %v2636_v46 = vsub.f32 1.0, %v2635_v43  ;;  %v2683_v44 = vand.u32 2147483647, %v7045_v41  ;;  %vm2644_vm7 = vcmp.eq.f32.partialorder %v2643_v56, 8.507059e+37 }
 0xd52   :  { %v2700_v28 = vadd.f32 0.18741608, %v2699_v51  ;;  %v2686_v26 = vor.u32 1.1754944e-38, %v2685_v11  ;;  %v2605_v8 = vmul.f32 0.5, %v6997_v19 }
 0xd53   :  { %v2711_v23 = vadd.f32 0.4994258, %v2710_v49  ;;  %v2637_v53 = vmul.f32 %v7052_v60, %v2636_v46  ;;  %vm2684_vm4 = vcmp.eq.f32.partialorder %v2683_v44, 8.507059e+37  ;;  %v7134_v44 = vpop.permute.xlu0 %2881 }
 0xd54   :  { %v2701_v10 = vmul.f32 %v2700_v28, %v7030_v57 }
 0xd55   :  { %v2712_v52 = vmul.f32 %v2711_v23, %v7030_v57  ;;  %v2638_v62 = vadd.f32 %v7052_v60, %v2637_v53 }
 0xd56   :  { %v5731_v27 = vpop.eup %5730  ;;  %v2702_v35 = vadd.f32 1.1283791, %v2701_v10 }
 0xd57   :  { %v2675_v36 = vmul.f32 %v5731_v27, %v7045_v41  ;;  %v7067_v50 = vadd.f32 1.0, %v2712_v52  ;;  %vm2680_vm11 = vweird.f32 %v5731_v27  ;;  %v3171_v41 = vpop.permute.xlu1 %3170  ;;  %v2642_v37 = vsel %vm7104_vm3, %v7052_v60, %v2638_v62 }
 0xd58   :  { %vm7092_vm14 = vmor %vm2679_vm13, %vm2680_vm11  ;;  %5505 = vmatmul.msk.bf16.vlgmr.msra.gmra.mxu1 %vm150_vm2, %v3171_v41  ;;  %v2647_v43 = vsel %vm2644_vm7, %v2646_v61, %v2642_v37  ;;  %v2623_v60 = vmul.f32 %v2622_v2, %v7000_v17  ;;  %v2606_v17 = vmul.f32 0.5, %v7007_v4 }
 0xd59   :  { %v2676_v29 = vsub.f32 1.0, %v2675_v36  ;;  %5732 = vrcp.f32 %v7067_v50  ;;  %v2725_v30 = vand.u32 2147483648, %v7067_v50  ;;  %v2723_v23 = vand.u32 2147483647, %v7067_v50 }
 0xd5a   :  { %vm2719_vm8 = vweird.f32 %v7067_v50  ;;  %v2703_v36 = vmul.f32 %v2702_v35, %v7022_v3 }
 0xd5b   :  { %v2677_v16 = vmul.f32 %v5731_v27, %v2676_v29  ;;  %v2726_v7 = vor.u32 1.1754944e-38, %v2725_v30  ;;  %vm2724_vm10 = vcmp.eq.f32.partialorder %v2723_v23, 8.507059e+37  ;;  %v2648_v29 = vmul.f32 %v2647_v43, %v2623_v60 }
 0xd5d   :  { %v2678_v58 = vadd.f32 %v5731_v27, %v2677_v16  ;;  %v5482_v32 = vclamps-f32 %v2648_v29, 1.0 }
 0xd5f   :  { %v5733_v54 = vpop.eup %5732  ;;  %v2682_v57 = vsel %vm7092_vm14, %v5731_v27, %v2678_v58  ;;  %v2663_v27 = vmul.f32 %v2662_v18, %v7010_v13  ;;  %v2607_v13 = vmul.f32 0.5, %v7019_v1  ;;  %v2731_v28 = vadd.f32 1.0, %v5482_v32  ;;  %v2858_v1 = vpop.permute.xlu2 %2857 }
 0xd60   :  { %v2715_v0 = vmul.f32 %v5733_v54, %v7067_v50  ;;  %v2687_v20 = vsel %vm2684_vm4, %v2686_v26, %v2682_v57  ;;  %vm2720_vm5 = vweird.f32 %v5733_v54 }
 0xd61   :  { %v2688_v38 = vmul.f32 %v2687_v20, %v2663_v27  ;;  %vm2721_vm9 = vmor %vm2719_vm8, %vm2720_vm5  ;;  %v2734_v24 = vmul.f32 %v2731_v28, %v2605_v8 }
 0xd62   :  { %v2716_v48 = vsub.f32 1.0, %v2715_v0 }
 0xd63   :  { %v5483_v9 = vclamps-f32 %v2688_v38, 1.0 }
 0xd64   :  { %v2717_v49 = vmul.f32 %v5733_v54, %v2716_v48 }
 0xd65   :  { %v2732_v53 = vadd.f32 1.0, %v5483_v9 }
 0xd66   :  { %v2718_v59 = vadd.f32 %v5733_v54, %v2717_v49 }
 0xd67   :  { %v2735_v3 = vmul.f32 %v2732_v53, %v2606_v17 }
 0xd68   :  { %v2722_v52 = vsel %vm2721_vm9, %v5733_v54, %v2718_v59 }
 0xd69   :  { %v2727_v46 = vsel %vm2724_vm10, %v2726_v7, %v2722_v52  ;;  %v2737_v58 = vpack.c.bf16 %v2735_v3, %v2734_v24  ;;  %v7141_v3 = vld [vmem:[%s5367_s17] sm:$0xff] }
 0xd6a   :  { %v2728_v51 = vmul.f32 %v2727_v46, %v2703_v36 }
 0xd6c   :  { %v5484_v15 = vclamps-f32 %v2728_v51, 1.0 }
 0xd6e   :  { %v2733_v16 = vadd.f32 1.0, %v5484_v15 }
 0xd70   :  { %v2736_v50 = vmul.f32 %v2733_v16, %v2607_v13 }
 0xd72   :  { %v2738_v22 = vpack.c.bf16 %v2736_v50, %v2736_v50 }
 0xd74   :  { %v2740_v21 = vsel %vm154_vm0, %v2738_v22, 0 }
 0xd75   :  { %2748 = vmatpush.bf16.msra.mxu2 %v2740_v21  ;;  %v2931_v21 = vld [vmem:[%s5367_s17 + $0x8] sm:$0x1] }
 0xd76   :  { %v2938_v24 = vunpack.c.l.b16 %v2931_v21 }
 0xd79   :  { %2749 = vmatpush.bf16.msra.mxu2 %v2737_v58  ;;  %v7145_v58 = vpack.c.b16 %v2938_v24, %v2938_v24 }
 0xd7c   :  { %5485 = vmatmul.msk.bf16.vlgmr.msra.gmra.mxu2 %vm443_vm6, %v6984_v47 }
 0xd7d   :  { %2872 = vmatpush.bf16.msrb.mxu2 %v7084_v39 }
 0xd81   :  { %3195 = vmatpush.bf16.msra.mxu2 %v7076_v63 }
 0xd8c   :  { %5492 = vmatmul.msk.bf16.vlgmr.msrb.gmra.mxu2 %vm150_vm2, %v2858_v1 }
 0xd9c   :  { %5506 = vmatmul.msk.bf16.vlgmr.msra.gmra.mxu2 %vm150_vm2, %v5920_v31 }
 0xdcb   :  { %v2848_v4 = vpop.f32.mrf.mxu0 }
 0xdd0   :  { %v2830_v19 = vpop.f32.mrf.mxu3 }
 0xdd1   :  { %v2849_v54 = vadd.f32 %v2848_v4, %v2830_v19 }
 0xdd3   :  { %v2850_v40 = vpop.f32.mrf.mxu0 }
 0xdd8   :  { %v2832_v34 = vpop.f32.mrf.mxu3 }
 0xdff   :  { %v7132_v55 = vpop.f32.mrf.mxu2 }
 0xe07   :  { %v2753_v11 = vpop.f32.mrf.mxu2 }
 0xe0f   :  { %v2874_v39 = vpop.f32.mrf.mxu2 }
 0xe10   :  { %v2878_v62 = vadd.f32 %v2874_v39, %v2849_v54 }
 0xe12   :  { %v2884_v47 = vadd.f32 %v7134_v44, %v2878_v62 }
 0xe14   :  { %v2886_v63 = vmul.f32 0.70710677, %v2884_v47  ;;  %v2885_v50 = vmul.f32 0.5, %v2884_v47 }
 0xe16   :  { %v2887_v10 = vmul.f32 %v2886_v63, %v2886_v63 }
 0xe17   :  { %v2876_v33 = vpop.f32.mrf.mxu2 }
 0xe18   :  { %v2888_v0 = vmin.f32 %v2887_v10, 16.0 }
 0xe1a   :  { %v2889_v56 = vmul.f32 2.1237322e-06, %v2888_v0  ;;  %v2900_v31 = vmul.f32 3.8918573e-05, %v2888_v0 }
 0xe1c   :  { %v2890_v18 = vadd.f32 0.00028619796, %v2889_v56  ;;  %v2901_v57 = vadd.f32 0.001143296, %v2900_v31 }
 0xe1e   :  { %v2891_v41 = vmul.f32 %v2890_v18, %v2888_v0  ;;  %v2902_v2 = vmul.f32 %v2901_v57, %v2888_v0 }
 0xe20   :  { %v2903_v6 = vadd.f32 0.014752088, %v2902_v2  ;;  %v2892_v61 = vadd.f32 0.0036580483, %v2891_v41 }
 0xe22   :  { %v2904_v26 = vmul.f32 %v2903_v6, %v2888_v0  ;;  %v2893_v37 = vmul.f32 %v2892_v61, %v2888_v0 }
 0xe24   :  { %v2905_v48 = vadd.f32 0.112945676, %v2904_v26  ;;  %v2894_v20 = vadd.f32 0.05243302, %v2893_v37 }
 0xe26   :  { %v2906_v35 = vmul.f32 %v2905_v48, %v2888_v0  ;;  %v2895_v27 = vmul.f32 %v2894_v20, %v2888_v0 }
 0xe28   :  { %v2907_v30 = vadd.f32 0.4994258, %v2906_v35  ;;  %v2896_v43 = vadd.f32 0.18741608, %v2895_v27 }
 0xe2a   :  { %v2908_v49 = vmul.f32 %v2907_v30, %v2888_v0  ;;  %v2897_v60 = vmul.f32 %v2896_v43, %v2888_v0 }
 0xe2c   :  { %v2909_v23 = vadd.f32 1.0, %v2908_v49  ;;  %v2898_v52 = vadd.f32 1.1283791, %v2897_v60 }
 0xe2e   :  { %5734 = vrcp.f32 %v2909_v23  ;;  %v2921_v36 = vand.u32 2147483648, %v2909_v23  ;;  %v2919_v46 = vand.u32 2147483647, %v2909_v23  ;;  %vm2915_vm12 = vweird.f32 %v2909_v23 }
 0xe2f   :  { %v2899_v15 = vmul.f32 %v2898_v52, %v2886_v63 }
 0xe30   :  { %v2922_v9 = vor.u32 1.1754944e-38, %v2921_v36  ;;  %vm2920_vm14 = vcmp.eq.f32.partialorder %v2919_v46, 8.507059e+37 }
 0xe34   :  { %v5735_v59 = vpop.eup %5734 }
 0xe35   :  { %v2911_v38 = vmul.f32 %v5735_v59, %v2909_v23  ;;  %vm2916_vm11 = vweird.f32 %v5735_v59 }
 0xe36   :  { %vm2917_vm13 = vmor %vm2915_vm12, %vm2916_vm11 }
 0xe37   :  { %v2912_v7 = vsub.f32 1.0, %v2911_v38 }
 0xe39   :  { %v2913_v29 = vmul.f32 %v5735_v59, %v2912_v7 }
 0xe3b   :  { %v2914_v51 = vadd.f32 %v5735_v59, %v2913_v29 }
 0xe3d   :  { %v2918_v32 = vsel %vm2917_vm13, %v5735_v59, %v2914_v51 }
 0xe3e   :  { %v2923_v13 = vsel %vm2920_vm14, %v2922_v9, %v2918_v32 }
 0xe3f   :  { %v2924_v16 = vmul.f32 %v2923_v13, %v2899_v15 }
 0xe41   :  { %v5493_v53 = vclamps-f32 %v2924_v16, 1.0 }
 0xe43   :  { %v2927_v28 = vadd.f32 1.0, %v5493_v53 }
 0xe45   :  { %v2928_v17 = vmul.f32 %v2927_v28, %v2885_v50 }
 0xe47   :  { %v2932_v22 = vpack.c.bf16 %v2928_v17, %v2928_v17 }
 0xe49   :  { %v2948_v8 = vand.u32 %v2932_v22, %v5886_v14 }
 0xe4b   :  { %2957 = vmatpush.bf16.msra.mxu3 %v2948_v8 }
 0xe4e   :  { %5498 = vmatmul.msk.bf16.vlgmr.msra.gmra.mxu3 %vm150_vm2, %v7141_v3 }
 0xe5e   :  { %5499 = vmatmul.msk.bf16.gmra.mxu3 %vm150_vm2, %v7145_v58 }
 0xed1   :  { %v7149_v1 = vpop.f32.mrf.mxu3 }
 0xed2   :  { %v7152_v19 = vmul.f32 0.70710677, %v7149_v1 }
 0xed4   :  { %v2974_v4 = vmul.f32 %v7152_v19, %v7152_v19 }
 0xed6   :  { %v2975_v34 = vmin.f32 %v2974_v4, 16.0 }
 0xed8   :  { %v2976_v40 = vmul.f32 2.1237322e-06, %v2975_v34  ;;  %v2987_v11 = vmul.f32 3.8918573e-05, %v2975_v34 }
 0xed9   :  { %v7156_v54 = vpop.f32.mrf.mxu3 }
 0xeda   :  { %v2977_v39 = vadd.f32 0.00028619796, %v2976_v40  ;;  %v2988_v62 = vadd.f32 0.001143296, %v2987_v11  ;;  %v7159_v47 = vmul.f32 0.70710677, %v7156_v54 }
 0xedc   :  { %v2989_v63 = vmul.f32 %v2988_v62, %v2975_v34  ;;  %v3014_v10 = vmul.f32 %v7159_v47, %v7159_v47  ;;  %v2978_v33 = vmul.f32 %v2977_v39, %v2975_v34 }
 0xede   :  { %v2990_v0 = vadd.f32 0.014752088, %v2989_v63  ;;  %v7163_v56 = vmin.f32 %v3014_v10, 16.0  ;;  %v2979_v2 = vadd.f32 0.0036580483, %v2978_v33 }
 0xee0   :  { %v2991_v31 = vmul.f32 %v2990_v0, %v2975_v34  ;;  %v3016_v18 = vmul.f32 2.1237322e-06, %v7163_v56  ;;  %v3027_v57 = vmul.f32 3.8918573e-05, %v7163_v56  ;;  %v2980_v49 = vmul.f32 %v2979_v2, %v2975_v34 }
 0xee1   :  { %v7167_v41 = vpop.f32.mrf.mxu3 }
 0xee2   :  { %v2992_v6 = vadd.f32 0.112945676, %v2991_v31  ;;  %v3017_v61 = vadd.f32 0.00028619796, %v3016_v18  ;;  %v3028_v26 = vadd.f32 0.001143296, %v3027_v57 }
 0xee3   :  { %v7170_v48 = vmul.f32 0.70710677, %v7167_v41  ;;  %v2981_v52 = vadd.f32 0.05243302, %v2980_v49 }
 0xee4   :  { %v2993_v37 = vmul.f32 %v2992_v6, %v2975_v34  ;;  %v3018_v35 = vmul.f32 %v3017_v61, %v7163_v56  ;;  %v3029_v30 = vmul.f32 %v3028_v26, %v7163_v56 }
 0xee5   :  { %v3054_v20 = vmul.f32 %v7170_v48, %v7170_v48  ;;  %v2982_v13 = vmul.f32 %v2981_v52, %v2975_v34 }
 0xee6   :  { %v2994_v23 = vadd.f32 0.4994258, %v2993_v37  ;;  %v3019_v27 = vadd.f32 0.0036580483, %v3018_v35  ;;  %v3030_v43 = vadd.f32 0.014752088, %v3029_v30 }
 0xee7   :  { %v7176_v59 = vmin.f32 %v3054_v20, 16.0  ;;  %v2983_v21 = vadd.f32 0.18741608, %v2982_v13 }
 0xee8   :  { %v2995_v60 = vmul.f32 %v2994_v23, %v2975_v34  ;;  %v3031_v38 = vmul.f32 %v3030_v43, %v7163_v56  ;;  %v3020_v51 = vmul.f32 %v3019_v27, %v7163_v56 }
 0xee9   :  { %v3056_v7 = vmul.f32 2.1237322e-06, %v7176_v59  ;;  %v2966_v36 = vpop.f32.mrf.mxu3  ;;  %v3067_v46 = vmul.f32 3.8918573e-05, %v7176_v59  ;;  %v2984_v10 = vmul.f32 %v2983_v21, %v2975_v34 }
 0xeea   :  { %v2996_v29 = vadd.f32 1.0, %v2995_v60  ;;  %v3032_v9 = vadd.f32 0.112945676, %v3031_v38  ;;  %v3021_v53 = vadd.f32 0.05243302, %v3020_v51 }
 0xeeb   :  { %v3057_v15 = vadd.f32 0.00028619796, %v3056_v7  ;;  %v3068_v16 = vadd.f32 0.001143296, %v3067_v46  ;;  %v2985_v26 = vadd.f32 1.1283791, %v2984_v10 }
 0xeec   :  { %5736 = vrcp.f32 %v2996_v29  ;;  %v3033_v32 = vmul.f32 %v3032_v9, %v7163_v56  ;;  %v3022_v40 = vmul.f32 %v3021_v53, %v7163_v56  ;;  %v3008_v33 = vand.u32 2147483648, %v2996_v29 }
 0xeed   :  { %v3058_v28 = vmul.f32 %v3057_v15, %v7176_v59  ;;  %v3069_v17 = vmul.f32 %v3068_v16, %v7176_v59  ;;  %v3006_v2 = vand.u32 2147483647, %v2996_v29  ;;  %vm3002_vm3 = vweird.f32 %v2996_v29 }
 0xeee   :  { %v3034_v50 = vadd.f32 0.4994258, %v3033_v32  ;;  %v3023_v18 = vadd.f32 0.18741608, %v3022_v40  ;;  %v3009_v20 = vor.u32 1.1754944e-38, %v3008_v33  ;;  %v2986_v60 = vmul.f32 %v2985_v26, %v7152_v19 }
 0xeef   :  { %v3070_v24 = vadd.f32 0.014752088, %v3069_v17  ;;  %v3059_v39 = vadd.f32 0.0036580483, %v3058_v28  ;;  %vm3007_vm5 = vcmp.eq.f32.partialorder %v3006_v2, 8.507059e+37  ;;  %v2970_v26 = vmul.f32 0.5, %v7167_v41 }
 0xef0   :  { %v3035_v22 = vmul.f32 %v3034_v50, %v7163_v56  ;;  %v3024_v34 = vmul.f32 %v3023_v18, %v7163_v56  ;;  %v3488_v41 = vld [vmem:[%s7201_s24] sm:$0x3] }
 0xef1   :  { %v3071_v62 = vmul.f32 %v3070_v24, %v7176_v59  ;;  %v3060_v57 = vmul.f32 %v3059_v39, %v7176_v59  ;;  %v2968_v24 = vmul.f32 0.5, %v7149_v1 }
 0xef2   :  { %v5737_v8 = vpop.eup %5736  ;;  %v3036_v11 = vadd.f32 1.0, %v3035_v22  ;;  %v3025_v7 = vadd.f32 1.1283791, %v3024_v34 }
 0xef3   :  { %v2998_v4 = vmul.f32 %v5737_v8, %v2996_v29  ;;  %v3072_v0 = vadd.f32 0.112945676, %v3071_v62  ;;  %vm3003_vm15 = vweird.f32 %v5737_v8  ;;  %v3061_v49 = vadd.f32 0.05243302, %v3060_v57 }
 0xef4   :  { %5738 = vrcp.f32 %v3036_v11  ;;  %vm3004_vm4 = vmor %vm3002_vm3, %vm3003_vm15  ;;  %v3048_v36 = vand.u32 2147483648, %v3036_v11  ;;  %v3046_v9 = vand.u32 2147483647, %v3036_v11  ;;  %vm3042_vm8 = vweird.f32 %v3036_v11 }
 0xef5   :  { %v2999_v63 = vsub.f32 1.0, %v2998_v4  ;;  %v3073_v6 = vmul.f32 %v3072_v0, %v7176_v59  ;;  %v3062_v52 = vmul.f32 %v3061_v49, %v7176_v59  ;;  %v3026_v16 = vmul.f32 %v3025_v7, %v7159_v47 }
 0xef6   :  { %v3049_v15 = vor.u32 1.1754944e-38, %v3048_v36  ;;  %vm3047_vm10 = vcmp.eq.f32.partialorder %v3046_v9, 8.507059e+37  ;;  %v2969_v4 = vmul.f32 0.5, %v7156_v54 }
 0xef7   :  { %v3000_v31 = vmul.f32 %v5737_v8, %v2999_v63  ;;  %v3074_v37 = vadd.f32 0.4994258, %v3073_v6  ;;  %v3063_v32 = vadd.f32 0.18741608, %v3062_v52  ;;  %v5516_v6 = vld [vmem:[%s7201_s24 + $0x2] sm:$0x3] }
 0xef8   :  { %v3827_v52 = vld.sshfl [vmem:[#allocation1] sm:$0xff pattern:$0x73625140] }
 0xef9   :  { %v3001_v61 = vadd.f32 %v5737_v8, %v3000_v31  ;;  %v3075_v43 = vmul.f32 %v3074_v37, %v7176_v59  ;;  %v3064_v17 = vmul.f32 %v3063_v32, %v7176_v59  ;;  %3829 = vrot.lane.b32.xlu2 %v3827_v52, %s5819_s11  ;;  %s5846_s11 = smov 18  }
 0xefa   :  { %v5739_v35 = vpop.eup %5738  ;;  %s5371_s30 = sld [smem:[%s8445_s0 + %s5846_s11]]  }
 0xefb   :  { %v3005_v30 = vsel %vm3004_vm4, %v5737_v8, %v3001_v61  ;;  %v3038_v23 = vmul.f32 %v5739_v35, %v3036_v11  ;;  %v3076_v29 = vadd.f32 1.0, %v3075_v43  ;;  %vm3043_vm7 = vweird.f32 %v5739_v35  ;;  %v3205_v43 = vpop.permute.xlu2 %3204 }
 0xefc   :  { %v3010_v27 = vsel %vm3007_vm5, %v3009_v20, %v3005_v30  ;;  %vm3044_vm9 = vmor %vm3042_vm8, %vm3043_vm7  ;;  %v3065_v39 = vadd.f32 1.1283791, %v3064_v17  ;;  %v7206_v61 = vand.u32 %v5516_v6, %v5886_v14  ;;  %v3500_v30 = vpop.permute.xlu0 %3499  ;;  %v5489_v20 = vld [vmem:[%s7063_s9 + $0x6] sm:$0x3]  ;;  %s5849_s9 = smov 20  }
 0xefd   :  { %v3039_v38 = vsub.f32 1.0, %v3038_v23  ;;  %v3011_v46 = vmul.f32 %v3010_v27, %v2986_v60  ;;  %5740 = vrcp.f32 %v3076_v29  ;;  %v3086_v62 = vand.u32 2147483647, %v3076_v29  ;;  %v7218_v23 = vld [vmem:[%s5368_s28] sm:$0x3]  ;;  %v3184_v60 = vpop.f32.mrf.mxu1  ;;  %s5373_s16 = sld [smem:[%s8445_s0 + %s5849_s9]]  }
 0xefe   :  { %v3088_v63 = vand.u32 2147483648, %v3076_v29  ;;  %vm3082_vm12 = vweird.f32 %v3076_v29  ;;  %v3066_v0 = vmul.f32 %v3065_v39, %v7170_v48  ;;  %3514 = vmatpush.bf16.msrb.mxu3 %v7206_v61  ;;  %v3210_v49 = vand.u32 %v5489_v20, %v5886_v14 }
 0xeff   :  { %v3040_v51 = vmul.f32 %v5739_v35, %v3039_v38  ;;  %v5500_v13 = vclamps-f32 %v3011_v46, 1.0  ;;  %vm3087_vm14 = vcmp.eq.f32.partialorder %v3086_v62, 8.507059e+37  ;;  %v3523_v27 = vand.u32 %v3488_v41, %v5886_v14  ;;  %v3197_v38 = vpop.f32.mrf.mxu2 }
 0xf00   :  { %v3089_v54 = vor.u32 1.1754944e-38, %v3088_v63  ;;  %v3198_v17 = vadd.f32 %v3197_v38, %v3184_v60 }
 0xf01   :  { %v3041_v56 = vadd.f32 %v5739_v35, %v3040_v51  ;;  %v3094_v22 = vadd.f32 1.0, %v5500_v13  ;;  %5518 = vmatmul.msk.bf16.vlgmr.msrb.gmra.mxu3 %vm150_vm2, %v3500_v30  ;;  %4174 = vrot.lane.b32.xlu2 %v5938_v42, %s5820_s12 }
 0xf03   :  { %v3045_v19 = vsel %vm3044_vm9, %v5739_v35, %v3041_v56  ;;  %v5741_v28 = vpop.eup %5740  ;;  %v3097_v47 = vmul.f32 %v3094_v22, %v2968_v24 }
 0xf04   :  { %v3050_v53 = vsel %vm3047_vm10, %v3049_v15, %v3045_v19  ;;  %v3078_v21 = vmul.f32 %v5741_v28, %v3076_v29  ;;  %vm3083_vm11 = vweird.f32 %v5741_v28  ;;  %v7239_v15 = vmul.f32 0.70710677, %v7132_v55 }
 0xf05   :  { %v3051_v50 = vmul.f32 %v3050_v53, %v3026_v16  ;;  %vm3084_vm13 = vmor %vm3082_vm12, %vm3083_vm11  ;;  %v3186_v7 = vpop.f32.mrf.mxu1 }
 0xf06   :  { %v3079_v11 = vsub.f32 1.0, %v3078_v21  ;;  %v2757_v53 = vmul.f32 %v7239_v15, %v7239_v15 }
 0xf07   :  { %v5501_v8 = vclamps-f32 %v3051_v50, 1.0  ;;  %v3199_v36 = vpop.f32.mrf.mxu2 }
 0xf08   :  { %v3080_v33 = vmul.f32 %v5741_v28, %v3079_v11  ;;  %v7245_v22 = vmin.f32 %v2757_v53, 16.0 }
 0xf09   :  { %v3095_v40 = vadd.f32 1.0, %v5501_v8 }
 0xf0a   :  { %v3081_v59 = vadd.f32 %v5741_v28, %v3080_v33  ;;  %v2770_v11 = vmul.f32 3.8918573e-05, %v7245_v22 }
 0xf0b   :  { %v3098_v10 = vmul.f32 %v3095_v40, %v2969_v4 }
 0xf0c   :  { %v3085_v31 = vsel %vm3084_vm13, %v5741_v28, %v3081_v59  ;;  %v2771_v33 = vadd.f32 0.001143296, %v2770_v11 }
 0xf0d   :  { %v3101_v1 = vpack.c.bf16 %v3098_v10, %v3097_v47  ;;  %v3090_v18 = vsel %vm3087_vm14, %v3089_v54, %v3085_v31 }
 0xf0e   :  { %v3091_v57 = vmul.f32 %v3090_v18, %v3066_v0 }
 0xf10   :  { %v5502_v2 = vclamps-f32 %v3091_v57, 1.0  ;;  %v2772_v57 = vmul.f32 %v2771_v33, %v7245_v22 }
 0xf12   :  { %v3096_v37 = vadd.f32 1.0, %v5502_v2 }
 0xf14   :  { %v3099_v35 = vmul.f32 %v3096_v37, %v2970_v26 }
 0xf16   :  { %v3102_v48 = vpack.c.bf16 %v3099_v35, %v3099_v35  ;;  %v2773_v35 = vadd.f32 0.014752088, %v2772_v57 }
 0xf18   :  { %v3107_v34 = vsel %vm154_vm0, %v3102_v48, 0 }
 0xf19   :  { %3115 = vmatpush.bf16.msrb.mxu0 %v3107_v34 }
 0xf1d   :  { %3116 = vmatpush.bf16.msrb.mxu0 %v3101_v1 }
 0xf20   :  { %5503 = vmatmul.msk.bf16.vlgmr.msrb.gmra.mxu0 %vm443_vm6, %v7218_v23 }
 0xf21   :  { %3219 = vmatpush.bf16.msra.mxu0 %v3210_v49 }
 0xf25   :  { %3532 = vmatpush.bf16.msrb.mxu0 %v3523_v27 }
 0xf30   :  { %5507 = vmatmul.msk.bf16.vlgmr.msra.gmra.mxu0 %vm150_vm2, %v3205_v43  ;;  %v2774_v43 = vmul.f32 %v2773_v35, %v7245_v22 }
 0xf40   :  { %5519 = vmatmul.msk.bf16.vlgmr.msrb.gmra.mxu0 %vm150_vm2, %v6628_v25 }
 0xf84   :  { %v3516_v51 = vpop.f32.mrf.mxu3 }
 0xf8c   :  { %v3518_v19 = vpop.f32.mrf.mxu3 }
 0xf9d   :  { %v7229_v29 = vpop.f32.mrf.mxu0 }
 0xf9e   :  { %v7232_v46 = vmul.f32 0.70710677, %v7229_v29 }
 0xfa0   :  { %v3124_v9 = vmul.f32 %v7232_v46, %v7232_v46 }
 0xfa2   :  { %v7236_v56 = vmin.f32 %v3124_v9, 16.0  ;;  %v2775_v9 = vadd.f32 0.112945676, %v2774_v43 }
 0xfa4   :  { %v3137_v32 = vmul.f32 3.8918573e-05, %v7236_v56  ;;  %v3126_v21 = vmul.f32 2.1237322e-06, %v7236_v56 }
 0xfa5   :  { %v3120_v13 = vpop.f32.mrf.mxu0 }
 0xfa6   :  { %v3138_v16 = vadd.f32 0.001143296, %v3137_v32  ;;  %v3127_v63 = vadd.f32 0.00028619796, %v3126_v21 }
 0xfa8   :  { %v3139_v50 = vmul.f32 %v3138_v16, %v7236_v56  ;;  %v3128_v1 = vmul.f32 %v3127_v63, %v7236_v56 }
 0xfaa   :  { %v3140_v28 = vadd.f32 0.014752088, %v3139_v50 }
 0xfac   :  { %v3141_v8 = vmul.f32 %v3140_v28, %v7236_v56  ;;  %v2776_v28 = vmul.f32 %v2775_v9, %v7245_v22  ;;  %v5517_v9 = vld [vmem:[%s7201_s24 + $0x4] sm:$0x3] }
 0xfad   :  { %v3221_v24 = vpop.f32.mrf.mxu0 }
 0xfae   :  { %v3142_v4 = vadd.f32 0.112945676, %v3141_v8  ;;  %v3225_v40 = vadd.f32 %v3221_v24, %v3198_v17 }
 0xfb0   :  { %v3143_v39 = vmul.f32 %v3142_v4, %v7236_v56  ;;  %v7252_v62 = vadd.f32 %v3225_v40, %v7134_v44  ;;  %v3129_v44 = vadd.f32 0.0036580483, %v3128_v1  ;;  %v2759_v4 = vmul.f32 2.1237322e-06, %v7245_v22 }
 0xfb1   :  { %v2777_v40 = vadd.f32 0.4994258, %v2776_v28 }
 0xfb2   :  { %v3144_v47 = vadd.f32 0.4994258, %v3143_v39  ;;  %v7255_v10 = vmul.f32 0.70710677, %v7252_v62  ;;  %v3130_v30 = vmul.f32 %v3129_v44, %v7236_v56  ;;  %v2760_v1 = vadd.f32 0.00028619796, %v2759_v4 }
 0xfb4   :  { %v3145_v59 = vmul.f32 %v3144_v47, %v7236_v56  ;;  %v3229_v54 = vmul.f32 %v7255_v10, %v7255_v10  ;;  %v3131_v38 = vadd.f32 0.05243302, %v3130_v30 }
 0xfb5   :  { %v3223_v0 = vpop.f32.mrf.mxu0 }
 0xfb6   :  { %v3146_v31 = vadd.f32 1.0, %v3145_v59  ;;  %v3230_v18 = vmin.f32 %v3229_v54, 16.0  ;;  %v3132_v13 = vmul.f32 %v3131_v38, %v7236_v56  ;;  %v2778_v54 = vmul.f32 %v2777_v40, %v7245_v22 }
 0xfb8   :  { %5742 = vrcp.f32 %v3146_v31  ;;  %v3231_v2 = vmul.f32 2.1237322e-06, %v3230_v18  ;;  %v3242_v6 = vmul.f32 3.8918573e-05, %v3230_v18  ;;  %v3133_v17 = vadd.f32 0.18741608, %v3132_v13 }
 0xfb9   :  { %v3158_v47 = vand.u32 2147483648, %v3146_v31  ;;  %vm3152_vm3 = vweird.f32 %v3146_v31  ;;  %v3156_v33 = vand.u32 2147483647, %v3146_v31  ;;  %v2779_v35 = vadd.f32 1.0, %v2778_v54 }
 0xfba   :  { %v3232_v26 = vadd.f32 0.00028619796, %v3231_v2  ;;  %v3243_v37 = vadd.f32 0.001143296, %v3242_v6  ;;  %v3134_v39 = vmul.f32 %v3133_v17, %v7236_v56  ;;  %v2761_v56 = vmul.f32 %v2760_v1, %v7245_v22 }
 0xfbb   :  { %v3159_v44 = vor.u32 1.1754944e-38, %v3158_v47  ;;  %vm3157_vm5 = vcmp.eq.f32.partialorder %v3156_v33, 8.507059e+37  ;;  %v3835_v13 = vand.u32 %v5517_v9, %v5886_v14  ;;  %v3227_v17 = vmul.f32 0.5, %v7252_v62 }
 0xfbc   :  { %v3233_v48 = vmul.f32 %v3232_v26, %v3230_v18  ;;  %v3244_v20 = vmul.f32 %v3243_v37, %v3230_v18  ;;  %v3135_v0 = vadd.f32 1.1283791, %v3134_v39  ;;  %v2791_v1 = vand.u32 2147483648, %v2779_v35 }
 0xfbd   :  { %v3534_v34 = vpop.f32.mrf.mxu0  ;;  %3844 = vmatpush.bf16.msra.mxu0 %v3835_v13  ;;  %vm2785_vm12 = vweird.f32 %v2779_v35  ;;  %v2789_v54 = vand.u32 2147483647, %v2779_v35 }
 0xfbe   :  { %v5743_v49 = vpop.eup %5742  ;;  %v7263_v41 = vadd.f32 %v3534_v34, %v3516_v51  ;;  %v3245_v27 = vadd.f32 0.014752088, %v3244_v20  ;;  %v3234_v60 = vadd.f32 0.0036580483, %v3233_v48  ;;  %v3136_v30 = vmul.f32 %v3135_v0, %v7232_v46 }
 0xfbf   :  { %v3148_v7 = vmul.f32 %v5743_v49, %v3146_v31  ;;  %vm3153_vm15 = vweird.f32 %v5743_v49  ;;  %vm2790_vm14 = vcmp.eq.f32.partialorder %v2789_v54, 8.507059e+37 }
 0xfc0   :  { %v3246_v36 = vmul.f32 %v3245_v27, %v3230_v18  ;;  %v3235_v32 = vmul.f32 %v3234_v60, %v3230_v18  ;;  %vm3154_vm4 = vmor %vm3152_vm3, %vm3153_vm15 }
 0xfc1   :  { %v3149_v16 = vsub.f32 1.0, %v3148_v7 }
 0xfc2   :  { %v3247_v52 = vadd.f32 0.112945676, %v3246_v36  ;;  %v3236_v51 = vadd.f32 0.05243302, %v3235_v32 }
 0xfc3   :  { %v3150_v8 = vmul.f32 %v5743_v49, %v3149_v16 }
 0xfc4   :  { %v3248_v19 = vmul.f32 %v3247_v52, %v3230_v18  ;;  %v3237_v11 = vmul.f32 %v3236_v51, %v3230_v18  ;;  %v3122_v51 = vmul.f32 0.5, %v7229_v29  ;;  %v3830_v29 = vpop.permute.xlu2 %3829 }
 0xfc5   :  { %v3536_v53 = vpop.f32.mrf.mxu0  ;;  %v3151_v63 = vadd.f32 %v5743_v49, %v3150_v8  ;;  %5532 = vmatmul.msk.bf16.vlgmr.msra.gmra.mxu0 %vm150_vm2, %v3830_v29 }
 0xfc6   :  { %v3249_v50 = vadd.f32 0.4994258, %v3248_v19  ;;  %v3238_v59 = vadd.f32 0.18741608, %v3237_v11 }
 0xfc7   :  { %v3155_v57 = vsel %vm3154_vm4, %v5743_v49, %v3151_v63  ;;  %v2762_v49 = vadd.f32 0.0036580483, %v2761_v56 }
 0xfc8   :  { %v3250_v21 = vmul.f32 %v3249_v50, %v3230_v18  ;;  %v3160_v6 = vsel %vm3157_vm5, %v3159_v44, %v3155_v57  ;;  %v3239_v26 = vmul.f32 %v3238_v59, %v3230_v18 }
 0xfc9   :  { %v3161_v31 = vmul.f32 %v3160_v6, %v3136_v30  ;;  %v2763_v46 = vmul.f32 %v2762_v49, %v7245_v22  ;;  %v7294_v30 = vpop.permute.xlu1 %3540 }
 0xfca   :  { %v3251_v24 = vadd.f32 1.0, %v3250_v21  ;;  %v3240_v34 = vadd.f32 1.1283791, %v3239_v26  ;;  %v2755_v26 = vmul.f32 0.5, %v7132_v55  ;;  %v7302_v55 = vadd.f32 %v7294_v30, %v7263_v41 }
 0xfcb   :  { %v5504_v38 = vclamps-f32 %v3161_v31, 1.0  ;;  %v2764_v50 = vadd.f32 0.05243302, %v2763_v46 }
 0xfcc   :  { %5744 = vrcp.f32 %v3251_v24  ;;  %v3263_v20 = vand.u32 2147483648, %v3251_v24  ;;  %v3261_v43 = vand.u32 2147483647, %v3251_v24  ;;  %vm3257_vm8 = vweird.f32 %v3251_v24 }
 0xfcd   :  { %5746 = vrcp.f32 %v2779_v35  ;;  %v3241_v7 = vmul.f32 %v3240_v34, %v7255_v10  ;;  %v3164_v19 = vadd.f32 1.0, %v5504_v38 }
 0xfce   :  { %v3264_v18 = vor.u32 1.1754944e-38, %v3263_v20  ;;  %vm3262_vm10 = vcmp.eq.f32.partialorder %v3261_v43, 8.507059e+37 }
 0xfcf   :  { %v3165_v8 = vmul.f32 %v3164_v19, %v3122_v51 }
 0xfd1   :  { %v3166_v11 = vpack.c.bf16 %v3165_v8, %v3165_v8 }
 0xfd2   :  { %v5745_v2 = vpop.eup %5744 }
 0xfd3   :  { %v3253_v37 = vmul.f32 %v5745_v2, %v3251_v24  ;;  %vm3258_vm7 = vweird.f32 %v5745_v2  ;;  %v5747_v16 = vpop.eup %5746  ;;  %v2765_v24 = vmul.f32 %v2764_v50, %v7245_v22  ;;  %v4138_v33 = vand.u32 %v3166_v11, %v5886_v14 }
 0xfd4   :  { %vm3259_vm9 = vmor %vm3257_vm8, %vm3258_vm7  ;;  %v2781_v28 = vmul.f32 %v5747_v16, %v2779_v35  ;;  %vm2786_vm11 = vweird.f32 %v5747_v16 }
 0xfd5   :  { %v3254_v48 = vsub.f32 1.0, %v3253_v37  ;;  %v2766_v63 = vadd.f32 0.18741608, %v2765_v24  ;;  %vm2787_vm13 = vmor %vm2785_vm12, %vm2786_vm11 }
 0xfd6   :  { %v2782_v4 = vsub.f32 1.0, %v2781_v28 }
 0xfd7   :  { %v3255_v27 = vmul.f32 %v5745_v2, %v3254_v48  ;;  %v2767_v62 = vmul.f32 %v2766_v63, %v7245_v22  ;;  %v4133_v48 = vpop.permute.xlu0 %4132 }
 0xfd8   :  { %v2783_v47 = vmul.f32 %v5747_v16, %v2782_v4 }
 0xfd9   :  { %v3256_v60 = vadd.f32 %v5745_v2, %v3255_v27  ;;  %v2768_v0 = vadd.f32 1.1283791, %v2767_v62 }
 0xfda   :  { %v2784_v59 = vadd.f32 %v5747_v16, %v2783_v47 }
 0xfdb   :  { %v3260_v36 = vsel %vm3259_vm9, %v5745_v2, %v3256_v60  ;;  %v2769_v2 = vmul.f32 %v2768_v0, %v7239_v15  ;;  %v7297_v15 = vpop.permute.xlu1 %4222 }
 0xfdc   :  { %v3265_v52 = vsel %vm3262_vm10, %v3264_v18, %v3260_v36  ;;  %v2788_v57 = vsel %vm2787_vm13, %v5747_v16, %v2784_v59 }
 0xfdd   :  { %v3266_v32 = vmul.f32 %v3265_v52, %v3241_v7 }
 0xfdf   :  { %v5508_v53 = vclamps-f32 %v3266_v32, 1.0 }
 0xfe1   :  { %v3269_v10 = vadd.f32 1.0, %v5508_v53 }
 0xfe3   :  { %v3270_v21 = vmul.f32 %v3269_v10, %v3227_v17  ;;  %v4199_v31 = vpop.permute.xlu1 %4198 }
 0xfe5   :  { %v3271_v40 = vpack.c.bf16 %v3270_v21, %v3270_v21 }
 0xfe7   :  { %v3273_v39 = vand.u32 %v3271_v40, %v5886_v14 }
 0xfe9   :  { %3282 = vmatpush.bf16.msrb.mxu1 %v3273_v39 }
 0xfec   :  { %5509 = vmatmul.msk.bf16.vlgmr.msrb.gmra.mxu1 %vm150_vm2, %v7141_v3 }
 0xfed   :  { %3857 = vmatpush.bf16.msra.mxu1 %v7206_v61  ;;  %v2792_v61 = vor.u32 1.1754944e-38, %v2791_v1 }
 0xfef   :  { %v2793_v44 = vsel %vm2790_vm14, %v2792_v61, %v2788_v57 }
 0xff0   :  { %v2794_v3 = vmul.f32 %v2793_v44, %v2769_v2 }
 0xff1   :  { %4147 = vmatpush.bf16.msrb.mxu1 %v4138_v33 }
 0xff2   :  { %v5486_v6 = vclamps-f32 %v2794_v3, 1.0 }
 0xff4   :  { %v2797_v22 = vadd.f32 1.0, %v5486_v6 }
 0xff6   :  { %v2798_v37 = vmul.f32 %v2797_v22, %v2755_v26 }
 0xff8   :  { %v2799_v56 = vpack.c.bf16 %v2798_v37, %v2798_v37 }
 0xffa   :  { %v4204_v35 = vand.u32 %v2799_v56, %v5886_v14 }
 0xffc   :  { %5510 = vmatmul.msk.bf16.gmra.mxu1 %vm150_vm2, %v7145_v58  ;;  %v7305_v58 = vmul.f32 0.70710677, %v7302_v55 }
 0xffe   :  { %v3546_v20 = vmul.f32 %v7305_v58, %v7305_v58 }
0x1000   :  { %v7314_v27 = vmin.f32 %v3546_v20, 16.0 }
0x1002   :  { %v3559_v49 = vmul.f32 3.8918573e-05, %v7314_v27  ;;  %v3548_v57 = vmul.f32 2.1237322e-06, %v7314_v27 }
0x1004   :  { %v3560_v60 = vadd.f32 0.001143296, %v3559_v49  ;;  %v3549_v20 = vadd.f32 0.00028619796, %v3548_v57 }
0x1006   :  { %v3561_v38 = vmul.f32 %v3560_v60, %v7314_v27 }
0x1008   :  { %v3562_v36 = vadd.f32 0.014752088, %v3561_v38 }
0x100a   :  { %v3563_v32 = vmul.f32 %v3562_v36, %v7314_v27 }
0x100c   :  { %5533 = vmatmul.msk.bf16.vlgmr.msra.gmra.mxu1 %vm150_vm2, %v6628_v25  ;;  %v7308_v25 = vmul.f32 0.70710677, %v6989_v5  ;;  %v3564_v53 = vadd.f32 0.112945676, %v3563_v32 }
0x100d   :  { %4213 = vmatpush.bf16.msra.mxu1 %v4204_v35 }
0x100e   :  { %v2430_v34 = vmul.f32 %v7308_v25, %v7308_v25  ;;  %v3565_v24 = vmul.f32 %v3564_v53, %v7314_v27  ;;  %v3550_v53 = vmul.f32 %v3549_v20, %v7314_v27 }
0x1010   :  { %v7316_v43 = vmin.f32 %v2430_v34, 16.0  ;;  %v3566_v29 = vadd.f32 0.4994258, %v3565_v24 }
0x1012   :  { %v2443_v41 = vmul.f32 3.8918573e-05, %v7316_v43  ;;  %v2432_v40 = vmul.f32 2.1237322e-06, %v7316_v43  ;;  %v3567_v22 = vmul.f32 %v3566_v29, %v7314_v27 }
0x1014   :  { %v2444_v18 = vadd.f32 0.001143296, %v2443_v41  ;;  %v2433_v1 = vadd.f32 0.00028619796, %v2432_v40  ;;  %v7369_v38 = vadd.f32 1.0, %v3567_v22 }
0x1016   :  { %v2445_v7 = vmul.f32 %v2444_v18, %v7316_v43  ;;  %v2434_v35 = vmul.f32 %v2433_v1, %v7316_v43  ;;  %5748 = vrcp.f32 %v7369_v38  ;;  %vm3574_vm12 = vweird.f32 %v7369_v38 }
0x1018   :  { %v2446_v46 = vadd.f32 0.014752088, %v2445_v7  ;;  %v2435_v32 = vadd.f32 0.0036580483, %v2434_v35 }
0x101a   :  { %v2447_v13 = vmul.f32 %v2446_v46, %v7316_v43 }
0x101c   :  { %5546 = vmatmul.msk.bf16.vlgmr.msrb.gmra.mxu1 %vm150_vm2, %v4133_v48  ;;  %v2448_v28 = vadd.f32 0.112945676, %v2447_v13 }
0x101e   :  { %v2449_v11 = vmul.f32 %v2448_v28, %v7316_v43 }
0x1020   :  { %v2450_v54 = vadd.f32 0.4994258, %v2449_v11 }
0x1022   :  { %v2451_v48 = vmul.f32 %v2450_v54, %v7316_v43 }
0x102c   :  { %5549 = vmatmul.msk.bf16.vlgmr.msra.gmra.mxu1 %vm150_vm2, %v4199_v31 }
0x1042   :  { %v7333_v50 = vpop.f32.mrf.mxu0 }
0x104a   :  { %v3848_v59 = vpop.f32.mrf.mxu0 }
0x1069   :  { %v7322_v52 = vpop.f32.mrf.mxu1 }
0x106a   :  { %v7325_v9 = vmul.f32 0.70710677, %v7322_v52 }
0x106c   :  { %v3299_v16 = vmul.f32 %v7325_v9, %v7325_v9 }
0x106e   :  { %v7331_v19 = vmin.f32 %v3299_v16, 16.0  ;;  %v7374_v16 = vadd.f32 1.0, %v2451_v48 }
0x1070   :  { %v3301_v51 = vmul.f32 2.1237322e-06, %v7331_v19  ;;  %v3312_v17 = vmul.f32 3.8918573e-05, %v7331_v19  ;;  %vm2458_vm5 = vweird.f32 %v7374_v16 }
0x1071   :  { %v7337_v10 = vpop.f32.mrf.mxu1 }
0x1072   :  { %v3302_v8 = vadd.f32 0.00028619796, %v3301_v51  ;;  %v3313_v21 = vadd.f32 0.001143296, %v3312_v17  ;;  %v7341_v4 = vmul.f32 0.70710677, %v7337_v10 }
0x1074   :  { %v3314_v39 = vmul.f32 %v3313_v21, %v7331_v19  ;;  %v3339_v63 = vmul.f32 %v7341_v4, %v7341_v4  ;;  %v3303_v47 = vmul.f32 %v3302_v8, %v7331_v19 }
0x1076   :  { %v3315_v33 = vadd.f32 0.014752088, %v3314_v39  ;;  %v7349_v62 = vmin.f32 %v3339_v63, 16.0  ;;  %v3304_v3 = vadd.f32 0.0036580483, %v3303_v47  ;;  %v2436_v63 = vmul.f32 %v2435_v32, %v7316_v43 }
0x1077   :  { %v3551_v47 = vadd.f32 0.0036580483, %v3550_v53 }
0x1078   :  { %v3316_v0 = vmul.f32 %v3315_v33, %v7331_v19  ;;  %v3341_v61 = vmul.f32 2.1237322e-06, %v7349_v62  ;;  %v3352_v44 = vmul.f32 3.8918573e-05, %v7349_v62  ;;  %v3305_v60 = vmul.f32 %v3304_v3, %v7331_v19 }
0x1079   :  { %v7355_v2 = vpop.f32.mrf.mxu1  ;;  %v2437_v57 = vadd.f32 0.05243302, %v2436_v63  ;;  %v3552_v3 = vmul.f32 %v3551_v47, %v7314_v27 }
0x107a   :  { %v3317_v6 = vadd.f32 0.112945676, %v3316_v0  ;;  %v3342_v26 = vadd.f32 0.00028619796, %v3341_v61  ;;  %v3353_v37 = vadd.f32 0.001143296, %v3352_v44  ;;  %v7391_v44 = vpop.eup %5748 }
0x107b   :  { %v7359_v56 = vmul.f32 0.70710677, %v7355_v2  ;;  %v3306_v8 = vadd.f32 0.05243302, %v3305_v60  ;;  %v2438_v60 = vmul.f32 %v2437_v57, %v7316_v43  ;;  %vm3575_vm10 = vweird.f32 %v7391_v44 }
0x107c   :  { %v3318_v31 = vmul.f32 %v3317_v6, %v7331_v19  ;;  %v3343_v34 = vmul.f32 %v3342_v26, %v7349_v62  ;;  %v3354_v49 = vmul.f32 %v3353_v37, %v7349_v62  ;;  %vm7442_vm14 = vmor %vm3574_vm12, %vm3575_vm10 }
0x107d   :  { %v3379_v41 = vmul.f32 %v7359_v56, %v7359_v56  ;;  %v3307_v29 = vmul.f32 %v3306_v8, %v7331_v19 }
0x107e   :  { %v3319_v18 = vadd.f32 0.4994258, %v3318_v31  ;;  %v3344_v7 = vadd.f32 0.0036580483, %v3343_v34  ;;  %v3355_v36 = vadd.f32 0.014752088, %v3354_v49 }
0x107f   :  { %v7371_v46 = vmin.f32 %v3379_v41, 16.0  ;;  %v3308_v37 = vadd.f32 0.18741608, %v3307_v29 }
0x1080   :  { %v3320_v13 = vmul.f32 %v3319_v18, %v7331_v19  ;;  %v3356_v28 = vmul.f32 %v3355_v36, %v7349_v62  ;;  %v3345_v40 = vmul.f32 %v3344_v7, %v7349_v62  ;;  %v3553_v7 = vadd.f32 0.05243302, %v3552_v3 }
0x1081   :  { %v3381_v51 = vmul.f32 2.1237322e-06, %v7371_v46  ;;  %v3291_v17 = vpop.f32.mrf.mxu1  ;;  %v3392_v24 = vmul.f32 3.8918573e-05, %v7371_v46  ;;  %v3570_v36 = vmul.f32 %v7391_v44, %v7369_v38  ;;  %v2462_v3 = vand.u32 2147483647, %v7374_v16 }
0x1082   :  { %v7379_v21 = vadd.f32 1.0, %v3320_v13  ;;  %v3357_v11 = vadd.f32 0.112945676, %v3356_v28  ;;  %v3346_v1 = vadd.f32 0.05243302, %v3345_v40  ;;  %v3309_v13 = vmul.f32 %v3308_v37, %v7331_v19 }
0x1083   :  { %v3382_v39 = vadd.f32 0.00028619796, %v3381_v51  ;;  %v3393_v59 = vadd.f32 0.001143296, %v3392_v24  ;;  %v2439_v24 = vadd.f32 0.18741608, %v2438_v60 }
0x1084   :  { %5750 = vrcp.f32 %v7379_v21  ;;  %v3358_v33 = vmul.f32 %v3357_v11, %v7349_v62  ;;  %v3347_v34 = vmul.f32 %v3346_v1, %v7349_v62  ;;  %v3333_v53 = vand.u32 2147483648, %v7379_v21 }
0x1085   :  { %5752 = vrcp.f32 %v7374_v16  ;;  %v3383_v0 = vmul.f32 %v3382_v39, %v7371_v46  ;;  %v3394_v61 = vmul.f32 %v3393_v59, %v7371_v46  ;;  %v3331_v40 = vand.u32 2147483647, %v7379_v21 }
0x1086   :  { %v3359_v54 = vadd.f32 0.4994258, %v3358_v33  ;;  %v3348_v17 = vadd.f32 0.18741608, %v3347_v34  ;;  %v3554_v39 = vmul.f32 %v3553_v7, %v7314_v27  ;;  %v3571_v63 = vsub.f32 1.0, %v3570_v36 }
0x1087   :  { %v3395_v35 = vadd.f32 0.014752088, %v3394_v61  ;;  %v3384_v41 = vadd.f32 0.0036580483, %v3383_v0  ;;  %vm3327_vm3 = vweird.f32 %v7379_v21  ;;  %v3310_v29 = vadd.f32 1.1283791, %v3309_v13 }
0x1088   :  { %v3360_v6 = vmul.f32 %v3359_v54, %v7349_v62  ;;  %v3334_v0 = vor.u32 1.1754944e-38, %v3333_v53  ;;  %v3349_v57 = vmul.f32 %v3348_v17, %v7349_v62  ;;  %vm3332_vm7 = vcmp.eq.f32.partialorder %v3331_v40, 8.507059e+37 }
0x1089   :  { %v3859_v22 = vpop.f32.mrf.mxu1  ;;  %v3396_v18 = vmul.f32 %v3395_v35, %v7371_v46  ;;  %v3385_v8 = vmul.f32 %v3384_v41, %v7371_v46  ;;  %v3572_v37 = vmul.f32 %v7391_v44, %v3571_v63  ;;  %v3311_v62 = vmul.f32 %v3310_v29, %v7325_v9 }
0x108a   :  { %v5751_v26 = vpop.eup %5750  ;;  %v7396_v48 = vadd.f32 %v3859_v22, %v7333_v50  ;;  %v7402_v49 = vadd.f32 1.0, %v3360_v6  ;;  %v2464_v6 = vand.u32 2147483648, %v7374_v16  ;;  %v3555_v22 = vadd.f32 0.18741608, %v3554_v39 }
0x108b   :  { %v7398_v31 = vpop.eup %5752  ;;  %v3323_v20 = vmul.f32 %v5751_v26, %v7379_v21  ;;  %v3397_v28 = vadd.f32 0.112945676, %v3396_v18  ;;  %vm3328_vm15 = vweird.f32 %v5751_v26  ;;  %v3386_v61 = vadd.f32 0.05243302, %v3385_v8 }
0x108c   :  { %5754 = vrcp.f32 %v7402_v49  ;;  %v2454_v50 = vmul.f32 %v7398_v31, %v7374_v16  ;;  %vm3329_vm4 = vmor %vm3327_vm3, %vm3328_vm15  ;;  %vm2459_vm8 = vweird.f32 %v7398_v31  ;;  %v3350_v41 = vadd.f32 1.1283791, %v3349_v57 }
0x108d   :  { %v3324_v32 = vsub.f32 1.0, %v3323_v20  ;;  %v3398_v11 = vmul.f32 %v3397_v28, %v7371_v46  ;;  %v3373_v60 = vand.u32 2147483648, %v7402_v49  ;;  %v3387_v18 = vmul.f32 %v3386_v61, %v7371_v46  ;;  %vm7452_vm3 = vmor %vm2458_vm5, %vm2459_vm8 }
0x108e   :  { %v2455_v33 = vsub.f32 1.0, %v2454_v50  ;;  %v3371_v50 = vand.u32 2147483647, %v7402_v49  ;;  %v3556_v13 = vmul.f32 %v3555_v22, %v7314_v27  ;;  %v3573_v53 = vadd.f32 %v7391_v44, %v3572_v37 }
0x108f   :  { %v3325_v51 = vmul.f32 %v5751_v26, %v3324_v32  ;;  %v3399_v59 = vadd.f32 0.4994258, %v3398_v11  ;;  %v3580_v28 = vand.u32 2147483648, %v7369_v38  ;;  %vm3367_vm11 = vweird.f32 %v7402_v49 }
0x1090   :  { %v3578_v17 = vand.u32 2147483647, %v7369_v38  ;;  %v3374_v8 = vor.u32 1.1754944e-38, %v3373_v60  ;;  %v3388_v27 = vadd.f32 0.18741608, %v3387_v18  ;;  %v3351_v39 = vmul.f32 %v3350_v41, %v7341_v4 }
0x1091   :  { %v3326_v47 = vadd.f32 %v5751_v26, %v3325_v51  ;;  %v3861_v19 = vpop.f32.mrf.mxu1  ;;  %v3400_v20 = vmul.f32 %v3399_v59, %v7371_v46  ;;  %vm3372_vm15 = vcmp.eq.f32.partialorder %v3371_v50, 8.507059e+37  ;;  %v3581_v29 = vor.u32 1.1754944e-38, %v3580_v28 }
0x1092   :  { %v5755_v1 = vpop.eup %5754  ;;  %v3577_v19 = vsel %vm7442_vm14, %v7391_v44, %v3573_v53  ;;  %v2465_v59 = vor.u32 1.1754944e-38, %v2464_v6  ;;  %v3389_v16 = vmul.f32 %v3388_v27, %v7371_v46  ;;  %v3293_v22 = vmul.f32 0.5, %v7322_v52 }
0x1093   :  { %v3330_v54 = vsel %vm3329_vm4, %v5751_v26, %v3326_v47  ;;  %v3363_v21 = vmul.f32 %v5755_v1, %v7402_v49  ;;  %v2456_v26 = vmul.f32 %v7398_v31, %v2455_v33  ;;  %v7430_v7 = vadd.f32 1.0, %v3400_v20 }
0x1094   :  { %v3335_v35 = vsel %vm3332_vm7, %v3334_v0, %v3330_v54  ;;  %vm3368_vm9 = vweird.f32 %v5755_v1  ;;  %v2440_v47 = vmul.f32 %v2439_v24, %v7316_v43  ;;  %v3557_v49 = vadd.f32 1.1283791, %v3556_v13 }
0x1095   :  { %v3364_v34 = vsub.f32 1.0, %v3363_v21  ;;  %v3336_v36 = vmul.f32 %v3335_v35, %v3311_v62  ;;  %5756 = vrcp.f32 %v7430_v7  ;;  %v2457_v9 = vadd.f32 %v7398_v31, %v2456_v26  ;;  %vm3369_vm13 = vmor %vm3367_vm11, %vm3368_vm9 }
0x1096   :  { %vm2463_vm4 = vcmp.eq.f32.partialorder %v2462_v3, 8.507059e+37  ;;  %vm3579_vm7 = vcmp.eq.f32.partialorder %v3578_v17, 8.507059e+37  ;;  %v2441_v61 = vadd.f32 1.1283791, %v2440_v47  ;;  %v3558_v21 = vmul.f32 %v3557_v49, %v7305_v58 }
0x1097   :  { %v3365_v32 = vmul.f32 %v5755_v1, %v3364_v34  ;;  %v5511_v11 = vclamps-f32 %v3336_v36, 1.0  ;;  %v2461_v4 = vsel %vm7452_vm3, %v7398_v31, %v2457_v9  ;;  %v3294_v31 = vmul.f32 0.5, %v7337_v10 }
0x1098   :  { %v2466_v44 = vsel %vm2463_vm4, %v2465_v59, %v2461_v4  ;;  %v3390_v6 = vadd.f32 1.1283791, %v3389_v16  ;;  %v3411_v20 = vand.u32 2147483647, %v7430_v7  ;;  %v3413_v46 = vand.u32 2147483648, %v7430_v7 }
0x1099   :  { %v3366_v51 = vadd.f32 %v5755_v1, %v3365_v32  ;;  %v3419_v54 = vadd.f32 1.0, %v5511_v11  ;;  %v2442_v41 = vmul.f32 %v2441_v61, %v7308_v25  ;;  %vm3407_vm8 = vweird.f32 %v7430_v7 }
0x109a   :  { %v3414_v10 = vor.u32 1.1754944e-38, %v3413_v46  ;;  %v3391_v36 = vmul.f32 %v3390_v6, %v7359_v56  ;;  %vm3412_vm10 = vcmp.eq.f32.partialorder %v3411_v20, 8.507059e+37  ;;  %v3295_v25 = vmul.f32 0.5, %v7355_v2  ;;  %v3590_v2 = vld [vmem:[%s5371_s30 + $0x8] sm:$0x1] }
0x109b   :  { %v3370_v63 = vsel %vm3369_vm13, %v5755_v1, %v3366_v51  ;;  %v5757_v24 = vpop.eup %5756  ;;  %v3582_v1 = vsel %vm3579_vm7, %v3581_v29, %v3577_v19  ;;  %v3422_v26 = vmul.f32 %v3419_v54, %v3293_v22  ;;  %v2467_v52 = vmul.f32 %v2466_v44, %v2442_v41 }
0x109c   :  { %v3375_v33 = vsel %vm3372_vm15, %v3374_v8, %v3370_v63  ;;  %v3403_v57 = vmul.f32 %v5757_v24, %v7430_v7  ;;  %v3583_v3 = vmul.f32 %v3582_v1, %v3558_v21  ;;  %vm3408_vm5 = vweird.f32 %v5757_v24 }
0x109d   :  { %v3376_v43 = vmul.f32 %v3375_v33, %v3351_v39  ;;  %vm3409_vm9 = vmor %vm3407_vm8, %vm3408_vm5  ;;  %v5475_v53 = vclamps-f32 %v2467_v52, 1.0  ;;  %v3544_v51 = vmul.f32 0.5, %v7302_v55  ;;  %v2428_v40 = vmul.f32 0.5, %v6989_v5  ;;  %v7483_v5 = vld [vmem:[%s5371_s30] sm:$0xff] }
0x109e   :  { %v3404_v35 = vsub.f32 1.0, %v3403_v57  ;;  %v5520_v18 = vclamps-f32 %v3583_v3, 1.0  ;;  %v3597_v49 = vunpack.c.l.b16 %v3590_v2 }
0x109f   :  { %v5512_v0 = vclamps-f32 %v3376_v43, 1.0  ;;  %v2470_v7 = vadd.f32 1.0, %v5475_v53 }
0x10a0   :  { %v3405_v34 = vmul.f32 %v5757_v24, %v3404_v35  ;;  %v3586_v9 = vadd.f32 1.0, %v5520_v18  ;;  %v7487_v19 = vpack.c.b16 %v3597_v49, %v3597_v49 }
0x10a1   :  { %v3420_v37 = vadd.f32 1.0, %v5512_v0  ;;  %v2471_v39 = vmul.f32 %v2470_v7, %v2428_v40 }
0x10a2   :  { %v3406_v60 = vadd.f32 %v5757_v24, %v3405_v34  ;;  %v3587_v8 = vmul.f32 %v3586_v9, %v3544_v51 }
0x10a3   :  { %v3423_v62 = vmul.f32 %v3420_v37, %v3294_v31  ;;  %v2472_v47 = vpack.c.bf16 %v2471_v39, %v2471_v39 }
0x10a4   :  { %v3410_v32 = vsel %vm3409_vm9, %v5757_v24, %v3406_v60  ;;  %v3591_v56 = vpack.c.bf16 %v3587_v8, %v3587_v8 }
0x10a5   :  { %v3425_v58 = vpack.c.bf16 %v3423_v62, %v3422_v26  ;;  %v3415_v50 = vsel %vm3412_vm10, %v3414_v10, %v3410_v32  ;;  %v4158_v55 = vand.u32 %v2472_v47, %v5886_v14 }
0x10a6   :  { %v3416_v13 = vmul.f32 %v3415_v50, %v3391_v36  ;;  %v3607_v38 = vand.u32 %v3591_v56, %v5886_v14 }
0x10a8   :  { %v5513_v28 = vclamps-f32 %v3416_v13, 1.0 }
0x10aa   :  { %v3421_v17 = vadd.f32 1.0, %v5513_v28 }
0x10ac   :  { %v3424_v27 = vmul.f32 %v3421_v17, %v3295_v25 }
0x10ae   :  { %v3426_v11 = vpack.c.bf16 %v3424_v27, %v3424_v27 }
0x10b0   :  { %v3428_v63 = vsel %vm154_vm0, %v3426_v11, 0 }
0x10b1   :  { %3436 = vmatpush.bf16.msrb.mxu2 %v3428_v63 }
0x10b5   :  { %3437 = vmatpush.bf16.msrb.mxu2 %v3425_v58 }
0x10b8   :  { %5514 = vmatmul.msk.bf16.vlgmr.msrb.gmra.mxu2 %vm443_vm6, %v7218_v23  ;;  %v7495_v23 = vadd.f32 %v7396_v48, %v7294_v30 }
0x10b9   :  { %3616 = vmatpush.bf16.msra.mxu2 %v3607_v38 }
0x10ba   :  { %v7498_v33 = vmul.f32 0.70710677, %v7495_v23 }
0x10bc   :  { %v3866_v4 = vmul.f32 %v7498_v33, %v7498_v33 }
0x10bd   :  { %4167 = vmatpush.bf16.msrb.mxu2 %v4158_v55 }
0x10be   :  { %v7502_v29 = vmin.f32 %v3866_v4, 16.0 }
0x10c0   :  { %v3879_v43 = vmul.f32 3.8918573e-05, %v7502_v29  ;;  %v3868_v10 = vmul.f32 2.1237322e-06, %v7502_v29 }
0x10c2   :  { %v3880_v24 = vadd.f32 0.001143296, %v3879_v43  ;;  %v3869_v25 = vadd.f32 0.00028619796, %v3868_v10 }
0x10c4   :  { %v3881_v30 = vmul.f32 %v3880_v24, %v7502_v29  ;;  %v3870_v39 = vmul.f32 %v3869_v25, %v7502_v29 }
0x10c6   :  { %v3882_v0 = vadd.f32 0.014752088, %v3881_v30  ;;  %v3871_v30 = vadd.f32 0.0036580483, %v3870_v39 }
0x10c8   :  { %5525 = vmatmul.msk.bf16.vlgmr.msra.gmra.mxu2 %vm150_vm2, %v7483_v5  ;;  %v3883_v31 = vmul.f32 %v3882_v0, %v7502_v29  ;;  %v3872_v39 = vmul.f32 %v3871_v30, %v7502_v29 }
0x10ca   :  { %v3884_v20 = vadd.f32 0.112945676, %v3883_v31 }
0x10cc   :  { %v3885_v60 = vmul.f32 %v3884_v20, %v7502_v29 }
0x10ce   :  { %v3886_v50 = vadd.f32 0.4994258, %v3885_v60 }
0x10d0   :  { %v3887_v27 = vmul.f32 %v3886_v50, %v7502_v29 }
0x10d2   :  { %v7540_v55 = vadd.f32 1.0, %v3887_v27 }
0x10d4   :  { %vm3894_vm7 = vweird.f32 %v7540_v55 }
0x10d8   :  { %5526 = vmatmul.msk.bf16.gmra.mxu2 %vm150_vm2, %v7487_v19 }
0x10e8   :  { %5547 = vmatmul.msk.bf16.vlgmr.msrb.gmra.mxu2 %vm150_vm2, %v5938_v42 }
0x113b   :  { %v7505_v59 = vpop.f32.mrf.mxu2 }
0x113c   :  { %v7508_v16 = vmul.f32 0.70710677, %v7505_v59 }
0x113e   :  { %v3445_v42 = vmul.f32 %v7508_v16, %v7508_v16 }
0x1140   :  { %v3446_v48 = vmin.f32 %v3445_v42, 16.0 }
0x1142   :  { %v3447_v1 = vmul.f32 2.1237322e-06, %v3446_v48  ;;  %v3458_v54 = vmul.f32 3.8918573e-05, %v3446_v48 }
0x1143   :  { %v3441_v57 = vpop.f32.mrf.mxu2 }
0x1144   :  { %v3448_v61 = vadd.f32 0.00028619796, %v3447_v1  ;;  %v3459_v44 = vadd.f32 0.001143296, %v3458_v54 }
0x1146   :  { %v3449_v21 = vmul.f32 %v3448_v61, %v3446_v48  ;;  %v3460_v22 = vmul.f32 %v3459_v44, %v3446_v48 }
0x1148   :  { %v3450_v37 = vadd.f32 0.0036580483, %v3449_v21  ;;  %v3461_v35 = vadd.f32 0.014752088, %v3460_v22 }
0x114a   :  { %v3451_v3 = vmul.f32 %v3450_v37, %v3446_v48  ;;  %v3462_v6 = vmul.f32 %v3461_v35, %v3446_v48 }
0x114b   :  { %v7514_v46 = vpop.f32.mrf.mxu2 }
0x114c   :  { %v3463_v26 = vadd.f32 0.112945676, %v3462_v6  ;;  %v7517_v62 = vmul.f32 0.70710677, %v7514_v46  ;;  %v3452_v34 = vadd.f32 0.05243302, %v3451_v3 }
0x114e   :  { %v3464_v41 = vmul.f32 %v3463_v26, %v3446_v48  ;;  %v3633_v58 = vmul.f32 %v7517_v62, %v7517_v62  ;;  %v3453_v36 = vmul.f32 %v3452_v34, %v3446_v48 }
0x1150   :  { %v3465_v52 = vadd.f32 0.4994258, %v3464_v41  ;;  %v7523_v18 = vmin.f32 %v3633_v58, 16.0  ;;  %v3454_v8 = vadd.f32 0.18741608, %v3453_v36 }
0x1152   :  { %v3466_v32 = vmul.f32 %v3465_v52, %v3446_v48  ;;  %v3635_v13 = vmul.f32 2.1237322e-06, %v7523_v18  ;;  %v3646_v53 = vmul.f32 3.8918573e-05, %v7523_v18  ;;  %v3455_v38 = vmul.f32 %v3454_v8, %v3446_v48 }
0x1153   :  { %v7527_v9 = vpop.f32.mrf.mxu2 }
0x1154   :  { %v3467_v28 = vadd.f32 1.0, %v3466_v32  ;;  %v7530_v51 = vmul.f32 0.70710677, %v7527_v9  ;;  %v3636_v17 = vadd.f32 0.00028619796, %v3635_v13 }
0x1155   :  { %v3647_v7 = vadd.f32 0.001143296, %v3646_v53  ;;  %v3456_v57 = vadd.f32 1.1283791, %v3455_v38 }
0x1156   :  { %5758 = vrcp.f32 %v3467_v28  ;;  %v3673_v11 = vmul.f32 %v7530_v51, %v7530_v51  ;;  %v3637_v56 = vmul.f32 %v3636_v17, %v7523_v18  ;;  %v3477_v22 = vand.u32 2147483647, %v3467_v28 }
0x1157   :  { %v3648_v40 = vmul.f32 %v3647_v7, %v7523_v18  ;;  %5760 = vrcp.f32 %v7540_v55  ;;  %v3479_v37 = vand.u32 2147483648, %v3467_v28  ;;  %v3457_v41 = vmul.f32 %v3456_v57, %v7508_v16 }
0x1158   :  { %v7538_v47 = vmin.f32 %v3673_v11, 16.0  ;;  %v3638_v54 = vadd.f32 0.0036580483, %v3637_v56  ;;  %vm3473_vm12 = vweird.f32 %v3467_v28  ;;  %vm3478_vm14 = vcmp.eq.f32.partialorder %v3477_v22, 8.507059e+37 }
0x1159   :  { %v3649_v63 = vadd.f32 0.014752088, %v3648_v40  ;;  %v3480_v13 = vor.u32 1.1754944e-38, %v3479_v37 }
0x115a   :  { %v3675_v49 = vmul.f32 2.1237322e-06, %v7538_v47  ;;  %v3686_v4 = vmul.f32 3.8918573e-05, %v7538_v47  ;;  %v3639_v26 = vmul.f32 %v3638_v54, %v7523_v18  ;;  %v3873_v54 = vadd.f32 0.05243302, %v3872_v39 }
0x115b   :  { %v3650_v2 = vmul.f32 %v3649_v63, %v7523_v18  ;;  %v7545_v43 = vpop.f32.mrf.mxu2 }
0x115c   :  { %v5759_v24 = vpop.eup %5758  ;;  %v7548_v42 = vmul.f32 0.70710677, %v7545_v43  ;;  %v3676_v48 = vadd.f32 0.00028619796, %v3675_v49  ;;  %v3687_v61 = vadd.f32 0.001143296, %v3686_v4 }
0x115d   :  { %v3469_v1 = vmul.f32 %v5759_v24, %v3467_v28  ;;  %v3651_v0 = vadd.f32 0.112945676, %v3650_v2  ;;  %vm3474_vm11 = vweird.f32 %v5759_v24  ;;  %v7564_v17 = vpop.eup %5760  ;;  %v3640_v7 = vadd.f32 0.05243302, %v3639_v26 }
0x115e   :  { %v3713_v44 = vmul.f32 %v7548_v42, %v7548_v42  ;;  %v3677_v35 = vmul.f32 %v3676_v48, %v7538_v47  ;;  %v3688_v3 = vmul.f32 %v3687_v61, %v7538_v47  ;;  %vm3475_vm13 = vmor %vm3473_vm12, %vm3474_vm11  ;;  %vm3895_vm8 = vweird.f32 %v7564_v17 }
0x115f   :  { %v3470_v21 = vsub.f32 1.0, %v3469_v1  ;;  %v3652_v31 = vmul.f32 %v3651_v0, %v7523_v18  ;;  %v3641_v49 = vmul.f32 %v3640_v7, %v7523_v18  ;;  %v3443_v0 = vmul.f32 0.5, %v7505_v59  ;;  %vm7604_vm10 = vmor %vm3894_vm7, %vm3895_vm8 }
0x1160   :  { %v7556_v6 = vmin.f32 %v3713_v44, 16.0  ;;  %v3678_v60 = vadd.f32 0.0036580483, %v3677_v35  ;;  %v3689_v58 = vadd.f32 0.014752088, %v3688_v3  ;;  %v3874_v59 = vmul.f32 %v3873_v54, %v7502_v29 }
0x1161   :  { %v3471_v20 = vmul.f32 %v5759_v24, %v3470_v21  ;;  %v3653_v34 = vadd.f32 0.4994258, %v3652_v31  ;;  %v3890_v21 = vmul.f32 %v7564_v17, %v7540_v55  ;;  %v3642_v31 = vadd.f32 0.18741608, %v3641_v49 }
0x1162   :  { %v3715_v52 = vmul.f32 2.1237322e-06, %v7556_v6  ;;  %v3726_v32 = vmul.f32 3.8918573e-05, %v7556_v6  ;;  %v3690_v53 = vmul.f32 %v3689_v58, %v7538_v47  ;;  %v3679_v28 = vmul.f32 %v3678_v60, %v7538_v47 }
0x1163   :  { %v3472_v10 = vadd.f32 %v5759_v24, %v3471_v20  ;;  %v3654_v36 = vmul.f32 %v3653_v34, %v7523_v18  ;;  %v3625_v50 = vpop.f32.mrf.mxu2  ;;  %v3891_v58 = vsub.f32 1.0, %v3890_v21 }
0x1164   :  { %v3716_v25 = vadd.f32 0.00028619796, %v3715_v52  ;;  %v3727_v27 = vadd.f32 0.001143296, %v3726_v32  ;;  %v3691_v11 = vadd.f32 0.112945676, %v3690_v53 }
0x1165   :  { %v3476_v16 = vsel %vm3475_vm13, %v5759_v24, %v3472_v10  ;;  %v3655_v8 = vadd.f32 1.0, %v3654_v36  ;;  %v3680_v24 = vadd.f32 0.05243302, %v3679_v28  ;;  %v3643_v10 = vmul.f32 %v3642_v31, %v7523_v18 }
0x1166   :  { %v3481_v40 = vsel %vm3478_vm14, %v3480_v13, %v3476_v16  ;;  %v3692_v63 = vmul.f32 %v3691_v11, %v7538_v47  ;;  %v3717_v38 = vmul.f32 %v3716_v25, %v7556_v6  ;;  %v3728_v4 = vmul.f32 %v3727_v27, %v7556_v6 }
0x1167   :  { %v3482_v56 = vmul.f32 %v3481_v40, %v3457_v41  ;;  %5762 = vrcp.f32 %v3655_v8  ;;  %v3681_v3 = vmul.f32 %v3680_v24, %v7538_v47  ;;  %v3667_v36 = vand.u32 2147483648, %v3655_v8 }
0x1168   :  { %v3693_v1 = vadd.f32 0.4994258, %v3692_v63  ;;  %v3729_v48 = vadd.f32 0.014752088, %v3728_v4  ;;  %v3718_v61 = vadd.f32 0.0036580483, %v3717_v38  ;;  %vm3661_vm3 = vweird.f32 %v3655_v8 }
0x1169   :  { %v5515_v2 = vclamps-f32 %v3482_v56, 1.0  ;;  %v3682_v50 = vadd.f32 0.18741608, %v3681_v3  ;;  %v3875_v53 = vadd.f32 0.18741608, %v3874_v59  ;;  %v3892_v40 = vmul.f32 %v7564_v17, %v3891_v58 }
0x116a   :  { %v3694_v30 = vmul.f32 %v3693_v1, %v7538_v47  ;;  %v3730_v37 = vmul.f32 %v3729_v48, %v7556_v6  ;;  %v3719_v60 = vmul.f32 %v3718_v61, %v7556_v6  ;;  %v3665_v25 = vand.u32 2147483647, %v3655_v8 }
0x116b   :  { %v3485_v57 = vadd.f32 1.0, %v5515_v2  ;;  %v3644_v28 = vadd.f32 1.1283791, %v3643_v10  ;;  %v3668_v18 = vor.u32 1.1754944e-38, %v3667_v36  ;;  %v3683_v56 = vmul.f32 %v3682_v50, %v7538_v47 }
0x116c   :  { %v7578_v20 = vadd.f32 1.0, %v3694_v30  ;;  %v3731_v34 = vadd.f32 0.112945676, %v3730_v37  ;;  %v3720_v7 = vadd.f32 0.05243302, %v3719_v60  ;;  %v3876_v38 = vmul.f32 %v3875_v53, %v7502_v29 }
0x116d   :  { %v5763_v44 = vpop.eup %5762  ;;  %v3486_v22 = vmul.f32 %v3485_v57, %v3443_v0  ;;  %vm3666_vm5 = vcmp.eq.f32.partialorder %v3665_v25, 8.507059e+37  ;;  %v3898_v2 = vand.u32 2147483647, %v7540_v55  ;;  %v3893_v47 = vadd.f32 %v7564_v17, %v3892_v40 }
0x116e   :  { %v3657_v35 = vmul.f32 %v5763_v44, %v3655_v8  ;;  %5764 = vrcp.f32 %v7578_v20  ;;  %vm3662_vm15 = vweird.f32 %v5763_v44  ;;  %v3732_v13 = vmul.f32 %v3731_v34, %v7556_v6 }
0x116f   :  { %v3487_v26 = vpack.c.bf16 %v3486_v22, %v3486_v22  ;;  %vm3663_vm4 = vmor %vm3661_vm3, %vm3662_vm15  ;;  %v3721_v4 = vmul.f32 %v3720_v7, %v7556_v6  ;;  %v3645_v1 = vmul.f32 %v3644_v28, %v7517_v62  ;;  %v3900_v29 = vand.u32 2147483648, %v7540_v55 }
0x1170   :  { %v3658_v41 = vsub.f32 1.0, %v3657_v35  ;;  %v3733_v27 = vadd.f32 0.4994258, %v3732_v13  ;;  %v3684_v54 = vadd.f32 1.1283791, %v3683_v56  ;;  %v3707_v0 = vand.u32 2147483648, %v7578_v20 }
0x1171   :  { %v4228_v52 = vand.u32 %v3487_v26, %v5886_v14  ;;  %v3705_v30 = vand.u32 2147483647, %v7578_v20  ;;  %v3877_v62 = vadd.f32 1.1283791, %v3876_v38  ;;  %v3897_v21 = vsel %vm7604_vm10, %v7564_v17, %v3893_v47 }
0x1172   :  { %v3659_v32 = vmul.f32 %v5763_v44, %v3658_v41  ;;  %v3734_v63 = vmul.f32 %v3733_v27, %v7556_v6  ;;  %vm3701_vm11 = vweird.f32 %v7578_v20  ;;  %vm3899_vm12 = vcmp.eq.f32.partialorder %v3898_v2, 8.507059e+37 }
0x1173   :  { %4237 = vmatpush.bf16.msra.mxu2 %v4228_v52  ;;  %v3901_v31 = vor.u32 1.1754944e-38, %v3900_v29  ;;  %v3708_v37 = vor.u32 1.1754944e-38, %v3707_v0  ;;  %v3685_v55 = vmul.f32 %v3684_v54, %v7530_v51  ;;  %vm3706_vm14 = vcmp.eq.f32.partialorder %v3705_v30, 8.507059e+37 }
0x1174   :  { %v3660_v16 = vadd.f32 %v5763_v44, %v3659_v32  ;;  %v5765_v11 = vpop.eup %5764  ;;  %v3735_v24 = vadd.f32 1.0, %v3734_v63  ;;  %v3878_v60 = vmul.f32 %v3877_v62, %v7498_v33  ;;  %v3627_v32 = vmul.f32 0.5, %v7514_v46 }
0x1175   :  { %v3697_v8 = vmul.f32 %v5765_v11, %v7578_v20  ;;  %vm3702_vm9 = vweird.f32 %v5765_v11  ;;  %v3902_v26 = vsel %vm3899_vm12, %v3901_v31, %v3897_v21  ;;  %v3628_v50 = vmul.f32 0.5, %v7527_v9 }
0x1176   :  { %v3664_v39 = vsel %vm3663_vm4, %v5763_v44, %v3660_v16  ;;  %5550 = vmatmul.msk.bf16.vlgmr.msra.gmra.mxu2 %vm150_vm2, %v7297_v15  ;;  %5766 = vrcp.f32 %v3735_v24  ;;  %v3722_v44 = vadd.f32 0.18741608, %v3721_v4  ;;  %vm3703_vm13 = vmor %vm3701_vm11, %vm3702_vm9  ;;  %v3903_v52 = vmul.f32 %v3902_v26, %v3878_v60 }
0x1177   :  { %v3669_v49 = vsel %vm3666_vm5, %v3668_v18, %v3664_v39  ;;  %v3698_v15 = vsub.f32 1.0, %v3697_v8  ;;  %v3747_v13 = vand.u32 2147483648, %v3735_v24  ;;  %v3745_v16 = vand.u32 2147483647, %v3735_v24 }
0x1178   :  { %v3670_v57 = vmul.f32 %v3669_v49, %v3645_v1  ;;  %v3723_v41 = vmul.f32 %v3722_v44, %v7556_v6  ;;  %vm3741_vm3 = vweird.f32 %v3735_v24  ;;  %v5534_v33 = vclamps-f32 %v3903_v52, 1.0  ;;  %v7625_v1 = vld [vmem:[%s5372_s3] sm:$0x3] }
0x1179   :  { %v3699_v48 = vmul.f32 %v5765_v11, %v3698_v15  ;;  %v3748_v40 = vor.u32 1.1754944e-38, %v3747_v13  ;;  %vm3746_vm7 = vcmp.eq.f32.partialorder %v3745_v16, 8.507059e+37  ;;  %v3864_v63 = vmul.f32 0.5, %v7495_v23 }
0x117a   :  { %v5527_v35 = vclamps-f32 %v3670_v57, 1.0  ;;  %v3724_v51 = vadd.f32 1.1283791, %v3723_v41  ;;  %v3906_v18 = vadd.f32 1.0, %v5534_v33  ;;  %v3629_v38 = vmul.f32 0.5, %v7545_v43 }
0x117b   :  { %v3700_v22 = vadd.f32 %v5765_v11, %v3699_v48 }
0x117c   :  { %v5767_v59 = vpop.eup %5766  ;;  %v3753_v20 = vadd.f32 1.0, %v5527_v35  ;;  %v3725_v28 = vmul.f32 %v3724_v51, %v7548_v42  ;;  %v3907_v2 = vmul.f32 %v3906_v18, %v3864_v63 }
0x117d   :  { %v3704_v3 = vsel %vm3703_vm13, %v5765_v11, %v3700_v22  ;;  %v3737_v58 = vmul.f32 %v5767_v59, %v3735_v24  ;;  %vm3742_vm15 = vweird.f32 %v5767_v59 }
0x117e   :  { %v3709_v34 = vsel %vm3706_vm14, %v3708_v37, %v3704_v3  ;;  %v3756_v7 = vmul.f32 %v3753_v20, %v3627_v32  ;;  %vm3743_vm4 = vmor %vm3741_vm3, %vm3742_vm15  ;;  %v3908_v4 = vpack.c.bf16 %v3907_v2, %v3907_v2 }
0x117f   :  { %v3710_v17 = vmul.f32 %v3709_v34, %v3685_v55  ;;  %v3738_v36 = vsub.f32 1.0, %v3737_v58 }
0x1180   :  { %v3910_v47 = vand.u32 %v3908_v4, %v5886_v14 }
0x1181   :  { %v5528_v10 = vclamps-f32 %v3710_v17, 1.0  ;;  %v3739_v25 = vmul.f32 %v5767_v59, %v3738_v36 }
0x1183   :  { %v3754_v53 = vadd.f32 1.0, %v5528_v10  ;;  %v3740_v27 = vadd.f32 %v5767_v59, %v3739_v25 }
0x1185   :  { %v3757_v6 = vmul.f32 %v3754_v53, %v3628_v50  ;;  %v3744_v11 = vsel %vm3743_vm4, %v5767_v59, %v3740_v27 }
0x1186   :  { %v3749_v39 = vsel %vm3746_vm7, %v3748_v40, %v3744_v11 }
0x1187   :  { %v3760_v46 = vpack.c.bf16 %v3757_v6, %v3756_v7  ;;  %v3750_v9 = vmul.f32 %v3749_v39, %v3725_v28 }
0x1189   :  { %v5529_v56 = vclamps-f32 %v3750_v9, 1.0 }
0x118b   :  { %v3755_v8 = vadd.f32 1.0, %v5529_v56 }
0x118d   :  { %v3758_v49 = vmul.f32 %v3755_v8, %v3629_v38 }
0x118f   :  { %v3761_v42 = vpack.c.bf16 %v3758_v49, %v3758_v49 }
0x1191   :  { %v3766_v24 = vsel %vm154_vm0, %v3761_v42, 0 }
0x1192   :  { %3774 = vmatpush.bf16.msra.mxu3 %v3766_v24 }
0x1196   :  { %3775 = vmatpush.bf16.msra.mxu3 %v3760_v46 }
0x1199   :  { %5530 = vmatmul.msk.bf16.vlgmr.msra.gmra.mxu3 %vm443_vm6, %v7625_v1 }
0x119a   :  { %3919 = vmatpush.bf16.msrb.mxu3 %v3910_v47 }
0x11a9   :  { %5535 = vmatmul.msk.bf16.vlgmr.msrb.gmra.mxu3 %vm150_vm2, %v7483_v5 }
0x11b9   :  { %5536 = vmatmul.msk.bf16.gmra.mxu3 %vm150_vm2, %v7487_v19 }
0x121c   :  { %v7633_v23 = vpop.f32.mrf.mxu3 }
0x121d   :  { %v7636_v43 = vmul.f32 0.70710677, %v7633_v23 }
0x121f   :  { %v3783_v15 = vmul.f32 %v7636_v43, %v7636_v43 }
0x1221   :  { %v7640_v29 = vmin.f32 %v3783_v15, 16.0 }
0x1223   :  { %v3796_v54 = vmul.f32 3.8918573e-05, %v7640_v29  ;;  %v3785_v26 = vmul.f32 2.1237322e-06, %v7640_v29 }
0x1224   :  { %v3779_v0 = vpop.f32.mrf.mxu3 }
0x1225   :  { %v3797_v57 = vadd.f32 0.001143296, %v3796_v54  ;;  %v3786_v20 = vadd.f32 0.00028619796, %v3785_v26 }
0x1227   :  { %v3798_v48 = vmul.f32 %v3797_v57, %v7640_v29  ;;  %v3787_v27 = vmul.f32 %v3786_v20, %v7640_v29 }
0x1229   :  { %v3799_v5 = vadd.f32 0.014752088, %v3798_v48  ;;  %v3788_v38 = vadd.f32 0.0036580483, %v3787_v27 }
0x122b   :  { %v3800_v19 = vmul.f32 %v3799_v5, %v7640_v29  ;;  %v3789_v57 = vmul.f32 %v3788_v38, %v7640_v29 }
0x122c   :  { %v7644_v30 = vpop.f32.mrf.mxu3 }
0x122d   :  { %v7648_v61 = vmul.f32 0.70710677, %v7644_v30  ;;  %v3801_v62 = vadd.f32 0.112945676, %v3800_v19 }
0x122f   :  { %v3936_v44 = vmul.f32 %v7648_v61, %v7648_v61  ;;  %v3802_v35 = vmul.f32 %v3801_v62, %v7640_v29 }
0x1231   :  { %v7652_v21 = vmin.f32 %v3936_v44, 16.0  ;;  %v3803_v60 = vadd.f32 0.4994258, %v3802_v35  ;;  %v3790_v35 = vadd.f32 0.05243302, %v3789_v57 }
0x1233   :  { %v3938_v22 = vmul.f32 2.1237322e-06, %v7652_v21  ;;  %v3949_v31 = vmul.f32 3.8918573e-05, %v7652_v21  ;;  %v3804_v51 = vmul.f32 %v3803_v60, %v7640_v29 }
0x1234   :  { %v7656_v37 = vpop.f32.mrf.mxu3 }
0x1235   :  { %v7660_v55 = vmul.f32 0.70710677, %v7656_v37  ;;  %v3939_v3 = vadd.f32 0.00028619796, %v3938_v22  ;;  %v3950_v59 = vadd.f32 0.001143296, %v3949_v31 }
0x1236   :  { %v7682_v40 = vadd.f32 1.0, %v3804_v51 }
0x1237   :  { %v3951_v34 = vmul.f32 %v3950_v59, %v7652_v21  ;;  %v3976_v41 = vmul.f32 %v7660_v55, %v7660_v55  ;;  %v3940_v17 = vmul.f32 %v3939_v3, %v7652_v21 }
0x1238   :  { %5768 = vrcp.f32 %v7682_v40  ;;  %vm3811_vm13 = vweird.f32 %v7682_v40 }
0x1239   :  { %v3952_v58 = vadd.f32 0.014752088, %v3951_v34  ;;  %v7667_v52 = vmin.f32 %v3976_v41, 16.0  ;;  %v3941_v53 = vadd.f32 0.0036580483, %v3940_v17 }
0x123b   :  { %v3953_v10 = vmul.f32 %v3952_v58, %v7652_v21  ;;  %v3978_v36 = vmul.f32 2.1237322e-06, %v7667_v52  ;;  %v3989_v32 = vmul.f32 3.8918573e-05, %v7667_v52  ;;  %v3942_v39 = vmul.f32 %v3941_v53, %v7652_v21 }
0x123c   :  { %v7672_v50 = vpop.f32.mrf.mxu3 }
0x123d   :  { %v7676_v13 = vmul.f32 0.70710677, %v7672_v50  ;;  %v3954_v25 = vadd.f32 0.112945676, %v3953_v10  ;;  %v3979_v16 = vadd.f32 0.00028619796, %v3978_v36  ;;  %v3791_v36 = vmul.f32 %v3790_v35, %v7640_v29 }
0x123e   :  { %v3990_v7 = vadd.f32 0.001143296, %v3989_v32  ;;  %v3943_v24 = vadd.f32 0.05243302, %v3942_v39  ;;  %v7700_v62 = vpop.eup %5768 }
0x123f   :  { %v4016_v6 = vmul.f32 %v7676_v13, %v7676_v13  ;;  %v3955_v33 = vmul.f32 %v3954_v25, %v7652_v21  ;;  %v3980_v28 = vmul.f32 %v3979_v16, %v7667_v52  ;;  %v3807_v41 = vmul.f32 %v7700_v62, %v7682_v40 }
0x1240   :  { %v3991_v11 = vmul.f32 %v3990_v7, %v7667_v52  ;;  %v3944_v19 = vmul.f32 %v3943_v24, %v7652_v21  ;;  %vm3812_vm11 = vweird.f32 %v7700_v62 }
0x1241   :  { %v7686_v46 = vmin.f32 %v4016_v6, 16.0  ;;  %v3956_v9 = vadd.f32 0.4994258, %v3955_v33  ;;  %v3981_v18 = vadd.f32 0.0036580483, %v3980_v28  ;;  %v3808_v25 = vsub.f32 1.0, %v3807_v41  ;;  %vm7724_vm14 = vmor %vm3811_vm13, %vm3812_vm11 }
0x1242   :  { %v3992_v56 = vadd.f32 0.014752088, %v3991_v11  ;;  %v3945_v60 = vadd.f32 0.18741608, %v3944_v19  ;;  %v3792_v28 = vadd.f32 0.18741608, %v3791_v36 }
0x1243   :  { %v4018_v63 = vmul.f32 2.1237322e-06, %v7686_v46  ;;  %v3957_v8 = vmul.f32 %v3956_v9, %v7652_v21  ;;  %v4029_v2 = vmul.f32 3.8918573e-05, %v7686_v46  ;;  %v3982_v54 = vmul.f32 %v3981_v18, %v7667_v52 }
0x1244   :  { %v3928_v49 = vpop.f32.mrf.mxu3  ;;  %v3993_v42 = vmul.f32 %v3992_v56, %v7667_v52  ;;  %v3946_v16 = vmul.f32 %v3945_v60, %v7652_v21  ;;  %v3809_v56 = vmul.f32 %v7700_v62, %v3808_v25 }
0x1245   :  { %v4019_v4 = vadd.f32 0.00028619796, %v4018_v63  ;;  %v3958_v47 = vadd.f32 1.0, %v3957_v8  ;;  %v4030_v15 = vadd.f32 0.001143296, %v4029_v2 }
0x1246   :  { %v3994_v0 = vadd.f32 0.112945676, %v3993_v42  ;;  %v3983_v22 = vadd.f32 0.05243302, %v3982_v54  ;;  %v3947_v63 = vadd.f32 1.1283791, %v3946_v16 }
0x1247   :  { %5770 = vrcp.f32 %v3958_v47  ;;  %v4020_v5 = vmul.f32 %v4019_v4, %v7686_v46  ;;  %v4031_v44 = vmul.f32 %v4030_v15, %v7686_v46  ;;  %v3970_v7 = vand.u32 2147483648, %v3958_v47 }
0x1248   :  { %v3995_v48 = vmul.f32 %v3994_v0, %v7667_v52  ;;  %v3984_v20 = vmul.f32 %v3983_v22, %v7667_v52  ;;  %v3968_v11 = vand.u32 2147483647, %v3958_v47  ;;  %vm3964_vm8 = vweird.f32 %v3958_v47 }
0x1249   :  { %v4032_v3 = vadd.f32 0.014752088, %v4031_v44  ;;  %v4021_v26 = vadd.f32 0.0036580483, %v4020_v5  ;;  %v3971_v2 = vor.u32 1.1754944e-38, %v3970_v7  ;;  %v3793_v4 = vmul.f32 %v3792_v28, %v7640_v29 }
0x124a   :  { %v3996_v31 = vadd.f32 0.4994258, %v3995_v48  ;;  %v3985_v27 = vadd.f32 0.18741608, %v3984_v20  ;;  %vm3969_vm10 = vcmp.eq.f32.partialorder %v3968_v11, 8.507059e+37  ;;  %v3817_v54 = vand.u32 2147483648, %v7682_v40 }
0x124b   :  { %v4033_v17 = vmul.f32 %v4032_v3, %v7686_v46  ;;  %v4022_v53 = vmul.f32 %v4021_v26, %v7686_v46  ;;  %v3948_v0 = vmul.f32 %v3947_v63, %v7648_v61  ;;  %v3810_v48 = vadd.f32 %v7700_v62, %v3809_v56 }
0x124c   :  { %v3997_v59 = vmul.f32 %v3996_v31, %v7667_v52  ;;  %v3986_v21 = vmul.f32 %v3985_v27, %v7667_v52  ;;  %v3815_v22 = vand.u32 2147483647, %v7682_v40  ;;  %v3794_v3 = vadd.f32 1.1283791, %v3793_v4 }
0x124d   :  { %v5771_v34 = vpop.eup %5770  ;;  %v4034_v32 = vadd.f32 0.112945676, %v4033_v17  ;;  %v4023_v9 = vadd.f32 0.05243302, %v4022_v53  ;;  %v3818_v26 = vor.u32 1.1754944e-38, %v3817_v54 }
0x124e   :  { %v3960_v58 = vmul.f32 %v5771_v34, %v3958_v47  ;;  %v3998_v10 = vadd.f32 1.0, %v3997_v59  ;;  %vm3965_vm5 = vweird.f32 %v5771_v34  ;;  %v3987_v52 = vadd.f32 1.1283791, %v3986_v21  ;;  %v4373_v54 = vld [vmem:[%s5356_s8] sm:$0x3] }
0x124f   :  { %v4035_v33 = vmul.f32 %v4034_v32, %v7686_v46  ;;  %vm3966_vm9 = vmor %vm3964_vm8, %vm3965_vm5  ;;  %v4024_v47 = vmul.f32 %v4023_v9, %v7686_v46  ;;  %v3814_v59 = vsel %vm7724_vm14, %v7700_v62, %v3810_v48  ;;  %vm3816_vm7 = vcmp.eq.f32.partialorder %v3815_v22, 8.507059e+37 }
0x1250   :  { %v3961_v51 = vsub.f32 1.0, %v3960_v58  ;;  %5772 = vrcp.f32 %v3998_v10  ;;  %v4010_v5 = vand.u32 2147483648, %v3998_v10  ;;  %v4008_v29 = vand.u32 2147483647, %v3998_v10 }
0x1251   :  { %v4036_v18 = vadd.f32 0.4994258, %v4035_v33  ;;  %v4025_v31 = vadd.f32 0.18741608, %v4024_v47  ;;  %vm4004_vm15 = vweird.f32 %v3998_v10  ;;  %v3988_v40 = vmul.f32 %v3987_v52, %v7660_v55 }
0x1252   :  { %v3962_v6 = vmul.f32 %v5771_v34, %v3961_v51  ;;  %vm4009_vm4 = vcmp.eq.f32.partialorder %v4008_v29, 8.507059e+37  ;;  %v3819_v36 = vsel %vm3816_vm7, %v3818_v26, %v3814_v59  ;;  %v3795_v51 = vmul.f32 %v3794_v3, %v7636_v43 }
0x1253   :  { %v4037_v49 = vmul.f32 %v4036_v18, %v7686_v46  ;;  %v4026_v20 = vmul.f32 %v4025_v31, %v7686_v46  ;;  %v3930_v62 = vmul.f32 0.5, %v7644_v30  ;;  %v3931_v55 = vmul.f32 0.5, %v7656_v37 }
0x1254   :  { %v3963_v39 = vadd.f32 %v5771_v34, %v3962_v6  ;;  %v3820_v7 = vmul.f32 %v3819_v36, %v3795_v51  ;;  %v3781_v21 = vmul.f32 0.5, %v7633_v23  ;;  %v4384_v23 = vand.u32 %v4373_v54, %v5886_v14 }
0x1255   :  { %v4038_v15 = vadd.f32 1.0, %v4037_v49  ;;  %v4027_v6 = vadd.f32 1.1283791, %v4026_v20  ;;  %v3932_v49 = vmul.f32 0.5, %v7672_v50  ;;  %v4175_v50 = vpop.permute.xlu2 %4174  ;;  %v4270_v20 = vld [vmem:[%s6688_s23] sm:$0xff]  ;;  %s5851_s23 = smov 28  }
0x1256   :  { %v5773_v38 = vpop.eup %5772  ;;  %v3967_v8 = vsel %vm3966_vm9, %v5771_v34, %v3963_v39  ;;  %v4011_v34 = vor.u32 1.1754944e-38, %v4010_v5  ;;  %v5531_v18 = vclamps-f32 %v3820_v7, 1.0  ;;  %4274 = vperm.xlu2 %5657, %v4270_v20   ;;  %s5381_s20 = sld [smem:[%s8445_s0 + %s5851_s23]]  }
0x1257   :  { %v4000_v42 = vmul.f32 %v5773_v38, %v3998_v10  ;;  %v3972_v24 = vsel %vm3969_vm10, %v3971_v2, %v3967_v8  ;;  %5774 = vrcp.f32 %v4038_v15  ;;  %vm4005_vm12 = vweird.f32 %v5773_v38 }
0x1258   :  { %v3973_v19 = vmul.f32 %v3972_v24, %v3948_v0  ;;  %vm4006_vm3 = vmor %vm4004_vm15, %vm4005_vm12  ;;  %v4050_v27 = vand.u32 2147483648, %v4038_v15  ;;  %v4048_v11 = vand.u32 2147483647, %v4038_v15  ;;  %vm4044_vm8 = vweird.f32 %v4038_v15 }
0x1259   :  { %v4001_v57 = vsub.f32 1.0, %v4000_v42  ;;  %v4028_v30 = vmul.f32 %v4027_v6, %v7676_v13  ;;  %v3823_v8 = vadd.f32 1.0, %v5531_v18 }
0x125a   :  { %v5537_v41 = vclamps-f32 %v3973_v19, 1.0  ;;  %v4051_v43 = vor.u32 1.1754944e-38, %v4050_v27  ;;  %vm4049_vm10 = vcmp.eq.f32.partialorder %v4048_v11, 8.507059e+37 }
0x125b   :  { %v4002_v44 = vmul.f32 %v5773_v38, %v4001_v57  ;;  %v3824_v4 = vmul.f32 %v3823_v8, %v3781_v21  ;;  %v4372_v57 = vld [vmem:[%s5373_s16] sm:$0x3] }
0x125c   :  { %v4056_v53 = vadd.f32 1.0, %v5537_v41 }
0x125d   :  { %v4003_v61 = vadd.f32 %v5773_v38, %v4002_v44  ;;  %v5775_v17 = vpop.eup %5774  ;;  %v3825_v47 = vpack.c.bf16 %v3824_v4, %v3824_v4 }
0x125e   :  { %v4040_v32 = vmul.f32 %v5775_v17, %v4038_v15  ;;  %vm4045_vm5 = vweird.f32 %v5775_v17  ;;  %v4059_v46 = vmul.f32 %v4056_v53, %v3930_v62  ;;  %v7758_v62 = vld [vmem:[%s5951_s13] sm:$0xff] }
0x125f   :  { %v4007_v60 = vsel %vm4006_vm3, %v5773_v38, %v4003_v61  ;;  %vm4046_vm9 = vmor %vm4044_vm8, %vm4045_vm5  ;;  %v4180_v0 = vand.u32 %v3825_v47, %v5886_v14  ;;  %4434 = vrot.lane.b32.xlu2 %v7758_v62, %s5828_s7  ;;  %vm4511_vm8 = vcmask 1043456  }
0x1260   :  { %v4012_v58 = vsel %vm4009_vm4, %v4011_v34, %v4007_v60  ;;  %v4041_v16 = vsub.f32 1.0, %v4040_v32 }
0x1261   :  { %v4013_v10 = vmul.f32 %v4012_v58, %v3988_v40 }
0x1262   :  { %v4042_v28 = vmul.f32 %v5775_v17, %v4041_v16 }
0x1263   :  { %v5538_v25 = vclamps-f32 %v4013_v10, 1.0 }
0x1264   :  { %v4043_v9 = vadd.f32 %v5775_v17, %v4042_v28  ;;  %v7763_v28 = vld [vmem:[%s5951_s13 + $0x18] sm:$0xff] }
0x1265   :  { %v4057_v33 = vadd.f32 1.0, %v5538_v25  ;;  %v4378_v25 = vpop.permute.xlu1 %4377 }
0x1266   :  { %v4047_v56 = vsel %vm4046_vm9, %v5775_v17, %v4043_v9  ;;  %vm4512_vm9 = vcmask 1044480  }
0x1267   :  { %v4060_v39 = vmul.f32 %v4057_v33, %v3931_v55  ;;  %v4052_v38 = vsel %vm4049_vm10, %v4051_v43, %v4047_v56  ;;  %4440 = vrot.lane.b32.xlu2 %v7763_v28, %s5828_s7  ;;  %vm4495_vm10 = vcmask 72704   ;;  %s5850_s7 = smov 26  }
0x1268   :  { %v4053_v37 = vmul.f32 %v4052_v38, %v4028_v30 }
0x1269   :  { %v4062_v63 = vpack.c.bf16 %v4060_v39, %v4059_v46 }
0x126a   :  { %v5539_v2 = vclamps-f32 %v4053_v37, 1.0 }
0x126c   :  { %v4058_v42 = vadd.f32 1.0, %v5539_v2 }
0x126e   :  { %v4061_v24 = vmul.f32 %v4058_v42, %v3932_v49  ;;  %v4557_v49 = vld [vmem:[%s5958_s18 + $0x30] sm:$0xff] }
0x126f   :  { %4592 = vperm.xlu2 %5657, %v4557_v49  }
0x1270   :  { %v4063_v13 = vpack.c.bf16 %v4061_v24, %v4061_v24 }
0x1272   :  { %v4065_v15 = vsel %vm154_vm0, %v4063_v13, 0 }
0x1273   :  { %4073 = vmatpush.bf16.msrb.mxu0 %v4065_v15  ;;  %v4556_v15 = vld [vmem:[%s5958_s18 + $0x28] sm:$0xff] }
0x1277   :  { %4074 = vmatpush.bf16.msrb.mxu0 %v4062_v63  ;;  %4587 = vperm.xlu2 %5657, %v4556_v15  }
0x127a   :  { %5540 = vmatmul.msk.bf16.vlgmr.msrb.gmra.mxu0 %vm443_vm6, %v7625_v1 }
0x127b   :  { %4189 = vmatpush.bf16.msra.mxu0 %v4180_v0  ;;  %v4247_v0 = vpop.permute.xlu0 %4246 }
0x127f   :  { %4393 = vmatpush.bf16.msrb.mxu0 %v4384_v23  ;;  %v4551_v23 = vld [vmem:[%s5958_s18] sm:$0xff] }
0x1280   :  { %4562 = vperm.xlu2 %5657, %v4551_v23  }
0x128a   :  { %5548 = vmatmul.msk.bf16.vlgmr.msra.gmra.mxu0 %vm150_vm2, %v4175_v50  ;;  %v5022_v50 = vld [vmem:[%s5967_s22 + $0x10] sm:$0xff] }
0x128b   :  { %5037 = vperm.xlu2 %5657, %v5022_v50  }
0x129a   :  { %5554 = vmatmul.msk.bf16.vlgmr.msrb.gmra.mxu0 %vm150_vm2, %v4372_v57  ;;  %v5021_v57 = vld [vmem:[%s5967_s22 + $0x8] sm:$0xff]  ;;  %s5379_s22 = sld [smem:[%s8445_s0 + %s5850_s7]]  }
0x129b   :  { %5032 = vperm.xlu2 %5657, %v5021_v57  }
0x12f7   :  { %v4076_v48 = vpop.f32.mrf.mxu0 }
0x12f8   :  { %v4081_v52 = vmul.f32 0.70710677, %v4076_v48  ;;  %v4080_v4 = vmul.f32 0.5, %v4076_v48  ;;  %v4280_v48 = vpop.permute.xlu0 %4279 }
0x12fa   :  { %v4082_v5 = vmul.f32 %v4081_v52, %v4081_v52 }
0x12fc   :  { %v4083_v19 = vmin.f32 %v4082_v5, 16.0 }
0x12fe   :  { %v4084_v44 = vmul.f32 2.1237322e-06, %v4083_v19  ;;  %v4095_v29 = vmul.f32 3.8918573e-05, %v4083_v19 }
0x12ff   :  { %v4078_v1 = vpop.f32.mrf.mxu0 }
0x1300   :  { %v4085_v22 = vadd.f32 0.00028619796, %v4084_v44  ;;  %v4096_v31 = vadd.f32 0.001143296, %v4095_v29  ;;  %v4149_v44 = vpop.f32.mrf.mxu1  ;;  %v4169_v29 = vpop.f32.mrf.mxu2 }
0x1302   :  { %v4086_v35 = vmul.f32 %v4085_v22, %v4083_v19  ;;  %v4097_v61 = vmul.f32 %v4096_v31, %v4083_v19 }
0x1304   :  { %v4098_v3 = vadd.f32 0.014752088, %v4097_v61  ;;  %v4087_v59 = vadd.f32 0.0036580483, %v4086_v35  ;;  %v4170_v35 = vadd.f32 %v4169_v29, %v4149_v44 }
0x1306   :  { %v4099_v26 = vmul.f32 %v4098_v3, %v4083_v19  ;;  %v4088_v40 = vmul.f32 %v4087_v59, %v4083_v19 }
0x1307   :  { %v7752_v34 = vpop.f32.mrf.mxu0 }
0x1308   :  { %v4100_v41 = vadd.f32 0.112945676, %v4099_v26  ;;  %v4089_v58 = vadd.f32 0.05243302, %v4088_v40  ;;  %v4151_v22 = vpop.f32.mrf.mxu1  ;;  %v4171_v31 = vpop.f32.mrf.mxu2  ;;  %v4196_v3 = vadd.f32 %v7752_v34, %v4170_v35 }
0x130a   :  { %v4101_v60 = vmul.f32 %v4100_v41, %v4083_v19  ;;  %v4090_v51 = vmul.f32 %v4089_v58, %v4083_v19  ;;  %v4172_v41 = vadd.f32 %v4171_v31, %v4151_v22 }
0x130c   :  { %v4102_v17 = vadd.f32 0.4994258, %v4101_v60  ;;  %v4091_v53 = vadd.f32 0.18741608, %v4090_v51 }
0x130e   :  { %v4103_v36 = vmul.f32 %v4102_v17, %v4083_v19  ;;  %v4092_v6 = vmul.f32 %v4091_v53, %v4083_v19  ;;  %v4437_v19 = vpop.permute.xlu0 %4436 }
0x130f   :  { %v7755_v10 = vpop.f32.mrf.mxu0 }
0x1310   :  { %v4104_v32 = vadd.f32 1.0, %v4103_v36  ;;  %v4093_v9 = vadd.f32 1.1283791, %v4092_v6  ;;  %v4215_v61 = vpop.f32.mrf.mxu1  ;;  %v4239_v59 = vpop.f32.mrf.mxu2  ;;  %v4197_v17 = vadd.f32 %v7755_v10, %v4172_v41 }
0x1311   :  { %v4220_v40 = vadd.f32 %v4215_v61, %v4196_v3 }
0x1312   :  { %5776 = vrcp.f32 %v4104_v32  ;;  %v4116_v46 = vand.u32 2147483648, %v4104_v32  ;;  %v4114_v43 = vand.u32 2147483647, %v4104_v32  ;;  %vm4110_vm6 = vweird.f32 %v4104_v32 }
0x1313   :  { %v4094_v37 = vmul.f32 %v4093_v9, %v4081_v52  ;;  %v4275_v52 = vpop.permute.xlu2 %4274  ;;  %v4244_v60 = vadd.f32 %v4239_v59, %v4220_v40 }
0x1314   :  { %v4117_v38 = vor.u32 1.1754944e-38, %v4116_v46  ;;  %vm4115_vm12 = vcmp.eq.f32.partialorder %v4114_v43, 8.507059e+37 }
0x1316   :  { %v4443_v26 = vpop.permute.xlu0 %4442 }
0x1317   :  { %v4395_v16 = vpop.f32.mrf.mxu0 }
0x1318   :  { %v5777_v7 = vpop.eup %5776  ;;  %v4396_v55 = vadd.f32 %v4395_v16, %v4378_v25  ;;  %v4217_v58 = vpop.f32.mrf.mxu1 }
0x1319   :  { %v4106_v27 = vmul.f32 %v5777_v7, %v4104_v32  ;;  %vm4111_vm0 = vweird.f32 %v5777_v7  ;;  %v4221_v32 = vadd.f32 %v4217_v58, %v4197_v17  ;;  %v4241_v53 = vpop.f32.mrf.mxu2 }
0x131a   :  { %v4399_v33 = vmax.f32 %v4396_v55, 0.0  ;;  %vm4112_vm11 = vmor %vm4110_vm6, %vm4111_vm0 }
0x131b   :  { %v4107_v11 = vsub.f32 1.0, %v4106_v27  ;;  %v4435_v5 = vpop.permute.xlu2 %4434  ;;  %v4245_v16 = vadd.f32 %v4241_v53, %v4221_v32 }
0x131c   :  { %v4410_v39 = vpack.c.bf16 %v4399_v33, %v4399_v33 }
0x131d   :  { %v4108_v18 = vmul.f32 %v5777_v7, %v4107_v11 }
0x131e   :  { %v4460_v30 = vand.u32 %v4410_v39, %v5886_v14 }
0x131f   :  { %v4109_v56 = vadd.f32 %v5777_v7, %v4108_v18  ;;  %v4397_v63 = vpop.f32.mrf.mxu0 }
0x1320   :  { %4469 = vmatpush.bf16.msrb.mxu1 %v4460_v30 }
0x1321   :  { %v4113_v8 = vsel %vm4112_vm11, %v5777_v7, %v4109_v56 }
0x1322   :  { %v4118_v2 = vsel %vm4115_vm12, %v4117_v38, %v4113_v8 }
0x1323   :  { %v4119_v21 = vmul.f32 %v4118_v2, %v4094_v37  ;;  %5571 = vmatmul.msk.bf16.vlgmr.msrb.gmra.mxu1 %vm150_vm2, %v4435_v5  ;;  %v4441_v1 = vpop.permute.xlu2 %4440 }
0x1325   :  { %v5541_v42 = vclamps-f32 %v4119_v21, 1.0 }
0x1327   :  { %v4122_v24 = vadd.f32 1.0, %v5541_v42 }
0x1329   :  { %v4123_v13 = vmul.f32 %v4122_v24, %v4080_v4 }
0x132b   :  { %v4124_v47 = vpack.c.bf16 %v4123_v13, %v4123_v13 }
0x132d   :  { %v4252_v54 = vand.u32 %v4124_v47, %v5886_v14  ;;  %v4439_v14 = vpop.permute.xlu1 %4438 }
0x132f   :  { %4261 = vmatpush.bf16.msra.mxu3 %v4252_v54 }
0x1332   :  { %5551 = vmatmul.msk.bf16.vlgmr.msra.gmra.mxu3 %vm150_vm2, %v4247_v0 }
0x1333   :  { %5572 = vmatmul.msk.bf16.gmra.mxu1 %vm150_vm2, %v4437_v19 }
0x1343   :  { %5573 = vmatmul.msk.bf16.gmra.mxu1 %vm150_vm2, %v4439_v14 }
0x1353   :  { %5574 = vmatmul.msk.bf16.gmra.mxu1 %vm150_vm2, %v4441_v1 }
0x1363   :  { %5575 = vmatmul.msk.bf16.gmra.mxu1 %vm150_vm2, %v4443_v26 }
0x13b5   :  { %v4263_v20 = vpop.f32.mrf.mxu3 }
0x13b6   :  { %v4268_v36 = vadd.f32 %v4263_v20, %v4244_v60 }
0x13b8   :  { %v7782_v51 = vadd.f32 %v4275_v52, %v4268_v36 }
0x13ba   :  { %v7785_v25 = vmul.f32 0.70710677, %v7782_v51 }
0x13bc   :  { %v4288_v34 = vmul.f32 %v7785_v25, %v7785_v25 }
0x13bd   :  { %v4265_v7 = vpop.f32.mrf.mxu3 }
0x13be   :  { %v4289_v55 = vmin.f32 %v4288_v34, 16.0  ;;  %v4269_v6 = vadd.f32 %v4265_v7, %v4245_v16 }
0x13c0   :  { %v4290_v27 = vmul.f32 2.1237322e-06, %v4289_v55  ;;  %v4301_v33 = vmul.f32 3.8918573e-05, %v4289_v55  ;;  %v7789_v10 = vadd.f32 %v4280_v48, %v4269_v6 }
0x13c2   :  { %v4291_v11 = vadd.f32 0.00028619796, %v4290_v27  ;;  %v4302_v46 = vadd.f32 0.001143296, %v4301_v33  ;;  %v7792_v39 = vmul.f32 0.70710677, %v7789_v10 }
0x13c4   :  { %v4303_v9 = vmul.f32 %v4302_v46, %v4289_v55  ;;  %v4328_v18 = vmul.f32 %v7792_v39, %v7792_v39  ;;  %v4292_v43 = vmul.f32 %v4291_v11, %v4289_v55 }
0x13c6   :  { %v4304_v30 = vadd.f32 0.014752088, %v4303_v9  ;;  %v4329_v56 = vmin.f32 %v4328_v18, 16.0  ;;  %v4293_v8 = vadd.f32 0.0036580483, %v4292_v43 }
0x13c8   :  { %v4305_v63 = vmul.f32 %v4304_v30, %v4289_v55  ;;  %v4330_v38 = vmul.f32 2.1237322e-06, %v4329_v56  ;;  %v4341_v37 = vmul.f32 3.8918573e-05, %v4329_v56  ;;  %v4294_v13 = vmul.f32 %v4293_v8, %v4289_v55 }
0x13c9   :  { %v4284_v8 = vmul.f32 0.5, %v7782_v51  ;;  %v4471_v51 = vpop.f32.mrf.mxu1 }
0x13ca   :  { %v4306_v2 = vadd.f32 0.112945676, %v4305_v63  ;;  %v4331_v21 = vadd.f32 0.00028619796, %v4330_v38  ;;  %v4342_v49 = vadd.f32 0.001143296, %v4341_v37 }
0x13cb   :  { %v4295_v50 = vadd.f32 0.05243302, %v4294_v13 }
0x13cc   :  { %v4307_v42 = vmul.f32 %v4306_v2, %v4289_v55  ;;  %v4332_v4 = vmul.f32 %v4331_v21, %v4329_v56  ;;  %v4343_v24 = vmul.f32 %v4342_v49, %v4329_v56  ;;  %v4285_v2 = vmul.f32 0.5, %v7789_v10 }
0x13cd   :  { %v4296_v19 = vmul.f32 %v4295_v50, %v4289_v55  ;;  %v4513_v49 = vsel %vm4511_vm8, 4294967295, %v5821_v12  ;;  %v7807_v12 = vpop.permute.xlu2 %4592 }
0x13ce   :  { %v4308_v47 = vadd.f32 0.4994258, %v4307_v42  ;;  %v4333_v15 = vadd.f32 0.0036580483, %v4332_v4  ;;  %v4344_v54 = vadd.f32 0.014752088, %v4343_v24 }
0x13cf   :  { %v4297_v22 = vadd.f32 0.18741608, %v4296_v19  ;;  %v4514_v4 = vsel %vm4512_vm9, %v4513_v49, 0 }
0x13d0   :  { %v4309_v0 = vmul.f32 %v4308_v47, %v4289_v55  ;;  %v4345_v23 = vmul.f32 %v4344_v54, %v4329_v56  ;;  %v4334_v52 = vmul.f32 %v4333_v15, %v4329_v56  ;;  %v5814_v47 = vld [vmem:[%s5951_s13 + $0x8] sm:$0xff]  ;;  %v5815_v15 = vld [vmem:[%s5951_s13 + $0x10] sm:$0xff] }
0x13d1   :  { %v4298_v59 = vmul.f32 %v4297_v22, %v4289_v55  ;;  %v4473_v10 = vpop.f32.mrf.mxu1 }
0x13d2   :  { %v4310_v57 = vadd.f32 1.0, %v4309_v0  ;;  %v4346_v5 = vadd.f32 0.112945676, %v4345_v23  ;;  %v4335_v14 = vadd.f32 0.05243302, %v4334_v52  ;;  %v7809_v0 = vpop.permute.xlu0 %4597 }
0x13d3   :  { %v4299_v58 = vadd.f32 1.1283791, %v4298_v59 }
0x13d4   :  { %5778 = vrcp.f32 %v4310_v57  ;;  %v4347_v48 = vmul.f32 %v4346_v5, %v4329_v56  ;;  %v4336_v35 = vmul.f32 %v4335_v14, %v4329_v56  ;;  %v4322_v41 = vand.u32 2147483648, %v4310_v57 }
0x13d5   :  { %v4320_v60 = vand.u32 2147483647, %v4310_v57  ;;  %vm4316_vm13 = vweird.f32 %v4310_v57  ;;  %v4300_v7 = vmul.f32 %v4299_v58, %v7785_v25  ;;  %v7811_v23 = vpop.permute.xlu2 %4587 }
0x13d6   :  { %v4348_v44 = vadd.f32 0.4994258, %v4347_v48  ;;  %v4337_v40 = vadd.f32 0.18741608, %v4336_v35  ;;  %v4323_v32 = vor.u32 1.1754944e-38, %v4322_v41 }
0x13d7   :  { %vm4321_vm15 = vcmp.eq.f32.partialorder %v4320_v60, 8.507059e+37 }
0x13d8   :  { %v4349_v29 = vmul.f32 %v4348_v44, %v4329_v56  ;;  %v4338_v53 = vmul.f32 %v4337_v40, %v4329_v56 }
0x13d9   :  { %v4476_v54 = vpop.f32.mrf.mxu1 }
0x13da   :  { %v5779_v1 = vpop.eup %5778  ;;  %v4350_v61 = vadd.f32 1.0, %v4349_v29  ;;  %v4339_v55 = vadd.f32 1.1283791, %v4338_v53 }
0x13db   :  { %v4312_v31 = vmul.f32 %v5779_v1, %v4310_v57  ;;  %vm4317_vm2 = vweird.f32 %v5779_v1  ;;  %v4573_v57 = vpop.permute.xlu0 %4572 }
0x13dc   :  { %5780 = vrcp.f32 %v4350_v61  ;;  %vm4318_vm14 = vmor %vm4316_vm13, %vm4317_vm2  ;;  %v4362_v27 = vand.u32 2147483648, %v4350_v61  ;;  %v4360_v46 = vand.u32 2147483647, %v4350_v61  ;;  %vm4356_vm4 = vweird.f32 %v4350_v61 }
0x13dd   :  { %v4313_v3 = vsub.f32 1.0, %v4312_v31  ;;  %v4340_v30 = vmul.f32 %v4339_v55, %v7792_v39  ;;  %v4563_v5 = vpop.permute.xlu2 %4562 }
0x13de   :  { %v4363_v18 = vor.u32 1.1754944e-38, %v4362_v27  ;;  %vm4361_vm5 = vcmp.eq.f32.partialorder %v4360_v46, 8.507059e+37 }
0x13df   :  { %v4314_v26 = vmul.f32 %v5779_v1, %v4313_v3 }
0x13e1   :  { %v4315_v17 = vadd.f32 %v5779_v1, %v4314_v26  ;;  %v4478_v50 = vpop.f32.mrf.mxu1 }
0x13e2   :  { %v5781_v20 = vpop.eup %5780 }
0x13e3   :  { %v4319_v36 = vsel %vm4318_vm14, %v5779_v1, %v4315_v17  ;;  %v4352_v34 = vmul.f32 %v5781_v20, %v4350_v61  ;;  %vm4357_vm3 = vweird.f32 %v5781_v20  ;;  %v4568_v22 = vpop.permute.xlu0 %4567 }
0x13e4   :  { %v4324_v16 = vsel %vm4321_vm15, %v4323_v32, %v4319_v36  ;;  %vm4358_vm7 = vmor %vm4356_vm4, %vm4357_vm3 }
0x13e5   :  { %v4353_v6 = vsub.f32 1.0, %v4352_v34  ;;  %v4325_v33 = vmul.f32 %v4324_v16, %v4300_v7 }
0x13e7   :  { %v4354_v11 = vmul.f32 %v5781_v20, %v4353_v6  ;;  %v5552_v43 = vclamps-f32 %v4325_v33, 1.0 }
0x13e9   :  { %v4355_v9 = vadd.f32 %v5781_v20, %v4354_v11  ;;  %v4368_v25 = vadd.f32 1.0, %v5552_v43  ;;  %v7813_v48 = vpop.f32.mrf.mxu1 }
0x13eb   :  { %v4359_v56 = vsel %vm4358_vm7, %v5781_v20, %v4355_v9  ;;  %v4370_v42 = vmul.f32 %v4368_v25, %v4284_v8 }
0x13ec   :  { %v4364_v63 = vsel %vm4361_vm5, %v4363_v18, %v4359_v56 }
0x13ed   :  { %v4365_v38 = vmul.f32 %v4364_v63, %v4340_v30 }
0x13ef   :  { %v5553_v37 = vclamps-f32 %v4365_v38, 1.0 }
0x13f1   :  { %v4369_v21 = vadd.f32 1.0, %v5553_v37  ;;  %v7830_v3 = vpop.f32.mrf.mxu1 }
0x13f3   :  { %v4371_v39 = vmul.f32 %v4369_v21, %v4285_v2 }
0x13f5   :  { %v4409_v24 = vpack.c.bf16 %v4371_v39, %v4370_v42 }
0x13f7   :  { %v4516_v13 = vand.u32 %v4514_v4, %v4409_v24 }
0x13f9   :  { %4525 = vmatpush.bf16.msrb.mxu2 %v4516_v13  ;;  %v7851_v46 = vpop.f32.mrf.mxu1 }
0x13fc   :  { %5576 = vmatmul.msk.bf16.vlgmr.msrb.gmra.mxu2 %vm4495_vm10, %v7758_v62 }
0x140c   :  { %5577 = vmatmul.msk.bf16.gmra.mxu2 %vm4495_vm10, %v5814_v47 }
0x141c   :  { %5578 = vmatmul.msk.bf16.gmra.mxu2 %vm4495_vm10, %v5815_v15 }
0x142c   :  { %5579 = vmatmul.msk.bf16.gmra.mxu2 %vm4495_vm10, %v7763_v28  ;;  %v7820_v28 = vpop.permute.xlu1 %4602 }
0x1434   :  { %v7836_v60 = vpop.permute.xlu1 %4582 }
0x143c   :  { %5580 = vmatmul.msk.bf16.gmra.mxu2 %vm4495_vm10, %v6752_v45  ;;  %v4578_v37 = vpop.permute.xlu1 %4577 }
0x147f   :  { %v4527_v62 = vpop.f32.mrf.mxu2 }
0x1480   :  { %v4528_v52 = vadd.f32 %v4527_v62, %v4471_v51 }
0x1482   :  { %v7815_v19 = vadd.f32 %v4563_v5, %v4528_v52  ;;  %v7872_v5 = vpop.f32.mrf.mxu1 }
0x1484   :  { %v7818_v45 = vmul.f32 0.70710677, %v7815_v19 }
0x1486   :  { %v4632_v14 = vmul.f32 %v7818_v45, %v7818_v45 }
0x1487   :  { %v4529_v44 = vpop.f32.mrf.mxu2 }
0x1488   :  { %v7824_v29 = vmin.f32 %v4632_v14, 16.0  ;;  %v4530_v1 = vadd.f32 %v4529_v44, %v4473_v10 }
0x148a   :  { %v4634_v31 = vmul.f32 2.1237322e-06, %v7824_v29  ;;  %v4645_v35 = vmul.f32 3.8918573e-05, %v7824_v29  ;;  %v7828_v61 = vadd.f32 %v4568_v22, %v4530_v1 }
0x148c   :  { %v4635_v59 = vadd.f32 0.00028619796, %v4634_v31  ;;  %v4646_v26 = vadd.f32 0.001143296, %v4645_v35  ;;  %v7833_v41 = vmul.f32 0.70710677, %v7828_v61 }
0x148e   :  { %v4647_v40 = vmul.f32 %v4646_v26, %v7824_v29  ;;  %v4636_v17 = vmul.f32 %v4635_v59, %v7824_v29  ;;  %v4672_v58 = vmul.f32 %v7833_v41, %v7833_v41 }
0x148f   :  { %v4532_v20 = vpop.f32.mrf.mxu2 }
0x1490   :  { %v4648_v36 = vadd.f32 0.014752088, %v4647_v40  ;;  %v4533_v32 = vadd.f32 %v4532_v20, %v4476_v54  ;;  %v7841_v53 = vmin.f32 %v4672_v58, 16.0  ;;  %v4637_v7 = vadd.f32 0.0036580483, %v4636_v17 }
0x1492   :  { %v4649_v34 = vmul.f32 %v4648_v36, %v7824_v29  ;;  %v7844_v16 = vadd.f32 %v4573_v57, %v4533_v32  ;;  %v4674_v6 = vmul.f32 2.1237322e-06, %v7841_v53  ;;  %v4685_v55 = vmul.f32 3.8918573e-05, %v7841_v53 }
0x1493   :  { %v4638_v43 = vmul.f32 %v4637_v7, %v7824_v29 }
0x1494   :  { %v4650_v27 = vadd.f32 0.112945676, %v4649_v34  ;;  %v4686_v33 = vadd.f32 0.001143296, %v4685_v55  ;;  %v7849_v11 = vmul.f32 0.70710677, %v7844_v16 }
0x1495   :  { %v4675_v18 = vadd.f32 0.00028619796, %v4674_v6  ;;  %v4639_v39 = vadd.f32 0.05243302, %v4638_v43 }
0x1496   :  { %v4651_v9 = vmul.f32 %v4650_v27, %v7824_v29  ;;  %v4687_v30 = vmul.f32 %v4686_v33, %v7841_v53  ;;  %v4712_v56 = vmul.f32 %v7849_v11, %v7849_v11 }
0x1497   :  { %v4534_v63 = vpop.f32.mrf.mxu2  ;;  %v4676_v49 = vmul.f32 %v4675_v18, %v7841_v53 }
0x1498   :  { %v4652_v38 = vadd.f32 0.4994258, %v4651_v9  ;;  %v4535_v25 = vadd.f32 %v4534_v63, %v4478_v50  ;;  %v4688_v8 = vadd.f32 0.014752088, %v4687_v30  ;;  %v7858_v2 = vmin.f32 %v4712_v56, 16.0  ;;  %v7899_v63 = vpop.f32.mrf.mxu1 }
0x1499   :  { %v4677_v54 = vadd.f32 0.0036580483, %v4676_v49  ;;  %v4640_v50 = vmul.f32 %v4639_v39, %v7824_v29 }
0x149a   :  { %v4653_v21 = vmul.f32 %v4652_v38, %v7824_v29  ;;  %v4608_v42 = vadd.f32 %v4578_v37, %v4535_v25  ;;  %v4689_v4 = vmul.f32 %v4688_v8, %v7841_v53  ;;  %v4714_v24 = vmul.f32 2.1237322e-06, %v7858_v2 }
0x149b   :  { %v4725_v47 = vmul.f32 3.8918573e-05, %v7858_v2  ;;  %v4678_v22 = vmul.f32 %v4677_v54, %v7841_v53  ;;  %v4641_v59 = vadd.f32 0.18741608, %v4640_v50 }
0x149c   :  { %v7864_v13 = vadd.f32 1.0, %v4653_v21  ;;  %v7867_v15 = vmul.f32 0.70710677, %v4608_v42  ;;  %v4690_v51 = vadd.f32 0.112945676, %v4689_v4 }
0x149d   :  { %v4715_v10 = vadd.f32 0.00028619796, %v4714_v24  ;;  %v4726_v14 = vadd.f32 0.001143296, %v4725_v47  ;;  %v4679_v7 = vadd.f32 0.05243302, %v4678_v22  ;;  %v4642_v27 = vmul.f32 %v4641_v59, %v7824_v29 }
0x149e   :  { %v4691_v57 = vmul.f32 %v4690_v51, %v7841_v53  ;;  %5782 = vrcp.f32 %v7864_v13  ;;  %v4752_v44 = vmul.f32 %v7867_v15, %v7867_v15  ;;  %vm4660_vm0 = vweird.f32 %v7864_v13 }
0x149f   :  { %v4716_v62 = vmul.f32 %v4715_v10, %v7858_v2  ;;  %v4537_v52 = vpop.f32.mrf.mxu2  ;;  %v4727_v31 = vmul.f32 %v4726_v14, %v7858_v2  ;;  %v4680_v38 = vmul.f32 %v4679_v7, %v7841_v53  ;;  %v7912_v10 = vmul.f32 0.5, %v7844_v16 }
0x14a0   :  { %v4692_v1 = vadd.f32 0.4994258, %v4691_v57  ;;  %v7879_v35 = vmin.f32 %v4752_v44, 16.0  ;;  %v4538_v17 = vadd.f32 %v4537_v52, %v7813_v48 }
0x14a1   :  { %v4717_v40 = vadd.f32 0.0036580483, %v4716_v62  ;;  %v4728_v58 = vadd.f32 0.014752088, %v4727_v31  ;;  %v4681_v51 = vadd.f32 0.18741608, %v4680_v38 }
0x14a2   :  { %v4693_v26 = vmul.f32 %v4692_v1, %v7841_v53  ;;  %v4754_v20 = vmul.f32 2.1237322e-06, %v7879_v35  ;;  %v4765_v36 = vmul.f32 3.8918573e-05, %v7879_v35  ;;  %v7892_v33 = vadd.f32 %v7836_v60, %v4538_v17 }
0x14a3   :  { %v4729_v6 = vmul.f32 %v4728_v58, %v7858_v2  ;;  %v4718_v48 = vmul.f32 %v4717_v40, %v7858_v2  ;;  %v4643_v60 = vadd.f32 1.1283791, %v4642_v27  ;;  %v7920_v62 = vmul.f32 0.5, %v4608_v42  ;;  %v4493_v42 = vpop.f32.mrf.mxu1 }
0x14a4   :  { %v7885_v32 = vadd.f32 1.0, %v4693_v26  ;;  %v7887_v34 = vpop.eup %5782  ;;  %v4766_v55 = vadd.f32 0.001143296, %v4765_v36  ;;  %v4755_v43 = vadd.f32 0.00028619796, %v4754_v20  ;;  %v4682_v59 = vmul.f32 %v4681_v51, %v7841_v53 }
0x14a5   :  { %v4730_v18 = vadd.f32 0.112945676, %v4729_v6  ;;  %v4656_v30 = vmul.f32 %v7887_v34, %v7864_v13  ;;  %v7904_v37 = vmul.f32 0.70710677, %v7892_v33  ;;  %v4719_v8 = vadd.f32 0.05243302, %v4718_v48 }
0x14a6   :  { %5784 = vrcp.f32 %v7885_v32  ;;  %v4767_v56 = vmul.f32 %v4766_v55, %v7879_v35  ;;  %v4756_v49 = vmul.f32 %v4755_v43, %v7879_v35  ;;  %v7917_v50 = vmul.f32 %v4643_v60, %v7818_v45 }
0x14a7   :  { %v4539_v9 = vpop.f32.mrf.mxu2  ;;  %v4731_v29 = vmul.f32 %v4730_v18, %v7858_v2  ;;  %v4657_v39 = vsub.f32 1.0, %v4656_v30  ;;  %v4792_v24 = vmul.f32 %v7904_v37, %v7904_v37  ;;  %v4720_v44 = vmul.f32 %v4719_v8, %v7858_v2 }
0x14a8   :  { %v4768_v25 = vadd.f32 0.014752088, %v4767_v56  ;;  %v4540_v47 = vadd.f32 %v4539_v9, %v7830_v3  ;;  %v4757_v3 = vadd.f32 0.0036580483, %v4756_v49  ;;  %v4664_v58 = vand.u32 2147483647, %v7864_v13 }
0x14a9   :  { %v4732_v21 = vadd.f32 0.4994258, %v4731_v29  ;;  %v7924_v1 = vmin.f32 %v4792_v24, 16.0  ;;  %v4658_v16 = vmul.f32 %v7887_v34, %v4657_v39  ;;  %v4666_v20 = vand.u32 2147483648, %v7864_v13 }
0x14aa   :  { %v4769_v4 = vmul.f32 %v4768_v25, %v7879_v35  ;;  %v7931_v31 = vadd.f32 %v7811_v23, %v4540_v47  ;;  %v4721_v23 = vadd.f32 0.18741608, %v4720_v44  ;;  %v4758_v7 = vmul.f32 %v4757_v3, %v7879_v35 }
0x14ab   :  { %v4733_v57 = vmul.f32 %v4732_v21, %v7858_v2  ;;  %v4794_v40 = vmul.f32 2.1237322e-06, %v7924_v1  ;;  %v4805_v17 = vmul.f32 3.8918573e-05, %v7924_v1  ;;  %v4659_v55 = vadd.f32 %v7887_v34, %v4658_v16 }
0x14ac   :  { %v7914_v54 = vpop.eup %5784  ;;  %v4770_v52 = vadd.f32 0.112945676, %v4769_v4  ;;  %vm4661_vm6 = vweird.f32 %v7887_v34  ;;  %v7946_v9 = vmul.f32 0.70710677, %v7931_v31  ;;  %v4683_v48 = vadd.f32 1.1283791, %v4682_v59 }
0x14ad   :  { %v7927_v22 = vadd.f32 1.0, %v4733_v57  ;;  %v4696_v26 = vmul.f32 %v7914_v54, %v7885_v32  ;;  %v4795_v53 = vadd.f32 0.00028619796, %v4794_v40  ;;  %v4806_v27 = vadd.f32 0.001143296, %v4805_v17  ;;  %vm7959_vm11 = vmor %vm4660_vm0, %vm4661_vm6 }
0x14ae   :  { %v4771_v45 = vmul.f32 %v4770_v52, %v7879_v35  ;;  %v4704_v43 = vand.u32 2147483647, %v7885_v32  ;;  %v4832_v38 = vmul.f32 %v7946_v9, %v7946_v9  ;;  %v4706_v8 = vand.u32 2147483648, %v7885_v32 }
0x14af   :  { %v4542_v14 = vpop.f32.mrf.mxu2  ;;  %5786 = vrcp.f32 %v7927_v22  ;;  %v4697_v18 = vsub.f32 1.0, %v4696_v26  ;;  %v4807_v56 = vmul.f32 %v4806_v27, %v7924_v1  ;;  %v4722_v21 = vmul.f32 %v4721_v23, %v7858_v2 }
0x14b0   :  { %v4543_v36 = vadd.f32 %v4542_v14, %v7851_v46  ;;  %v4772_v6 = vadd.f32 0.4994258, %v4771_v45  ;;  %v4796_v46 = vmul.f32 %v4795_v53, %v7924_v1  ;;  %v4759_v49 = vadd.f32 0.05243302, %v4758_v7 }
0x14b1   :  { %v4808_v24 = vadd.f32 0.014752088, %v4807_v56  ;;  %v7972_v47 = vmin.f32 %v4832_v38, 16.0  ;;  %vm4665_vm12 = vcmp.eq.f32.partialorder %v4664_v58, 8.507059e+37  ;;  %v4667_v51 = vor.u32 1.1754944e-38, %v4666_v20 }
0x14b2   :  { %v4773_v30 = vmul.f32 %v4772_v6, %v7879_v35  ;;  %v7955_v29 = vadd.f32 %v7807_v12, %v4543_v36  ;;  %v4663_v12 = vsel %vm7959_vm11, %v7887_v34, %v4659_v55  ;;  %v7978_v57 = vmul.f32 %v4683_v48, %v7833_v41 }
0x14b3   :  { %v4698_v2 = vmul.f32 %v7914_v54, %v4697_v18  ;;  %vm4700_vm2 = vweird.f32 %v7885_v32  ;;  %v4797_v52 = vadd.f32 0.0036580483, %v4796_v46  ;;  %v4668_v14 = vsel %vm4665_vm12, %v4667_v51, %v4663_v12 }
0x14b4   :  { %v7965_v39 = vadd.f32 1.0, %v4773_v30  ;;  %v7975_v13 = vmul.f32 0.70710677, %v7955_v29  ;;  %v4809_v44 = vmul.f32 %v4808_v24, %v7924_v1  ;;  %v4834_v3 = vmul.f32 2.1237322e-06, %v7972_v47 }
0x14b5   :  { %v7967_v4 = vpop.eup %5786  ;;  %v4845_v16 = vmul.f32 3.8918573e-05, %v7972_v47  ;;  %vm7988_vm13 = vcmp.eq.f32.partialorder %v4704_v43, 8.507059e+37  ;;  %v4707_v45 = vor.u32 1.1754944e-38, %v4706_v8  ;;  %v4723_v42 = vadd.f32 1.1283791, %v4722_v21 }
0x14b6   :  { %5788 = vrcp.f32 %v7965_v39  ;;  %v4736_v34 = vmul.f32 %v7967_v4, %v7927_v22  ;;  %v4760_v59 = vmul.f32 %v4759_v49, %v7879_v35  ;;  %v4872_v26 = vmul.f32 %v7975_v13, %v7975_v13 }
0x14b7   :  { %v4544_v60 = vpop.f32.mrf.mxu2  ;;  %vm4701_vm14 = vweird.f32 %v7914_v54  ;;  %v4810_v40 = vadd.f32 0.112945676, %v4809_v44  ;;  %v4835_v17 = vadd.f32 0.00028619796, %v4834_v3  ;;  %v4846_v58 = vadd.f32 0.001143296, %v4845_v16 }
0x14b8   :  { %v7997_v20 = vmul.f32 %v4668_v14, %v7917_v50  ;;  %v4699_v36 = vadd.f32 %v7914_v54, %v4698_v2  ;;  %v4737_v23 = vsub.f32 1.0, %v4736_v34  ;;  %v4798_v7 = vmul.f32 %v4797_v52, %v7924_v1  ;;  %vm8016_vm15 = vmor %vm4700_vm2, %vm4701_vm14 }
0x14b9   :  { %v4744_v55 = vand.u32 2147483647, %v7927_v22  ;;  %v4811_v27 = vmul.f32 %v4810_v40, %v7924_v1  ;;  %v4836_v48 = vmul.f32 %v4835_v17, %v7972_v47  ;;  %v4847_v18 = vmul.f32 %v4846_v58, %v7972_v47 }
0x14ba   :  { %v4746_v43 = vand.u32 2147483648, %v7927_v22  ;;  %v4761_v50 = vadd.f32 0.18741608, %v4760_v59  ;;  %v8010_v46 = vmin.f32 %v4872_v26, 16.0  ;;  %v8021_v38 = vmul.f32 %v4723_v42, %v7849_v11 }
0x14bb   :  { %v4812_v25 = vadd.f32 0.4994258, %v4811_v27  ;;  %v4837_v8 = vadd.f32 0.0036580483, %v4836_v48  ;;  %v4848_v21 = vadd.f32 0.014752088, %v4847_v18  ;;  %v4703_v49 = vsel %vm8016_vm15, %v7914_v54, %v4699_v36 }
0x14bc   :  { %v8001_v53 = vpop.eup %5788  ;;  %v4738_v12 = vmul.f32 %v7967_v4, %v4737_v23  ;;  %v4799_v51 = vadd.f32 0.05243302, %v4798_v7  ;;  %vm4740_vm3 = vweird.f32 %v7927_v22  ;;  %v4545_v11 = vadd.f32 %v4544_v60, %v7872_v5 }
0x14bd   :  { %v4776_v30 = vmul.f32 %v8001_v53, %v7965_v39  ;;  %v4813_v32 = vmul.f32 %v4812_v25, %v7924_v1  ;;  %v4849_v2 = vmul.f32 %v4848_v21, %v7972_v47  ;;  %vm8031_vm4 = vcmp.eq.f32.partialorder %v4744_v55, 8.507059e+37 }
0x14be   :  { %v4747_v52 = vor.u32 1.1754944e-38, %v4746_v43  ;;  %v4838_v54 = vmul.f32 %v4837_v8, %v7972_v47  ;;  %v4885_v44 = vmul.f32 3.8918573e-05, %v8010_v46  ;;  %v4708_v3 = vsel %vm7988_vm13, %v4707_v45, %v4703_v49 }
0x14bf   :  { %v4547_v6 = vpop.f32.mrf.mxu2  ;;  %v4777_v24 = vsub.f32 1.0, %v4776_v30  ;;  %v4762_v16 = vmul.f32 %v4761_v50, %v7879_v35  ;;  %v8041_v42 = vadd.f32 1.0, %v4813_v32  ;;  %v4850_v59 = vadd.f32 0.112945676, %v4849_v2 }
0x14c0   :  { %v4739_v5 = vadd.f32 %v7967_v4, %v4738_v12  ;;  %vm4741_vm7 = vweird.f32 %v7967_v4  ;;  %v4800_v60 = vmul.f32 %v4799_v51, %v7924_v1  ;;  %v4886_v26 = vadd.f32 0.001143296, %v4885_v44 }
0x14c1   :  { %v4778_v14 = vmul.f32 %v8001_v53, %v4777_v24  ;;  %vm4781_vm5 = vweird.f32 %v8001_v53  ;;  %5790 = vrcp.f32 %v8041_v42  ;;  %v8050_v41 = vadd.f32 %v7809_v0, %v4545_v11  ;;  %vm8060_vm9 = vmor %vm4740_vm3, %vm4741_vm7 }
0x14c2   :  { %v4784_v35 = vand.u32 2147483647, %v7965_v39  ;;  %v4786_v45 = vand.u32 2147483648, %v7965_v39  ;;  %v4839_v58 = vadd.f32 0.05243302, %v4838_v54  ;;  %v4851_v36 = vmul.f32 %v4850_v59, %v7972_v47 }
0x14c3   :  { %v4779_v17 = vadd.f32 %v8001_v53, %v4778_v14  ;;  %v8056_v23 = vmul.f32 %v4708_v3, %v7978_v57  ;;  %vm4780_vm10 = vweird.f32 %v7965_v39  ;;  %v4874_v0 = vmul.f32 2.1237322e-06, %v8010_v46 }
0x14c4   :  { %v4887_v55 = vmul.f32 %v4886_v26, %v8010_v46  ;;  %v4743_v27 = vsel %vm8060_vm9, %v7967_v4, %v4739_v5  ;;  %v4763_v48 = vadd.f32 1.1283791, %v4762_v16  ;;  %vm8070_vm0 = vmor %vm4780_vm10, %vm4781_vm5  ;;  %v4801_v22 = vadd.f32 0.18741608, %v4800_v60 }
0x14c5   :  { %v4852_v18 = vadd.f32 0.4994258, %v4851_v36  ;;  %v4783_v43 = vsel %vm8070_vm0, %v8001_v53, %v4779_v17  ;;  %v8078_v50 = vmul.f32 0.70710677, %v8050_v41  ;;  %v4548_v30 = vadd.f32 %v4547_v6, %v7899_v63 }
0x14c6   :  { %v4888_v39 = vadd.f32 0.014752088, %v4887_v55  ;;  %vm4785_vm6 = vcmp.eq.f32.partialorder %v4784_v35, 8.507059e+37  ;;  %v4787_v56 = vor.u32 1.1754944e-38, %v4786_v45  ;;  %v4840_v4 = vmul.f32 %v4839_v58, %v7972_v47 }
0x14c7   :  { %v4549_v40 = vpop.f32.mrf.mxu2  ;;  %v4853_v25 = vmul.f32 %v4852_v18, %v7972_v47  ;;  %v5791_v8 = vpop.eup %5790  ;;  %v4748_v21 = vsel %vm8031_vm4, %v4747_v52, %v4743_v27  ;;  %v4875_v49 = vadd.f32 0.00028619796, %v4874_v0  ;;  %v4912_v53 = vmul.f32 %v8078_v50, %v8078_v50 }
0x14c8   :  { %v4889_v12 = vmul.f32 %v4888_v39, %v8010_v46  ;;  %v4788_v24 = vsel %vm4785_vm6, %v4787_v56, %v4783_v43  ;;  %v4816_v51 = vmul.f32 %v5791_v8, %v8041_v42  ;;  %v8092_v6 = vadd.f32 %v7820_v28, %v4548_v30 }
0x14c9   :  { %v8089_v63 = vadd.f32 1.0, %v4853_v25  ;;  %v4764_v32 = vmul.f32 %v4763_v48, %v7867_v15  ;;  %v4802_v2 = vmul.f32 %v4801_v22, %v7924_v1  ;;  %v8096_v34 = vmin.f32 %v4912_v53, 16.0 }
0x14ca   :  { %v4890_v11 = vadd.f32 0.112945676, %v4889_v12  ;;  %v4749_v52 = vmul.f32 %v4748_v21, %v8021_v38  ;;  %v4817_v14 = vsub.f32 1.0, %v4816_v51  ;;  %v4841_v54 = vadd.f32 0.18741608, %v4840_v4 }
0x14cb   :  { %5792 = vrcp.f32 %v8089_v63  ;;  %v4789_v44 = vmul.f32 %v4788_v24, %v4764_v32  ;;  %v4824_v3 = vand.u32 2147483647, %v8041_v42  ;;  %v4876_v16 = vmul.f32 %v4875_v49, %v8010_v46 }
0x14cc   :  { %v4891_v28 = vmul.f32 %v4890_v11, %v8010_v46  ;;  %v4818_v59 = vmul.f32 %v5791_v8, %v4817_v14  ;;  %vm4821_vm11 = vweird.f32 %v5791_v8  ;;  %v4925_v15 = vmul.f32 3.8918573e-05, %v8096_v34 }
0x14cd   :  { %v8105_v1 = vmul.f32 0.70710677, %v8092_v6  ;;  %v4803_v5 = vadd.f32 1.1283791, %v4802_v2  ;;  %vm4820_vm12 = vweird.f32 %v8041_v42  ;;  %v4826_v38 = vand.u32 2147483648, %v8041_v42 }
0x14ce   :  { %v4914_v60 = vmul.f32 2.1237322e-06, %v8096_v34  ;;  %v4819_v26 = vadd.f32 %v5791_v8, %v4818_v59  ;;  %v4842_v40 = vmul.f32 %v4841_v54, %v7972_v47  ;;  %v4926_v17 = vadd.f32 0.001143296, %v4925_v15  ;;  %vm8113_vm2 = vmor %vm4820_vm12, %vm4821_vm11 }
0x14cf   :  { %v4952_v35 = vmul.f32 %v8105_v1, %v8105_v1  ;;  %vm8117_vm13 = vcmp.eq.f32.partialorder %v4824_v3, 8.507059e+37  ;;  %v8121_v36 = vadd.f32 0.0036580483, %v4876_v16  ;;  %v4892_v42 = vadd.f32 0.4994258, %v4891_v28 }
0x14d0   :  { %v5581_v7 = vclamps-f32 %v7997_v20, 1.0  ;;  %v4823_v47 = vsel %vm8113_vm2, %v5791_v8, %v4819_v26  ;;  %v4927_v55 = vmul.f32 %v4926_v17, %v8096_v34  ;;  %v5584_v48 = vclamps-f32 %v4789_v44, 1.0 }
0x14d1   :  { %v5793_v0 = vpop.eup %5792  ;;  %v8127_v27 = vmin.f32 %v4952_v35, 16.0  ;;  %v4827_v57 = vor.u32 1.1754944e-38, %v4826_v38  ;;  %v4915_v18 = vadd.f32 0.00028619796, %v4914_v60  ;;  %v5583_v43 = vclamps-f32 %v4749_v52, 1.0 }
0x14d2   :  { %v4856_v22 = vmul.f32 %v5793_v0, %v8089_v63  ;;  %v4804_v39 = vmul.f32 %v4803_v5, %v7904_v37  ;;  %v4843_v30 = vadd.f32 1.1283791, %v4842_v40  ;;  %v4928_v56 = vadd.f32 0.014752088, %v4927_v55 }
0x14d3   :  { %v4954_v20 = vmul.f32 2.1237322e-06, %v8127_v27  ;;  %v4828_v4 = vsel %vm8117_vm13, %v4827_v57, %v4823_v47  ;;  %v4864_v8 = vand.u32 2147483647, %v8089_v63  ;;  %v4893_v21 = vmul.f32 %v4892_v42, %v8010_v46 }
0x14d4   :  { %v4857_v25 = vsub.f32 1.0, %v4856_v22  ;;  %v4866_v49 = vand.u32 2147483648, %v8089_v63  ;;  %v4929_v12 = vmul.f32 %v4928_v56, %v8096_v34  ;;  %v4995_v24 = vadd.f32 1.0, %v5584_v48 }
0x14d5   :  { %v4955_v53 = vadd.f32 0.00028619796, %v4954_v20  ;;  %vm4861_vm14 = vweird.f32 %v5793_v0  ;;  %v4916_v37 = vmul.f32 %v4915_v18, %v8096_v34  ;;  %v4965_v32 = vmul.f32 3.8918573e-05, %v8127_v27 }
0x14d6   :  { %v4858_v51 = vmul.f32 %v5793_v0, %v4857_v25  ;;  %v4829_v2 = vmul.f32 %v4828_v4, %v4804_v39  ;;  %v4844_v11 = vmul.f32 %v4843_v30, %v7946_v9  ;;  %v4930_v52 = vadd.f32 0.112945676, %v4929_v12 }
0x14d7   :  { %v4994_v14 = vadd.f32 1.0, %v5583_v43  ;;  %vm4860_vm15 = vweird.f32 %v8089_v63  ;;  %v8142_v44 = vadd.f32 1.0, %v4893_v21  ;;  %v4966_v3 = vadd.f32 0.001143296, %v4965_v32 }
0x14d8   :  { %v4859_v54 = vadd.f32 %v5793_v0, %v4858_v51  ;;  %vm4862_vm3 = vmor %vm4860_vm15, %vm4861_vm14  ;;  %v4867_v16 = vor.u32 1.1754944e-38, %v4866_v49  ;;  %v4931_v28 = vmul.f32 %v4930_v52, %v8096_v34  ;;  %v4956_v59 = vmul.f32 %v4955_v53, %v8127_v27 }
0x14d9   :  { %v8147_v15 = vmul.f32 %v4995_v24, %v7920_v62  ;;  %vm4865_vm4 = vcmp.eq.f32.partialorder %v4864_v8, 8.507059e+37  ;;  %v4917_v9 = vadd.f32 0.0036580483, %v4916_v37  ;;  %v4967_v38 = vmul.f32 %v4966_v3, %v8127_v27 }
0x14da   :  { %v4863_v5 = vsel %vm4862_vm3, %v5793_v0, %v4859_v54  ;;  %v5585_v26 = vclamps-f32 %v4829_v2, 1.0  ;;  %v8151_v63 = vmul.f32 %v4994_v14, %v7912_v10  ;;  %v5582_v40 = vclamps-f32 %v8056_v23, 1.0 }
0x14db   :  { %v4868_v60 = vsel %vm4865_vm4, %v4867_v16, %v4863_v5  ;;  %5794 = vrcp.f32 %v8142_v44  ;;  %v4932_v35 = vadd.f32 0.4994258, %v4931_v28  ;;  %v4968_v45 = vadd.f32 0.014752088, %v4967_v38 }
0x14dc   :  { %v4869_v17 = vmul.f32 %v4868_v60, %v4844_v11  ;;  %v4614_v62 = vmul.f32 0.5, %v7815_v19  ;;  %v4957_v58 = vadd.f32 0.0036580483, %v4956_v59  ;;  %v5016_v42 = vpack.c.bf16 %v8147_v15, %v8151_v63 }
0x14dd   :  { %v4933_v0 = vmul.f32 %v4932_v35, %v8096_v34  ;;  %v4969_v47 = vmul.f32 %v4968_v45, %v8127_v27  ;;  %v4992_v10 = vadd.f32 1.0, %v5581_v7  ;;  %v4615_v48 = vmul.f32 0.5, %v7828_v61 }
0x14de   :  { %v5586_v55 = vclamps-f32 %v4869_v17, 1.0  ;;  %v4918_v23 = vmul.f32 %v4917_v9, %v8096_v34  ;;  %v4996_v57 = vadd.f32 1.0, %v5585_v26  ;;  %v4993_v22 = vadd.f32 1.0, %v5582_v40 }
0x14df   :  { %v4878_v18 = vmul.f32 %v8121_v36, %v8010_v46  ;;  %v4934_v19 = vadd.f32 1.0, %v4933_v0  ;;  %v4970_v43 = vadd.f32 0.112945676, %v4969_v47  ;;  %v4618_v30 = vmul.f32 0.5, %v7892_v33 }
0x14e0   :  { %v4997_v39 = vadd.f32 1.0, %v5586_v55  ;;  %v4619_v56 = vmul.f32 0.5, %v7931_v31  ;;  %v4958_v20 = vmul.f32 %v4957_v58, %v8127_v27  ;;  %v8167_v4 = vmul.f32 %v4993_v22, %v4615_v48 }
0x14e1   :  { %v8169_v7 = vpop.eup %5794  ;;  %5796 = vrcp.f32 %v4934_v19  ;;  %v8171_v61 = vmul.f32 %v4992_v10, %v4614_v62  ;;  %v4919_v25 = vadd.f32 0.05243302, %v4918_v23  ;;  %v4971_v8 = vmul.f32 %v4970_v43, %v8127_v27 }
0x14e2   :  { %v8174_v36 = vmul.f32 %v4996_v57, %v4618_v30  ;;  %v8176_v21 = vmul.f32 %v4997_v39, %v4619_v56  ;;  %v4879_v49 = vadd.f32 0.05243302, %v4878_v18  ;;  %v4896_v31 = vmul.f32 %v8169_v7, %v8142_v44 }
0x14e3   :  { %v5015_v33 = vpack.c.bf16 %v8167_v4, %v8171_v61  ;;  %v4959_v12 = vadd.f32 0.05243302, %v4958_v20  ;;  %v4972_v53 = vadd.f32 0.4994258, %v4971_v8  ;;  %v4920_v51 = vmul.f32 %v4919_v25, %v8096_v34 }
0x14e4   :  { %v5017_v24 = vpack.c.bf16 %v8176_v21, %v8174_v36  ;;  %v4880_v2 = vmul.f32 %v4879_v49, %v8010_v46  ;;  %v4897_v11 = vsub.f32 1.0, %v4896_v31  ;;  %vm4901_vm5 = vweird.f32 %v8169_v7  ;;  %v5038_v36 = vpop.permute.xlu2 %5037 }
0x14e5   :  { %v4973_v37 = vmul.f32 %v4972_v53, %v8127_v27  ;;  %v4960_v14 = vmul.f32 %v4959_v12, %v8127_v27  ;;  %v4921_v3 = vadd.f32 0.18741608, %v4920_v51  ;;  %v4906_v40 = vand.u32 2147483648, %v8142_v44 }
0x14e6   :  { %v4881_v28 = vadd.f32 0.18741608, %v4880_v2  ;;  %v4898_v59 = vmul.f32 %v8169_v7, %v4897_v11  ;;  %v4946_v17 = vand.u32 2147483648, %v4934_v19  ;;  %vm4940_vm9 = vweird.f32 %v4934_v19 }
0x14e7   :  { %v5797_v32 = vpop.eup %5796  ;;  %v4974_v54 = vadd.f32 1.0, %v4973_v37  ;;  %v4961_v9 = vadd.f32 0.18741608, %v4960_v14  ;;  %v4922_v38 = vmul.f32 %v4921_v3, %v8096_v34  ;;  %v4944_v62 = vand.u32 2147483647, %v4934_v19 }
0x14e8   :  { %v4936_v52 = vmul.f32 %v5797_v32, %v4934_v19  ;;  %vm4941_vm7 = vweird.f32 %v5797_v32  ;;  %v4882_v26 = vmul.f32 %v4881_v28, %v8010_v46  ;;  %v4899_v45 = vadd.f32 %v8169_v7, %v4898_v59 }
0x14e9   :  { %5798 = vrcp.f32 %v4974_v54  ;;  %v4962_v58 = vmul.f32 %v4961_v9, %v8127_v27  ;;  %vm8195_vm10 = vmor %vm4940_vm9, %vm4941_vm7  ;;  %vm4900_vm0 = vweird.f32 %v8142_v44  ;;  %v4904_v46 = vand.u32 2147483647, %v8142_v44 }
0x14ea   :  { %v4937_v16 = vsub.f32 1.0, %v4936_v52  ;;  %v4923_v47 = vadd.f32 1.1283791, %v4922_v38  ;;  %v4883_v10 = vadd.f32 1.1283791, %v4882_v26  ;;  %vm4902_vm6 = vmor %vm4900_vm0, %vm4901_vm5  ;;  %v4907_v48 = vor.u32 1.1754944e-38, %v4906_v40  ;;  %v5048_v38 = vpop.permute.xlu1 %5047 }
0x14eb   :  { %v4947_v23 = vor.u32 1.1754944e-38, %v4946_v17  ;;  %v4903_v57 = vsel %vm4902_vm6, %v8169_v7, %v4899_v45  ;;  %vm4945_vm11 = vcmp.eq.f32.partialorder %v4944_v62, 8.507059e+37  ;;  %v4963_v22 = vadd.f32 1.1283791, %v4962_v58 }
0x14ec   :  { %v4938_v5 = vmul.f32 %v5797_v32, %v4937_v16  ;;  %v4986_v18 = vand.u32 2147483648, %v4974_v54  ;;  %v4984_v44 = vand.u32 2147483647, %v4974_v54  ;;  %vm4905_vm2 = vcmp.eq.f32.partialorder %v4904_v46, 8.507059e+37  ;;  %v5033_v63 = vpop.permute.xlu2 %5032 }
0x14ed   :  { %v4924_v39 = vmul.f32 %v4923_v47, %v8078_v50  ;;  %v4908_v30 = vsel %vm4905_vm2, %v4907_v48, %v4903_v57  ;;  %vm4980_vm13 = vweird.f32 %v4974_v54  ;;  %v4884_v20 = vmul.f32 %v4883_v10, %v7975_v13 }
0x14ee   :  { %v4939_v60 = vadd.f32 %v5797_v32, %v4938_v5  ;;  %v4987_v8 = vor.u32 1.1754944e-38, %v4986_v18  ;;  %v4964_v7 = vmul.f32 %v4963_v22, %v8105_v1  ;;  %vm4985_vm15 = vcmp.eq.f32.partialorder %v4984_v44, 8.507059e+37 }
0x14ef   :  { %v5799_v35 = vpop.eup %5798  ;;  %v4909_v31 = vmul.f32 %v4908_v30, %v4884_v20  ;;  %v4622_v50 = vmul.f32 0.5, %v8092_v6  ;;  %v4621_v13 = vmul.f32 0.5, %v8050_v41  ;;  %v4620_v3 = vmul.f32 0.5, %v7955_v29  ;;  %v5616_v29 = vld [vmem:[%s5379_s22] sm:$0xff]  ;;  %v5617_v41 = vld [vmem:[%s5379_s22 + $0x8] sm:$0xff] }
0x14f0   :  { %v4976_v34 = vmul.f32 %v5799_v35, %v4974_v54  ;;  %v4943_v55 = vsel %vm8195_vm10, %v5797_v32, %v4939_v60  ;;  %vm4981_vm12 = vweird.f32 %v5799_v35  ;;  %v5014_v6 = vld [vmem:[%s5379_s22 + $0x10] sm:$0x3] }
0x14f1   :  { %v4948_v19 = vsel %vm4945_vm11, %v4947_v23, %v4943_v55  ;;  %vm4982_vm14 = vmor %vm4980_vm13, %vm4981_vm12  ;;  %v5587_v32 = vclamps-f32 %v4909_v31, 1.0  ;;  %v5059_v5 = vunpack.c.l.b16 %v5014_v6  ;;  %v5043_v55 = vpop.permute.xlu0 %5042 }
0x14f2   :  { %v4977_v27 = vsub.f32 1.0, %v4976_v34  ;;  %v4949_v25 = vmul.f32 %v4948_v19, %v4924_v39  ;;  %v5028_v21 = vpop.permute.xlu1 %5027 }
0x14f3   :  { %v4998_v14 = vadd.f32 1.0, %v5587_v32  ;;  %v5062_v9 = vpack.c.b16 %v5059_v5, %v5059_v5 }
0x14f4   :  { %v4978_v43 = vmul.f32 %v5799_v35, %v4977_v27  ;;  %v5588_v51 = vclamps-f32 %v4949_v25, 1.0 }
0x14f5   :  { %v5007_v28 = vmul.f32 %v4998_v14, %v4620_v3 }
0x14f6   :  { %v4979_v56 = vadd.f32 %v5799_v35, %v4978_v43  ;;  %v4999_v11 = vadd.f32 1.0, %v5588_v51 }
0x14f8   :  { %v4983_v49 = vsel %vm4982_vm14, %v5799_v35, %v4979_v56  ;;  %v5008_v1 = vmul.f32 %v4999_v11, %v4621_v13 }
0x14f9   :  { %v4988_v12 = vsel %vm4985_vm15, %v4987_v8, %v4983_v49 }
0x14fa   :  { %v4989_v53 = vmul.f32 %v4988_v12, %v4964_v7  ;;  %v5018_v59 = vpack.c.bf16 %v5008_v1, %v5007_v28 }
0x14fc   :  { %v5589_v37 = vclamps-f32 %v4989_v53, 1.0 }
0x14fe   :  { %v5000_v2 = vadd.f32 1.0, %v5589_v37 }
0x1500   :  { %v5009_v52 = vmul.f32 %v5000_v2, %v4622_v50 }
0x1502   :  { %v5019_v54 = vpack.c.bf16 %v5009_v52, %v5009_v52 }
0x1504   :  { %v5074_v16 = vsel %vm4511_vm8, %v5019_v54, 0  ;;  %vm5063_vm8 = vcmask 588800  }
0x1505   :  { %5079 = vmatpush.bf16.msrb.mxu3 %v5074_v16 }
0x1509   :  { %5080 = vmatpush.bf16.msrb.mxu3 %v5018_v59 }
0x150d   :  { %5081 = vmatpush.bf16.msrb.mxu3 %v5017_v24 }
0x1511   :  { %5082 = vmatpush.bf16.msrb.mxu3 %v5016_v42 }
0x1515   :  { %5083 = vmatpush.bf16.msrb.mxu3 %v5015_v33 }
0x1518   :  { %5598 = vmatmul.msk.bf16.vlgmr.msrb.gmra.mxu3 %vm5063_vm8, %v5616_v29 }
0x1528   :  { %5599 = vmatmul.msk.bf16.gmra.mxu3 %vm5063_vm8, %v5617_v41 }
0x1538   :  { %5600 = vmatmul.msk.bf16.gmra.mxu3 %vm5063_vm8, %v5062_v9 }
0x159b   :  { %v5085_v24 = vpop.f32.mrf.mxu3 }
0x159c   :  { %v8225_v60 = vadd.f32 %v5085_v24, %v5028_v21 }
0x159e   :  { %v8228_v15 = vmul.f32 0.70710677, %v8225_v60 }
0x15a0   :  { %v5109_v42 = vmul.f32 %v8228_v15, %v8228_v15 }
0x15a2   :  { %v8234_v33 = vmin.f32 %v5109_v42, 16.0 }
0x15a3   :  { %v5087_v4 = vpop.f32.mrf.mxu3 }
0x15a4   :  { %v8232_v61 = vadd.f32 %v5087_v4, %v5033_v63  ;;  %v5122_v17 = vmul.f32 3.8918573e-05, %v8234_v33  ;;  %v5111_v8 = vmul.f32 2.1237322e-06, %v8234_v33 }
0x15a6   :  { %v8237_v26 = vmul.f32 0.70710677, %v8232_v61  ;;  %v5123_v0 = vadd.f32 0.001143296, %v5122_v17  ;;  %v5112_v50 = vadd.f32 0.00028619796, %v5111_v8 }
0x15a8   :  { %v5149_v40 = vmul.f32 %v8237_v26, %v8237_v26  ;;  %v5124_v10 = vmul.f32 %v5123_v0, %v8234_v33  ;;  %v5113_v28 = vmul.f32 %v5112_v50, %v8234_v33 }
0x15aa   :  { %v8242_v35 = vmin.f32 %v5149_v40, 16.0  ;;  %v5125_v19 = vadd.f32 0.014752088, %v5124_v10  ;;  %v5114_v24 = vadd.f32 0.0036580483, %v5113_v28 }
0x15ab   :  { %v5090_v45 = vpop.f32.mrf.mxu3 }
0x15ac   :  { %v8244_v62 = vadd.f32 %v5090_v45, %v5038_v36  ;;  %v5162_v58 = vmul.f32 3.8918573e-05, %v8242_v35  ;;  %v5126_v30 = vmul.f32 %v5125_v19, %v8234_v33  ;;  %v5151_v37 = vmul.f32 2.1237322e-06, %v8242_v35 }
0x15ae   :  { %v8248_v34 = vmul.f32 0.70710677, %v8244_v62  ;;  %v5163_v47 = vadd.f32 0.001143296, %v5162_v58  ;;  %v5127_v12 = vadd.f32 0.112945676, %v5126_v30 }
0x15af   :  { %v5152_v3 = vadd.f32 0.00028619796, %v5151_v37 }
0x15b0   :  { %v5189_v46 = vmul.f32 %v8248_v34, %v8248_v34  ;;  %v5164_v57 = vmul.f32 %v5163_v47, %v8242_v35  ;;  %v5128_v52 = vmul.f32 %v5127_v12, %v8234_v33 }
0x15b1   :  { %v5153_v36 = vmul.f32 %v5152_v3, %v8242_v35 }
0x15b2   :  { %v8253_v48 = vmin.f32 %v5189_v46, 16.0  ;;  %v5165_v43 = vadd.f32 0.014752088, %v5164_v57  ;;  %v5129_v29 = vadd.f32 0.4994258, %v5128_v52 }
0x15b3   :  { %v5092_v23 = vpop.f32.mrf.mxu3  ;;  %v5154_v47 = vadd.f32 0.0036580483, %v5153_v36 }
0x15b4   :  { %v8255_v27 = vadd.f32 %v5092_v23, %v5043_v55  ;;  %v5202_v22 = vmul.f32 3.8918573e-05, %v8253_v48  ;;  %v5166_v7 = vmul.f32 %v5165_v43, %v8242_v35  ;;  %v5191_v9 = vmul.f32 2.1237322e-06, %v8253_v48 }
0x15b5   :  { %v5130_v4 = vmul.f32 %v5129_v29, %v8234_v33  ;;  %v5115_v55 = vmul.f32 %v5114_v24, %v8234_v33 }
0x15b6   :  { %v8260_v18 = vmul.f32 0.70710677, %v8255_v27  ;;  %v5203_v44 = vadd.f32 0.001143296, %v5202_v22  ;;  %v5167_v2 = vadd.f32 0.112945676, %v5166_v7 }
0x15b7   :  { %v5192_v45 = vadd.f32 0.00028619796, %v5191_v9  ;;  %v8298_v57 = vadd.f32 1.0, %v5130_v4  ;;  %v5116_v7 = vadd.f32 0.05243302, %v5115_v55 }
0x15b8   :  { %v5229_v39 = vmul.f32 %v8260_v18, %v8260_v18  ;;  %v5204_v20 = vmul.f32 %v5203_v44, %v8253_v48  ;;  %v5168_v59 = vmul.f32 %v5167_v2, %v8242_v35 }
0x15b9   :  { %v5193_v44 = vmul.f32 %v5192_v45, %v8253_v48  ;;  %5800 = vrcp.f32 %v8298_v57  ;;  %v5117_v2 = vmul.f32 %v5116_v7, %v8234_v33  ;;  %vm5137_vm7 = vweird.f32 %v8298_v57 }
0x15ba   :  { %v8266_v25 = vmin.f32 %v5229_v39, 16.0  ;;  %v5205_v49 = vadd.f32 0.014752088, %v5204_v20  ;;  %v5169_v63 = vadd.f32 0.4994258, %v5168_v59 }
0x15bb   :  { %v5095_v56 = vpop.f32.mrf.mxu3  ;;  %v5118_v59 = vadd.f32 0.18741608, %v5117_v2 }
0x15bc   :  { %v5242_v31 = vmul.f32 3.8918573e-05, %v8266_v25  ;;  %v5206_v53 = vmul.f32 %v5205_v49, %v8253_v48  ;;  %v8273_v32 = vadd.f32 %v5095_v56, %v5048_v38  ;;  %v5231_v41 = vmul.f32 2.1237322e-06, %v8266_v25 }
0x15bd   :  { %v5170_v10 = vmul.f32 %v5169_v63, %v8242_v35  ;;  %v5155_v56 = vmul.f32 %v5154_v47, %v8242_v35  ;;  %v5119_v4 = vmul.f32 %v5118_v59, %v8234_v33 }
0x15be   :  { %v5243_v51 = vadd.f32 0.001143296, %v5242_v31  ;;  %v5207_v11 = vadd.f32 0.112945676, %v5206_v53  ;;  %v8279_v16 = vmul.f32 0.70710677, %v8273_v32 }
0x15bf   :  { %v5232_v40 = vadd.f32 0.00028619796, %v5231_v41  ;;  %v8308_v49 = vadd.f32 1.0, %v5170_v10  ;;  %v5156_v37 = vadd.f32 0.05243302, %v5155_v56 }
0x15c0   :  { %v5244_v13 = vmul.f32 %v5243_v51, %v8266_v25  ;;  %v5208_v54 = vmul.f32 %v5207_v11, %v8253_v48  ;;  %v5269_v5 = vmul.f32 %v8279_v16, %v8279_v16  ;;  %v5194_v51 = vadd.f32 0.0036580483, %v5193_v44 }
0x15c1   :  { %v5233_v22 = vmul.f32 %v5232_v40, %v8266_v25  ;;  %v5157_v3 = vmul.f32 %v5156_v37, %v8242_v35  ;;  %v5141_v56 = vand.u32 2147483647, %v8298_v57  ;;  %vm5177_vm4 = vweird.f32 %v8308_v49 }
0x15c2   :  { %v5245_v1 = vadd.f32 0.014752088, %v5244_v13  ;;  %v5209_v38 = vadd.f32 0.4994258, %v5208_v54  ;;  %v8289_v42 = vmin.f32 %v5269_v5, 16.0  ;;  %v5195_v13 = vmul.f32 %v5194_v51, %v8253_v48  ;;  %v8320_v54 = vpop.eup %5800 }
0x15c3   :  { %v5097_v14 = vpop.f32.mrf.mxu3  ;;  %v5234_v12 = vadd.f32 0.0036580483, %v5233_v22  ;;  %v5158_v36 = vadd.f32 0.18741608, %v5157_v3  ;;  %v5133_v40 = vmul.f32 %v8320_v54, %v8298_v57  ;;  %v8348_v22 = vadd.f32 1.1283791, %v5119_v4 }
0x15c4   :  { %v5246_v6 = vmul.f32 %v5245_v1, %v8266_v25  ;;  %v5210_v58 = vmul.f32 %v5209_v38, %v8253_v48  ;;  %v5271_v0 = vmul.f32 2.1237322e-06, %v8289_v42  ;;  %v5282_v46 = vmul.f32 3.8918573e-05, %v8289_v42 }
0x15c5   :  { %v5235_v52 = vmul.f32 %v5234_v12, %v8266_v25  ;;  %v5196_v9 = vadd.f32 0.05243302, %v5195_v13  ;;  %v5159_v55 = vmul.f32 %v5158_v36, %v8242_v35  ;;  %vm5138_vm3 = vweird.f32 %v8320_v54 }
0x15c6   :  { %v5247_v21 = vadd.f32 0.112945676, %v5246_v6  ;;  %v5272_v19 = vadd.f32 0.00028619796, %v5271_v0  ;;  %v5283_v43 = vadd.f32 0.001143296, %v5282_v46 }
0x15c7   :  { %v8302_v39 = vadd.f32 1.0, %v5210_v58  ;;  %v5236_v6 = vadd.f32 0.05243302, %v5235_v52  ;;  %v5143_v46 = vand.u32 2147483648, %v8298_v57  ;;  %v5197_v47 = vmul.f32 %v5196_v9, %v8253_v48 }
0x15c8   :  { %v5248_v17 = vmul.f32 %v5247_v21, %v8266_v25  ;;  %v5273_v20 = vmul.f32 %v5272_v19, %v8289_v42  ;;  %v5284_v8 = vmul.f32 %v5283_v43, %v8289_v42  ;;  %v5134_v19 = vsub.f32 1.0, %v5133_v40 }
0x15c9   :  { %5802 = vrcp.f32 %v8302_v39  ;;  %v5237_v45 = vmul.f32 %v5236_v6, %v8266_v25  ;;  %v8356_v35 = vadd.f32 1.1283791, %v5159_v55  ;;  %v5181_v51 = vand.u32 2147483647, %v8308_v49 }
0x15ca   :  { %v5249_v23 = vadd.f32 0.4994258, %v5248_v17  ;;  %v5285_v53 = vadd.f32 0.014752088, %v5284_v8  ;;  %v5274_v50 = vadd.f32 0.0036580483, %v5273_v20  ;;  %vm5217_vm6 = vweird.f32 %v8302_v39 }
0x15cb   :  { %v5238_v44 = vadd.f32 0.18741608, %v5237_v45  ;;  %v8353_v20 = vor.u32 1.1754944e-38, %v5143_v46  ;;  %v5198_v8 = vadd.f32 0.18741608, %v5197_v47  ;;  %v5183_v37 = vand.u32 2147483648, %v8308_v49 }
0x15cc   :  { %v5250_v30 = vmul.f32 %v5249_v23, %v8266_v25  ;;  %v5286_v11 = vmul.f32 %v5285_v53, %v8289_v42  ;;  %v5275_v1 = vmul.f32 %v5274_v50, %v8289_v42  ;;  %v5135_v53 = vmul.f32 %v8320_v54, %v5134_v19 }
0x15cd   :  { %v5239_v2 = vmul.f32 %v5238_v44, %v8266_v25  ;;  %v5199_v52 = vmul.f32 %v5198_v8, %v8253_v48  ;;  %v5223_v13 = vand.u32 2147483648, %v8302_v39  ;;  %vm5182_vm15 = vcmp.eq.f32.partialorder %v5181_v51, 8.507059e+37 }
0x15ce   :  { %v8310_v31 = vadd.f32 1.0, %v5250_v30  ;;  %v5287_v14 = vadd.f32 0.112945676, %v5286_v11  ;;  %v5276_v24 = vadd.f32 0.05243302, %v5275_v1  ;;  %v5184_v47 = vor.u32 1.1754944e-38, %v5183_v37 }
0x15cf   :  { %v8324_v28 = vpop.eup %5802  ;;  %v5240_v36 = vadd.f32 1.1283791, %v5239_v2  ;;  %v5103_v2 = vmul.f32 0.5, %v8273_v32  ;;  %v5099_v32 = vmul.f32 0.5, %v8225_v60 }
0x15d0   :  { %5804 = vrcp.f32 %v8310_v31  ;;  %v5288_v29 = vmul.f32 %v5287_v14, %v8289_v42  ;;  %v5213_v21 = vmul.f32 %v8324_v28, %v8302_v39  ;;  %v5277_v33 = vmul.f32 %v5276_v24, %v8289_v42 }
0x15d1   :  { %5806 = vrcp.f32 %v8308_v49  ;;  %vm5218_vm9 = vweird.f32 %v8324_v28  ;;  %v5263_v14 = vand.u32 2147483648, %v8310_v31  ;;  %vm5257_vm10 = vweird.f32 %v8310_v31 }
0x15d2   :  { %v5289_v63 = vadd.f32 0.4994258, %v5288_v29  ;;  %v5214_v10 = vsub.f32 1.0, %v5213_v21  ;;  %v5278_v12 = vadd.f32 0.18741608, %v5277_v33  ;;  %v5136_v29 = vadd.f32 %v8320_v54, %v5135_v53  ;;  %vm8391_vm12 = vmor %vm5217_vm6, %vm5218_vm9 }
0x15d3   :  { %v5261_v59 = vand.u32 2147483647, %v8310_v31  ;;  %v5224_v24 = vor.u32 1.1754944e-38, %v5223_v13  ;;  %v5241_v46 = vmul.f32 %v5240_v36, %v8260_v18  ;;  %v5102_v13 = vmul.f32 0.5, %v8255_v27 }
0x15d4   :  { %v5290_v0 = vmul.f32 %v5289_v63, %v8289_v42  ;;  %v5215_v7 = vmul.f32 %v8324_v28, %v5214_v10  ;;  %v5279_v25 = vmul.f32 %v5278_v12, %v8289_v42  ;;  %v5264_v63 = vor.u32 1.1754944e-38, %v5263_v14 }
0x15d5   :  { %vm5262_vm2 = vcmp.eq.f32.partialorder %v5261_v59, 8.507059e+37  ;;  %v5100_v59 = vmul.f32 0.5, %v8232_v61  ;;  %v5327_v61 = vpop.permute.xlu0 %5326 }
0x15d6   :  { %v8327_v41 = vpop.eup %5804  ;;  %v8346_v23 = vadd.f32 1.0, %v5290_v0  ;;  %v5216_v1 = vadd.f32 %v8324_v28, %v5215_v7 }
0x15d7   :  { %v8329_v5 = vpop.eup %5806  ;;  %v5253_v38 = vmul.f32 %v8327_v41, %v8310_v31  ;;  %vm5258_vm5 = vweird.f32 %v8327_v41  ;;  %v5200_v31 = vadd.f32 1.1283791, %v5199_v52 }
0x15d8   :  { %v5173_v17 = vmul.f32 %v8329_v5, %v8308_v49  ;;  %5808 = vrcp.f32 %v8346_v23  ;;  %vm5178_vm0 = vweird.f32 %v8329_v5  ;;  %vm8379_vm11 = vmor %vm5257_vm10, %vm5258_vm5  ;;  %v5220_v40 = vsel %vm8391_vm12, %v8324_v28, %v5216_v1 }
0x15d9   :  { %v5254_v58 = vsub.f32 1.0, %v5253_v38  ;;  %v5221_v38 = vand.u32 2147483647, %v8302_v39  ;;  %v5280_v39 = vadd.f32 1.1283791, %v5279_v25  ;;  %vm8403_vm13 = vmor %vm5177_vm4, %vm5178_vm0  ;;  %vm5297_vm5 = vweird.f32 %v8346_v23 }
0x15da   :  { %v5174_v43 = vsub.f32 1.0, %v5173_v17  ;;  %v5303_v17 = vand.u32 2147483648, %v8346_v23  ;;  %v5301_v0 = vand.u32 2147483647, %v8346_v23  ;;  %vm8416_vm4 = vmor %vm5137_vm7, %vm5138_vm3  ;;  %v5201_v33 = vmul.f32 %v5200_v31, %v8248_v34 }
0x15db   :  { %v5255_v30 = vmul.f32 %v8327_v41, %v5254_v58  ;;  %vm5222_vm8 = vcmp.eq.f32.partialorder %v5221_v38, 8.507059e+37  ;;  %v5281_v44 = vmul.f32 %v5280_v39, %v8279_v16  ;;  %vm5142_vm7 = vcmp.eq.f32.partialorder %v5141_v56, 8.507059e+37 }
0x15dc   :  { %v5175_v50 = vmul.f32 %v8329_v5, %v5174_v43  ;;  %v5225_v55 = vsel %vm5222_vm8, %v5224_v24, %v5220_v40  ;;  %v5304_v19 = vor.u32 1.1754944e-38, %v5303_v17  ;;  %vm5302_vm3 = vcmp.eq.f32.partialorder %v5301_v0, 8.507059e+37 }
0x15dd   :  { %v5256_v11 = vadd.f32 %v8327_v41, %v5255_v30  ;;  %v5226_v8 = vmul.f32 %v5225_v55, %v5201_v33  ;;  %v5121_v34 = vmul.f32 %v8348_v22, %v8228_v15 }
0x15de   :  { %v5809_v3 = vpop.eup %5808  ;;  %v5176_v9 = vadd.f32 %v8329_v5, %v5175_v50 }
0x15df   :  { %v5293_v6 = vmul.f32 %v5809_v3, %v8346_v23  ;;  %v5260_v42 = vsel %vm8379_vm11, %v8327_v41, %v5256_v11  ;;  %vm5298_vm14 = vweird.f32 %v5809_v3  ;;  %v5161_v23 = vmul.f32 %v8356_v35, %v8237_v26 }
0x15e0   :  { %v5265_v45 = vsel %vm5262_vm2, %v5264_v63, %v5260_v42  ;;  %v5180_v28 = vsel %vm8403_vm13, %v8329_v5, %v5176_v9  ;;  %v5140_v5 = vsel %vm8416_vm4, %v8320_v54, %v5136_v29  ;;  %vm5299_vm9 = vmor %vm5297_vm5, %vm5298_vm14  ;;  %v5603_v50 = vclamps-f32 %v5226_v8, 1.0 }
0x15e1   :  { %v5294_v4 = vsub.f32 1.0, %v5293_v6  ;;  %v5266_v18 = vmul.f32 %v5265_v45, %v5241_v46  ;;  %v5185_v43 = vsel %vm5182_vm15, %v5184_v47, %v5180_v28  ;;  %v5145_v54 = vsel %vm5142_vm7, %v8353_v20, %v5140_v5  ;;  %v5319_v6 = vld [vmem:[%s5381_s20] sm:$0x7] }
0x15e2   :  { %v5186_v53 = vmul.f32 %v5185_v43, %v5161_v23  ;;  %v5146_v16 = vmul.f32 %v5145_v54, %v5121_v34  ;;  %v5311_v35 = vadd.f32 1.0, %v5603_v50 }
0x15e3   :  { %v5295_v58 = vmul.f32 %v5809_v3, %v5294_v4  ;;  %v5604_v51 = vclamps-f32 %v5266_v18, 1.0 }
0x15e4   :  { %v5602_v56 = vclamps-f32 %v5186_v53, 1.0  ;;  %v5601_v26 = vclamps-f32 %v5146_v16, 1.0 }
0x15e5   :  { %v5296_v10 = vadd.f32 %v5809_v3, %v5295_v58  ;;  %v5312_v11 = vadd.f32 1.0, %v5604_v51 }
0x15e6   :  { %v5310_v14 = vadd.f32 1.0, %v5602_v56  ;;  %v5309_v1 = vadd.f32 1.0, %v5601_v26 }
0x15e7   :  { %v5300_v30 = vsel %vm5299_vm9, %v5809_v3, %v5296_v10  ;;  %v5101_v3 = vmul.f32 0.5, %v8244_v62  ;;  %v5317_v15 = vmul.f32 %v5312_v11, %v5102_v13 }
0x15e8   :  { %v5305_v7 = vsel %vm5302_vm3, %v5304_v19, %v5300_v30  ;;  %v5315_v27 = vmul.f32 %v5310_v14, %v5100_v59  ;;  %v5314_v48 = vmul.f32 %v5309_v1, %v5099_v32 }
0x15e9   :  { %v5306_v12 = vmul.f32 %v5305_v7, %v5281_v44  ;;  %v5316_v25 = vmul.f32 %v5311_v35, %v5101_v3 }
0x15ea   :  { %v5320_v62 = vpack.c.bf16 %v5315_v27, %v5314_v48 }
0x15eb   :  { %v5605_v37 = vclamps-f32 %v5306_v12, 1.0  ;;  %v5321_v29 = vpack.c.bf16 %v5317_v15, %v5316_v25 }
0x15ed   :  { %v5313_v57 = vadd.f32 1.0, %v5605_v37 }
0x15ef   :  { %v5318_v52 = vmul.f32 %v5313_v57, %v5103_v2 }
0x15f1   :  { %v5322_v20 = vpack.c.bf16 %v5318_v52, %v5318_v52 }
0x15f3   :  { %v5334_v22 = vsel %vm155_vm1, %v5322_v20, 0  ;;  %vm5329_vm1 = vcmask 293888  }
0x15f4   :  { %5341 = vmatpush.bf16.msra.mxu0 %v5334_v22 }
0x15f8   :  { %5342 = vmatpush.bf16.msra.mxu0 %v5321_v29 }
0x15fc   :  { %5343 = vmatpush.bf16.msra.mxu0 %v5320_v62 }
0x15ff   :  { %5606 = vmatmul.msk.bf16.vlgmr.msra.gmra.mxu0 %vm5329_vm1, %v5319_v6 }
0x167c   :  { %v5345_v9 = vpop.f32.mrf.mxu0 }
0x167d   :  { %v5346_v38 = vadd.f32 %v5345_v9, %v5327_v61 }
0x167f   :  { %5349 = vst [vmem:[%s5383_s26] sm:$0x3f] %v5346_v38 }
0x1684   :  { %v5347_v36 = vpop.f32.mrf.mxu0 }

</bundles_post_ra>
